<compile_context>
chip_gen: v5e
topology: v5e:2x2
jax: 0.10.0
libtpu: 0.0.40
codegen_flags: <defaults>
</compile_context>

<pallas_src>
import functools

import jax
import jax.numpy as jnp
from jax.experimental import pallas as pl
from jax.experimental.pallas import tpu as pltpu


_VMEM_LIMIT = 64 * 1024 * 1024


def _round_up(x, m):
    return -(-x // m) * m


def _pick_row_tile(M, target):
    if M <= target:
        return _round_up(M, 8)
    return target


def _pick_col_tile(N, target):
    if N <= target:
        return N
    for t in (target, 512, 256, 128):
        if t <= target and N % t == 0:
            return t
    return N


def _pick_batch_tile(BT, bytes_per_item, budget=4 * 1024 * 1024, cap=16):
    """Largest batch tile whose per-buffer footprint stays under `budget`."""
    tb = max(1, budget // max(1, bytes_per_item))
    return int(min(tb, BT, cap))


# ----------------------------- Pallas kernels ------------------------------

def _dense_kernel(x_ref, w_ref, b_ref, *rest, activation, has_residual):
    if has_residual:
        r_ref, o_ref = rest
    else:
        (o_ref,) = rest
    y = jnp.dot(x_ref[...], w_ref[...], preferred_element_type=jnp.float32)
    y = y + b_ref[...].astype(jnp.float32)
    if has_residual:
        y = y + r_ref[...].astype(jnp.float32)
    if activation == "quick_gelu":                       # CLIP quick_gelu
        y = y * jax.nn.sigmoid(1.702 * y)
    o_ref[...] = y.astype(o_ref.dtype)


def dense(x, w, b, *, residual=None, activation=None,
          out_dtype=jnp.bfloat16, tm=256, tn=512):
    """y = x @ w + b (+ residual) (optionally quick_gelu).

    x:(M,K) bf16, w:(K,N) bf16, b:(1,N) f32, residual:(M,N) or None.
    """
    M, K = x.shape
    Kw, N = w.shape
    assert K == Kw, (K, Kw)
    tm = _pick_row_tile(M, tm)
    tn = _pick_col_tile(N, tn)
    Mp = _round_up(M, tm)
    pad = Mp - M
    if pad:
        x = jnp.pad(x, ((0, pad), (0, 0)))
        if residual is not None:
            residual = jnp.pad(residual, ((0, pad), (0, 0)))
    has_res = residual is not None
    kernel = functools.partial(_dense_kernel, activation=activation,
                               has_residual=has_res)
    in_specs = [
        pl.BlockSpec((tm, K), lambda i, j: (i, 0)),
        pl.BlockSpec((K, tn), lambda i, j: (0, j)),
        pl.BlockSpec((1, tn), lambda i, j: (0, j)),
    ]
    args = [x, w, b]
    if has_res:
        in_specs.append(pl.BlockSpec((tm, tn), lambda i, j: (i, j)))
        args.append(residual)
    out = pl.pallas_call(
        kernel,
        out_shape=jax.ShapeDtypeStruct((Mp, N), out_dtype),
        grid=(Mp // tm, N // tn),
        in_specs=in_specs,
        out_specs=pl.BlockSpec((tm, tn), lambda i, j: (i, j)),
        compiler_params=pltpu.CompilerParams(
            dimension_semantics=("parallel", "parallel"),
            vmem_limit_bytes=_VMEM_LIMIT),
    )(*args)
    return out[:M] if pad else out


def _ln_dense_kernel(x_ref, g_ref, bln_ref, w_ref, b_ref, o_ref, *,
                     eps, activation):
    x = x_ref[...].astype(jnp.float32)
    mean = jnp.mean(x, axis=-1, keepdims=True)
    xc = x - mean
    var = jnp.mean(xc * xc, axis=-1, keepdims=True)
    xn = xc * jax.lax.rsqrt(var + eps)
    xn = xn * g_ref[...].astype(jnp.float32) + bln_ref[...].astype(jnp.float32)
    y = jnp.dot(xn.astype(w_ref.dtype), w_ref[...],
                preferred_element_type=jnp.float32)
    y = y + b_ref[...].astype(jnp.float32)
    if activation == "quick_gelu":
        y = y * jax.nn.sigmoid(1.702 * y)
    o_ref[...] = y.astype(o_ref.dtype)


def ln_dense(x, g, bln, w, b, *, activation=None, eps=1e-5,
             out_dtype=jnp.bfloat16, tm=256, tn=512):
    """y = LayerNorm(x) @ w + b, fused.  x:(M,D) bf16, w:(D,N) bf16."""
    M, D = x.shape
    Dw, N = w.shape
    assert D == Dw, (D, Dw)
    tm = _pick_row_tile(M, tm)
    tn = _pick_col_tile(N, tn)
    Mp = _round_up(M, tm)
    pad = Mp - M
    if pad:
        x = jnp.pad(x, ((0, pad), (0, 0)))
    kernel = functools.partial(_ln_dense_kernel, eps=eps, activation=activation)
    out = pl.pallas_call(
        kernel,
        out_shape=jax.ShapeDtypeStruct((Mp, N), out_dtype),
        grid=(Mp // tm, N // tn),
        in_specs=[
            pl.BlockSpec((tm, D), lambda i, j: (i, 0)),
            pl.BlockSpec((1, D), lambda i, j: (0, 0)),
            pl.BlockSpec((1, D), lambda i, j: (0, 0)),
            pl.BlockSpec((D, tn), lambda i, j: (0, j)),
            pl.BlockSpec((1, tn), lambda i, j: (0, j)),
        ],
        out_specs=pl.BlockSpec((tm, tn), lambda i, j: (i, j)),
        compiler_params=pltpu.CompilerParams(
            dimension_semantics=("parallel", "parallel"),
            vmem_limit_bytes=_VMEM_LIMIT),
    )(x, g, bln, w, b)
    return out[:M] if pad else out


def _add_pos_ln_kernel(x_ref, pos_ref, g_ref, b_ref, o_ref, *, eps):
    """LayerNorm(x + pos_embedding) fused (pre-layernorm of the embeddings)."""
    x = x_ref[...].astype(jnp.float32) + pos_ref[...].astype(jnp.float32)
    mean = jnp.mean(x, axis=-1, keepdims=True)
    xc = x - mean
    var = jnp.mean(xc * xc, axis=-1, keepdims=True)
    xn = xc * jax.lax.rsqrt(var + eps)
    xn = xn * g_ref[...].astype(jnp.float32) + b_ref[...].astype(jnp.float32)
    o_ref[...] = xn.astype(o_ref.dtype)


def add_pos_layernorm(x, pos, g, b, *, eps=1e-5, out_dtype=jnp.bfloat16):
    """x:(BT,S,D) bf16, pos:(S,D), g/b:(1,D) -> LayerNorm(x + pos):(BT,S,D)."""
    BT, S, D = x.shape
    tb = _pick_batch_tile(BT, S * D * 2)
    BTp = _round_up(BT, tb)
    pad = BTp - BT
    if pad:
        x = jnp.pad(x, ((0, pad), (0, 0), (0, 0)))
    pos3 = pos.reshape(1, S, D)
    g3 = g.reshape(1, 1, D)
    b3 = b.reshape(1, 1, D)
    kernel = functools.partial(_add_pos_ln_kernel, eps=eps)
    out = pl.pallas_call(
        kernel,
        out_shape=jax.ShapeDtypeStruct((BTp, S, D), out_dtype),
        grid=(BTp // tb,),
        in_specs=[
            pl.BlockSpec((tb, S, D), lambda i: (i, 0, 0)),
            pl.BlockSpec((1, S, D), lambda i: (0, 0, 0)),
            pl.BlockSpec((1, 1, D), lambda i: (0, 0, 0)),
            pl.BlockSpec((1, 1, D), lambda i: (0, 0, 0)),
        ],
        out_specs=pl.BlockSpec((tb, S, D), lambda i: (i, 0, 0)),
        compiler_params=pltpu.CompilerParams(
            dimension_semantics=("parallel",),
            vmem_limit_bytes=_VMEM_LIMIT),
    )(x, pos3, g3, b3)
    return out[:BT] if pad else out


def _attn_kernel(qkv_ref, o_ref, *, scale, n_heads, head_dim):
    """Per-head softmax attention on a packed (tb, S, 3D) QKV block."""
    D = n_heads * head_dim
    qkv = qkv_ref[...]                                   # bf16 (tb, S, 3D)
    outs = []
    for h in range(n_heads):
        lo = h * head_dim
        hi = lo + head_dim
        q = qkv[:, :, lo:hi] * scale                     # fold scale into Q
        k = qkv[:, :, D + lo:D + hi]
        v = qkv[:, :, 2 * D + lo:2 * D + hi]
        s = jnp.einsum("bqd,bkd->bqk", q, k,
                       preferred_element_type=jnp.float32)
        m = jnp.max(s, axis=-1, keepdims=True)
        p = jnp.exp(s - m)
        l = jnp.sum(p, axis=-1, keepdims=True)
        o = jnp.einsum("bqk,bkd->bqd", p.astype(v.dtype), v,
                       preferred_element_type=jnp.float32)
        o = o * pl.reciprocal(l, approx=True)
        outs.append(o)
    o_ref[...] = jnp.concatenate(outs, axis=-1).astype(o_ref.dtype)


def mha_attention(qkv, n_heads, scale, out_dtype=jnp.bfloat16):
    """qkv: (B*T, S, 3D) packed -> (B*T, S, D) attention output."""
    BT, S, D3 = qkv.shape
    D = D3 // 3
    Dh = D // n_heads
    tb = _pick_batch_tile(BT, S * D3 * 2)                # keep QKV tile in VMEM
    BTp = _round_up(BT, tb)
    pad = BTp - BT
    if pad:
        qkv = jnp.pad(qkv, ((0, pad), (0, 0), (0, 0)))
    kernel = functools.partial(_attn_kernel, scale=scale, n_heads=n_heads,
                               head_dim=Dh)
    out = pl.pallas_call(
        kernel,
        out_shape=jax.ShapeDtypeStruct((BTp, S, D), out_dtype),
        grid=(BTp // tb,),
        in_specs=[pl.BlockSpec((tb, S, D3), lambda i: (i, 0, 0))],
        out_specs=pl.BlockSpec((tb, S, D), lambda i: (i, 0, 0)),
        compiler_params=pltpu.CompilerParams(
            dimension_semantics=("parallel",),
            vmem_limit_bytes=_VMEM_LIMIT),
    )(qkv)
    return out[:BT] if pad else out


# ------------------------------ model glue ---------------------------------

def init_params(key, cfg):
    D = cfg["hidden"]
    C = 3
    ps = cfg["patch_size"]
    I = cfg["intermediate"]
    P = (cfg["image_size"] // ps) ** 2
    ks = jax.random.split(key, 3 + cfg["layers"])

    def nrm(k, shape):
        return (0.02 * jax.random.normal(k, shape, jnp.float32)).astype(jnp.bfloat16)

    params = dict(
        patch_w=nrm(ks[0], (C * ps * ps, D)),     # conv (D,C,ps,ps) flattened & transposed
        class_embedding=nrm(ks[1], (D,)),
        pos_embedding=nrm(ks[2], (P + 1, D)),
        pre_ln_g=jnp.ones((1, D), jnp.float32),
        pre_ln_b=jnp.zeros((1, D), jnp.float32),
        layers=[],
    )
    for li in range(cfg["layers"]):
        lk = jax.random.split(ks[3 + li], 4)
        params["layers"].append(dict(
            ln1_g=jnp.ones((1, D), jnp.float32), ln1_b=jnp.zeros((1, D), jnp.float32),
            qkv_w=nrm(lk[0], (D, 3 * D)), qkv_b=jnp.zeros((1, 3 * D), jnp.float32),
            o_w=nrm(lk[1], (D, D)), o_b=jnp.zeros((1, D), jnp.float32),
            ln2_g=jnp.ones((1, D), jnp.float32), ln2_b=jnp.zeros((1, D), jnp.float32),
            fc1_w=nrm(lk[2], (D, I)), fc1_b=jnp.zeros((1, I), jnp.float32),
            fc2_w=nrm(lk[3], (I, D)), fc2_b=jnp.zeros((1, D), jnp.float32),
        ))
    return params


def vision_tower_forward(pixel_values, params, cfg):
    """CLIP-style vision transformer over video frames.

    pixel_values: (B, C, T, H, W) float.  Returns list of hidden states,
    each (B*T, S, D) bf16 with S = num_patches + 1 (CLS first).
    """
    B, C, T, H, W = pixel_values.shape
    ps = cfg["patch_size"]
    D = cfg["hidden"]
    nH = cfg["heads"]
    Dh = D // nH
    Hp, Wp = H // ps, W // ps
    P = Hp * Wp
    S = P + 1
    BT = B * T
    M = BT * S

    # fold frames into batch (same as HF LanguageBind / CLIPVisionTransformer)
    x = jnp.transpose(pixel_values, (0, 2, 1, 3, 4)).reshape(BT, C, H, W)
    x = x.astype(jnp.bfloat16)

    # --- patch embedding (Conv2d stride=kernel=ps, no bias) as a matmul ---
    patches = x.reshape(BT, C, Hp, ps, Wp, ps)
    patches = jnp.transpose(patches, (0, 2, 4, 1, 3, 5)).reshape(BT * P, C * ps * ps)
    K = patches.shape[1]
    Kp = _round_up(K, 128)                      # lane-align contraction dim
    patch_w = params["patch_w"]
    if Kp != K:
        patches = jnp.pad(patches, ((0, 0), (0, Kp - K)))
        patch_w = jnp.pad(patch_w, ((0, Kp - K), (0, 0)))
    patch_emb = dense(patches, patch_w, jnp.zeros((1, D), jnp.float32))
    patch_emb = patch_emb.reshape(BT, P, D)

    # --- class token + (pos embedding + pre layernorm fused in one kernel) ---
    cls = jnp.broadcast_to(
        params["class_embedding"][None, None, :].astype(jnp.bfloat16), (BT, 1, D))
    emb = jnp.concatenate([cls, patch_emb], axis=1)              # (BT, S, D)
    h3 = add_pos_layernorm(emb, params["pos_embedding"],
                           params["pre_ln_g"], params["pre_ln_b"])
    hidden_states = [h3]                  # hidden_states[0] = post-pre-LN embeds
    h = h3.reshape(M, D)

    scale = Dh ** -0.5

    for lp in params["layers"]:
        # --- self attention block (pre-LN), LN + fused QKV in one kernel ---
        resid = h
        qkv = ln_dense(h, lp["ln1_g"], lp["ln1_b"], lp["qkv_w"], lp["qkv_b"])
        attn = mha_attention(qkv.reshape(BT, S, 3 * D), n_heads=nH, scale=scale)
        h = dense(attn.reshape(M, D), lp["o_w"], lp["o_b"], residual=resid)

        # --- MLP block (LN + fc1 + quick_gelu fused, fc2 + residual fused) ---
        resid = h
        mid = ln_dense(h, lp["ln2_g"], lp["ln2_b"], lp["fc1_w"], lp["fc1_b"],
                       activation="quick_gelu")
        h = dense(mid, lp["fc2_w"], lp["fc2_b"], residual=resid)

        hidden_states.append(h.reshape(BT, S, D))

    return hidden_states


def feature_select(hidden_states, select_layer=-2, select_feature="patch",
                   frames=8):
    feats = hidden_states[select_layer]                  # (B*T, S, D)
    feats = feats.reshape(-1, frames, feats.shape[-2], feats.shape[-1])
    if select_feature == "patch":
        feats = feats[:, :, 1:, :]                       # drop CLS
    elif select_feature == "cls_patch":
        pass
    else:
        raise ValueError(f"Unexpected select feature: {select_feature}")
    feats = feats.reshape(feats.shape[0], -1, feats.shape[-1])
    return feats


def language_bind_video_tower_forward(images, params, cfg,
                                      select_layer=-2, select_feature="patch"):
    hidden_states = vision_tower_forward(images, params, cfg)
    feats = feature_select(hidden_states, select_layer, select_feature,
                           frames=cfg.get("frames", 8))
    return feats.astype(images.dtype)


# ----------------------------------- main -----------------------------------

if __name__ == "__main__":
    cfg = dict(image_size=16, patch_size=8, hidden=32, heads=4,
               layers=2, intermediate=128, frames=8)

    key = jax.random.PRNGKey(0)
    pkey, xkey = jax.random.split(key)
    params = init_params(pkey, cfg)

    # (B, C, T, H, W) video pixel values, T = 8 frames (LanguageBind convention)
    images = jax.random.normal(xkey, (2, 3, cfg["frames"], 16, 16), jnp.float32)

    @jax.jit
    def run(imgs):
        return language_bind_video_tower_forward(imgs, params, cfg,
                                                 select_layer=-2,
                                                 select_feature="patch")

    feats = jax.block_until_ready(run(images))

    B = images.shape[0]
    P = (cfg["image_size"] // cfg["patch_size"]) ** 2
    assert feats.shape == (B, cfg["frames"] * P, cfg["hidden"]), feats.shape
    assert feats.dtype == images.dtype
    print("KERNEL_OK")
</pallas_src>

<mosaic_0001>
module attributes {stable_mosaic.version = 11 : i64} {
  func.func @_dense_kernel(%arg0: i32, %arg1: i32, %arg2: memref<64x256xbf16, #tpu.memory_space<vmem>>, %arg3: memref<256x32xbf16, #tpu.memory_space<vmem>>, %arg4: memref<1x32xf32, #tpu.memory_space<vmem>>, %arg5: memref<64x32xbf16, #tpu.memory_space<vmem>>) attributes {dimension_semantics = [#tpu.dimension_semantics<parallel>, #tpu.dimension_semantics<parallel>], iteration_bounds = array<i64: 1, 1>, scalar_prefetch = 0 : i64, scratch_operands = 0 : i64, tpu.core_type = #tpu.core_type<tc>, window_params = [{transform_indices = @transform_0, window_bounds = array<i64: 64, 256>}, {transform_indices = @transform_1, window_bounds = array<i64: 256, 32>}, {transform_indices = @transform_2, window_bounds = array<i64: 1, 32>}, {transform_indices = @transform_3, window_bounds = array<i64: 64, 32>}]} {
    %c0 = arith.constant 0 : index
    %c0_0 = arith.constant 0 : index
    %0 = vector.load %arg2[%c0, %c0_0] : memref<64x256xbf16, #tpu.memory_space<vmem>>, vector<64x256xbf16>
    %c0_1 = arith.constant 0 : index
    %c0_2 = arith.constant 0 : index
    %1 = vector.load %arg3[%c0_1, %c0_2] : memref<256x32xbf16, #tpu.memory_space<vmem>>, vector<256x32xbf16>
    %cst = arith.constant dense<0.000000e+00> : vector<64x32xf32>
    %2 = tpu.matmul %0, %1, %cst {dimension_numbers = #tpu.dot_dimension_numbers<[1], [0], [0], [1], [0, 0, 1, 1], [], []>} : vector<64x256xbf16>, vector<256x32xbf16>, vector<64x32xf32> -> vector<64x32xf32>
    %c0_3 = arith.constant 0 : index
    %c0_4 = arith.constant 0 : index
    %3 = vector.load %arg4[%c0_3, %c0_4] : memref<1x32xf32, #tpu.memory_space<vmem>>, vector<1x32xf32>
    %4 = vector.broadcast %3 : vector<1x32xf32> to vector<64x32xf32>
    %5 = arith.addf %2, %4 : vector<64x32xf32>
    %6 = arith.truncf %5 : vector<64x32xf32> to vector<64x32xbf16>
    %c0_5 = arith.constant 0 : index
    %c0_6 = arith.constant 0 : index
    %7 = vector.load %arg5[%c0_5, %c0_6] : memref<64x32xbf16, #tpu.memory_space<vmem>>, vector<64x32xbf16>
    tpu.vector_store %arg5[%c0_5, %c0_6], %6 {strides = array<i32>} : memref<64x32xbf16, #tpu.memory_space<vmem>>, vector<64x32xbf16>,
    return
  }
  func.func @transform_0(%arg0: i32, %arg1: i32) -> (i32, i32) {
    %c0_i32 = arith.constant 0 : i32
    %c0_i32_0 = arith.constant 0 : i32
    return %arg0, %c0_i32 : i32, i32
  }
  func.func @transform_1(%arg0: i32, %arg1: i32) -> (i32, i32) {
    %c0_i32 = arith.constant 0 : i32
    %c0_i32_0 = arith.constant 0 : i32
    return %c0_i32, %arg1 : i32, i32
  }
  func.func @transform_2(%arg0: i32, %arg1: i32) -> (i32, i32) {
    %c0_i32 = arith.constant 0 : i32
    %c0_i32_0 = arith.constant 0 : i32
    return %c0_i32, %arg1 : i32, i32
  }
  func.func @transform_3(%arg0: i32, %arg1: i32) -> (i32, i32) {
    %c0_i32 = arith.constant 0 : i32
    return %arg0, %arg1 : i32, i32
  }
}

module attributes {stable_mosaic.version = 11 : i64} {
  func.func @_add_pos_ln_kernel(%arg0: i32, %arg1: memref<16x5x32xbf16, #tpu.memory_space<vmem>>, %arg2: memref<1x5x32xbf16, #tpu.memory_space<vmem>>, %arg3: memref<1x1x32xf32, #tpu.memory_space<vmem>>, %arg4: memref<1x1x32xf32, #tpu.memory_space<vmem>>, %arg5: memref<16x5x32xbf16, #tpu.memory_space<vmem>>) attributes {dimension_semantics = [#tpu.dimension_semantics<parallel>], iteration_bounds = array<i64: 1>, scalar_prefetch = 0 : i64, scratch_operands = 0 : i64, tpu.core_type = #tpu.core_type<tc>, window_params = [{transform_indices = @transform_0, window_bounds = array<i64: 16, 5, 32>}, {pipeline_mode = #tpu.pipeline_mode<synchronous>, transform_indices = @transform_1, window_bounds = array<i64: 1, 5, 32>}, {pipeline_mode = #tpu.pipeline_mode<synchronous>, transform_indices = @transform_2, window_bounds = array<i64: 1, 1, 32>}, {pipeline_mode = #tpu.pipeline_mode<synchronous>, transform_indices = @transform_3, window_bounds = array<i64: 1, 1, 32>}, {transform_indices = @transform_4, window_bounds = array<i64: 16, 5, 32>}]} {
    %c0 = arith.constant 0 : index
    %c0_0 = arith.constant 0 : index
    %c0_1 = arith.constant 0 : index
    %0 = vector.load %arg1[%c0, %c0_0, %c0_1] : memref<16x5x32xbf16, #tpu.memory_space<vmem>>, vector<16x5x32xbf16>
    %1 = arith.extf %0 : vector<16x5x32xbf16> to vector<16x5x32xf32>
    %c0_2 = arith.constant 0 : index
    %c0_3 = arith.constant 0 : index
    %c0_4 = arith.constant 0 : index
    %2 = vector.load %arg2[%c0_2, %c0_3, %c0_4] : memref<1x5x32xbf16, #tpu.memory_space<vmem>>, vector<1x5x32xbf16>
    %3 = arith.extf %2 : vector<1x5x32xbf16> to vector<1x5x32xf32>
    %4 = vector.broadcast %3 : vector<1x5x32xf32> to vector<16x5x32xf32>
    %5 = arith.addf %1, %4 : vector<16x5x32xf32>
    %cst = arith.constant dense<0.000000e+00> : vector<16x5xf32>
    %6 = vector.multi_reduction <add>, %5, %cst [2] : vector<16x5x32xf32> to vector<16x5xf32>
    %7 = vector.shape_cast %6 : vector<16x5xf32> to vector<16x5x1xf32>
    %cst_5 = arith.constant 3.200000e+01 : f32
    %8 = vector.broadcast %cst_5 : f32 to vector<16x5x1xf32>
    %9 = arith.divf %7, %8 : vector<16x5x1xf32>
    %10 = vector.broadcast %9 : vector<16x5x1xf32> to vector<16x5x32xf32>
    %11 = arith.subf %5, %10 : vector<16x5x32xf32>
    %12 = arith.mulf %11, %11 : vector<16x5x32xf32>
    %cst_6 = arith.constant dense<0.000000e+00> : vector<16x5xf32>
    %13 = vector.multi_reduction <add>, %12, %cst_6 [2] : vector<16x5x32xf32> to vector<16x5xf32>
    %14 = vector.shape_cast %13 : vector<16x5xf32> to vector<16x5x1xf32>
    %cst_7 = arith.constant 3.200000e+01 : f32
    %15 = vector.broadcast %cst_7 : f32 to vector<16x5x1xf32>
    %16 = arith.divf %14, %15 : vector<16x5x1xf32>
    %cst_8 = arith.constant 9.99999974E-6 : f32
    %17 = vector.broadcast %cst_8 : f32 to vector<16x5x1xf32>
    %18 = arith.addf %16, %17 : vector<16x5x1xf32>
    %19 = math.rsqrt %18 : vector<16x5x1xf32>
    %20 = vector.broadcast %19 : vector<16x5x1xf32> to vector<16x5x32xf32>
    %21 = arith.mulf %11, %20 : vector<16x5x32xf32>
    %c0_9 = arith.constant 0 : index
    %c0_10 = arith.constant 0 : index
    %c0_11 = arith.constant 0 : index
    %22 = vector.load %arg3[%c0_9, %c0_10, %c0_11] : memref<1x1x32xf32, #tpu.memory_space<vmem>>, vector<1x1x32xf32>
    %23 = vector.broadcast %22 : vector<1x1x32xf32> to vector<16x5x32xf32>
    %24 = arith.mulf %21, %23 : vector<16x5x32xf32>
    %c0_12 = arith.constant 0 : index
    %c0_13 = arith.constant 0 : index
    %c0_14 = arith.constant 0 : index
    %25 = vector.load %arg4[%c0_12, %c0_13, %c0_14] : memref<1x1x32xf32, #tpu.memory_space<vmem>>, vector<1x1x32xf32>
    %26 = vector.broadcast %25 : vector<1x1x32xf32> to vector<16x5x32xf32>
    %27 = arith.addf %24, %26 : vector<16x5x32xf32>
    %28 = arith.truncf %27 : vector<16x5x32xf32> to vector<16x5x32xbf16>
    %c0_15 = arith.constant 0 : index
    %c0_16 = arith.constant 0 : index
    %c0_17 = arith.constant 0 : index
    %29 = vector.load %arg5[%c0_15, %c0_16, %c0_17] : memref<16x5x32xbf16, #tpu.memory_space<vmem>>, vector<16x5x32xbf16>
    tpu.vector_store %arg5[%c0_15, %c0_16, %c0_17], %28 {strides = array<i32>} : memref<16x5x32xbf16, #tpu.memory_space<vmem>>, vector<16x5x32xbf16>,
    return
  }
  func.func @transform_0(%arg0: i32) -> (i32, i32, i32) {
    %c0_i32 = arith.constant 0 : i32
    %c0_i32_0 = arith.constant 0 : i32
    %c0_i32_1 = arith.constant 0 : i32
    return %arg0, %c0_i32, %c0_i32_0 : i32, i32, i32
  }
  func.func @transform_1(%arg0: i32) -> (i32, i32, i32) {
    %c0_i32 = arith.constant 0 : i32
    %c0_i32_0 = arith.constant 0 : i32
    %c0_i32_1 = arith.constant 0 : i32
    %c0_i32_2 = arith.constant 0 : i32
    return %c0_i32, %c0_i32_0, %c0_i32_1 : i32, i32, i32
  }
  func.func @transform_2(%arg0: i32) -> (i32, i32, i32) {
    %c0_i32 = arith.constant 0 : i32
    %c0_i32_0 = arith.constant 0 : i32
    %c0_i32_1 = arith.constant 0 : i32
    %c0_i32_2 = arith.constant 0 : i32
    return %c0_i32, %c0_i32_0, %c0_i32_1 : i32, i32, i32
  }
  func.func @transform_3(%arg0: i32) -> (i32, i32, i32) {
    %c0_i32 = arith.constant 0 : i32
    %c0_i32_0 = arith.constant 0 : i32
    %c0_i32_1 = arith.constant 0 : i32
    %c0_i32_2 = arith.constant 0 : i32
    return %c0_i32, %c0_i32_0, %c0_i32_1 : i32, i32, i32
  }
  func.func @transform_4(%arg0: i32) -> (i32, i32, i32) {
    %c0_i32 = arith.constant 0 : i32
    %c0_i32_0 = arith.constant 0 : i32
    %c0_i32_1 = arith.constant 0 : i32
    return %arg0, %c0_i32, %c0_i32_0 : i32, i32, i32
  }
}

module attributes {stable_mosaic.version = 11 : i64} {
  func.func @_ln_dense_kernel(%arg0: i32, %arg1: i32, %arg2: memref<80x32xbf16, #tpu.memory_space<vmem>>, %arg3: memref<1x32xf32, #tpu.memory_space<vmem>>, %arg4: memref<1x32xf32, #tpu.memory_space<vmem>>, %arg5: memref<32x96xbf16, #tpu.memory_space<vmem>>, %arg6: memref<1x96xf32, #tpu.memory_space<vmem>>, %arg7: memref<80x96xbf16, #tpu.memory_space<vmem>>) attributes {dimension_semantics = [#tpu.dimension_semantics<parallel>, #tpu.dimension_semantics<parallel>], iteration_bounds = array<i64: 1, 1>, scalar_prefetch = 0 : i64, scratch_operands = 0 : i64, tpu.core_type = #tpu.core_type<tc>, window_params = [{transform_indices = @transform_0, window_bounds = array<i64: 80, 32>}, {pipeline_mode = #tpu.pipeline_mode<synchronous>, transform_indices = @transform_1, window_bounds = array<i64: 1, 32>}, {pipeline_mode = #tpu.pipeline_mode<synchronous>, transform_indices = @transform_2, window_bounds = array<i64: 1, 32>}, {transform_indices = @transform_3, window_bounds = array<i64: 32, 96>}, {transform_indices = @transform_4, window_bounds = array<i64: 1, 96>}, {transform_indices = @transform_5, window_bounds = array<i64: 80, 96>}]} {
    %c0 = arith.constant 0 : index
    %c0_0 = arith.constant 0 : index
    %0 = vector.load %arg2[%c0, %c0_0] : memref<80x32xbf16, #tpu.memory_space<vmem>>, vector<80x32xbf16>
    %1 = arith.extf %0 : vector<80x32xbf16> to vector<80x32xf32>
    %cst = arith.constant dense<0.000000e+00> : vector<80xf32>
    %2 = vector.multi_reduction <add>, %1, %cst [1] : vector<80x32xf32> to vector<80xf32>
    %3 = vector.shape_cast %2 : vector<80xf32> to vector<80x1xf32>
    %cst_1 = arith.constant 3.200000e+01 : f32
    %4 = vector.broadcast %cst_1 : f32 to vector<80x1xf32>
    %5 = arith.divf %3, %4 : vector<80x1xf32>
    %6 = vector.broadcast %5 : vector<80x1xf32> to vector<80x32xf32>
    %7 = arith.subf %1, %6 : vector<80x32xf32>
    %8 = arith.mulf %7, %7 : vector<80x32xf32>
    %cst_2 = arith.constant dense<0.000000e+00> : vector<80xf32>
    %9 = vector.multi_reduction <add>, %8, %cst_2 [1] : vector<80x32xf32> to vector<80xf32>
    %10 = vector.shape_cast %9 : vector<80xf32> to vector<80x1xf32>
    %cst_3 = arith.constant 3.200000e+01 : f32
    %11 = vector.broadcast %cst_3 : f32 to vector<80x1xf32>
    %12 = arith.divf %10, %11 : vector<80x1xf32>
    %cst_4 = arith.constant 9.99999974E-6 : f32
    %13 = vector.broadcast %cst_4 : f32 to vector<80x1xf32>
    %14 = arith.addf %12, %13 : vector<80x1xf32>
    %15 = math.rsqrt %14 : vector<80x1xf32>
    %16 = vector.broadcast %15 : vector<80x1xf32> to vector<80x32xf32>
    %17 = arith.mulf %7, %16 : vector<80x32xf32>
    %c0_5 = arith.constant 0 : index
    %c0_6 = arith.constant 0 : index
    %18 = vector.load %arg3[%c0_5, %c0_6] : memref<1x32xf32, #tpu.memory_space<vmem>>, vector<1x32xf32>
    %19 = vector.broadcast %18 : vector<1x32xf32> to vector<80x32xf32>
    %20 = arith.mulf %17, %19 : vector<80x32xf32>
    %c0_7 = arith.constant 0 : index
    %c0_8 = arith.constant 0 : index
    %21 = vector.load %arg4[%c0_7, %c0_8] : memref<1x32xf32, #tpu.memory_space<vmem>>, vector<1x32xf32>
    %22 = vector.broadcast %21 : vector<1x32xf32> to vector<80x32xf32>
    %23 = arith.addf %20, %22 : vector<80x32xf32>
    %24 = arith.truncf %23 : vector<80x32xf32> to vector<80x32xbf16>
    %c0_9 = arith.constant 0 : index
    %c0_10 = arith.constant 0 : index
    %25 = vector.load %arg5[%c0_9, %c0_10] : memref<32x96xbf16, #tpu.memory_space<vmem>>, vector<32x96xbf16>
    %cst_11 = arith.constant dense<0.000000e+00> : vector<80x96xf32>
    %26 = tpu.matmul %24, %25, %cst_11 {dimension_numbers = #tpu.dot_dimension_numbers<[1], [0], [0], [1], [0, 0, 1, 1], [], []>} : vector<80x32xbf16>, vector<32x96xbf16>, vector<80x96xf32> -> vector<80x96xf32>
    %c0_12 = arith.constant 0 : index
    %c0_13 = arith.constant 0 : index
    %27 = vector.load %arg6[%c0_12, %c0_13] : memref<1x96xf32, #tpu.memory_space<vmem>>, vector<1x96xf32>
    %28 = vector.broadcast %27 : vector<1x96xf32> to vector<80x96xf32>
    %29 = arith.addf %26, %28 : vector<80x96xf32>
    %30 = arith.truncf %29 : vector<80x96xf32> to vector<80x96xbf16>
    %c0_14 = arith.constant 0 : index
    %c0_15 = arith.constant 0 : index
    %31 = vector.load %arg7[%c0_14, %c0_15] : memref<80x96xbf16, #tpu.memory_space<vmem>>, vector<80x96xbf16>
    tpu.vector_store %arg7[%c0_14, %c0_15], %30 {strides = array<i32>} : memref<80x96xbf16, #tpu.memory_space<vmem>>, vector<80x96xbf16>,
    return
  }
  func.func @transform_0(%arg0: i32, %arg1: i32) -> (i32, i32) {
    %c0_i32 = arith.constant 0 : i32
    %c0_i32_0 = arith.constant 0 : i32
    return %arg0, %c0_i32 : i32, i32
  }
  func.func @transform_1(%arg0: i32, %arg1: i32) -> (i32, i32) {
    %c0_i32 = arith.constant 0 : i32
    %c0_i32_0 = arith.constant 0 : i32
    %c0_i32_1 = arith.constant 0 : i32
    return %c0_i32, %c0_i32_0 : i32, i32
  }
  func.func @transform_2(%arg0: i32, %arg1: i32) -> (i32, i32) {
    %c0_i32 = arith.constant 0 : i32
    %c0_i32_0 = arith.constant 0 : i32
    %c0_i32_1 = arith.constant 0 : i32
    return %c0_i32, %c0_i32_0 : i32, i32
  }
  func.func @transform_3(%arg0: i32, %arg1: i32) -> (i32, i32) {
    %c0_i32 = arith.constant 0 : i32
    %c0_i32_0 = arith.constant 0 : i32
    return %c0_i32, %arg1 : i32, i32
  }
  func.func @transform_4(%arg0: i32, %arg1: i32) -> (i32, i32) {
    %c0_i32 = arith.constant 0 : i32
    %c0_i32_0 = arith.constant 0 : i32
    return %c0_i32, %arg1 : i32, i32
  }
  func.func @transform_5(%arg0: i32, %arg1: i32) -> (i32, i32) {
    %c0_i32 = arith.constant 0 : i32
    return %arg0, %arg1 : i32, i32
  }
}

module attributes {stable_mosaic.version = 11 : i64} {
  func.func @_dense_kernel(%arg0: i32, %arg1: i32, %arg2: memref<80x32xbf16, #tpu.memory_space<vmem>>, %arg3: memref<32x32xbf16, #tpu.memory_space<vmem>>, %arg4: memref<1x32xf32, #tpu.memory_space<vmem>>, %arg5: memref<80x32xbf16, #tpu.memory_space<vmem>>, %arg6: memref<80x32xbf16, #tpu.memory_space<vmem>>) attributes {dimension_semantics = [#tpu.dimension_semantics<parallel>, #tpu.dimension_semantics<parallel>], iteration_bounds = array<i64: 1, 1>, scalar_prefetch = 0 : i64, scratch_operands = 0 : i64, tpu.core_type = #tpu.core_type<tc>, window_params = [{transform_indices = @transform_0, window_bounds = array<i64: 80, 32>}, {transform_indices = @transform_1, window_bounds = array<i64: 32, 32>}, {transform_indices = @transform_2, window_bounds = array<i64: 1, 32>}, {transform_indices = @transform_3, window_bounds = array<i64: 80, 32>}, {transform_indices = @transform_4, window_bounds = array<i64: 80, 32>}]} {
    %c0 = arith.constant 0 : index
    %c0_0 = arith.constant 0 : index
    %0 = vector.load %arg2[%c0, %c0_0] : memref<80x32xbf16, #tpu.memory_space<vmem>>, vector<80x32xbf16>
    %c0_1 = arith.constant 0 : index
    %c0_2 = arith.constant 0 : index
    %1 = vector.load %arg3[%c0_1, %c0_2] : memref<32x32xbf16, #tpu.memory_space<vmem>>, vector<32x32xbf16>
    %cst = arith.constant dense<0.000000e+00> : vector<80x32xf32>
    %2 = tpu.matmul %0, %1, %cst {dimension_numbers = #tpu.dot_dimension_numbers<[1], [0], [0], [1], [0, 0, 1, 1], [], []>} : vector<80x32xbf16>, vector<32x32xbf16>, vector<80x32xf32> -> vector<80x32xf32>
    %c0_3 = arith.constant 0 : index
    %c0_4 = arith.constant 0 : index
    %3 = vector.load %arg4[%c0_3, %c0_4] : memref<1x32xf32, #tpu.memory_space<vmem>>, vector<1x32xf32>
    %4 = vector.broadcast %3 : vector<1x32xf32> to vector<80x32xf32>
    %5 = arith.addf %2, %4 : vector<80x32xf32>
    %c0_5 = arith.constant 0 : index
    %c0_6 = arith.constant 0 : index
    %6 = vector.load %arg5[%c0_5, %c0_6] : memref<80x32xbf16, #tpu.memory_space<vmem>>, vector<80x32xbf16>
    %7 = arith.extf %6 : vector<80x32xbf16> to vector<80x32xf32>
    %8 = arith.addf %5, %7 : vector<80x32xf32>
    %9 = arith.truncf %8 : vector<80x32xf32> to vector<80x32xbf16>
    %c0_7 = arith.constant 0 : index
    %c0_8 = arith.constant 0 : index
    %10 = vector.load %arg6[%c0_7, %c0_8] : memref<80x32xbf16, #tpu.memory_space<vmem>>, vector<80x32xbf16>
    tpu.vector_store %arg6[%c0_7, %c0_8], %9 {strides = array<i32>} : memref<80x32xbf16, #tpu.memory_space<vmem>>, vector<80x32xbf16>,
    return
  }
  func.func @transform_0(%arg0: i32, %arg1: i32) -> (i32, i32) {
    %c0_i32 = arith.constant 0 : i32
    %c0_i32_0 = arith.constant 0 : i32
    return %arg0, %c0_i32 : i32, i32
  }
  func.func @transform_1(%arg0: i32, %arg1: i32) -> (i32, i32) {
    %c0_i32 = arith.constant 0 : i32
    %c0_i32_0 = arith.constant 0 : i32
    return %c0_i32, %arg1 : i32, i32
  }
  func.func @transform_2(%arg0: i32, %arg1: i32) -> (i32, i32) {
    %c0_i32 = arith.constant 0 : i32
    %c0_i32_0 = arith.constant 0 : i32
    return %c0_i32, %arg1 : i32, i32
  }
  func.func @transform_3(%arg0: i32, %arg1: i32) -> (i32, i32) {
    %c0_i32 = arith.constant 0 : i32
    return %arg0, %arg1 : i32, i32
  }
  func.func @transform_4(%arg0: i32, %arg1: i32) -> (i32, i32) {
    %c0_i32 = arith.constant 0 : i32
    return %arg0, %arg1 : i32, i32
  }
}

module attributes {stable_mosaic.version = 11 : i64} {
  func.func @_attn_kernel(%arg0: i32, %arg1: memref<16x5x96xbf16, #tpu.memory_space<vmem>>, %arg2: memref<16x5x32xbf16, #tpu.memory_space<vmem>>) attributes {dimension_semantics = [#tpu.dimension_semantics<parallel>], iteration_bounds = array<i64: 1>, scalar_prefetch = 0 : i64, scratch_operands = 0 : i64, tpu.core_type = #tpu.core_type<tc>, window_params = [{transform_indices = @transform_0, window_bounds = array<i64: 16, 5, 96>}, {transform_indices = @transform_1, window_bounds = array<i64: 16, 5, 32>}]} {
    %c0 = arith.constant 0 : index
    %c0_0 = arith.constant 0 : index
    %c0_1 = arith.constant 0 : index
    %0 = vector.load %arg1[%c0, %c0_0, %c0_1] : memref<16x5x96xbf16, #tpu.memory_space<vmem>>, vector<16x5x96xbf16>
    %1 = vector.extract_strided_slice %0 {offsets = [0, 0, 0], sizes = [16, 5, 8], strides = [1, 1, 1]} : vector<16x5x96xbf16> to vector<16x5x8xbf16>
    %cst = arith.constant 3.535160e-01 : bf16
    %2 = vector.broadcast %cst : bf16 to vector<16x5x8xbf16>
    %3 = arith.mulf %1, %2 : vector<16x5x8xbf16>
    %4 = vector.extract_strided_slice %0 {offsets = [0, 0, 32], sizes = [16, 5, 8], strides = [1, 1, 1]} : vector<16x5x96xbf16> to vector<16x5x8xbf16>
    %5 = vector.extract_strided_slice %0 {offsets = [0, 0, 64], sizes = [16, 5, 8], strides = [1, 1, 1]} : vector<16x5x96xbf16> to vector<16x5x8xbf16>
    "tpu.trace_start"() <{level = 10 : i32, message = "bqd,bkd->bqk"}> : () -> ()
    %cst_2 = arith.constant dense<0.000000e+00> : vector<16x5x5xf32>
    %6 = tpu.matmul %3, %4, %cst_2 {dimension_numbers = #tpu.dot_dimension_numbers<[2], [2], [1], [1], [0, 0, 0, 1, 1, 1], [0], [0]>} : vector<16x5x8xbf16>, vector<16x5x8xbf16>, vector<16x5x5xf32> -> vector<16x5x5xf32>
    "tpu.trace_stop"() : () -> ()
    %cst_3 = arith.constant dense<0xFF800000> : vector<16x5xf32>
    %7 = vector.multi_reduction <maximumf>, %6, %cst_3 [2] : vector<16x5x5xf32> to vector<16x5xf32>
    %8 = vector.shape_cast %7 : vector<16x5xf32> to vector<16x5x1xf32>
    %9 = vector.broadcast %8 : vector<16x5x1xf32> to vector<16x5x5xf32>
    %10 = arith.subf %6, %9 : vector<16x5x5xf32>
    %11 = math.exp %10 : vector<16x5x5xf32>
    %cst_4 = arith.constant dense<0.000000e+00> : vector<16x5xf32>
    %12 = vector.multi_reduction <add>, %11, %cst_4 [2] : vector<16x5x5xf32> to vector<16x5xf32>
    %13 = vector.shape_cast %12 : vector<16x5xf32> to vector<16x5x1xf32>
    %14 = arith.truncf %11 : vector<16x5x5xf32> to vector<16x5x5xbf16>
    "tpu.trace_start"() <{level = 10 : i32, message = "bqk,bkd->bqd"}> : () -> ()
    %cst_5 = arith.constant dense<0.000000e+00> : vector<16x5x8xf32>
    %15 = tpu.matmul %14, %5, %cst_5 {dimension_numbers = #tpu.dot_dimension_numbers<[2], [1], [1], [2], [0, 0, 0, 1, 1, 2], [0], [0]>} : vector<16x5x5xbf16>, vector<16x5x8xbf16>, vector<16x5x8xf32> -> vector<16x5x8xf32>
    "tpu.trace_stop"() : () -> ()
    %16 = tpu.reciprocal %13 {approx = true} : vector<16x5x1xf32> -> vector<16x5x1xf32>
    %17 = vector.broadcast %16 : vector<16x5x1xf32> to vector<16x5x8xf32>
    %18 = arith.mulf %15, %17 : vector<16x5x8xf32>
    %19 = vector.extract_strided_slice %0 {offsets = [0, 0, 8], sizes = [16, 5, 8], strides = [1, 1, 1]} : vector<16x5x96xbf16> to vector<16x5x8xbf16>
    %cst_6 = arith.constant 3.535160e-01 : bf16
    %20 = vector.broadcast %cst_6 : bf16 to vector<16x5x8xbf16>
    %21 = arith.mulf %19, %20 : vector<16x5x8xbf16>
    %22 = vector.extract_strided_slice %0 {offsets = [0, 0, 40], sizes = [16, 5, 8], strides = [1, 1, 1]} : vector<16x5x96xbf16> to vector<16x5x8xbf16>
    %23 = vector.extract_strided_slice %0 {offsets = [0, 0, 72], sizes = [16, 5, 8], strides = [1, 1, 1]} : vector<16x5x96xbf16> to vector<16x5x8xbf16>
    "tpu.trace_start"() <{level = 10 : i32, message = "bqd,bkd->bqk"}> : () -> ()
    %cst_7 = arith.constant dense<0.000000e+00> : vector<16x5x5xf32>
    %24 = tpu.matmul %21, %22, %cst_7 {dimension_numbers = #tpu.dot_dimension_numbers<[2], [2], [1], [1], [0, 0, 0, 1, 1, 1], [0], [0]>} : vector<16x5x8xbf16>, vector<16x5x8xbf16>, vector<16x5x5xf32> -> vector<16x5x5xf32>
    "tpu.trace_stop"() : () -> ()
    %cst_8 = arith.constant dense<0xFF800000> : vector<16x5xf32>
    %25 = vector.multi_reduction <maximumf>, %24, %cst_8 [2] : vector<16x5x5xf32> to vector<16x5xf32>
    %26 = vector.shape_cast %25 : vector<16x5xf32> to vector<16x5x1xf32>
    %27 = vector.broadcast %26 : vector<16x5x1xf32> to vector<16x5x5xf32>
    %28 = arith.subf %24, %27 : vector<16x5x5xf32>
    %29 = math.exp %28 : vector<16x5x5xf32>
    %cst_9 = arith.constant dense<0.000000e+00> : vector<16x5xf32>
    %30 = vector.multi_reduction <add>, %29, %cst_9 [2] : vector<16x5x5xf32> to vector<16x5xf32>
    %31 = vector.shape_cast %30 : vector<16x5xf32> to vector<16x5x1xf32>
    %32 = arith.truncf %29 : vector<16x5x5xf32> to vector<16x5x5xbf16>
    "tpu.trace_start"() <{level = 10 : i32, message = "bqk,bkd->bqd"}> : () -> ()
    %cst_10 = arith.constant dense<0.000000e+00> : vector<16x5x8xf32>
    %33 = tpu.matmul %32, %23, %cst_10 {dimension_numbers = #tpu.dot_dimension_numbers<[2], [1], [1], [2], [0, 0, 0, 1, 1, 2], [0], [0]>} : vector<16x5x5xbf16>, vector<16x5x8xbf16>, vector<16x5x8xf32> -> vector<16x5x8xf32>
    "tpu.trace_stop"() : () -> ()
    %34 = tpu.reciprocal %31 {approx = true} : vector<16x5x1xf32> -> vector<16x5x1xf32>
    %35 = vector.broadcast %34 : vector<16x5x1xf32> to vector<16x5x8xf32>
    %36 = arith.mulf %33, %35 : vector<16x5x8xf32>
    %37 = vector.extract_strided_slice %0 {offsets = [0, 0, 16], sizes = [16, 5, 8], strides = [1, 1, 1]} : vector<16x5x96xbf16> to vector<16x5x8xbf16>
    %cst_11 = arith.constant 3.535160e-01 : bf16
    %38 = vector.broadcast %cst_11 : bf16 to vector<16x5x8xbf16>
    %39 = arith.mulf %37, %38 : vector<16x5x8xbf16>
    %40 = vector.extract_strided_slice %0 {offsets = [0, 0, 48], sizes = [16, 5, 8], strides = [1, 1, 1]} : vector<16x5x96xbf16> to vector<16x5x8xbf16>
    %41 = vector.extract_strided_slice %0 {offsets = [0, 0, 80], sizes = [16, 5, 8], strides = [1, 1, 1]} : vector<16x5x96xbf16> to vector<16x5x8xbf16>
    "tpu.trace_start"() <{level = 10 : i32, message = "bqd,bkd->bqk"}> : () -> ()
    %cst_12 = arith.constant dense<0.000000e+00> : vector<16x5x5xf32>
    %42 = tpu.matmul %39, %40, %cst_12 {dimension_numbers = #tpu.dot_dimension_numbers<[2], [2], [1], [1], [0, 0, 0, 1, 1, 1], [0], [0]>} : vector<16x5x8xbf16>, vector<16x5x8xbf16>, vector<16x5x5xf32> -> vector<16x5x5xf32>
    "tpu.trace_stop"() : () -> ()
    %cst_13 = arith.constant dense<0xFF800000> : vector<16x5xf32>
    %43 = vector.multi_reduction <maximumf>, %42, %cst_13 [2] : vector<16x5x5xf32> to vector<16x5xf32>
    %44 = vector.shape_cast %43 : vector<16x5xf32> to vector<16x5x1xf32>
    %45 = vector.broadcast %44 : vector<16x5x1xf32> to vector<16x5x5xf32>
    %46 = arith.subf %42, %45 : vector<16x5x5xf32>
    %47 = math.exp %46 : vector<16x5x5xf32>
    %cst_14 = arith.constant dense<0.000000e+00> : vector<16x5xf32>
    %48 = vector.multi_reduction <add>, %47, %cst_14 [2] : vector<16x5x5xf32> to vector<16x5xf32>
    %49 = vector.shape_cast %48 : vector<16x5xf32> to vector<16x5x1xf32>
    %50 = arith.truncf %47 : vector<16x5x5xf32> to vector<16x5x5xbf16>
    "tpu.trace_start"() <{level = 10 : i32, message = "bqk,bkd->bqd"}> : () -> ()
    %cst_15 = arith.constant dense<0.000000e+00> : vector<16x5x8xf32>
    %51 = tpu.matmul %50, %41, %cst_15 {dimension_numbers = #tpu.dot_dimension_numbers<[2], [1], [1], [2], [0, 0, 0, 1, 1, 2], [0], [0]>} : vector<16x5x5xbf16>, vector<16x5x8xbf16>, vector<16x5x8xf32> -> vector<16x5x8xf32>
    "tpu.trace_stop"() : () -> ()
    %52 = tpu.reciprocal %49 {approx = true} : vector<16x5x1xf32> -> vector<16x5x1xf32>
    %53 = vector.broadcast %52 : vector<16x5x1xf32> to vector<16x5x8xf32>
    %54 = arith.mulf %51, %53 : vector<16x5x8xf32>
    %55 = vector.extract_strided_slice %0 {offsets = [0, 0, 24], sizes = [16, 5, 8], strides = [1, 1, 1]} : vector<16x5x96xbf16> to vector<16x5x8xbf16>
    %cst_16 = arith.constant 3.535160e-01 : bf16
    %56 = vector.broadcast %cst_16 : bf16 to vector<16x5x8xbf16>
    %57 = arith.mulf %55, %56 : vector<16x5x8xbf16>
    %58 = vector.extract_strided_slice %0 {offsets = [0, 0, 56], sizes = [16, 5, 8], strides = [1, 1, 1]} : vector<16x5x96xbf16> to vector<16x5x8xbf16>
    %59 = vector.extract_strided_slice %0 {offsets = [0, 0, 88], sizes = [16, 5, 8], strides = [1, 1, 1]} : vector<16x5x96xbf16> to vector<16x5x8xbf16>
    "tpu.trace_start"() <{level = 10 : i32, message = "bqd,bkd->bqk"}> : () -> ()
    %cst_17 = arith.constant dense<0.000000e+00> : vector<16x5x5xf32>
    %60 = tpu.matmul %57, %58, %cst_17 {dimension_numbers = #tpu.dot_dimension_numbers<[2], [2], [1], [1], [0, 0, 0, 1, 1, 1], [0], [0]>} : vector<16x5x8xbf16>, vector<16x5x8xbf16>, vector<16x5x5xf32> -> vector<16x5x5xf32>
    "tpu.trace_stop"() : () -> ()
    %cst_18 = arith.constant dense<0xFF800000> : vector<16x5xf32>
    %61 = vector.multi_reduction <maximumf>, %60, %cst_18 [2] : vector<16x5x5xf32> to vector<16x5xf32>
    %62 = vector.shape_cast %61 : vector<16x5xf32> to vector<16x5x1xf32>
    %63 = vector.broadcast %62 : vector<16x5x1xf32> to vector<16x5x5xf32>
    %64 = arith.subf %60, %63 : vector<16x5x5xf32>
    %65 = math.exp %64 : vector<16x5x5xf32>
    %cst_19 = arith.constant dense<0.000000e+00> : vector<16x5xf32>
    %66 = vector.multi_reduction <add>, %65, %cst_19 [2] : vector<16x5x5xf32> to vector<16x5xf32>
    %67 = vector.shape_cast %66 : vector<16x5xf32> to vector<16x5x1xf32>
    %68 = arith.truncf %65 : vector<16x5x5xf32> to vector<16x5x5xbf16>
    "tpu.trace_start"() <{level = 10 : i32, message = "bqk,bkd->bqd"}> : () -> ()
    %cst_20 = arith.constant dense<0.000000e+00> : vector<16x5x8xf32>
    %69 = tpu.matmul %68, %59, %cst_20 {dimension_numbers = #tpu.dot_dimension_numbers<[2], [1], [1], [2], [0, 0, 0, 1, 1, 2], [0], [0]>} : vector<16x5x5xbf16>, vector<16x5x8xbf16>, vector<16x5x8xf32> -> vector<16x5x8xf32>
    "tpu.trace_stop"() : () -> ()
    %70 = tpu.reciprocal %67 {approx = true} : vector<16x5x1xf32> -> vector<16x5x1xf32>
    %71 = vector.broadcast %70 : vector<16x5x1xf32> to vector<16x5x8xf32>
    %72 = arith.mulf %69, %71 : vector<16x5x8xf32>
    %73 = tpu.concatenate %18, %36, %54, %72 in 2 : vector<16x5x8xf32>, vector<16x5x8xf32>, vector<16x5x8xf32>, vector<16x5x8xf32> -> vector<16x5x32xf32>
    %74 = arith.truncf %73 : vector<16x5x32xf32> to vector<16x5x32xbf16>
    %c0_21 = arith.constant 0 : index
    %c0_22 = arith.constant 0 : index
    %c0_23 = arith.constant 0 : index
    %75 = vector.load %arg2[%c0_21, %c0_22, %c0_23] : memref<16x5x32xbf16, #tpu.memory_space<vmem>>, vector<16x5x32xbf16>
    tpu.vector_store %arg2[%c0_21, %c0_22, %c0_23], %74 {strides = array<i32>} : memref<16x5x32xbf16, #tpu.memory_space<vmem>>, vector<16x5x32xbf16>,
    return
  }
  func.func @transform_0(%arg0: i32) -> (i32, i32, i32) {
    %c0_i32 = arith.constant 0 : i32
    %c0_i32_0 = arith.constant 0 : i32
    %c0_i32_1 = arith.constant 0 : i32
    return %arg0, %c0_i32, %c0_i32_0 : i32, i32, i32
  }
  func.func @transform_1(%arg0: i32) -> (i32, i32, i32) {
    %c0_i32 = arith.constant 0 : i32
    %c0_i32_0 = arith.constant 0 : i32
    %c0_i32_1 = arith.constant 0 : i32
    return %arg0, %c0_i32, %c0_i32_0 : i32, i32, i32
  }
}

module attributes {stable_mosaic.version = 11 : i64} {
  func.func @_dense_kernel(%arg0: i32, %arg1: i32, %arg2: memref<80x128xbf16, #tpu.memory_space<vmem>>, %arg3: memref<128x32xbf16, #tpu.memory_space<vmem>>, %arg4: memref<1x32xf32, #tpu.memory_space<vmem>>, %arg5: memref<80x32xbf16, #tpu.memory_space<vmem>>, %arg6: memref<80x32xbf16, #tpu.memory_space<vmem>>) attributes {dimension_semantics = [#tpu.dimension_semantics<parallel>, #tpu.dimension_semantics<parallel>], iteration_bounds = array<i64: 1, 1>, scalar_prefetch = 0 : i64, scratch_operands = 0 : i64, tpu.core_type = #tpu.core_type<tc>, window_params = [{transform_indices = @transform_0, window_bounds = array<i64: 80, 128>}, {transform_indices = @transform_1, window_bounds = array<i64: 128, 32>}, {transform_indices = @transform_2, window_bounds = array<i64: 1, 32>}, {transform_indices = @transform_3, window_bounds = array<i64: 80, 32>}, {transform_indices = @transform_4, window_bounds = array<i64: 80, 32>}]} {
    %c0 = arith.constant 0 : index
    %c0_0 = arith.constant 0 : index
    %0 = vector.load %arg2[%c0, %c0_0] : memref<80x128xbf16, #tpu.memory_space<vmem>>, vector<80x128xbf16>
    %c0_1 = arith.constant 0 : index
    %c0_2 = arith.constant 0 : index
    %1 = vector.load %arg3[%c0_1, %c0_2] : memref<128x32xbf16, #tpu.memory_space<vmem>>, vector<128x32xbf16>
    %cst = arith.constant dense<0.000000e+00> : vector<80x32xf32>
    %2 = tpu.matmul %0, %1, %cst {dimension_numbers = #tpu.dot_dimension_numbers<[1], [0], [0], [1], [0, 0, 1, 1], [], []>} : vector<80x128xbf16>, vector<128x32xbf16>, vector<80x32xf32> -> vector<80x32xf32>
    %c0_3 = arith.constant 0 : index
    %c0_4 = arith.constant 0 : index
    %3 = vector.load %arg4[%c0_3, %c0_4] : memref<1x32xf32, #tpu.memory_space<vmem>>, vector<1x32xf32>
    %4 = vector.broadcast %3 : vector<1x32xf32> to vector<80x32xf32>
    %5 = arith.addf %2, %4 : vector<80x32xf32>
    %c0_5 = arith.constant 0 : index
    %c0_6 = arith.constant 0 : index
    %6 = vector.load %arg5[%c0_5, %c0_6] : memref<80x32xbf16, #tpu.memory_space<vmem>>, vector<80x32xbf16>
    %7 = arith.extf %6 : vector<80x32xbf16> to vector<80x32xf32>
    %8 = arith.addf %5, %7 : vector<80x32xf32>
    %9 = arith.truncf %8 : vector<80x32xf32> to vector<80x32xbf16>
    %c0_7 = arith.constant 0 : index
    %c0_8 = arith.constant 0 : index
    %10 = vector.load %arg6[%c0_7, %c0_8] : memref<80x32xbf16, #tpu.memory_space<vmem>>, vector<80x32xbf16>
    tpu.vector_store %arg6[%c0_7, %c0_8], %9 {strides = array<i32>} : memref<80x32xbf16, #tpu.memory_space<vmem>>, vector<80x32xbf16>,
    return
  }
  func.func @transform_0(%arg0: i32, %arg1: i32) -> (i32, i32) {
    %c0_i32 = arith.constant 0 : i32
    %c0_i32_0 = arith.constant 0 : i32
    return %arg0, %c0_i32 : i32, i32
  }
  func.func @transform_1(%arg0: i32, %arg1: i32) -> (i32, i32) {
    %c0_i32 = arith.constant 0 : i32
    %c0_i32_0 = arith.constant 0 : i32
    return %c0_i32, %arg1 : i32, i32
  }
  func.func @transform_2(%arg0: i32, %arg1: i32) -> (i32, i32) {
    %c0_i32 = arith.constant 0 : i32
    %c0_i32_0 = arith.constant 0 : i32
    return %c0_i32, %arg1 : i32, i32
  }
  func.func @transform_3(%arg0: i32, %arg1: i32) -> (i32, i32) {
    %c0_i32 = arith.constant 0 : i32
    return %arg0, %arg1 : i32, i32
  }
  func.func @transform_4(%arg0: i32, %arg1: i32) -> (i32, i32) {
    %c0_i32 = arith.constant 0 : i32
    return %arg0, %arg1 : i32, i32
  }
}

module attributes {stable_mosaic.version = 11 : i64} {
  func.func @_ln_dense_kernel(%arg0: i32, %arg1: i32, %arg2: memref<80x32xbf16, #tpu.memory_space<vmem>>, %arg3: memref<1x32xf32, #tpu.memory_space<vmem>>, %arg4: memref<1x32xf32, #tpu.memory_space<vmem>>, %arg5: memref<32x128xbf16, #tpu.memory_space<vmem>>, %arg6: memref<1x128xf32, #tpu.memory_space<vmem>>, %arg7: memref<80x128xbf16, #tpu.memory_space<vmem>>) attributes {dimension_semantics = [#tpu.dimension_semantics<parallel>, #tpu.dimension_semantics<parallel>], iteration_bounds = array<i64: 1, 1>, scalar_prefetch = 0 : i64, scratch_operands = 0 : i64, tpu.core_type = #tpu.core_type<tc>, window_params = [{transform_indices = @transform_0, window_bounds = array<i64: 80, 32>}, {pipeline_mode = #tpu.pipeline_mode<synchronous>, transform_indices = @transform_1, window_bounds = array<i64: 1, 32>}, {pipeline_mode = #tpu.pipeline_mode<synchronous>, transform_indices = @transform_2, window_bounds = array<i64: 1, 32>}, {transform_indices = @transform_3, window_bounds = array<i64: 32, 128>}, {transform_indices = @transform_4, window_bounds = array<i64: 1, 128>}, {transform_indices = @transform_5, window_bounds = array<i64: 80, 128>}]} {
    %c0 = arith.constant 0 : index
    %c0_0 = arith.constant 0 : index
    %0 = vector.load %arg2[%c0, %c0_0] : memref<80x32xbf16, #tpu.memory_space<vmem>>, vector<80x32xbf16>
    %1 = arith.extf %0 : vector<80x32xbf16> to vector<80x32xf32>
    %cst = arith.constant dense<0.000000e+00> : vector<80xf32>
    %2 = vector.multi_reduction <add>, %1, %cst [1] : vector<80x32xf32> to vector<80xf32>
    %3 = vector.shape_cast %2 : vector<80xf32> to vector<80x1xf32>
    %cst_1 = arith.constant 3.200000e+01 : f32
    %4 = vector.broadcast %cst_1 : f32 to vector<80x1xf32>
    %5 = arith.divf %3, %4 : vector<80x1xf32>
    %6 = vector.broadcast %5 : vector<80x1xf32> to vector<80x32xf32>
    %7 = arith.subf %1, %6 : vector<80x32xf32>
    %8 = arith.mulf %7, %7 : vector<80x32xf32>
    %cst_2 = arith.constant dense<0.000000e+00> : vector<80xf32>
    %9 = vector.multi_reduction <add>, %8, %cst_2 [1] : vector<80x32xf32> to vector<80xf32>
    %10 = vector.shape_cast %9 : vector<80xf32> to vector<80x1xf32>
    %cst_3 = arith.constant 3.200000e+01 : f32
    %11 = vector.broadcast %cst_3 : f32 to vector<80x1xf32>
    %12 = arith.divf %10, %11 : vector<80x1xf32>
    %cst_4 = arith.constant 9.99999974E-6 : f32
    %13 = vector.broadcast %cst_4 : f32 to vector<80x1xf32>
    %14 = arith.addf %12, %13 : vector<80x1xf32>
    %15 = math.rsqrt %14 : vector<80x1xf32>
    %16 = vector.broadcast %15 : vector<80x1xf32> to vector<80x32xf32>
    %17 = arith.mulf %7, %16 : vector<80x32xf32>
    %c0_5 = arith.constant 0 : index
    %c0_6 = arith.constant 0 : index
    %18 = vector.load %arg3[%c0_5, %c0_6] : memref<1x32xf32, #tpu.memory_space<vmem>>, vector<1x32xf32>
    %19 = vector.broadcast %18 : vector<1x32xf32> to vector<80x32xf32>
    %20 = arith.mulf %17, %19 : vector<80x32xf32>
    %c0_7 = arith.constant 0 : index
    %c0_8 = arith.constant 0 : index
    %21 = vector.load %arg4[%c0_7, %c0_8] : memref<1x32xf32, #tpu.memory_space<vmem>>, vector<1x32xf32>
    %22 = vector.broadcast %21 : vector<1x32xf32> to vector<80x32xf32>
    %23 = arith.addf %20, %22 : vector<80x32xf32>
    %24 = arith.truncf %23 : vector<80x32xf32> to vector<80x32xbf16>
    %c0_9 = arith.constant 0 : index
    %c0_10 = arith.constant 0 : index
    %25 = vector.load %arg5[%c0_9, %c0_10] : memref<32x128xbf16, #tpu.memory_space<vmem>>, vector<32x128xbf16>
    %cst_11 = arith.constant dense<0.000000e+00> : vector<80x128xf32>
    %26 = tpu.matmul %24, %25, %cst_11 {dimension_numbers = #tpu.dot_dimension_numbers<[1], [0], [0], [1], [0, 0, 1, 1], [], []>} : vector<80x32xbf16>, vector<32x128xbf16>, vector<80x128xf32> -> vector<80x128xf32>
    %c0_12 = arith.constant 0 : index
    %c0_13 = arith.constant 0 : index
    %27 = vector.load %arg6[%c0_12, %c0_13] : memref<1x128xf32, #tpu.memory_space<vmem>>, vector<1x128xf32>
    %28 = vector.broadcast %27 : vector<1x128xf32> to vector<80x128xf32>
    %29 = arith.addf %26, %28 : vector<80x128xf32>
    %cst_14 = arith.constant 1.702000e+00 : f32
    %30 = vector.broadcast %cst_14 : f32 to vector<80x128xf32>
    %31 = arith.mulf %30, %29 : vector<80x128xf32>
    %32 = arith.negf %31 : vector<80x128xf32>
    %33 = math.exp %32 : vector<80x128xf32>
    %cst_15 = arith.constant 1.000000e+00 : f32
    %34 = vector.broadcast %cst_15 : f32 to vector<80x128xf32>
    %35 = arith.addf %34, %33 : vector<80x128xf32>
    %36 = arith.divf %34, %35 : vector<80x128xf32>
    %37 = arith.mulf %29, %36 : vector<80x128xf32>
    %38 = arith.truncf %37 : vector<80x128xf32> to vector<80x128xbf16>
    %c0_16 = arith.constant 0 : index
    %c0_17 = arith.constant 0 : index
    %39 = vector.load %arg7[%c0_16, %c0_17] : memref<80x128xbf16, #tpu.memory_space<vmem>>, vector<80x128xbf16>
    tpu.vector_store %arg7[%c0_16, %c0_17], %38 {strides = array<i32>} : memref<80x128xbf16, #tpu.memory_space<vmem>>, vector<80x128xbf16>,
    return
  }
  func.func @transform_0(%arg0: i32, %arg1: i32) -> (i32, i32) {
    %c0_i32 = arith.constant 0 : i32
    %c0_i32_0 = arith.constant 0 : i32
    return %arg0, %c0_i32 : i32, i32
  }
  func.func @transform_1(%arg0: i32, %arg1: i32) -> (i32, i32) {
    %c0_i32 = arith.constant 0 : i32
    %c0_i32_0 = arith.constant 0 : i32
    %c0_i32_1 = arith.constant 0 : i32
    return %c0_i32, %c0_i32_0 : i32, i32
  }
  func.func @transform_2(%arg0: i32, %arg1: i32) -> (i32, i32) {
    %c0_i32 = arith.constant 0 : i32
    %c0_i32_0 = arith.constant 0 : i32
    %c0_i32_1 = arith.constant 0 : i32
    return %c0_i32, %c0_i32_0 : i32, i32
  }
  func.func @transform_3(%arg0: i32, %arg1: i32) -> (i32, i32) {
    %c0_i32 = arith.constant 0 : i32
    %c0_i32_0 = arith.constant 0 : i32
    return %c0_i32, %arg1 : i32, i32
  }
  func.func @transform_4(%arg0: i32, %arg1: i32) -> (i32, i32) {
    %c0_i32 = arith.constant 0 : i32
    %c0_i32_0 = arith.constant 0 : i32
    return %c0_i32, %arg1 : i32, i32
  }
  func.func @transform_5(%arg0: i32, %arg1: i32) -> (i32, i32) {
    %c0_i32 = arith.constant 0 : i32
    return %arg0, %arg1 : i32, i32
  }
}

</mosaic_0001>

<bundles_post_ra>
// kernel: run.7
= control target key start
LH: loop header
LB: loop body
LE: loop exit
PB: predicated region body
PF: predicated region fallthrough
CT: control target
= control target key end

     0   :  { %vm260_vm0 = vcmask 257024   ;;  %s561_s1 = inlined_call_operand.vmem [shape: bf16[256,32], index: 1, kind: input, shape index: {}]   ;;  %s562_s2 = inlined_call_operand.vmem [shape: f32[1,32], index: 2, kind: input, shape index: {}]   ;;  %s563_s0 = inlined_call_operand.vmem [shape: bf16[64,256], index: 0, kind: input, shape index: {}]   ;;  %s564_s3 = inlined_call_operand.vmem [shape: bf16[64,32], index: 3, kind: output, shape index: {}]  }
   0x1   :  { %v384_v0 = vld [vmem:[%s561_s1 + $0x38] sm:$0xff]  ;;  %v383_v2 = vld [vmem:[%s561_s1 + $0x30] sm:$0xff]  ;;  %v382_v4 = vld [vmem:[%s561_s1 + $0x28] sm:$0xff] }
   0x2   :  { %v392_v1 = vld [vmem:[%s561_s1 + $0x78] sm:$0xff]  ;;  %194 = vmatpush.bf16.msra.mxu0 %v384_v0  ;;  %393 = vmatpush.bf16.msra.mxu2 %v384_v0  ;;  %v391_v3 = vld [vmem:[%s561_s1 + $0x70] sm:$0xff]  ;;  %v390_v5 = vld [vmem:[%s561_s1 + $0x68] sm:$0xff] }
   0x3   :  { %223 = vmatpush.bf16.msra.mxu1 %v392_v1  ;;  %401 = vmatpush.bf16.msra.mxu3 %v392_v1  ;;  %v381_v6 = vld [vmem:[%s561_s1 + $0x20] sm:$0xff]  ;;  %v380_v8 = vld [vmem:[%s561_s1 + $0x18] sm:$0xff]  ;;  %v379_v10 = vld [vmem:[%s561_s1 + $0x10] sm:$0xff] }
   0x4   :  { %v389_v7 = vld [vmem:[%s561_s1 + $0x60] sm:$0xff]  ;;  %v388_v9 = vld [vmem:[%s561_s1 + $0x58] sm:$0xff]  ;;  %v387_v11 = vld [vmem:[%s561_s1 + $0x50] sm:$0xff] }
   0x5   :  { %v378_v12 = vld [vmem:[%s561_s1 + $0x8] sm:$0xff]  ;;  %v377_v14 = vld [vmem:[%s561_s1] sm:$0xff]  ;;  %v283_v28 = vld [vmem:[%s563_s0 + $0x10] sm:$0xf] }
   0x6   :  { %195 = vmatpush.bf16.msra.mxu0 %v383_v2  ;;  %394 = vmatpush.bf16.msra.mxu2 %v383_v2  ;;  %v386_v13 = vld [vmem:[%s561_s1 + $0x48] sm:$0xff]  ;;  %v385_v15 = vld [vmem:[%s561_s1 + $0x40] sm:$0xff]  ;;  %v372_v29 = vld [vmem:[%s563_s0 + $0x14] sm:$0xf0] }
   0x7   :  { %224 = vmatpush.bf16.msra.mxu1 %v391_v3  ;;  %402 = vmatpush.bf16.msra.mxu3 %v391_v3  ;;  %v275_v16 = vld [vmem:[%s563_s0] sm:$0xf]  ;;  %v370_v17 = vld [vmem:[%s563_s0 + $0x4] sm:$0xf0]  ;;  %v369_v20 = vld [vmem:[%s563_s0 + $0x4] sm:$0xf]  ;;  %v284_v36 = vor.u32 %v372_v29, %v283_v28 }
   0x8   :  { %v291_v18 = vld [vmem:[%s563_s0 + $0x20] sm:$0xf]  ;;  %v374_v19 = vld [vmem:[%s563_s0 + $0x24] sm:$0xf0]  ;;  %v277_v21 = vld [vmem:[%s563_s0 + $0x8] sm:$0xf0]  ;;  %v276_v24 = vor.u32 %v370_v17, %v275_v16 }
   0x9   :  { %v373_v22 = vld [vmem:[%s563_s0 + $0x24] sm:$0xf]  ;;  %v293_v23 = vld [vmem:[%s563_s0 + $0x28] sm:$0xf0]  ;;  %v292_v25 = vor.u32 %v374_v19, %v291_v18  ;;  %v280_v26 = vor.u32 %v369_v20, %v277_v21  ;;  %v299_v30 = vld [vmem:[%s563_s0 + $0x30] sm:$0xf] }
   0xa   :  { %196 = vmatpush.bf16.msra.mxu0 %v382_v4  ;;  %395 = vmatpush.bf16.msra.mxu2 %v382_v4  ;;  %v296_v27 = vor.u32 %v373_v22, %v293_v23  ;;  %v376_v31 = vld [vmem:[%s563_s0 + $0x34] sm:$0xf0]  ;;  %v371_v32 = vld [vmem:[%s563_s0 + $0x14] sm:$0xf]  ;;  %v285_v33 = vld [vmem:[%s563_s0 + $0x18] sm:$0xf0] }
   0xb   :  { %225 = vmatpush.bf16.msra.mxu1 %v390_v5  ;;  %403 = vmatpush.bf16.msra.mxu3 %v390_v5  ;;  %v375_v34 = vld [vmem:[%s563_s0 + $0x34] sm:$0xf]  ;;  %v301_v35 = vld [vmem:[%s563_s0 + $0x38] sm:$0xf0]  ;;  %v300_v37 = vor.u32 %v376_v31, %v299_v30  ;;  %v288_v38 = vor.u32 %v371_v32, %v285_v33  ;;  %v409_v40 = vld [vmem:[%s562_s2] ss:$0 sm:$0xff] }
   0xc   :  { %v304_v39 = vor.u32 %v375_v34, %v301_v35 }
   0xe   :  { %197 = vmatpush.bf16.msra.mxu0 %v381_v6  ;;  %396 = vmatpush.bf16.msra.mxu2 %v381_v6 }
   0xf   :  { %226 = vmatpush.bf16.msra.mxu1 %v389_v7  ;;  %404 = vmatpush.bf16.msra.mxu3 %v389_v7 }
  0x12   :  { %198 = vmatpush.bf16.msra.mxu0 %v380_v8  ;;  %397 = vmatpush.bf16.msra.mxu2 %v380_v8 }
  0x13   :  { %227 = vmatpush.bf16.msra.mxu1 %v388_v9  ;;  %405 = vmatpush.bf16.msra.mxu3 %v388_v9 }
  0x16   :  { %199 = vmatpush.bf16.msra.mxu0 %v379_v10  ;;  %398 = vmatpush.bf16.msra.mxu2 %v379_v10 }
  0x17   :  { %228 = vmatpush.bf16.msra.mxu1 %v387_v11  ;;  %406 = vmatpush.bf16.msra.mxu3 %v387_v11 }
  0x1a   :  { %200 = vmatpush.bf16.msra.mxu0 %v378_v12  ;;  %399 = vmatpush.bf16.msra.mxu2 %v378_v12 }
  0x1b   :  { %229 = vmatpush.bf16.msra.mxu1 %v386_v13  ;;  %407 = vmatpush.bf16.msra.mxu3 %v386_v13 }
  0x1e   :  { %201 = vmatpush.bf16.msra.mxu0 %v377_v14  ;;  %400 = vmatpush.bf16.msra.mxu2 %v377_v14 }
  0x1f   :  { %230 = vmatpush.bf16.msra.mxu1 %v385_v15  ;;  %408 = vmatpush.bf16.msra.mxu3 %v385_v15 }
  0x21   :  { %202 = vmatmul.bf16.vlgmr.msra.gmra.mxu0 %v276_v24  ;;  %212 = vmatmul.bf16.vlgmr.msra.gmra.mxu2 %v292_v25 }
  0x22   :  { %231 = vmatmul.bf16.vlgmr.msra.gmra.mxu1 %v280_v26  ;;  %241 = vmatmul.bf16.vlgmr.msra.gmra.mxu3 %v296_v27 }
  0x31   :  { %207 = vmatmul.bf16.gmra.mxu0 %v284_v36  ;;  %217 = vmatmul.bf16.gmra.mxu2 %v300_v37 }
  0x32   :  { %236 = vmatmul.bf16.gmra.mxu1 %v288_v38  ;;  %246 = vmatmul.bf16.gmra.mxu3 %v304_v39 }
  0x9e   :  { %v203_v41 = vpop.f32.mrf.mxu0 }
  0x9f   :  { %v204_v42 = vadd.f32 %v409_v40, %v203_v41  ;;  %v232_v43 = vpop.f32.mrf.mxu1 }
  0xa1   :  { %v233_v44 = vadd.f32 %v232_v43, %v204_v42 }
  0xa3   :  { %v252_v45 = vpack.c.bf16 %v233_v44, %v233_v44 }
  0xa4   :  { %v213_v46 = vpop.f32.mrf.mxu2 }
  0xa5   :  { %261 = vst.msk [vmem:[%s564_s3] sm:$0xf] %vm260_vm0, %v252_v45  ;;  %v214_v47 = vadd.f32 %v409_v40, %v213_v46  ;;  %v242_v48 = vpop.f32.mrf.mxu3 }
  0xa6   :  { %v205_v49 = vpop.f32.mrf.mxu0 }
  0xa7   :  { %v243_v50 = vadd.f32 %v242_v48, %v214_v47  ;;  %v206_v51 = vadd.f32 %v409_v40, %v205_v49  ;;  %v234_v52 = vpop.f32.mrf.mxu1 }
  0xa9   :  { %v256_v53 = vpack.c.bf16 %v243_v50, %v243_v50  ;;  %v235_v54 = vadd.f32 %v234_v52, %v206_v51 }
  0xab   :  { %265 = vst.msk [vmem:[%s564_s3 + $0x10] sm:$0xf] %vm260_vm0, %v256_v53  ;;  %v253_v55 = vpack.c.bf16 %v235_v54, %v235_v54 }
  0xac   :  { %v215_v56 = vpop.f32.mrf.mxu2 }
  0xad   :  { %262 = vst.msk [vmem:[%s564_s3 + $0x4] sm:$0xf] %vm260_vm0, %v253_v55  ;;  %v216_v57 = vadd.f32 %v409_v40, %v215_v56  ;;  %v244_v58 = vpop.f32.mrf.mxu3 }
  0xae   :  { %v208_v59 = vpop.f32.mrf.mxu0 }
  0xaf   :  { %v245_v60 = vadd.f32 %v244_v58, %v216_v57  ;;  %v209_v61 = vadd.f32 %v409_v40, %v208_v59  ;;  %v237_v62 = vpop.f32.mrf.mxu1 }
  0xb1   :  { %v257_v63 = vpack.c.bf16 %v245_v60, %v245_v60  ;;  %v238_v0 = vadd.f32 %v237_v62, %v209_v61 }
  0xb3   :  { %266 = vst.msk [vmem:[%s564_s3 + $0x14] sm:$0xf] %vm260_vm0, %v257_v63  ;;  %v254_v1 = vpack.c.bf16 %v238_v0, %v238_v0 }
  0xb4   :  { %v218_v2 = vpop.f32.mrf.mxu2 }
  0xb5   :  { %263 = vst.msk [vmem:[%s564_s3 + $0x8] sm:$0xf] %vm260_vm0, %v254_v1  ;;  %v219_v3 = vadd.f32 %v409_v40, %v218_v2  ;;  %v247_v4 = vpop.f32.mrf.mxu3 }
  0xb6   :  { %v210_v5 = vpop.f32.mrf.mxu0 }
  0xb7   :  { %v248_v6 = vadd.f32 %v247_v4, %v219_v3  ;;  %v211_v7 = vadd.f32 %v409_v40, %v210_v5  ;;  %v239_v8 = vpop.f32.mrf.mxu1 }
  0xb9   :  { %v258_v9 = vpack.c.bf16 %v248_v6, %v248_v6  ;;  %v240_v10 = vadd.f32 %v239_v8, %v211_v7 }
  0xbb   :  { %267 = vst.msk [vmem:[%s564_s3 + $0x18] sm:$0xf] %vm260_vm0, %v258_v9  ;;  %v255_v11 = vpack.c.bf16 %v240_v10, %v240_v10 }
  0xbc   :  { %v220_v12 = vpop.f32.mrf.mxu2 }
  0xbd   :  { %264 = vst.msk [vmem:[%s564_s3 + $0xc] sm:$0xf] %vm260_vm0, %v255_v11  ;;  %v221_v13 = vadd.f32 %v409_v40, %v220_v12  ;;  %v249_v14 = vpop.f32.mrf.mxu3 }
  0xbf   :  { %v250_v15 = vadd.f32 %v249_v14, %v221_v13 }
  0xc1   :  { %v259_v16 = vpack.c.bf16 %v250_v15, %v250_v15 }
  0xc3   :  { %268 = vst.msk [vmem:[%s564_s3 + $0x1c] sm:$0xf] %vm260_vm0, %v259_v16 }

// kernel: run.8
= control target key start
LH: loop header
LB: loop body
LE: loop exit
PB: predicated region body
PF: predicated region fallthrough
CT: control target
= control target key end

     0   :  { %vm67_vm0 = vcmask 258048   ;;  %vm483_vm2 = vcmask 256000   ;;  %vm484_vm4 = vsmask.f32 2304  ;;  %s1226_s0 = inlined_call_operand.vmem [shape: bf16[16,5,32], index: 0, kind: input, shape index: {}]   ;;  %s1227_s1 = inlined_call_operand.vmem [shape: bf16[1,5,32], index: 1, kind: input, shape index: {}]   ;;  %s1228_s2 = inlined_call_operand.vmem [shape: f32[1,1,32], index: 2, kind: input, shape index: {}]   ;;  %s1229_s3 = inlined_call_operand.vmem [shape: f32[1,1,32], index: 3, kind: input, shape index: {}]   ;;  %s1230_s4 = inlined_call_operand.vmem [shape: bf16[16,5,32], index: 4, kind: output, shape index: {}]  }
   0x1   :  { %v21_v0 = vld [vmem:[%s1226_s0 + $0x10] sm:$0x7]  ;;  %v49_v1 = vld [vmem:[%s1227_s1] sm:$0x7]  ;;  %v19_v2 = vld [vmem:[%s1226_s0 + $0x8] sm:$0x7] }
   0x2   :  { %v37_v3 = vunpack.c.l.bf16 %v21_v0  ;;  %v610_v4 = vunpack.c.l.bf16 %v49_v1  ;;  %v35_v5 = vunpack.c.l.bf16 %v19_v2  ;;  %v17_v6 = vld [vmem:[%s1226_s0] sm:$0x7]  ;;  %v22_v7 = vld [vmem:[%s1226_s0 + $0x14] sm:$0x7]  ;;  %v20_v8 = vld [vmem:[%s1226_s0 + $0xc] sm:$0x7] }
   0x3   :  { %v33_v9 = vunpack.c.l.bf16 %v17_v6  ;;  %v18_v10 = vld [vmem:[%s1226_s0 + $0x4] sm:$0x7]  ;;  %v38_v13 = vunpack.c.l.bf16 %v22_v7  ;;  %v36_v14 = vunpack.c.l.bf16 %v20_v8  ;;  %v25_v23 = vld [vmem:[%s1226_s0 + $0x20] sm:$0x7]  ;;  %v24_v24 = vld [vmem:[%s1226_s0 + $0x1c] sm:$0x7] }
   0x4   :  { %v625_v11 = vadd.f32 %v610_v4, %v37_v3  ;;  %v628_v12 = vadd.f32 %v610_v4, %v35_v5  ;;  %v34_v16 = vunpack.c.l.bf16 %v18_v10  ;;  %v23_v25 = vld [vmem:[%s1226_s0 + $0x18] sm:$0x7]  ;;  %v41_v28 = vunpack.c.l.bf16 %v25_v23  ;;  %v28_v35 = vld [vmem:[%s1226_s0 + $0x2c] sm:$0x7]  ;;  %v27_v36 = vld [vmem:[%s1226_s0 + $0x28] sm:$0x7] }
   0x5   :  { %v631_v15 = vadd.f32 %v610_v4, %v33_v9  ;;  %v640_v20 = vadd.f32 %v610_v4, %v38_v13  ;;  %v643_v21 = vadd.f32 %v610_v4, %v36_v14  ;;  %v40_v29 = vunpack.c.l.bf16 %v24_v24  ;;  %v26_v37 = vld [vmem:[%s1226_s0 + $0x24] sm:$0x7]  ;;  %v31_v47 = vld [vmem:[%s1226_s0 + $0x38] sm:$0x7]  ;;  %v30_v48 = vld [vmem:[%s1226_s0 + $0x34] sm:$0x7] }
   0x6   :  { %v80_v17 = vsel %vm67_vm0, %v625_v11, 0.0  ;;  %v74_v18 = vsel %vm67_vm0, %v628_v12, 0.0  ;;  %v646_v22 = vadd.f32 %v610_v4, %v34_v16  ;;  %v39_v31 = vunpack.c.l.bf16 %v23_v25  ;;  %v29_v49 = vld [vmem:[%s1226_s0 + $0x30] sm:$0x7]  ;;  %v32_v59 = vld [vmem:[%s1226_s0 + $0x3c] sm:$0x7]  ;;  %vm912_vm14 = vmand %vm483_vm2, %vm484_vm4 }
   0x7   :  { %81 = vadd.xlane.f32.xlu2 %v80_v17  ;;  %75 = vadd.xlane.f32.xlu1 %v74_v18  ;;  %v68_v19 = vsel %vm67_vm0, %v631_v15, 0.0  ;;  %v83_v26 = vsel %vm67_vm0, %v640_v20, 0.0  ;;  %v77_v27 = vsel %vm67_vm0, %v643_v21, 0.0  ;;  %v664_v32 = vadd.f32 %v610_v4, %v41_v28 }
   0x8   :  { %69 = vadd.xlane.f32.xlu0 %v68_v19  ;;  %v71_v30 = vsel %vm67_vm0, %v646_v22, 0.0  ;;  %v667_v33 = vadd.f32 %v610_v4, %v40_v29  ;;  %v670_v34 = vadd.f32 %v610_v4, %v39_v31  ;;  %v44_v39 = vunpack.c.l.bf16 %v28_v35 }
   0x9   :  { %v92_v38 = vsel %vm67_vm0, %v664_v32, 0.0  ;;  %v43_v41 = vunpack.c.l.bf16 %v27_v36  ;;  %v42_v43 = vunpack.c.l.bf16 %v26_v37  ;;  %v47_v51 = vunpack.c.l.bf16 %v31_v47 }
   0xa   :  { %v89_v40 = vsel %vm67_vm0, %v667_v33, 0.0  ;;  %v86_v42 = vsel %vm67_vm0, %v670_v34, 0.0  ;;  %v688_v44 = vadd.f32 %v610_v4, %v44_v39  ;;  %v46_v53 = vunpack.c.l.bf16 %v30_v48 }
   0xb   :  { %v691_v45 = vadd.f32 %v610_v4, %v43_v41  ;;  %v694_v46 = vadd.f32 %v610_v4, %v42_v43  ;;  %v45_v55 = vunpack.c.l.bf16 %v29_v49  ;;  %v712_v56 = vadd.f32 %v610_v4, %v47_v51 }
   0xc   :  { %v101_v50 = vsel %vm67_vm0, %v688_v44, 0.0  ;;  %v715_v57 = vadd.f32 %v610_v4, %v46_v53  ;;  %v48_v63 = vunpack.c.l.bf16 %v32_v59  ;;  %v575_v2 = vmov 32.0  }
   0xd   :  { %v98_v52 = vsel %vm67_vm0, %v691_v45, 0.0  ;;  %v95_v54 = vsel %vm67_vm0, %v694_v46, 0.0  ;;  %v718_v58 = vadd.f32 %v610_v4, %v45_v55  ;;  %v110_v60 = vsel %vm67_vm0, %v712_v56, 0.0 }
   0xe   :  { %v107_v61 = vsel %vm67_vm0, %v715_v57, 0.0  ;;  %v730_v0 = vadd.f32 %v610_v4, %v48_v63  ;;  %541 = vrcp.f32 %v575_v2 }
   0xf   :  { %84 = vadd.xlane.f32.xlu2 %v83_v26  ;;  %78 = vadd.xlane.f32.xlu1 %v77_v27  ;;  %v104_v62 = vsel %vm67_vm0, %v718_v58, 0.0 }
  0x10   :  { %72 = vadd.xlane.f32.xlu0 %v71_v30  ;;  %v113_v1 = vsel %vm67_vm0, %v730_v0, 0.0 }
  0x14   :  { %v542_v3 = vpop.eup %541 }
  0x15   :  { %v117_v5 = vmul.f32 32.0, %v542_v3  ;;  %vm121_vm1 = vweird.f32 %v542_v3 }
  0x17   :  { %93 = vadd.xlane.f32.xlu2 %v92_v38  ;;  %90 = vadd.xlane.f32.xlu1 %v89_v40  ;;  %v118_v6 = vsub.f32 1.0, %v117_v5 }
  0x18   :  { %87 = vadd.xlane.f32.xlu0 %v86_v42 }
  0x19   :  { %v119_v7 = vmul.f32 %v542_v3, %v118_v6 }
  0x1b   :  { %v120_v8 = vadd.f32 %v542_v3, %v119_v7 }
  0x1d   :  { %v734_v9 = vsel %vm121_vm1, %v542_v3, %v120_v8 }
  0x1f   :  { %102 = vadd.xlane.f32.xlu2 %v101_v50  ;;  %99 = vadd.xlane.f32.xlu1 %v98_v52 }
  0x20   :  { %96 = vadd.xlane.f32.xlu0 %v95_v54 }
  0x27   :  { %111 = vadd.xlane.f32.xlu2 %v110_v60  ;;  %108 = vadd.xlane.f32.xlu1 %v107_v61 }
  0x28   :  { %105 = vadd.xlane.f32.xlu0 %v104_v62 }
  0x30   :  { %114 = vadd.xlane.f32.xlu0 %v113_v1 }
  0x7a   :  { %v82_v10 = vpop.xlane.xlu2 %81  ;;  %v76_v13 = vpop.xlane.xlu1 %75 }
  0x7b   :  { %v125_v14 = vmul.f32 %v734_v9, %v76_v13  ;;  %v70_v4 = vpop.xlane.xlu0 %69  ;;  %v127_v35 = vmul.f32 %v734_v9, %v82_v10 }
  0x7c   :  { %v123_v16 = vmul.f32 %v734_v9, %v70_v4 }
  0x7d   :  { %v739_v17 = vsub.f32 %v628_v12, %v125_v14 }
  0x7e   :  { %v742_v18 = vsub.f32 %v631_v15, %v123_v16 }
  0x7f   :  { %v157_v19 = vmul.f32 %v739_v17, %v739_v17 }
  0x80   :  { %v155_v23 = vmul.f32 %v742_v18, %v742_v18 }
  0x81   :  { %v177_v24 = vsel %vm67_vm0, %v157_v19, 0.0 }
  0x82   :  { %v85_v25 = vpop.xlane.xlu2 %84  ;;  %v79_v26 = vpop.xlane.xlu1 %78  ;;  %178 = vadd.xlane.f32.xlu0 %v177_v24  ;;  %v171_v27 = vsel %vm67_vm0, %v155_v23, 0.0 }
  0x83   :  { %v128_v28 = vmul.f32 %v734_v9, %v85_v25  ;;  %v126_v12 = vmul.f32 %v734_v9, %v79_v26  ;;  %172 = vadd.xlane.f32.xlu1 %v171_v27  ;;  %v73_v15 = vpop.xlane.xlu0 %72 }
  0x84   :  { %v124_v29 = vmul.f32 %v734_v9, %v73_v15 }
  0x85   :  { %v754_v30 = vsub.f32 %v640_v20, %v128_v28  ;;  %v757_v31 = vsub.f32 %v643_v21, %v126_v12  ;;  %v772_v21 = vsub.f32 %v625_v11, %v127_v35 }
  0x86   :  { %v761_v36 = vsub.f32 %v646_v22, %v124_v29 }
  0x87   :  { %v160_v37 = vmul.f32 %v754_v30, %v754_v30  ;;  %v158_v38 = vmul.f32 %v757_v31, %v757_v31  ;;  %v159_v51 = vmul.f32 %v772_v21, %v772_v21 }
  0x88   :  { %v156_v39 = vmul.f32 %v761_v36, %v761_v36 }
  0x89   :  { %v186_v20 = vsel %vm67_vm0, %v160_v37, 0.0  ;;  %v180_v40 = vsel %vm67_vm0, %v158_v38, 0.0 }
  0x8a   :  { %v94_v41 = vpop.xlane.xlu2 %93  ;;  %187 = vadd.xlane.f32.xlu0 %v186_v20  ;;  %v174_v22 = vsel %vm67_vm0, %v156_v39, 0.0  ;;  %v91_v42 = vpop.xlane.xlu1 %90 }
  0x8b   :  { %v131_v43 = vmul.f32 %v734_v9, %v94_v41  ;;  %181 = vadd.xlane.f32.xlu1 %v180_v40  ;;  %175 = vadd.xlane.f32.xlu2 %v174_v22  ;;  %v88_v47 = vpop.xlane.xlu0 %87  ;;  %v130_v49 = vmul.f32 %v734_v9, %v91_v42 }
  0x8c   :  { %v129_v48 = vmul.f32 %v734_v9, %v88_v47 }
  0x8d   :  { %v779_v50 = vsub.f32 %v664_v32, %v131_v43  ;;  %v789_v53 = vsub.f32 %v667_v33, %v130_v49  ;;  %v183_v32 = vsel %vm67_vm0, %v159_v51, 0.0 }
  0x8e   :  { %v782_v11 = vsub.f32 %v670_v34, %v129_v48 }
  0x8f   :  { %v163_v52 = vmul.f32 %v779_v50, %v779_v50  ;;  %v162_v1 = vmul.f32 %v789_v53, %v789_v53 }
  0x90   :  { %v161_v54 = vmul.f32 %v782_v11, %v782_v11 }
  0x91   :  { %v195_v55 = vsel %vm67_vm0, %v163_v52, 0.0  ;;  %v192_v7 = vsel %vm67_vm0, %v162_v1, 0.0 }
  0x92   :  { %v103_v59 = vpop.xlane.xlu2 %102  ;;  %196 = vadd.xlane.f32.xlu0 %v195_v55  ;;  %v189_v34 = vsel %vm67_vm0, %v161_v54, 0.0  ;;  %v100_v60 = vpop.xlane.xlu1 %99 }
  0x93   :  { %v134_v61 = vmul.f32 %v734_v9, %v103_v59  ;;  %184 = vadd.xlane.f32.xlu2 %v183_v32  ;;  %190 = vadd.xlane.f32.xlu1 %v189_v34  ;;  %v97_v62 = vpop.xlane.xlu0 %96  ;;  %v133_v63 = vmul.f32 %v734_v9, %v100_v60 }
  0x94   :  { %v132_v33 = vmul.f32 %v734_v9, %v97_v62 }
  0x95   :  { %v802_v2 = vsub.f32 %v688_v44, %v134_v61  ;;  %v810_v6 = vsub.f32 %v691_v45, %v133_v63 }
  0x96   :  { %v805_v3 = vsub.f32 %v694_v46, %v132_v33 }
  0x97   :  { %v166_v5 = vmul.f32 %v802_v2, %v802_v2  ;;  %v165_v19 = vmul.f32 %v810_v6, %v810_v6 }
  0x98   :  { %v164_v8 = vmul.f32 %v805_v3, %v805_v3 }
  0x99   :  { %v204_v10 = vsel %vm67_vm0, %v166_v5, 0.0  ;;  %v201_v27 = vsel %vm67_vm0, %v165_v19, 0.0 }
  0x9a   :  { %v112_v13 = vpop.xlane.xlu2 %111  ;;  %205 = vadd.xlane.f32.xlu0 %v204_v10  ;;  %v198_v44 = vsel %vm67_vm0, %v164_v8, 0.0  ;;  %v109_v14 = vpop.xlane.xlu1 %108 }
  0x9b   :  { %v137_v46 = vmul.f32 %v734_v9, %v112_v13  ;;  %193 = vadd.xlane.f32.xlu2 %v192_v7  ;;  %199 = vadd.xlane.f32.xlu1 %v198_v44  ;;  %v106_v4 = vpop.xlane.xlu0 %105  ;;  %v136_v16 = vmul.f32 %v734_v9, %v109_v14 }
  0x9c   :  { %v135_v45 = vmul.f32 %v734_v9, %v106_v4 }
  0x9d   :  { %v823_v23 = vsub.f32 %v712_v56, %v137_v46  ;;  %v831_v26 = vsub.f32 %v715_v57, %v136_v16 }
  0x9e   :  { %v826_v24 = vsub.f32 %v718_v58, %v135_v45 }
  0x9f   :  { %v169_v25 = vmul.f32 %v823_v23, %v823_v23  ;;  %v168_v29 = vmul.f32 %v831_v26, %v831_v26 }
  0xa0   :  { %v167_v28 = vmul.f32 %v826_v24, %v826_v24 }
  0xa1   :  { %v213_v12 = vsel %vm67_vm0, %v169_v25, 0.0  ;;  %v210_v35 = vsel %vm67_vm0, %v168_v29, 0.0 }
  0xa2   :  { %214 = vadd.xlane.f32.xlu0 %v213_v12  ;;  %v207_v56 = vsel %vm67_vm0, %v167_v28, 0.0 }
  0xa3   :  { %202 = vadd.xlane.f32.xlu2 %v201_v27  ;;  %208 = vadd.xlane.f32.xlu1 %v207_v56  ;;  %v115_v58 = vpop.xlane.xlu0 %114  ;;  %v878_v27 = vld [vmem:[%s1228_s2] ss:$0 sm:$0xff] }
  0xa4   :  { %v138_v15 = vmul.f32 %v734_v9, %v115_v58 }
  0xa6   :  { %v842_v57 = vsub.f32 %v730_v0, %v138_v15 }
  0xa8   :  { %v170_v37 = vmul.f32 %v842_v57, %v842_v57 }
  0xaa   :  { %v216_v38 = vsel %vm67_vm0, %v170_v37, 0.0  ;;  %v894_v37 = vld [vmem:[%s1229_s3] ss:$0 sm:$0xff] }
  0xab   :  { %211 = vadd.xlane.f32.xlu2 %v210_v35  ;;  %217 = vadd.xlane.f32.xlu1 %v216_v38 }
  0xf5   :  { %v179_v39 = vpop.xlane.xlu0 %178 }
  0xf6   :  { %v173_v20 = vpop.xlane.xlu1 %172  ;;  %v221_v40 = vmul.f32 %v179_v39, %v734_v9 }
  0xf7   :  { %v219_v41 = vmul.f32 %v173_v20, %v734_v9 }
  0xf8   :  { %v237_v22 = vadd.f32 1e-05, %v221_v40 }
  0xf9   :  { %v235_v42 = vadd.f32 1e-05, %v219_v41 }
  0xfa   :  { %543 = vrsqrt.f32 %v237_v22  ;;  %vm277_vm6 = vweird.f32 %v237_v22 }
  0xfb   :  { %545 = vrsqrt.f32 %v235_v42  ;;  %vm257_vm7 = vweird.f32 %v235_v42 }
  0xfd   :  { %v188_v0 = vpop.xlane.xlu0 %187 }
  0xfe   :  { %v182_v43 = vpop.xlane.xlu1 %181  ;;  %v176_v47 = vpop.xlane.xlu2 %175  ;;  %v224_v48 = vmul.f32 %v188_v0, %v734_v9 }
  0xff   :  { %v222_v49 = vmul.f32 %v182_v43, %v734_v9  ;;  %v220_v51 = vmul.f32 %v176_v47, %v734_v9 }
 0x100   :  { %v544_v52 = vpop.eup %543  ;;  %v853_v54 = vadd.f32 1e-05, %v224_v48 }
 0x101   :  { %v546_v55 = vpop.eup %545  ;;  %v272_v59 = vmul.f32 %v544_v52, %v237_v22  ;;  %v855_v32 = vadd.f32 1e-05, %v222_v49  ;;  %v857_v34 = vadd.f32 1e-05, %v220_v51  ;;  %vm278_vm3 = vweird.f32 %v544_v52 }
 0x102   :  { %v252_v60 = vmul.f32 %v546_v55, %v235_v42  ;;  %547 = vrsqrt.f32 %v853_v54  ;;  %vm258_vm5 = vweird.f32 %v546_v55  ;;  %vm279_vm8 = vmor %vm277_vm6, %vm278_vm3  ;;  %vm307_vm9 = vweird.f32 %v853_v54 }
 0x103   :  { %v273_v61 = vmul.f32 %v544_v52, %v272_v59  ;;  %549 = vrsqrt.f32 %v855_v32  ;;  %vm259_vm10 = vmor %vm257_vm7, %vm258_vm5  ;;  %vm287_vm11 = vweird.f32 %v855_v32  ;;  %vm267_vm0 = vweird.f32 %v857_v34 }
 0x104   :  { %v253_v62 = vmul.f32 %v546_v55, %v252_v60  ;;  %551 = vrsqrt.f32 %v857_v34  ;;  %v492_v60 = vld [vmem:[%s1230_s4 + $0x8] sm:$0x7] }
 0x105   :  { %v274_v33 = vmul.f32 0.5, %v273_v61  ;;  %v197_v63 = vpop.xlane.xlu0 %196 }
 0x106   :  { %v254_v1 = vmul.f32 0.5, %v253_v62  ;;  %v185_v5 = vpop.xlane.xlu2 %184  ;;  %v191_v7 = vpop.xlane.xlu1 %190  ;;  %v227_v44 = vmul.f32 %v197_v63, %v734_v9  ;;  %v486_v63 = vld [vmem:[%s1230_s4] sm:$0x7] }
 0x107   :  { %v275_v8 = vsub.f32 1.5, %v274_v33  ;;  %v223_v10 = vmul.f32 %v185_v5, %v734_v9  ;;  %v225_v13 = vmul.f32 %v191_v7, %v734_v9 }
 0x108   :  { %v865_v14 = vpop.eup %547  ;;  %v255_v46 = vsub.f32 1.5, %v254_v1  ;;  %v889_v35 = vadd.f32 1e-05, %v227_v44 }
 0x109   :  { %v867_v4 = vpop.eup %549  ;;  %v276_v45 = vmul.f32 %v544_v52, %v275_v8  ;;  %v302_v16 = vmul.f32 %v865_v14, %v853_v54  ;;  %v871_v19 = vadd.f32 1e-05, %v223_v10  ;;  %v884_v56 = vadd.f32 1e-05, %v225_v13 }
 0x10a   :  { %v873_v25 = vpop.eup %551  ;;  %v256_v28 = vmul.f32 %v546_v55, %v255_v46  ;;  %v282_v12 = vmul.f32 %v867_v4, %v855_v32  ;;  %vm308_vm12 = vweird.f32 %v865_v14  ;;  %vm288_vm13 = vweird.f32 %v867_v4 }
 0x10b   :  { %v280_v58 = vsel %vm279_vm8, %v544_v52, %v276_v45  ;;  %v262_v15 = vmul.f32 %v873_v25, %v857_v34  ;;  %v303_v29 = vmul.f32 %v865_v14, %v302_v16  ;;  %553 = vrsqrt.f32 %v871_v19  ;;  %vm309_vm1 = vmor %vm307_vm9, %vm308_vm12 }
 0x10c   :  { %v260_v38 = vsel %vm259_vm10, %v546_v55, %v256_v28  ;;  %v413_v39 = vmul.f32 %v280_v58, %v739_v17  ;;  %v283_v20 = vmul.f32 %v867_v4, %v282_v12  ;;  %555 = vrsqrt.f32 %v884_v56  ;;  %vm289_vm2 = vmor %vm287_vm11, %vm288_vm13 }
 0x10d   :  { %v411_v40 = vmul.f32 %v260_v38, %v742_v18  ;;  %v263_v41 = vmul.f32 %v873_v25, %v262_v15  ;;  %v304_v22 = vmul.f32 0.5, %v303_v29  ;;  %557 = vrsqrt.f32 %v889_v35  ;;  %v206_v44 = vpop.xlane.xlu0 %205 }
 0x10e   :  { %v433_v42 = vmul.f32 %v878_v27, %v413_v39  ;;  %v284_v0 = vmul.f32 0.5, %v283_v20  ;;  %v194_v43 = vpop.xlane.xlu2 %193  ;;  %v200_v18 = vpop.xlane.xlu1 %199  ;;  %vm268_vm15 = vweird.f32 %v873_v25  ;;  %vm297_vm3 = vweird.f32 %v871_v19 }
 0x10f   :  { %v431_v17 = vmul.f32 %v878_v27, %v411_v40  ;;  %v264_v47 = vmul.f32 0.5, %v263_v41  ;;  %v305_v48 = vsub.f32 1.5, %v304_v22  ;;  %v226_v52 = vmul.f32 %v194_v43, %v734_v9  ;;  %vm269_vm4 = vmor %vm267_vm0, %vm268_vm15  ;;  %v501_v22 = vld [vmem:[%s1230_s4 + $0x14] sm:$0x7]  ;;  %v495_v43 = vld [vmem:[%s1230_s4 + $0xc] sm:$0x7] }
 0x110   :  { %v453_v49 = vadd.f32 %v894_v37, %v433_v42  ;;  %v285_v51 = vsub.f32 1.5, %v284_v0  ;;  %v228_v7 = vmul.f32 %v200_v18, %v734_v9  ;;  %vm337_vm5 = vweird.f32 %v889_v35 }
 0x111   :  { %v451_v59 = vadd.f32 %v894_v37, %v431_v17  ;;  %v265_v61 = vsub.f32 1.5, %v264_v47  ;;  %v306_v62 = vmul.f32 %v865_v14, %v305_v48  ;;  %v922_v33 = vpop.eup %553  ;;  %v951_v16 = vadd.f32 1e-05, %v226_v52 }
 0x112   :  { %v469_v1 = vpack.c.bf16 %v453_v49, %v453_v49  ;;  %v286_v5 = vmul.f32 %v867_v4, %v285_v51  ;;  %v292_v34 = vmul.f32 %v922_v33, %v871_v19  ;;  %v943_v54 = vpop.eup %555  ;;  %vm317_vm6 = vweird.f32 %v884_v56  ;;  %v489_v51 = vld [vmem:[%s1230_s4 + $0x4] sm:$0x7] }
 0x113   :  { %v467_v8 = vpack.c.bf16 %v451_v59, %v451_v59  ;;  %v266_v10 = vmul.f32 %v873_v25, %v265_v61  ;;  %v310_v13 = vsel %vm309_vm1, %v865_v14, %v306_v62  ;;  %v953_v14 = vpop.eup %557  ;;  %v312_v29 = vmul.f32 %v943_v54, %v884_v56 }
 0x114   :  { %v493_v46 = vsel %vm912_vm14, %v469_v1, %v492_v60  ;;  %v290_v45 = vsel %vm289_vm2, %v867_v4, %v286_v5  ;;  %v416_v32 = vmul.f32 %v310_v13, %v754_v30  ;;  %v293_v58 = vmul.f32 %v922_v33, %v292_v34 }
 0x115   :  { %v487_v28 = vsel %vm912_vm14, %v467_v8, %v486_v63  ;;  %494 = vst [vmem:[%s1230_s4 + $0x8] sm:$0x7] %v493_v46  ;;  %v414_v12 = vmul.f32 %v290_v45, %v757_v31  ;;  %v270_v4 = vsel %vm269_vm4, %v873_v25, %v266_v10  ;;  %v230_v31 = vmul.f32 %v206_v44, %v734_v9 }
 0x116   :  { %488 = vst [vmem:[%s1230_s4] sm:$0x7] %v487_v28  ;;  %v412_v30 = vmul.f32 %v270_v4, %v761_v36  ;;  %v436_v15 = vmul.f32 %v878_v27, %v416_v32  ;;  %v294_v38 = vmul.f32 0.5, %v293_v58  ;;  %vm298_vm7 = vweird.f32 %v922_v33  ;;  %v203_v61 = vpop.xlane.xlu2 %202  ;;  %v209_v10 = vpop.xlane.xlu1 %208 }
 0x117   :  { %v434_v25 = vmul.f32 %v878_v27, %v414_v12  ;;  %v332_v39 = vmul.f32 %v953_v14, %v889_v35  ;;  %v313_v40 = vmul.f32 %v943_v54, %v312_v29  ;;  %559 = vrsqrt.f32 %v951_v16  ;;  %vm299_vm9 = vmor %vm297_vm3, %vm298_vm7  ;;  %v215_v58 = vpop.xlane.xlu0 %214 }
 0x118   :  { %v432_v20 = vmul.f32 %v878_v27, %v412_v30  ;;  %v456_v36 = vadd.f32 %v894_v37, %v436_v15  ;;  %v295_v42 = vsub.f32 1.5, %v294_v38  ;;  %vm318_vm8 = vweird.f32 %v943_v54 }
 0x119   :  { %v454_v41 = vadd.f32 %v894_v37, %v434_v25  ;;  %v333_v0 = vmul.f32 %v953_v14, %v332_v39  ;;  %v314_v48 = vmul.f32 0.5, %v313_v40  ;;  %v991_v18 = vadd.f32 1e-05, %v228_v7  ;;  %vm319_vm11 = vmor %vm317_vm6, %vm318_vm8 }
 0x11a   :  { %v452_v17 = vadd.f32 %v894_v37, %v432_v20  ;;  %v472_v47 = vpack.c.bf16 %v456_v36, %v456_v36  ;;  %v296_v52 = vmul.f32 %v922_v33, %v295_v42  ;;  %v997_v60 = vadd.f32 1e-05, %v230_v31 }
 0x11b   :  { %v470_v49 = vpack.c.bf16 %v454_v41, %v454_v41  ;;  %v334_v59 = vmul.f32 0.5, %v333_v0  ;;  %v315_v1 = vsub.f32 1.5, %v314_v48  ;;  %561 = vrsqrt.f32 %v991_v18  ;;  %v510_v48 = vld [vmem:[%s1230_s4 + $0x20] sm:$0x7] }
 0x11c   :  { %v468_v62 = vpack.c.bf16 %v452_v17, %v452_v17  ;;  %v502_v63 = vsel %vm912_vm14, %v472_v47, %v501_v22  ;;  %v300_v7 = vsel %vm299_vm9, %v922_v33, %v296_v52  ;;  %vm338_vm10 = vweird.f32 %v953_v14 }
 0x11d   :  { %v496_v5 = vsel %vm912_vm14, %v470_v49, %v495_v43  ;;  %503 = vst [vmem:[%s1230_s4 + $0x14] sm:$0x7] %v502_v63  ;;  %v335_v8 = vsub.f32 1.5, %v334_v59  ;;  %v1013_v13 = vpop.eup %559  ;;  %v415_v34 = vmul.f32 %v300_v7, %v772_v21  ;;  %v316_v44 = vmul.f32 %v943_v54, %v315_v1  ;;  %vm339_vm12 = vmor %vm337_vm5, %vm338_vm10  ;;  %v504_v43 = vld [vmem:[%s1230_s4 + $0x18] sm:$0x7] }
 0x11e   :  { %497 = vst [vmem:[%s1230_s4 + $0xc] sm:$0x7] %v496_v5  ;;  %v490_v19 = vsel %vm912_vm14, %v468_v62, %v489_v51  ;;  %563 = vrsqrt.f32 %v997_v60  ;;  %v322_v46 = vmul.f32 %v1013_v13, %v951_v16  ;;  %v229_v32 = vmul.f32 %v203_v61, %v734_v9  ;;  %v212_v42 = vpop.xlane.xlu2 %211 }
 0x11f   :  { %491 = vst [vmem:[%s1230_s4 + $0x4] sm:$0x7] %v490_v19  ;;  %v336_v33 = vmul.f32 %v953_v14, %v335_v8  ;;  %v435_v21 = vmul.f32 %v878_v27, %v415_v34  ;;  %v320_v45 = vsel %vm319_vm11, %v943_v54, %v316_v44  ;;  %v231_v28 = vmul.f32 %v209_v10, %v734_v9  ;;  %v218_v8 = vpop.xlane.xlu1 %217 }
 0x120   :  { %v417_v12 = vmul.f32 %v320_v45, %v782_v11  ;;  %v323_v4 = vmul.f32 %v1013_v13, %v322_v46  ;;  %vm327_vm13 = vweird.f32 %v951_v16  ;;  %v1047_v15 = vadd.f32 1e-05, %v229_v32  ;;  %v498_v11 = vld [vmem:[%s1230_s4 + $0x10] sm:$0x7] }
 0x121   :  { %v340_v56 = vsel %vm339_vm12, %v953_v14, %v336_v33  ;;  %v1043_v30 = vpop.eup %561  ;;  %v455_v54 = vadd.f32 %v894_v37, %v435_v21  ;;  %v1049_v29 = vadd.f32 1e-05, %v231_v28  ;;  %vm328_vm15 = vweird.f32 %v1013_v13 }
 0x122   :  { %v419_v35 = vmul.f32 %v340_v56, %v779_v50  ;;  %v437_v14 = vmul.f32 %v878_v27, %v417_v12  ;;  %v324_v31 = vmul.f32 0.5, %v323_v4  ;;  %v342_v25 = vmul.f32 %v1043_v30, %v991_v18  ;;  %vm329_vm1 = vmor %vm327_vm13, %vm328_vm15 }
 0x123   :  { %v471_v39 = vpack.c.bf16 %v455_v54, %v455_v54  ;;  %565 = vrsqrt.f32 %v1047_v15  ;;  %v233_v20 = vmul.f32 %v215_v58, %v734_v9  ;;  %vm347_vm0 = vweird.f32 %v991_v18 }
 0x124   :  { %v1058_v38 = vpop.eup %563  ;;  %v439_v50 = vmul.f32 %v878_v27, %v419_v35  ;;  %v457_v36 = vadd.f32 %v894_v37, %v437_v14  ;;  %v325_v40 = vsub.f32 1.5, %v324_v31  ;;  %v343_v41 = vmul.f32 %v1043_v30, %v342_v25 }
 0x125   :  { %v362_v22 = vmul.f32 %v1058_v38, %v997_v60  ;;  %v499_v0 = vsel %vm912_vm14, %v471_v39, %v498_v11  ;;  %567 = vrsqrt.f32 %v1049_v29  ;;  %vm348_vm2 = vweird.f32 %v1043_v30 }
 0x126   :  { %v459_v17 = vadd.f32 %v894_v37, %v439_v50  ;;  %500 = vst [vmem:[%s1230_s4 + $0x10] sm:$0x7] %v499_v0  ;;  %v473_v47 = vpack.c.bf16 %v457_v36, %v457_v36  ;;  %v326_v49 = vmul.f32 %v1013_v13, %v325_v40  ;;  %v344_v51 = vmul.f32 0.5, %v343_v41  ;;  %vm349_vm5 = vmor %vm347_vm0, %vm348_vm2  ;;  %v519_v0 = vld [vmem:[%s1230_s4 + $0x2c] sm:$0x7] }
 0x127   :  { %v363_v52 = vmul.f32 %v1058_v38, %v362_v22  ;;  %v1088_v61 = vadd.f32 1e-05, %v233_v20  ;;  %v232_v62 = vmul.f32 %v212_v42, %v734_v9  ;;  %vm367_vm3 = vweird.f32 %v997_v60 }
 0x128   :  { %v475_v59 = vpack.c.bf16 %v459_v17, %v459_v17  ;;  %v505_v63 = vsel %vm912_vm14, %v473_v47, %v504_v43  ;;  %v330_v1 = vsel %vm329_vm1, %v1013_v13, %v326_v49  ;;  %v345_v5 = vsub.f32 1.5, %v344_v51 }
 0x129   :  { %v364_v7 = vmul.f32 0.5, %v363_v52  ;;  %v566_v10 = vpop.eup %565  ;;  %506 = vst [vmem:[%s1230_s4 + $0x18] sm:$0x7] %v505_v63  ;;  %v418_v19 = vmul.f32 %v330_v1, %v789_v53  ;;  %569 = vrsqrt.f32 %v1088_v61  ;;  %vm368_vm4 = vweird.f32 %v1058_v38 }
 0x12a   :  { %v511_v16 = vsel %vm912_vm14, %v475_v59, %v510_v48  ;;  %v346_v13 = vmul.f32 %v1043_v30, %v345_v5  ;;  %v352_v44 = vmul.f32 %v566_v10, %v1047_v15  ;;  %v1113_v53 = vadd.f32 1e-05, %v232_v62  ;;  %vm369_vm6 = vmor %vm367_vm3, %vm368_vm4 }
 0x12b   :  { %512 = vst [vmem:[%s1230_s4 + $0x20] sm:$0x7] %v511_v16  ;;  %v365_v34 = vsub.f32 1.5, %v364_v7  ;;  %v568_v33 = vpop.eup %567  ;;  %v438_v46 = vmul.f32 %v878_v27, %v418_v19  ;;  %v234_v21 = vmul.f32 %v218_v8, %v734_v9  ;;  %v507_v9 = vld [vmem:[%s1230_s4 + $0x1c] sm:$0x7]  ;;  %vm357_vm7 = vweird.f32 %v1047_v15 }
 0x12c   :  { %v350_v45 = vsel %vm349_vm5, %v1043_v30, %v346_v13  ;;  %v353_v28 = vmul.f32 %v566_v10, %v352_v44  ;;  %v372_v12 = vmul.f32 %v568_v33, %v1049_v29  ;;  %571 = vrsqrt.f32 %v1113_v53  ;;  %v516_v19 = vld [vmem:[%s1230_s4 + $0x28] sm:$0x7] }
 0x12d   :  { %v366_v32 = vmul.f32 %v1058_v38, %v365_v34  ;;  %v458_v56 = vadd.f32 %v894_v37, %v438_v46  ;;  %v420_v4 = vmul.f32 %v350_v45, %v805_v3  ;;  %v1131_v60 = vadd.f32 1e-05, %v234_v21  ;;  %v522_v21 = vld [vmem:[%s1230_s4 + $0x30] sm:$0x7] }
 0x12e   :  { %v354_v58 = vmul.f32 0.5, %v353_v28  ;;  %v373_v30 = vmul.f32 %v568_v33, %v372_v12  ;;  %vm358_vm8 = vweird.f32 %v566_v10  ;;  %vm378_vm9 = vweird.f32 %v568_v33 }
 0x12f   :  { %v370_v18 = vsel %vm369_vm6, %v1058_v38, %v366_v32  ;;  %v570_v54 = vpop.eup %569  ;;  %v474_v35 = vpack.c.bf16 %v458_v56, %v458_v56  ;;  %v440_v11 = vmul.f32 %v878_v27, %v420_v4  ;;  %573 = vrsqrt.f32 %v1131_v60  ;;  %vm359_vm10 = vmor %vm357_vm7, %vm358_vm8 }
 0x130   :  { %v422_v3 = vmul.f32 %v370_v18, %v802_v2  ;;  %v355_v14 = vsub.f32 1.5, %v354_v58  ;;  %v374_v31 = vmul.f32 0.5, %v373_v30  ;;  %v392_v25 = vmul.f32 %v570_v54, %v1088_v61  ;;  %v513_v2 = vld [vmem:[%s1230_s4 + $0x24] sm:$0x7]  ;;  %v528_v18 = vld [vmem:[%s1230_s4 + $0x38] sm:$0x7] }
 0x131   :  { %v508_v38 = vsel %vm912_vm14, %v474_v35, %v507_v9  ;;  %v460_v39 = vadd.f32 %v894_v37, %v440_v11  ;;  %vm377_vm11 = vweird.f32 %v1049_v29  ;;  %vm397_vm13 = vweird.f32 %v1088_v61 }
 0x132   :  { %v442_v50 = vmul.f32 %v878_v27, %v422_v3  ;;  %509 = vst [vmem:[%s1230_s4 + $0x1c] sm:$0x7] %v508_v38  ;;  %v356_v20 = vmul.f32 %v566_v10, %v355_v14  ;;  %v375_v36 = vsub.f32 1.5, %v374_v31  ;;  %v393_v40 = vmul.f32 %v570_v54, %v392_v25  ;;  %v572_v41 = vpop.eup %571  ;;  %vm379_vm12 = vmor %vm377_vm11, %vm378_vm9 }
 0x133   :  { %v476_v22 = vpack.c.bf16 %v460_v39, %v460_v39  ;;  %v382_v48 = vmul.f32 %v572_v41, %v1113_v53  ;;  %vm398_vm15 = vweird.f32 %v570_v54  ;;  %vm388_vm1 = vweird.f32 %v572_v41 }
 0x134   :  { %v462_v42 = vadd.f32 %v894_v37, %v442_v50  ;;  %v360_v43 = vsel %vm359_vm10, %v566_v10, %v356_v20  ;;  %v376_v17 = vmul.f32 %v568_v33, %v375_v36  ;;  %v394_v47 = vmul.f32 0.5, %v393_v40  ;;  %vm399_vm0 = vmor %vm397_vm13, %vm398_vm15 }
 0x135   :  { %v514_v49 = vsel %vm912_vm14, %v476_v22, %v513_v2  ;;  %v421_v52 = vmul.f32 %v360_v43, %v810_v6  ;;  %v383_v59 = vmul.f32 %v572_v41, %v382_v48  ;;  %v574_v62 = vpop.eup %573  ;;  %vm387_vm2 = vweird.f32 %v1113_v53 }
 0x136   :  { %v478_v51 = vpack.c.bf16 %v462_v42, %v462_v42  ;;  %515 = vst [vmem:[%s1230_s4 + $0x24] sm:$0x7] %v514_v49  ;;  %v380_v15 = vsel %vm379_vm12, %v568_v33, %v376_v17  ;;  %v395_v29 = vsub.f32 1.5, %v394_v47  ;;  %v402_v8 = vmul.f32 %v574_v62, %v1131_v60  ;;  %vm389_vm3 = vmor %vm387_vm2, %vm388_vm1 }
 0x137   :  { %v441_v1 = vmul.f32 %v878_v27, %v421_v52  ;;  %v423_v6 = vmul.f32 %v380_v15, %v826_v24  ;;  %v384_v7 = vmul.f32 0.5, %v383_v59  ;;  %vm408_vm4 = vweird.f32 %v574_v62 }
 0x138   :  { %v520_v63 = vsel %vm912_vm14, %v478_v51, %v519_v0  ;;  %v396_v5 = vmul.f32 %v570_v54, %v395_v29  ;;  %v403_v34 = vmul.f32 %v574_v62, %v402_v8  ;;  %vm407_vm5 = vweird.f32 %v1131_v60  ;;  %v525_v60 = vld [vmem:[%s1230_s4 + $0x34] sm:$0x7] }
 0x139   :  { %521 = vst [vmem:[%s1230_s4 + $0x2c] sm:$0x7] %v520_v63  ;;  %v461_v10 = vadd.f32 %v894_v37, %v441_v1  ;;  %v443_v16 = vmul.f32 %v878_v27, %v423_v6  ;;  %v385_v13 = vsub.f32 1.5, %v384_v7  ;;  %vm409_vm6 = vmor %vm407_vm5, %vm408_vm4 }
 0x13a   :  { %v400_v24 = vsel %vm399_vm0, %v570_v54, %v396_v5  ;;  %v404_v61 = vmul.f32 0.5, %v403_v34 }
 0x13b   :  { %v477_v44 = vpack.c.bf16 %v461_v10, %v461_v10  ;;  %v463_v33 = vadd.f32 %v894_v37, %v443_v16  ;;  %v425_v46 = vmul.f32 %v400_v24, %v823_v23  ;;  %v386_v45 = vmul.f32 %v572_v41, %v385_v13 }
 0x13c   :  { %v405_v56 = vsub.f32 1.5, %v404_v61 }
 0x13d   :  { %v517_v32 = vsel %vm912_vm14, %v477_v44, %v516_v19  ;;  %v479_v28 = vpack.c.bf16 %v463_v33, %v463_v33  ;;  %v445_v12 = vmul.f32 %v878_v27, %v425_v46  ;;  %v390_v23 = vsel %vm389_vm3, %v572_v41, %v386_v45 }
 0x13e   :  { %518 = vst [vmem:[%s1230_s4 + $0x28] sm:$0x7] %v517_v32  ;;  %v424_v9 = vmul.f32 %v390_v23, %v831_v26  ;;  %v406_v58 = vmul.f32 %v574_v62, %v405_v56 }
 0x13f   :  { %v523_v4 = vsel %vm912_vm14, %v479_v28, %v522_v21  ;;  %v465_v53 = vadd.f32 %v894_v37, %v445_v12 }
 0x140   :  { %524 = vst [vmem:[%s1230_s4 + $0x30] sm:$0x7] %v523_v4  ;;  %v444_v54 = vmul.f32 %v878_v27, %v424_v9  ;;  %v410_v35 = vsel %vm409_vm6, %v574_v62, %v406_v58 }
 0x141   :  { %v481_v30 = vpack.c.bf16 %v465_v53, %v465_v53  ;;  %v426_v3 = vmul.f32 %v410_v35, %v842_v57  ;;  %v531_v57 = vld [vmem:[%s1230_s4 + $0x3c] sm:$0x7] }
 0x142   :  { %v464_v26 = vadd.f32 %v894_v37, %v444_v54 }
 0x143   :  { %v529_v11 = vsel %vm912_vm14, %v481_v30, %v528_v18  ;;  %v446_v31 = vmul.f32 %v878_v27, %v426_v3 }
 0x144   :  { %530 = vst [vmem:[%s1230_s4 + $0x38] sm:$0x7] %v529_v11  ;;  %v480_v14 = vpack.c.bf16 %v464_v26, %v464_v26 }
 0x145   :  { %v466_v38 = vadd.f32 %v894_v37, %v446_v31 }
 0x146   :  { %v526_v25 = vsel %vm912_vm14, %v480_v14, %v525_v60 }
 0x147   :  { %527 = vst [vmem:[%s1230_s4 + $0x34] sm:$0x7] %v526_v25  ;;  %v482_v39 = vpack.c.bf16 %v466_v38, %v466_v38 }
 0x149   :  { %v532_v50 = vsel %vm912_vm14, %v482_v39, %v531_v57 }
 0x14a   :  { %533 = vst [vmem:[%s1230_s4 + $0x3c] sm:$0x7] %v532_v50 }

// kernel: run.9
= control target key start
LH: loop header
LB: loop body
LE: loop exit
PB: predicated region body
PF: predicated region fallthrough
CT: control target
= control target key end

     0   :  { %vm41_vm0 = vcmask 261120   ;;  %v467_v25 = vmov 32.0   ;;  %s837_s0 = inlined_call_operand.vmem [shape: bf16[80,32], index: 0, kind: input, shape index: {}]   ;;  %s838_s1 = inlined_call_operand.vmem [shape: f32[1,32], index: 1, kind: input, shape index: {}]   ;;  %s839_s2 = inlined_call_operand.vmem [shape: f32[1,32], index: 2, kind: input, shape index: {}]   ;;  %s840_s4 = inlined_call_operand.vmem [shape: f32[1,96], index: 4, kind: input, shape index: {}]   ;;  %s841_s3 = inlined_call_operand.vmem [shape: bf16[32,96], index: 3, kind: input, shape index: {}]   ;;  %s842_s5 = inlined_call_operand.vmem [shape: bf16[80,96], index: 5, kind: output, shape index: {}]  }
   0x1   :  { %v501_v0 = vld [vmem:[%s837_s0 + $0x20] sm:$0xff]   ;;  %v506_v1 = vld [vmem:[%s837_s0 + $0x18] sm:$0xff]   ;;  %v511_v2 = vld [vmem:[%s837_s0 + $0x10] sm:$0xff]   ;;  %445 = vrcp.f32 %v467_v25 }
   0x2   :  { %v429_v3 = vunpack.c.l.bf16 %v501_v0  ;;  %v425_v4 = vunpack.c.l.bf16 %v506_v1  ;;  %v421_v5 = vunpack.c.l.bf16 %v511_v2  ;;  %v430_v9 = vunpack.c.h.bf16 %v501_v0  ;;  %v530_v15 = vld [vmem:[%s837_s0 + $0x8] sm:$0xff]   ;;  %v535_v16 = vld [vmem:[%s837_s0] sm:$0xff]  }
   0x3   :  { %v426_v10 = vunpack.c.h.bf16 %v506_v1  ;;  %v422_v11 = vunpack.c.h.bf16 %v511_v2  ;;  %v417_v17 = vunpack.c.l.bf16 %v530_v15  ;;  %v414_v18 = vunpack.c.h.bf16 %v535_v16  ;;  %v409_v25 = vld [vmem:[%s841_s3] sm:$0xff] }
   0x4   :  { %v66_v6 = vsel %vm41_vm0, %v429_v3, 0.0  ;;  %v60_v7 = vsel %vm41_vm0, %v425_v4, 0.0  ;;  %v54_v8 = vsel %vm41_vm0, %v421_v5, 0.0  ;;  %v69_v12 = vsel %vm41_vm0, %v430_v9, 0.0 }
   0x5   :  { %67 = vadd.xlane.f32.xlu2 %v66_v6  ;;  %61 = vadd.xlane.f32.xlu1 %v60_v7  ;;  %v63_v13 = vsel %vm41_vm0, %v426_v10, 0.0  ;;  %v57_v14 = vsel %vm41_vm0, %v422_v11, 0.0  ;;  %v413_v19 = vunpack.c.l.bf16 %v535_v16  ;;  %v48_v20 = vsel %vm41_vm0, %v417_v17, 0.0 }
   0x6   :  { %55 = vadd.xlane.f32.xlu0 %v54_v8  ;;  %v45_v21 = vsel %vm41_vm0, %v414_v18, 0.0  ;;  %v418_v23 = vunpack.c.h.bf16 %v530_v15  ;;  %v410_v15 = vld [vmem:[%s841_s3 + $0x8] sm:$0xff] }
   0x7   :  { %v42_v22 = vsel %vm41_vm0, %v413_v19, 0.0  ;;  %v446_v26 = vpop.eup %445  ;;  %436 = vmatpush.bf16.msra.mxu2 %v410_v15  ;;  %437 = vmatpush.bf16.msra.mxu3 %v410_v15 }
   0x8   :  { %v51_v24 = vsel %vm41_vm0, %v418_v23, 0.0  ;;  %v73_v27 = vmul.f32 32.0, %v446_v26  ;;  %vm77_vm1 = vweird.f32 %v446_v26  ;;  %343 = vmatpush.bf16.msra.mxu0 %v410_v15  ;;  %435 = vmatpush.bf16.msra.mxu1 %v410_v15 }
   0xa   :  { %v74_v28 = vsub.f32 1.0, %v73_v27 }
   0xb   :  { %439 = vmatpush.bf16.msra.mxu2 %v409_v25  ;;  %440 = vmatpush.bf16.msra.mxu3 %v409_v25 }
   0xc   :  { %v75_v29 = vmul.f32 %v446_v26, %v74_v28  ;;  %344 = vmatpush.bf16.msra.mxu0 %v409_v25  ;;  %438 = vmatpush.bf16.msra.mxu1 %v409_v25 }
   0xd   :  { %70 = vadd.xlane.f32.xlu2 %v69_v12  ;;  %64 = vadd.xlane.f32.xlu1 %v63_v13 }
   0xe   :  { %58 = vadd.xlane.f32.xlu0 %v57_v14  ;;  %v76_v30 = vadd.f32 %v446_v26, %v75_v29 }
  0x10   :  { %v549_v31 = vsel %vm77_vm1, %v446_v26, %v76_v30 }
  0x15   :  { %49 = vadd.xlane.f32.xlu2 %v48_v20  ;;  %46 = vadd.xlane.f32.xlu1 %v45_v21 }
  0x16   :  { %43 = vadd.xlane.f32.xlu0 %v42_v22 }
  0x1e   :  { %52 = vadd.xlane.f32.xlu0 %v51_v24 }
  0x78   :  { %v68_v32 = vpop.xlane.xlu2 %67  ;;  %v62_v33 = vpop.xlane.xlu1 %61 }
  0x79   :  { %v85_v34 = vmul.f32 %v549_v31, %v62_v33  ;;  %v56_v35 = vpop.xlane.xlu0 %55  ;;  %v87_v51 = vmul.f32 %v549_v31, %v68_v32 }
  0x7a   :  { %v83_v36 = vmul.f32 %v549_v31, %v56_v35 }
  0x7b   :  { %v553_v37 = vsub.f32 %v425_v4, %v85_v34  ;;  %v583_v58 = vsub.f32 %v429_v3, %v87_v51 }
  0x7c   :  { %v555_v38 = vsub.f32 %v421_v5, %v83_v36 }
  0x7d   :  { %v105_v39 = vmul.f32 %v553_v37, %v553_v37  ;;  %v107_v0 = vmul.f32 %v583_v58, %v583_v58 }
  0x7e   :  { %v103_v40 = vmul.f32 %v555_v38, %v555_v38 }
  0x7f   :  { %v127_v41 = vsel %vm41_vm0, %v105_v39, 0.0 }
  0x80   :  { %v71_v42 = vpop.xlane.xlu2 %70  ;;  %v65_v43 = vpop.xlane.xlu1 %64  ;;  %v121_v44 = vsel %vm41_vm0, %v103_v40, 0.0  ;;  %128 = vadd.xlane.f32.xlu0 %v127_v41 }
  0x81   :  { %v88_v45 = vmul.f32 %v549_v31, %v71_v42  ;;  %v86_v46 = vmul.f32 %v549_v31, %v65_v43  ;;  %v59_v47 = vpop.xlane.xlu0 %58  ;;  %122 = vadd.xlane.f32.xlu1 %v121_v44 }
  0x82   :  { %v84_v48 = vmul.f32 %v549_v31, %v59_v47 }
  0x83   :  { %v566_v49 = vsub.f32 %v430_v9, %v88_v45  ;;  %v568_v50 = vsub.f32 %v426_v10, %v86_v46  ;;  %v133_v9 = vsel %vm41_vm0, %v107_v0, 0.0 }
  0x84   :  { %v571_v52 = vsub.f32 %v422_v11, %v84_v48 }
  0x85   :  { %v106_v53 = vmul.f32 %v568_v50, %v568_v50  ;;  %v108_v54 = vmul.f32 %v566_v49, %v566_v49 }
  0x86   :  { %v104_v55 = vmul.f32 %v571_v52, %v571_v52 }
  0x87   :  { %v130_v56 = vsel %vm41_vm0, %v106_v53, 0.0  ;;  %v136_v57 = vsel %vm41_vm0, %v108_v54, 0.0 }
  0x88   :  { %v124_v59 = vsel %vm41_vm0, %v104_v55, 0.0  ;;  %v50_v60 = vpop.xlane.xlu2 %49  ;;  %137 = vadd.xlane.f32.xlu0 %v136_v57  ;;  %v47_v61 = vpop.xlane.xlu1 %46 }
  0x89   :  { %125 = vadd.xlane.f32.xlu2 %v124_v59  ;;  %v81_v62 = vmul.f32 %v549_v31, %v50_v60  ;;  %131 = vadd.xlane.f32.xlu1 %v130_v56  ;;  %v44_v63 = vpop.xlane.xlu0 %43  ;;  %v80_v2 = vmul.f32 %v549_v31, %v47_v61 }
  0x8a   :  { %v79_v1 = vmul.f32 %v549_v31, %v44_v63 }
  0x8b   :  { %v589_v4 = vsub.f32 %v417_v17, %v81_v62  ;;  %v599_v6 = vsub.f32 %v414_v18, %v80_v2 }
  0x8c   :  { %v591_v5 = vsub.f32 %v413_v19, %v79_v1 }
  0x8d   :  { %v101_v3 = vmul.f32 %v589_v4, %v589_v4  ;;  %v100_v13 = vmul.f32 %v599_v6, %v599_v6 }
  0x8e   :  { %v99_v7 = vmul.f32 %v591_v5, %v591_v5 }
  0x8f   :  { %v115_v8 = vsel %vm41_vm0, %v101_v3, 0.0  ;;  %v112_v16 = vsel %vm41_vm0, %v100_v13, 0.0 }
  0x90   :  { %116 = vadd.xlane.f32.xlu0 %v115_v8  ;;  %v109_v10 = vsel %vm41_vm0, %v99_v7, 0.0 }
  0x91   :  { %134 = vadd.xlane.f32.xlu2 %v133_v9  ;;  %110 = vadd.xlane.f32.xlu1 %v109_v10  ;;  %v53_v11 = vpop.xlane.xlu0 %52 }
  0x92   :  { %v82_v12 = vmul.f32 %v549_v31, %v53_v11 }
  0x94   :  { %v611_v14 = vsub.f32 %v418_v23, %v82_v12 }
  0x96   :  { %v102_v17 = vmul.f32 %v611_v14, %v611_v14 }
  0x98   :  { %v118_v18 = vsel %vm41_vm0, %v102_v17, 0.0 }
  0x99   :  { %113 = vadd.xlane.f32.xlu2 %v112_v16  ;;  %119 = vadd.xlane.f32.xlu1 %v118_v18 }
  0xf3   :  { %v129_v19 = vpop.xlane.xlu0 %128 }
  0xf4   :  { %v123_v20 = vpop.xlane.xlu1 %122  ;;  %v145_v21 = vmul.f32 %v129_v19, %v549_v31 }
  0xf5   :  { %v143_v22 = vmul.f32 %v123_v20, %v549_v31 }
  0xf6   :  { %v619_v24 = vadd.f32 1e-05, %v145_v21 }
  0xf7   :  { %v153_v23 = vadd.f32 1e-05, %v143_v22 }
  0xf8   :  { %447 = vrsqrt.f32 %v619_v24  ;;  %vm225_vm8 = vweird.f32 %v619_v24 }
  0xf9   :  { %449 = vrsqrt.f32 %v153_v23  ;;  %vm205_vm3 = vweird.f32 %v153_v23 }
  0xfb   :  { %v138_v26 = vpop.xlane.xlu0 %137 }
  0xfc   :  { %v126_v27 = vpop.xlane.xlu2 %125  ;;  %v132_v28 = vpop.xlane.xlu1 %131  ;;  %v148_v29 = vmul.f32 %v138_v26, %v549_v31 }
  0xfd   :  { %v144_v30 = vmul.f32 %v126_v27, %v549_v31  ;;  %v146_v32 = vmul.f32 %v132_v28, %v549_v31 }
  0xfe   :  { %v631_v33 = vpop.eup %447  ;;  %v158_v34 = vadd.f32 1e-05, %v148_v29 }
  0xff   :  { %v450_v35 = vpop.eup %449  ;;  %v220_v36 = vmul.f32 %v631_v33, %v619_v24  ;;  %v154_v39 = vadd.f32 1e-05, %v144_v30  ;;  %v635_v40 = vadd.f32 1e-05, %v146_v32  ;;  %vm226_vm9 = vweird.f32 %v631_v33  ;;  %v688_v24 = vld [vmem:[%s838_s1] ss:$0 sm:$0xff] }
 0x100   :  { %v200_v41 = vmul.f32 %v450_v35, %v153_v23  ;;  %451 = vrsqrt.f32 %v158_v34  ;;  %vm206_vm2 = vweird.f32 %v450_v35  ;;  %vm255_vm5 = vweird.f32 %v158_v34  ;;  %vm695_vm13 = vmor %vm225_vm8, %vm226_vm9 }
 0x101   :  { %453 = vrsqrt.f32 %v154_v39  ;;  %v221_v43 = vmul.f32 %v631_v33, %v220_v36  ;;  %vm658_vm4 = vmor %vm205_vm3, %vm206_vm2  ;;  %vm215_vm10 = vweird.f32 %v154_v39  ;;  %vm235_vm14 = vweird.f32 %v635_v40 }
 0x102   :  { %v201_v42 = vmul.f32 %v450_v35, %v200_v41  ;;  %455 = vrsqrt.f32 %v635_v40 }
 0x103   :  { %v117_v44 = vpop.xlane.xlu0 %116  ;;  %v222_v57 = vmul.f32 0.5, %v221_v43 }
 0x104   :  { %v202_v45 = vmul.f32 0.5, %v201_v42  ;;  %v135_v46 = vpop.xlane.xlu2 %134  ;;  %v111_v47 = vpop.xlane.xlu1 %110  ;;  %v141_v53 = vmul.f32 %v117_v44, %v549_v31 }
 0x105   :  { %v147_v48 = vmul.f32 %v135_v46, %v549_v31  ;;  %v139_v51 = vmul.f32 %v111_v47, %v549_v31  ;;  %v223_v8 = vsub.f32 1.5, %v222_v57 }
 0x106   :  { %v642_v54 = vpop.eup %451  ;;  %v203_v55 = vsub.f32 1.5, %v202_v45  ;;  %v654_v3 = vadd.f32 1e-05, %v141_v53 }
 0x107   :  { %v454_v56 = vpop.eup %453  ;;  %v250_v59 = vmul.f32 %v642_v54, %v158_v34  ;;  %v645_v60 = vadd.f32 1e-05, %v147_v48  ;;  %v649_v63 = vadd.f32 1e-05, %v139_v51  ;;  %vm256_vm6 = vweird.f32 %v642_v54 }
 0x108   :  { %v647_v61 = vpop.eup %455  ;;  %v210_v62 = vmul.f32 %v454_v56, %v154_v39  ;;  %v204_v1 = vmul.f32 %v450_v35, %v203_v55  ;;  %vm216_vm7 = vweird.f32 %v454_v56  ;;  %v670_v15 = vmul.f32 %v631_v33, %v223_v8  ;;  %vm681_vm11 = vmor %vm255_vm5, %vm256_vm6 }
 0x109   :  { %v230_v2 = vmul.f32 %v647_v61, %v635_v40  ;;  %v251_v0 = vmul.f32 %v642_v54, %v250_v59  ;;  %457 = vrsqrt.f32 %v645_v60  ;;  %vm217_vm12 = vmor %vm215_vm10, %vm216_vm7  ;;  %vm236_vm15 = vweird.f32 %v647_v61 }
 0x10a   :  { %v211_v7 = vmul.f32 %v454_v56, %v210_v62  ;;  %459 = vrsqrt.f32 %v649_v63  ;;  %v208_v17 = vsel %vm658_vm4, %v450_v35, %v204_v1  ;;  %v228_v39 = vsel %vm695_vm13, %v631_v33, %v670_v15  ;;  %v720_v33 = vld [vmem:[%s839_s2] ss:$0 sm:$0xff]  ;;  %vm737_vm5 = vmor %vm235_vm14, %vm236_vm15 }
 0x10b   :  { %v231_v9 = vmul.f32 %v647_v61, %v230_v2  ;;  %v252_v10 = vmul.f32 0.5, %v251_v0  ;;  %461 = vrsqrt.f32 %v654_v3  ;;  %v263_v26 = vmul.f32 %v208_v17, %v555_v38 }
 0x10c   :  { %v212_v12 = vmul.f32 0.5, %v211_v7  ;;  %v114_v13 = vpop.xlane.xlu2 %113  ;;  %v120_v16 = vpop.xlane.xlu1 %119  ;;  %vm245_vm1 = vweird.f32 %v645_v60  ;;  %vm165_vm2 = vweird.f32 %v649_v63  ;;  %vm185_vm4 = vweird.f32 %v654_v3 }
 0x10d   :  { %v253_v18 = vsub.f32 1.5, %v252_v10  ;;  %v140_v19 = vmul.f32 %v114_v13, %v549_v31  ;;  %v232_v21 = vmul.f32 0.5, %v231_v9  ;;  %v142_v22 = vmul.f32 %v120_v16, %v549_v31 }
 0x10e   :  { %v213_v20 = vsub.f32 1.5, %v212_v12  ;;  %v277_v46 = vmul.f32 %v688_v24, %v263_v26 }
 0x10f   :  { %v674_v23 = vadd.f32 1e-05, %v140_v19  ;;  %v458_v25 = vpop.eup %457  ;;  %v254_v28 = vmul.f32 %v642_v54, %v253_v18  ;;  %v691_v38 = vadd.f32 1e-05, %v142_v22  ;;  %v233_v35 = vsub.f32 1.5, %v232_v21 }
 0x110   :  { %v214_v27 = vmul.f32 %v454_v56, %v213_v20  ;;  %v240_v29 = vmul.f32 %v458_v25, %v645_v60  ;;  %v693_v30 = vpop.eup %459  ;;  %vm246_vm3 = vweird.f32 %v458_v25  ;;  %v291_v62 = vadd.f32 %v720_v33, %v277_v46 }
 0x111   :  { %463 = vrsqrt.f32 %v674_v23  ;;  %v701_v36 = vpop.eup %461  ;;  %v160_v43 = vmul.f32 %v693_v30, %v649_v63  ;;  %v258_v44 = vsel %vm681_vm11, %v642_v54, %v254_v28  ;;  %v234_v48 = vmul.f32 %v647_v61, %v233_v35  ;;  %vm247_vm7 = vmor %vm245_vm1, %vm246_vm3 }
 0x112   :  { %v218_v34 = vsel %vm217_vm12, %v454_v56, %v214_v27  ;;  %v241_v42 = vmul.f32 %v458_v25, %v240_v29  ;;  %v180_v45 = vmul.f32 %v701_v36, %v654_v3  ;;  %465 = vrsqrt.f32 %v691_v38 }
 0x113   :  { %v264_v41 = vmul.f32 %v218_v34, %v571_v52  ;;  %v161_v47 = vmul.f32 %v693_v30, %v160_v43  ;;  %v268_v54 = vmul.f32 %v258_v44, %v566_v49  ;;  %vm166_vm6 = vweird.f32 %v693_v30 }
 0x114   :  { %v242_v52 = vmul.f32 0.5, %v241_v42  ;;  %v181_v51 = vmul.f32 %v701_v36, %v180_v45  ;;  %v238_v8 = vsel %vm737_vm5, %v647_v61, %v234_v48  ;;  %vm186_vm8 = vweird.f32 %v701_v36  ;;  %vm167_vm9 = vmor %vm165_vm2, %vm166_vm6  ;;  %v444_v48 = vld [vmem:[%s840_s4] ss:$0 sm:$0xff] }
 0x115   :  { %v278_v53 = vmul.f32 %v688_v24, %v264_v41  ;;  %v162_v56 = vmul.f32 0.5, %v161_v47  ;;  %v282_v16 = vmul.f32 %v688_v24, %v268_v54  ;;  %vm760_vm10 = vmor %vm185_vm4, %vm186_vm8  ;;  %v266_v63 = vmul.f32 %v238_v8, %v568_v50 }
 0x116   :  { %v243_v55 = vsub.f32 1.5, %v242_v52  ;;  %v182_v59 = vmul.f32 0.5, %v181_v51  ;;  %vm175_vm11 = vweird.f32 %v674_v23  ;;  %vm195_vm13 = vweird.f32 %v691_v38 }
 0x117   :  { %v464_v57 = vpop.eup %463  ;;  %v292_v1 = vadd.f32 %v720_v33, %v278_v53  ;;  %v163_v0 = vsub.f32 1.5, %v162_v56  ;;  %vm381_vm2 = vcmask 781312  }
 0x118   :  { %v244_v49 = vmul.f32 %v458_v25, %v243_v55  ;;  %v170_v7 = vmul.f32 %v464_v57, %v674_v23  ;;  %v183_v9 = vsub.f32 1.5, %v182_v59  ;;  %v466_v10 = vpop.eup %465  ;;  %vm176_vm12 = vweird.f32 %v464_v57 }
 0x119   :  { %v299_v40 = vpack.c.bf16 %v292_v1, %v291_v62  ;;  %v164_v12 = vmul.f32 %v693_v30, %v163_v0  ;;  %v190_v60 = vmul.f32 %v466_v10, %v691_v38  ;;  %vm177_vm14 = vmor %vm175_vm11, %vm176_vm12  ;;  %vm196_vm15 = vweird.f32 %v466_v10 }
 0x11a   :  { %v248_v11 = vsel %vm247_vm7, %v458_v25, %v244_v49  ;;  %v171_v13 = vmul.f32 %v464_v57, %v170_v7  ;;  %v184_v61 = vmul.f32 %v701_v36, %v183_v9  ;;  %v296_v25 = vadd.f32 %v720_v33, %v282_v16  ;;  %vm197_vm1 = vmor %vm195_vm13, %vm196_vm15 }
 0x11b   :  { %v267_v17 = vmul.f32 %v248_v11, %v583_v58  ;;  %406 = vmatmul.msk.bf16.vlgmr.msra.gmra.mxu2 %vm41_vm0, %v299_v40  ;;  %v168_v18 = vsel %vm167_vm9, %v693_v30, %v164_v12  ;;  %v265_v58 = vmul.f32 %v228_v39, %v553_v37  ;;  %v191_v21 = vmul.f32 %v466_v10, %v190_v60 }
 0x11c   :  { %v172_v20 = vmul.f32 0.5, %v171_v13  ;;  %v259_v3 = vmul.f32 %v168_v18, %v591_v5  ;;  %v188_v26 = vsel %vm760_vm10, %v701_v36, %v184_v61  ;;  %v280_v23 = vmul.f32 %v688_v24, %v266_v63 }
 0x11d   :  { %v281_v22 = vmul.f32 %v688_v24, %v267_v17  ;;  %v192_v27 = vmul.f32 0.5, %v191_v21  ;;  %v261_v29 = vmul.f32 %v188_v26, %v589_v4  ;;  %v279_v35 = vmul.f32 %v688_v24, %v265_v58 }
 0x11e   :  { %v173_v15 = vsub.f32 1.5, %v172_v20  ;;  %v273_v34 = vmul.f32 %v688_v24, %v259_v3  ;;  %v294_v39 = vadd.f32 %v720_v33, %v280_v23 }
 0x11f   :  { %v295_v37 = vadd.f32 %v720_v33, %v281_v22  ;;  %v193_v50 = vsub.f32 1.5, %v192_v27  ;;  %v275_v4 = vmul.f32 %v688_v24, %v261_v29  ;;  %v293_v43 = vadd.f32 %v720_v33, %v279_v35 }
 0x120   :  { %v174_v28 = vmul.f32 %v464_v57, %v173_v15  ;;  %v287_v42 = vadd.f32 %v720_v33, %v273_v34 }
 0x121   :  { %v301_v31 = vpack.c.bf16 %v296_v25, %v295_v37  ;;  %v194_v32 = vmul.f32 %v466_v10, %v193_v50  ;;  %v300_v46 = vpack.c.bf16 %v294_v39, %v293_v43  ;;  %v289_v52 = vadd.f32 %v720_v33, %v275_v4 }
 0x122   :  { %v178_v30 = vsel %vm177_vm14, %v464_v57, %v174_v28 }
 0x123   :  { %v260_v5 = vmul.f32 %v178_v30, %v599_v6  ;;  %408 = vmatmul.msk.bf16.vlgmr.msra.gmra.mxu3 %vm41_vm0, %v301_v31  ;;  %v198_v38 = vsel %vm197_vm1, %v466_v10, %v194_v32 }
 0x124   :  { %v262_v41 = vmul.f32 %v198_v38, %v611_v14 }
 0x125   :  { %v274_v36 = vmul.f32 %v688_v24, %v260_v5 }
 0x126   :  { %v276_v44 = vmul.f32 %v688_v24, %v262_v41 }
 0x127   :  { %v288_v6 = vadd.f32 %v720_v33, %v274_v36 }
 0x128   :  { %v290_v47 = vadd.f32 %v720_v33, %v276_v44 }
 0x129   :  { %v297_v45 = vpack.c.bf16 %v288_v6, %v287_v42 }
 0x12a   :  { %v298_v14 = vpack.c.bf16 %v290_v47, %v289_v52 }
 0x12b   :  { %404 = vmatmul.msk.bf16.vlgmr.msra.gmra.mxu0 %vm41_vm0, %v297_v45  ;;  %407 = vmatmul.msk.bf16.gmra.mxu2 %vm41_vm0, %v300_v46 }
 0x12c   :  { %405 = vmatmul.msk.bf16.vlgmr.msra.gmra.mxu1 %vm41_vm0, %v298_v14 }
 0x19e   :  { %v356_v51 = vpop.f32.mrf.mxu2 }
 0x19f   :  { %v357_v53 = vadd.f32 %v444_v48, %v356_v51 }
 0x1a1   :  { %v375_v24 = vpack.c.bf16 %v357_v53, %v357_v53 }
 0x1a3   :  { %386 = vst.msk [vmem:[%s842_s5 + $0x10] sm:$0xf] %vm381_vm2, %v375_v24 }
 0x1a6   :  { %v358_v33 = vpop.f32.mrf.mxu2  ;;  %v366_v54 = vpop.f32.mrf.mxu3 }
 0x1a7   :  { %v359_v55 = vadd.f32 %v444_v48, %v358_v33  ;;  %v367_v56 = vadd.f32 %v444_v48, %v366_v54 }
 0x1a8   :  { %v346_v57 = vpop.f32.mrf.mxu0 }
 0x1a9   :  { %v376_v59 = vpack.c.bf16 %v359_v55, %v359_v55  ;;  %v379_v62 = vpack.c.bf16 %v367_v56, %v367_v56  ;;  %v347_v1 = vadd.f32 %v444_v48, %v346_v57  ;;  %v351_v49 = vpop.f32.mrf.mxu1 }
 0x1aa   :  { %v352_v0 = vadd.f32 %v444_v48, %v351_v49 }
 0x1ab   :  { %387 = vst.msk [vmem:[%s842_s5 + $0x14] sm:$0xf] %vm381_vm2, %v376_v59  ;;  %v371_v2 = vpack.c.bf16 %v347_v1, %v347_v1 }
 0x1ac   :  { %390 = vst.msk [vmem:[%s842_s5 + $0x20] sm:$0xf] %vm381_vm2, %v379_v62  ;;  %v373_v7 = vpack.c.bf16 %v352_v0, %v352_v0 }
 0x1ad   :  { %382 = vst.msk [vmem:[%s842_s5] sm:$0xf] %vm381_vm2, %v371_v2 }
 0x1ae   :  { %v361_v8 = vpop.f32.mrf.mxu2  ;;  %v368_v9 = vpop.f32.mrf.mxu3  ;;  %384 = vst.msk [vmem:[%s842_s5 + $0x8] sm:$0xf] %vm381_vm2, %v373_v7 }
 0x1af   :  { %v362_v40 = vadd.f32 %v444_v48, %v361_v8  ;;  %v369_v10 = vadd.f32 %v444_v48, %v368_v9 }
 0x1b0   :  { %v348_v11 = vpop.f32.mrf.mxu0 }
 0x1b1   :  { %v377_v12 = vpack.c.bf16 %v362_v40, %v362_v40  ;;  %v380_v13 = vpack.c.bf16 %v369_v10, %v369_v10  ;;  %v349_v16 = vadd.f32 %v444_v48, %v348_v11  ;;  %v353_v61 = vpop.f32.mrf.mxu1 }
 0x1b2   :  { %v354_v60 = vadd.f32 %v444_v48, %v353_v61 }
 0x1b3   :  { %388 = vst.msk [vmem:[%s842_s5 + $0x18] sm:$0xf] %vm381_vm2, %v377_v12  ;;  %v372_v17 = vpack.c.bf16 %v349_v16, %v349_v16 }
 0x1b4   :  { %391 = vst.msk [vmem:[%s842_s5 + $0x24] sm:$0xf] %vm381_vm2, %v380_v13  ;;  %v374_v18 = vpack.c.bf16 %v354_v60, %v354_v60 }
 0x1b5   :  { %383 = vst.msk [vmem:[%s842_s5 + $0x4] sm:$0xf] %vm381_vm2, %v372_v17 }
 0x1b6   :  { %v363_v19 = vpop.f32.mrf.mxu2  ;;  %385 = vst.msk [vmem:[%s842_s5 + $0xc] sm:$0xf] %vm381_vm2, %v374_v18 }
 0x1b7   :  { %v364_v20 = vadd.f32 %v444_v48, %v363_v19 }
 0x1b9   :  { %v378_v58 = vpack.c.bf16 %v364_v20, %v364_v20 }
 0x1bb   :  { %389 = vst.msk [vmem:[%s842_s5 + $0x1c] sm:$0xf] %vm381_vm2, %v378_v58 }

// kernel: run.11
= control target key start
LH: loop header
LB: loop body
LE: loop exit
PB: predicated region body
PF: predicated region fallthrough
CT: control target
= control target key end

     0   :  { %vm73_vm0 = vcmask 261120   ;;  %vm163_vm1 = vcmask 257024   ;;  %s353_s1 = inlined_call_operand.vmem [shape: bf16[32,32], index: 1, kind: input, shape index: {}]   ;;  %s354_s2 = inlined_call_operand.vmem [shape: f32[1,32], index: 2, kind: input, shape index: {}]   ;;  %s355_s0 = inlined_call_operand.vmem [shape: bf16[80,32], index: 0, kind: input, shape index: {}]   ;;  %s356_s3 = inlined_call_operand.vmem [shape: bf16[80,32], index: 3, kind: input, shape index: {}]   ;;  %s357_s4 = inlined_call_operand.vmem [shape: bf16[80,32], index: 4, kind: output, shape index: {}]  }
   0x1   :  { %v217_v0 = vld [vmem:[%s353_s1 + $0x8] sm:$0xff]  ;;  %v216_v1 = vld [vmem:[%s353_s1] sm:$0xff]  ;;  %v213_v2 = vld [vmem:[%s355_s0 + $0x10] sm:$0xff] }
   0x2   :  { %243 = vmatpush.bf16.msra.mxu2 %v217_v0  ;;  %244 = vmatpush.bf16.msra.mxu3 %v217_v0  ;;  %v215_v3 = vld [vmem:[%s355_s0 + $0x20] sm:$0xff]  ;;  %v212_v5 = vld [vmem:[%s355_s0 + $0x8] sm:$0xff]  ;;  %v214_v6 = vld [vmem:[%s355_s0 + $0x18] sm:$0xff] }
   0x3   :  { %95 = vmatpush.bf16.msra.mxu0 %v217_v0  ;;  %242 = vmatpush.bf16.msra.mxu1 %v217_v0  ;;  %v211_v4 = vld [vmem:[%s355_s0] sm:$0xff]  ;;  %v238_v8 = vld [vmem:[%s356_s3 + $0x8] sm:$0xff]   ;;  %v239_v14 = vld [vmem:[%s356_s3 + $0x10] sm:$0xff]  }
   0x4   :  { %v219_v7 = vld [vmem:[%s356_s3] sm:$0xff]   ;;  %v224_v11 = vunpack.c.l.bf16 %v238_v8  ;;  %v228_v20 = vunpack.c.l.bf16 %v239_v14  ;;  %v225_v29 = vunpack.c.h.bf16 %v238_v8  ;;  %v229_v40 = vunpack.c.h.bf16 %v239_v14  ;;  %v240_v50 = vld [vmem:[%s356_s3 + $0x18] sm:$0xff]  }
   0x5   :  { %v248_v9 = vld [vmem:[%s354_s2] ss:$0 sm:$0xff]  ;;  %v220_v10 = vunpack.c.l.bf16 %v219_v7  ;;  %v221_v28 = vunpack.c.h.bf16 %v219_v7  ;;  %v232_v53 = vunpack.c.l.bf16 %v240_v50  ;;  %v233_v58 = vunpack.c.h.bf16 %v240_v50 }
   0x6   :  { %246 = vmatpush.bf16.msra.mxu2 %v216_v1  ;;  %247 = vmatpush.bf16.msra.mxu3 %v216_v1  ;;  %v241_v17 = vld [vmem:[%s356_s3 + $0x20] sm:$0xff]  }
   0x7   :  { %96 = vmatpush.bf16.msra.mxu0 %v216_v1  ;;  %245 = vmatpush.bf16.msra.mxu1 %v216_v1  ;;  %v236_v21 = vunpack.c.l.bf16 %v241_v17  ;;  %v237_v41 = vunpack.c.h.bf16 %v241_v17 }
   0x9   :  { %208 = vmatmul.msk.bf16.vlgmr.msra.gmra.mxu2 %vm73_vm0, %v213_v2  ;;  %210 = vmatmul.msk.bf16.vlgmr.msra.gmra.mxu3 %vm73_vm0, %v215_v3 }
   0xa   :  { %206 = vmatmul.msk.bf16.vlgmr.msra.gmra.mxu0 %vm73_vm0, %v211_v4  ;;  %207 = vmatmul.msk.bf16.vlgmr.msra.gmra.mxu1 %vm73_vm0, %v212_v5 }
  0x19   :  { %209 = vmatmul.msk.bf16.gmra.mxu2 %vm73_vm0, %v214_v6 }
  0x87   :  { %v98_v12 = vpop.f32.mrf.mxu0  ;;  %v103_v13 = vpop.f32.mrf.mxu1 }
  0x88   :  { %v99_v15 = vadd.f32 %v248_v9, %v98_v12  ;;  %v104_v16 = vadd.f32 %v248_v9, %v103_v13 }
  0x8a   :  { %v143_v18 = vadd.f32 %v220_v10, %v99_v15  ;;  %v145_v19 = vadd.f32 %v224_v11, %v104_v16 }
  0x8c   :  { %v108_v22 = vpop.f32.mrf.mxu2  ;;  %v153_v23 = vpack.c.bf16 %v143_v18, %v143_v18  ;;  %v155_v24 = vpack.c.bf16 %v145_v19, %v145_v19  ;;  %v118_v25 = vpop.f32.mrf.mxu3 }
  0x8d   :  { %v109_v26 = vadd.f32 %v248_v9, %v108_v22  ;;  %v119_v27 = vadd.f32 %v248_v9, %v118_v25 }
  0x8e   :  { %164 = vst.msk [vmem:[%s357_s4] sm:$0xf] %vm163_vm1, %v153_v23 }
  0x8f   :  { %v147_v30 = vadd.f32 %v228_v20, %v109_v26  ;;  %166 = vst.msk [vmem:[%s357_s4 + $0x8] sm:$0xf] %vm163_vm1, %v155_v24  ;;  %v151_v31 = vadd.f32 %v236_v21, %v119_v27  ;;  %v100_v32 = vpop.f32.mrf.mxu0  ;;  %v105_v33 = vpop.f32.mrf.mxu1 }
  0x90   :  { %v101_v34 = vadd.f32 %v248_v9, %v100_v32  ;;  %v106_v35 = vadd.f32 %v248_v9, %v105_v33 }
  0x91   :  { %v157_v36 = vpack.c.bf16 %v147_v30, %v147_v30  ;;  %v161_v37 = vpack.c.bf16 %v151_v31, %v151_v31 }
  0x92   :  { %v144_v38 = vadd.f32 %v221_v28, %v101_v34  ;;  %v146_v39 = vadd.f32 %v225_v29, %v106_v35 }
  0x93   :  { %168 = vst.msk [vmem:[%s357_s4 + $0x10] sm:$0xf] %vm163_vm1, %v157_v36 }
  0x94   :  { %v110_v42 = vpop.f32.mrf.mxu2  ;;  %172 = vst.msk [vmem:[%s357_s4 + $0x20] sm:$0xf] %vm163_vm1, %v161_v37  ;;  %v154_v43 = vpack.c.bf16 %v144_v38, %v144_v38  ;;  %v156_v44 = vpack.c.bf16 %v146_v39, %v146_v39  ;;  %v120_v45 = vpop.f32.mrf.mxu3 }
  0x95   :  { %v111_v46 = vadd.f32 %v248_v9, %v110_v42  ;;  %v121_v47 = vadd.f32 %v248_v9, %v120_v45 }
  0x96   :  { %165 = vst.msk [vmem:[%s357_s4 + $0x4] sm:$0xf] %vm163_vm1, %v154_v43 }
  0x97   :  { %v148_v48 = vadd.f32 %v229_v40, %v111_v46  ;;  %167 = vst.msk [vmem:[%s357_s4 + $0xc] sm:$0xf] %vm163_vm1, %v156_v44  ;;  %v152_v49 = vadd.f32 %v237_v41, %v121_v47 }
  0x99   :  { %v158_v51 = vpack.c.bf16 %v148_v48, %v148_v48  ;;  %v162_v52 = vpack.c.bf16 %v152_v49, %v152_v49 }
  0x9b   :  { %169 = vst.msk [vmem:[%s357_s4 + $0x14] sm:$0xf] %vm163_vm1, %v158_v51 }
  0x9c   :  { %v113_v54 = vpop.f32.mrf.mxu2  ;;  %173 = vst.msk [vmem:[%s357_s4 + $0x24] sm:$0xf] %vm163_vm1, %v162_v52 }
  0x9d   :  { %v114_v55 = vadd.f32 %v248_v9, %v113_v54 }
  0x9f   :  { %v149_v56 = vadd.f32 %v232_v53, %v114_v55 }
  0xa1   :  { %v159_v57 = vpack.c.bf16 %v149_v56, %v149_v56 }
  0xa3   :  { %170 = vst.msk [vmem:[%s357_s4 + $0x18] sm:$0xf] %vm163_vm1, %v159_v57 }
  0xa4   :  { %v115_v59 = vpop.f32.mrf.mxu2 }
  0xa5   :  { %v116_v60 = vadd.f32 %v248_v9, %v115_v59 }
  0xa7   :  { %v150_v61 = vadd.f32 %v233_v58, %v116_v60 }
  0xa9   :  { %v160_v62 = vpack.c.bf16 %v150_v61, %v150_v61 }
  0xab   :  { %171 = vst.msk [vmem:[%s357_s4 + $0x1c] sm:$0xf] %vm163_vm1, %v160_v62 }

// kernel: run.13
= control target key start
LH: loop header
LB: loop body
LE: loop exit
PB: predicated region body
PF: predicated region fallthrough
CT: control target
= control target key end

     0   :  { %vm199_vm0 = vcmask 257024   ;;  %s450_s1 = inlined_call_operand.vmem [shape: bf16[128,32], index: 1, kind: input, shape index: {}]   ;;  %s451_s2 = inlined_call_operand.vmem [shape: f32[1,32], index: 2, kind: input, shape index: {}]   ;;  %s452_s0 = inlined_call_operand.vmem [shape: bf16[80,128], index: 0, kind: input, shape index: {}]   ;;  %s453_s3 = inlined_call_operand.vmem [shape: bf16[80,32], index: 3, kind: input, shape index: {}]   ;;  %s454_s4 = inlined_call_operand.vmem [shape: bf16[80,32], index: 4, kind: output, shape index: {}]  }
   0x1   :  { %v278_v0 = vld [vmem:[%s450_s1 + $0x38] sm:$0xff]  ;;  %v277_v1 = vld [vmem:[%s450_s1 + $0x30] sm:$0xff]  ;;  %v276_v2 = vld [vmem:[%s450_s1 + $0x28] sm:$0xff] }
   0x2   :  { %305 = vmatpush.bf16.msra.mxu3 %v278_v0  ;;  %304 = vmatpush.bf16.msra.mxu2 %v278_v0  ;;  %v275_v3 = vld [vmem:[%s450_s1 + $0x20] sm:$0xff]  ;;  %v274_v4 = vld [vmem:[%s450_s1 + $0x18] sm:$0xff]  ;;  %v273_v5 = vld [vmem:[%s450_s1 + $0x10] sm:$0xff] }
   0x3   :  { %125 = vmatpush.bf16.msra.mxu0 %v278_v0  ;;  %303 = vmatpush.bf16.msra.mxu1 %v278_v0  ;;  %v272_v6 = vld [vmem:[%s450_s1 + $0x8] sm:$0xff]  ;;  %v271_v7 = vld [vmem:[%s450_s1] sm:$0xff]  ;;  %v269_v8 = vld [vmem:[%s452_s0 + $0x18] sm:$0xff] }
   0x4   :  { %v268_v9 = vld [vmem:[%s452_s0 + $0x10] sm:$0xff]  ;;  %v266_v10 = vld [vmem:[%s452_s0] sm:$0xff]  ;;  %v267_v11 = vld [vmem:[%s452_s0 + $0x8] sm:$0xff] }
   0x5   :  { %v270_v12 = vld [vmem:[%s452_s0 + $0x20] sm:$0xff]  ;;  %v299_v14 = vld [vmem:[%s453_s3 + $0x8] sm:$0xff]   ;;  %v301_v20 = vld [vmem:[%s453_s3 + $0x18] sm:$0xff]  }
   0x6   :  { %308 = vmatpush.bf16.msra.mxu3 %v277_v1  ;;  %307 = vmatpush.bf16.msra.mxu2 %v277_v1  ;;  %v280_v13 = vld [vmem:[%s453_s3] sm:$0xff]   ;;  %v285_v17 = vunpack.c.l.bf16 %v299_v14  ;;  %v300_v23 = vld [vmem:[%s453_s3 + $0x10] sm:$0xff]   ;;  %v293_v26 = vunpack.c.l.bf16 %v301_v20  ;;  %v286_v35 = vunpack.c.h.bf16 %v299_v14  ;;  %v294_v46 = vunpack.c.h.bf16 %v301_v20 }
   0x7   :  { %126 = vmatpush.bf16.msra.mxu0 %v277_v1  ;;  %306 = vmatpush.bf16.msra.mxu1 %v277_v1  ;;  %v327_v15 = vld [vmem:[%s451_s2] ss:$0 sm:$0xff]  ;;  %v281_v16 = vunpack.c.l.bf16 %v280_v13  ;;  %v289_v27 = vunpack.c.l.bf16 %v300_v23  ;;  %v282_v34 = vunpack.c.h.bf16 %v280_v13  ;;  %v290_v47 = vunpack.c.h.bf16 %v300_v23 }
   0x8   :  { %v302_v56 = vld [vmem:[%s453_s3 + $0x20] sm:$0xff]  }
   0x9   :  { %v297_v59 = vunpack.c.l.bf16 %v302_v56  ;;  %v298_v0 = vunpack.c.h.bf16 %v302_v56 }
   0xa   :  { %311 = vmatpush.bf16.msra.mxu3 %v276_v2  ;;  %310 = vmatpush.bf16.msra.mxu2 %v276_v2 }
   0xb   :  { %127 = vmatpush.bf16.msra.mxu0 %v276_v2  ;;  %309 = vmatpush.bf16.msra.mxu1 %v276_v2 }
   0xe   :  { %314 = vmatpush.bf16.msra.mxu3 %v275_v3  ;;  %313 = vmatpush.bf16.msra.mxu2 %v275_v3 }
   0xf   :  { %128 = vmatpush.bf16.msra.mxu0 %v275_v3  ;;  %312 = vmatpush.bf16.msra.mxu1 %v275_v3 }
  0x12   :  { %317 = vmatpush.bf16.msra.mxu3 %v274_v4  ;;  %316 = vmatpush.bf16.msra.mxu2 %v274_v4 }
  0x13   :  { %129 = vmatpush.bf16.msra.mxu0 %v274_v4  ;;  %315 = vmatpush.bf16.msra.mxu1 %v274_v4 }
  0x16   :  { %320 = vmatpush.bf16.msra.mxu3 %v273_v5  ;;  %319 = vmatpush.bf16.msra.mxu2 %v273_v5 }
  0x17   :  { %130 = vmatpush.bf16.msra.mxu0 %v273_v5  ;;  %318 = vmatpush.bf16.msra.mxu1 %v273_v5 }
  0x1a   :  { %323 = vmatpush.bf16.msra.mxu3 %v272_v6  ;;  %322 = vmatpush.bf16.msra.mxu2 %v272_v6 }
  0x1b   :  { %131 = vmatpush.bf16.msra.mxu0 %v272_v6  ;;  %321 = vmatpush.bf16.msra.mxu1 %v272_v6 }
  0x1e   :  { %326 = vmatpush.bf16.msra.mxu3 %v271_v7  ;;  %325 = vmatpush.bf16.msra.mxu2 %v271_v7 }
  0x1f   :  { %132 = vmatpush.bf16.msra.mxu0 %v271_v7  ;;  %324 = vmatpush.bf16.msra.mxu1 %v271_v7 }
  0x21   :  { %148 = vmatmul.bf16.vlgmr.msra.gmra.mxu3 %v269_v8  ;;  %143 = vmatmul.bf16.vlgmr.msra.gmra.mxu2 %v268_v9 }
  0x22   :  { %133 = vmatmul.bf16.vlgmr.msra.gmra.mxu0 %v266_v10  ;;  %138 = vmatmul.bf16.vlgmr.msra.gmra.mxu1 %v267_v11 }
  0x31   :  { %153 = vmatmul.bf16.gmra.mxu3 %v270_v12 }
  0x9f   :  { %v134_v18 = vpop.f32.mrf.mxu0  ;;  %v139_v19 = vpop.f32.mrf.mxu1 }
  0xa0   :  { %v135_v21 = vadd.f32 %v327_v15, %v134_v18  ;;  %v140_v22 = vadd.f32 %v327_v15, %v139_v19 }
  0xa2   :  { %v179_v24 = vadd.f32 %v281_v16, %v135_v21  ;;  %v181_v25 = vadd.f32 %v285_v17, %v140_v22 }
  0xa4   :  { %v149_v28 = vpop.f32.mrf.mxu3  ;;  %v189_v29 = vpack.c.bf16 %v179_v24, %v179_v24  ;;  %v191_v30 = vpack.c.bf16 %v181_v25, %v181_v25  ;;  %v144_v31 = vpop.f32.mrf.mxu2 }
  0xa5   :  { %v150_v32 = vadd.f32 %v327_v15, %v149_v28  ;;  %v145_v33 = vadd.f32 %v327_v15, %v144_v31 }
  0xa6   :  { %200 = vst.msk [vmem:[%s454_s4] sm:$0xf] %vm199_vm0, %v189_v29 }
  0xa7   :  { %v185_v36 = vadd.f32 %v293_v26, %v150_v32  ;;  %202 = vst.msk [vmem:[%s454_s4 + $0x8] sm:$0xf] %vm199_vm0, %v191_v30  ;;  %v183_v37 = vadd.f32 %v289_v27, %v145_v33  ;;  %v136_v38 = vpop.f32.mrf.mxu0  ;;  %v141_v39 = vpop.f32.mrf.mxu1 }
  0xa8   :  { %v137_v40 = vadd.f32 %v327_v15, %v136_v38  ;;  %v142_v41 = vadd.f32 %v327_v15, %v141_v39 }
  0xa9   :  { %v195_v42 = vpack.c.bf16 %v185_v36, %v185_v36  ;;  %v193_v43 = vpack.c.bf16 %v183_v37, %v183_v37 }
  0xaa   :  { %v180_v44 = vadd.f32 %v282_v34, %v137_v40  ;;  %v182_v45 = vadd.f32 %v286_v35, %v142_v41 }
  0xab   :  { %206 = vst.msk [vmem:[%s454_s4 + $0x18] sm:$0xf] %vm199_vm0, %v195_v42 }
  0xac   :  { %204 = vst.msk [vmem:[%s454_s4 + $0x10] sm:$0xf] %vm199_vm0, %v193_v43  ;;  %v151_v48 = vpop.f32.mrf.mxu3  ;;  %v190_v49 = vpack.c.bf16 %v180_v44, %v180_v44  ;;  %v192_v50 = vpack.c.bf16 %v182_v45, %v182_v45  ;;  %v146_v51 = vpop.f32.mrf.mxu2 }
  0xad   :  { %v152_v52 = vadd.f32 %v327_v15, %v151_v48  ;;  %v147_v53 = vadd.f32 %v327_v15, %v146_v51 }
  0xae   :  { %201 = vst.msk [vmem:[%s454_s4 + $0x4] sm:$0xf] %vm199_vm0, %v190_v49 }
  0xaf   :  { %v186_v54 = vadd.f32 %v294_v46, %v152_v52  ;;  %203 = vst.msk [vmem:[%s454_s4 + $0xc] sm:$0xf] %vm199_vm0, %v192_v50  ;;  %v184_v55 = vadd.f32 %v290_v47, %v147_v53 }
  0xb1   :  { %v196_v57 = vpack.c.bf16 %v186_v54, %v186_v54  ;;  %v194_v58 = vpack.c.bf16 %v184_v55, %v184_v55 }
  0xb3   :  { %207 = vst.msk [vmem:[%s454_s4 + $0x1c] sm:$0xf] %vm199_vm0, %v196_v57 }
  0xb4   :  { %205 = vst.msk [vmem:[%s454_s4 + $0x14] sm:$0xf] %vm199_vm0, %v194_v58  ;;  %v154_v60 = vpop.f32.mrf.mxu3 }
  0xb5   :  { %v155_v61 = vadd.f32 %v327_v15, %v154_v60 }
  0xb7   :  { %v187_v62 = vadd.f32 %v297_v59, %v155_v61 }
  0xb9   :  { %v197_v63 = vpack.c.bf16 %v187_v62, %v187_v62 }
  0xbb   :  { %208 = vst.msk [vmem:[%s454_s4 + $0x20] sm:$0xf] %vm199_vm0, %v197_v63 }
  0xbc   :  { %v156_v1 = vpop.f32.mrf.mxu3 }
  0xbd   :  { %v157_v2 = vadd.f32 %v327_v15, %v156_v1 }
  0xbf   :  { %v188_v3 = vadd.f32 %v298_v0, %v157_v2 }
  0xc1   :  { %v198_v4 = vpack.c.bf16 %v188_v3, %v188_v3 }
  0xc3   :  { %209 = vst.msk [vmem:[%s454_s4 + $0x24] sm:$0xf] %vm199_vm0, %v198_v4 }

// kernel: run.12
= control target key start
LH: loop header
LB: loop body
LE: loop exit
PB: predicated region body
PF: predicated region fallthrough
CT: control target
= control target key end

     0   :  { %vm41_vm0 = vcmask 261120   ;;  %v755_v25 = vmov 32.0   ;;  %s1276_s0 = inlined_call_operand.vmem [shape: bf16[80,32], index: 0, kind: input, shape index: {}]   ;;  %s1277_s1 = inlined_call_operand.vmem [shape: f32[1,32], index: 1, kind: input, shape index: {}]   ;;  %s1278_s2 = inlined_call_operand.vmem [shape: f32[1,32], index: 2, kind: input, shape index: {}]   ;;  %s1279_s4 = inlined_call_operand.vmem [shape: f32[1,128], index: 4, kind: input, shape index: {}]   ;;  %s1280_s3 = inlined_call_operand.vmem [shape: bf16[32,128], index: 3, kind: input, shape index: {}]   ;;  %s1281_s5 = inlined_call_operand.vmem [shape: bf16[80,128], index: 5, kind: output, shape index: {}]  }
   0x1   :  { %v789_v0 = vld [vmem:[%s1276_s0 + $0x20] sm:$0xff]   ;;  %v794_v1 = vld [vmem:[%s1276_s0 + $0x18] sm:$0xff]   ;;  %v799_v2 = vld [vmem:[%s1276_s0 + $0x10] sm:$0xff]   ;;  %693 = vrcp.f32 %v755_v25 }
   0x2   :  { %v648_v3 = vunpack.c.l.bf16 %v789_v0  ;;  %v644_v4 = vunpack.c.l.bf16 %v794_v1  ;;  %v640_v5 = vunpack.c.l.bf16 %v799_v2  ;;  %v649_v9 = vunpack.c.h.bf16 %v789_v0  ;;  %v818_v15 = vld [vmem:[%s1276_s0 + $0x8] sm:$0xff]   ;;  %v823_v16 = vld [vmem:[%s1276_s0] sm:$0xff]  }
   0x3   :  { %v645_v10 = vunpack.c.h.bf16 %v794_v1  ;;  %v641_v11 = vunpack.c.h.bf16 %v799_v2  ;;  %v636_v17 = vunpack.c.l.bf16 %v818_v15  ;;  %v633_v18 = vunpack.c.h.bf16 %v823_v16  ;;  %v628_v25 = vld [vmem:[%s1280_s3] sm:$0xff] }
   0x4   :  { %v66_v6 = vsel %vm41_vm0, %v648_v3, 0.0  ;;  %v60_v7 = vsel %vm41_vm0, %v644_v4, 0.0  ;;  %v54_v8 = vsel %vm41_vm0, %v640_v5, 0.0  ;;  %v69_v12 = vsel %vm41_vm0, %v649_v9, 0.0 }
   0x5   :  { %67 = vadd.xlane.f32.xlu2 %v66_v6  ;;  %61 = vadd.xlane.f32.xlu1 %v60_v7  ;;  %v63_v13 = vsel %vm41_vm0, %v645_v10, 0.0  ;;  %v57_v14 = vsel %vm41_vm0, %v641_v11, 0.0  ;;  %v632_v19 = vunpack.c.l.bf16 %v823_v16  ;;  %v48_v20 = vsel %vm41_vm0, %v636_v17, 0.0 }
   0x6   :  { %55 = vadd.xlane.f32.xlu0 %v54_v8  ;;  %v45_v21 = vsel %vm41_vm0, %v633_v18, 0.0  ;;  %v637_v23 = vunpack.c.h.bf16 %v818_v15  ;;  %v629_v15 = vld [vmem:[%s1280_s3 + $0x8] sm:$0xff] }
   0x7   :  { %v42_v22 = vsel %vm41_vm0, %v632_v19, 0.0  ;;  %v694_v26 = vpop.eup %693  ;;  %684 = vmatpush.bf16.msra.mxu2 %v629_v15  ;;  %685 = vmatpush.bf16.msra.mxu3 %v629_v15 }
   0x8   :  { %v51_v24 = vsel %vm41_vm0, %v637_v23, 0.0  ;;  %v73_v27 = vmul.f32 32.0, %v694_v26  ;;  %vm77_vm1 = vweird.f32 %v694_v26  ;;  %343 = vmatpush.bf16.msra.mxu0 %v629_v15  ;;  %683 = vmatpush.bf16.msra.mxu1 %v629_v15 }
   0xa   :  { %v74_v28 = vsub.f32 1.0, %v73_v27 }
   0xb   :  { %687 = vmatpush.bf16.msra.mxu2 %v628_v25  ;;  %688 = vmatpush.bf16.msra.mxu3 %v628_v25 }
   0xc   :  { %v75_v29 = vmul.f32 %v694_v26, %v74_v28  ;;  %344 = vmatpush.bf16.msra.mxu0 %v628_v25  ;;  %686 = vmatpush.bf16.msra.mxu1 %v628_v25 }
   0xd   :  { %70 = vadd.xlane.f32.xlu2 %v69_v12  ;;  %64 = vadd.xlane.f32.xlu1 %v63_v13 }
   0xe   :  { %58 = vadd.xlane.f32.xlu0 %v57_v14  ;;  %v76_v30 = vadd.f32 %v694_v26, %v75_v29 }
  0x10   :  { %v837_v31 = vsel %vm77_vm1, %v694_v26, %v76_v30 }
  0x15   :  { %49 = vadd.xlane.f32.xlu2 %v48_v20  ;;  %46 = vadd.xlane.f32.xlu1 %v45_v21 }
  0x16   :  { %43 = vadd.xlane.f32.xlu0 %v42_v22 }
  0x1e   :  { %52 = vadd.xlane.f32.xlu0 %v51_v24 }
  0x78   :  { %v68_v32 = vpop.xlane.xlu2 %67  ;;  %v62_v33 = vpop.xlane.xlu1 %61 }
  0x79   :  { %v85_v34 = vmul.f32 %v837_v31, %v62_v33  ;;  %v56_v35 = vpop.xlane.xlu0 %55  ;;  %v87_v51 = vmul.f32 %v837_v31, %v68_v32 }
  0x7a   :  { %v83_v36 = vmul.f32 %v837_v31, %v56_v35 }
  0x7b   :  { %v841_v37 = vsub.f32 %v644_v4, %v85_v34  ;;  %v871_v58 = vsub.f32 %v648_v3, %v87_v51 }
  0x7c   :  { %v843_v38 = vsub.f32 %v640_v5, %v83_v36 }
  0x7d   :  { %v105_v39 = vmul.f32 %v841_v37, %v841_v37  ;;  %v107_v0 = vmul.f32 %v871_v58, %v871_v58 }
  0x7e   :  { %v103_v40 = vmul.f32 %v843_v38, %v843_v38 }
  0x7f   :  { %v127_v41 = vsel %vm41_vm0, %v105_v39, 0.0 }
  0x80   :  { %v71_v42 = vpop.xlane.xlu2 %70  ;;  %v65_v43 = vpop.xlane.xlu1 %64  ;;  %v121_v44 = vsel %vm41_vm0, %v103_v40, 0.0  ;;  %128 = vadd.xlane.f32.xlu0 %v127_v41 }
  0x81   :  { %v88_v45 = vmul.f32 %v837_v31, %v71_v42  ;;  %v86_v46 = vmul.f32 %v837_v31, %v65_v43  ;;  %v59_v47 = vpop.xlane.xlu0 %58  ;;  %122 = vadd.xlane.f32.xlu1 %v121_v44 }
  0x82   :  { %v84_v48 = vmul.f32 %v837_v31, %v59_v47 }
  0x83   :  { %v854_v49 = vsub.f32 %v649_v9, %v88_v45  ;;  %v856_v50 = vsub.f32 %v645_v10, %v86_v46  ;;  %v133_v9 = vsel %vm41_vm0, %v107_v0, 0.0 }
  0x84   :  { %v859_v52 = vsub.f32 %v641_v11, %v84_v48 }
  0x85   :  { %v106_v53 = vmul.f32 %v856_v50, %v856_v50  ;;  %v108_v54 = vmul.f32 %v854_v49, %v854_v49 }
  0x86   :  { %v104_v55 = vmul.f32 %v859_v52, %v859_v52 }
  0x87   :  { %v130_v56 = vsel %vm41_vm0, %v106_v53, 0.0  ;;  %v136_v57 = vsel %vm41_vm0, %v108_v54, 0.0 }
  0x88   :  { %v124_v59 = vsel %vm41_vm0, %v104_v55, 0.0  ;;  %v50_v60 = vpop.xlane.xlu2 %49  ;;  %137 = vadd.xlane.f32.xlu0 %v136_v57  ;;  %v47_v61 = vpop.xlane.xlu1 %46 }
  0x89   :  { %125 = vadd.xlane.f32.xlu2 %v124_v59  ;;  %v81_v62 = vmul.f32 %v837_v31, %v50_v60  ;;  %131 = vadd.xlane.f32.xlu1 %v130_v56  ;;  %v44_v63 = vpop.xlane.xlu0 %43  ;;  %v80_v2 = vmul.f32 %v837_v31, %v47_v61 }
  0x8a   :  { %v79_v1 = vmul.f32 %v837_v31, %v44_v63 }
  0x8b   :  { %v877_v4 = vsub.f32 %v636_v17, %v81_v62  ;;  %v887_v6 = vsub.f32 %v633_v18, %v80_v2 }
  0x8c   :  { %v879_v5 = vsub.f32 %v632_v19, %v79_v1 }
  0x8d   :  { %v101_v3 = vmul.f32 %v877_v4, %v877_v4  ;;  %v100_v13 = vmul.f32 %v887_v6, %v887_v6 }
  0x8e   :  { %v99_v7 = vmul.f32 %v879_v5, %v879_v5 }
  0x8f   :  { %v115_v8 = vsel %vm41_vm0, %v101_v3, 0.0  ;;  %v112_v16 = vsel %vm41_vm0, %v100_v13, 0.0 }
  0x90   :  { %116 = vadd.xlane.f32.xlu0 %v115_v8  ;;  %v109_v10 = vsel %vm41_vm0, %v99_v7, 0.0 }
  0x91   :  { %134 = vadd.xlane.f32.xlu2 %v133_v9  ;;  %110 = vadd.xlane.f32.xlu1 %v109_v10  ;;  %v53_v11 = vpop.xlane.xlu0 %52 }
  0x92   :  { %v82_v12 = vmul.f32 %v837_v31, %v53_v11 }
  0x94   :  { %v899_v14 = vsub.f32 %v637_v23, %v82_v12 }
  0x96   :  { %v102_v17 = vmul.f32 %v899_v14, %v899_v14 }
  0x98   :  { %v118_v18 = vsel %vm41_vm0, %v102_v17, 0.0 }
  0x99   :  { %113 = vadd.xlane.f32.xlu2 %v112_v16  ;;  %119 = vadd.xlane.f32.xlu1 %v118_v18 }
  0xf3   :  { %v129_v19 = vpop.xlane.xlu0 %128 }
  0xf4   :  { %v123_v20 = vpop.xlane.xlu1 %122  ;;  %v145_v21 = vmul.f32 %v129_v19, %v837_v31 }
  0xf5   :  { %v143_v22 = vmul.f32 %v123_v20, %v837_v31 }
  0xf6   :  { %v907_v24 = vadd.f32 1e-05, %v145_v21 }
  0xf7   :  { %v153_v23 = vadd.f32 1e-05, %v143_v22 }
  0xf8   :  { %695 = vrsqrt.f32 %v907_v24  ;;  %vm225_vm8 = vweird.f32 %v907_v24 }
  0xf9   :  { %697 = vrsqrt.f32 %v153_v23  ;;  %vm205_vm3 = vweird.f32 %v153_v23 }
  0xfb   :  { %v138_v26 = vpop.xlane.xlu0 %137 }
  0xfc   :  { %v126_v27 = vpop.xlane.xlu2 %125  ;;  %v132_v28 = vpop.xlane.xlu1 %131  ;;  %v148_v29 = vmul.f32 %v138_v26, %v837_v31 }
  0xfd   :  { %v144_v30 = vmul.f32 %v126_v27, %v837_v31  ;;  %v146_v32 = vmul.f32 %v132_v28, %v837_v31 }
  0xfe   :  { %v919_v33 = vpop.eup %695  ;;  %v158_v34 = vadd.f32 1e-05, %v148_v29 }
  0xff   :  { %v698_v35 = vpop.eup %697  ;;  %v220_v36 = vmul.f32 %v919_v33, %v907_v24  ;;  %v154_v39 = vadd.f32 1e-05, %v144_v30  ;;  %v923_v40 = vadd.f32 1e-05, %v146_v32  ;;  %vm226_vm9 = vweird.f32 %v919_v33  ;;  %v976_v24 = vld [vmem:[%s1277_s1] ss:$0 sm:$0xff] }
 0x100   :  { %v200_v41 = vmul.f32 %v698_v35, %v153_v23  ;;  %699 = vrsqrt.f32 %v158_v34  ;;  %vm206_vm2 = vweird.f32 %v698_v35  ;;  %vm255_vm5 = vweird.f32 %v158_v34  ;;  %vm983_vm13 = vmor %vm225_vm8, %vm226_vm9 }
 0x101   :  { %701 = vrsqrt.f32 %v154_v39  ;;  %v221_v43 = vmul.f32 %v919_v33, %v220_v36  ;;  %vm946_vm4 = vmor %vm205_vm3, %vm206_vm2  ;;  %vm215_vm10 = vweird.f32 %v154_v39  ;;  %vm235_vm14 = vweird.f32 %v923_v40 }
 0x102   :  { %v201_v42 = vmul.f32 %v698_v35, %v200_v41  ;;  %703 = vrsqrt.f32 %v923_v40 }
 0x103   :  { %v117_v44 = vpop.xlane.xlu0 %116  ;;  %v222_v57 = vmul.f32 0.5, %v221_v43 }
 0x104   :  { %v202_v45 = vmul.f32 0.5, %v201_v42  ;;  %v135_v46 = vpop.xlane.xlu2 %134  ;;  %v111_v47 = vpop.xlane.xlu1 %110  ;;  %v141_v53 = vmul.f32 %v117_v44, %v837_v31 }
 0x105   :  { %v147_v48 = vmul.f32 %v135_v46, %v837_v31  ;;  %v139_v51 = vmul.f32 %v111_v47, %v837_v31  ;;  %v223_v8 = vsub.f32 1.5, %v222_v57 }
 0x106   :  { %v930_v54 = vpop.eup %699  ;;  %v203_v55 = vsub.f32 1.5, %v202_v45  ;;  %v942_v3 = vadd.f32 1e-05, %v141_v53 }
 0x107   :  { %v702_v56 = vpop.eup %701  ;;  %v250_v59 = vmul.f32 %v930_v54, %v158_v34  ;;  %v933_v60 = vadd.f32 1e-05, %v147_v48  ;;  %v937_v63 = vadd.f32 1e-05, %v139_v51  ;;  %vm256_vm6 = vweird.f32 %v930_v54 }
 0x108   :  { %v935_v61 = vpop.eup %703  ;;  %v210_v62 = vmul.f32 %v702_v56, %v154_v39  ;;  %v204_v1 = vmul.f32 %v698_v35, %v203_v55  ;;  %vm216_vm7 = vweird.f32 %v702_v56  ;;  %v958_v15 = vmul.f32 %v919_v33, %v223_v8  ;;  %vm969_vm11 = vmor %vm255_vm5, %vm256_vm6 }
 0x109   :  { %v230_v2 = vmul.f32 %v935_v61, %v923_v40  ;;  %v251_v0 = vmul.f32 %v930_v54, %v250_v59  ;;  %705 = vrsqrt.f32 %v933_v60  ;;  %vm217_vm12 = vmor %vm215_vm10, %vm216_vm7  ;;  %vm236_vm15 = vweird.f32 %v935_v61 }
 0x10a   :  { %v211_v7 = vmul.f32 %v702_v56, %v210_v62  ;;  %707 = vrsqrt.f32 %v937_v63  ;;  %v208_v17 = vsel %vm946_vm4, %v698_v35, %v204_v1  ;;  %v228_v39 = vsel %vm983_vm13, %v919_v33, %v958_v15  ;;  %v1008_v33 = vld [vmem:[%s1278_s2] ss:$0 sm:$0xff]  ;;  %vm1025_vm5 = vmor %vm235_vm14, %vm236_vm15 }
 0x10b   :  { %v231_v9 = vmul.f32 %v935_v61, %v230_v2  ;;  %v252_v10 = vmul.f32 0.5, %v251_v0  ;;  %709 = vrsqrt.f32 %v942_v3  ;;  %v263_v26 = vmul.f32 %v208_v17, %v843_v38 }
 0x10c   :  { %v212_v12 = vmul.f32 0.5, %v211_v7  ;;  %v114_v13 = vpop.xlane.xlu2 %113  ;;  %v120_v16 = vpop.xlane.xlu1 %119  ;;  %vm245_vm1 = vweird.f32 %v933_v60  ;;  %vm165_vm2 = vweird.f32 %v937_v63  ;;  %vm185_vm4 = vweird.f32 %v942_v3 }
 0x10d   :  { %v253_v18 = vsub.f32 1.5, %v252_v10  ;;  %v140_v19 = vmul.f32 %v114_v13, %v837_v31  ;;  %v232_v21 = vmul.f32 0.5, %v231_v9  ;;  %v142_v22 = vmul.f32 %v120_v16, %v837_v31 }
 0x10e   :  { %v213_v20 = vsub.f32 1.5, %v212_v12  ;;  %v277_v46 = vmul.f32 %v976_v24, %v263_v26 }
 0x10f   :  { %v962_v23 = vadd.f32 1e-05, %v140_v19  ;;  %v706_v25 = vpop.eup %705  ;;  %v254_v28 = vmul.f32 %v930_v54, %v253_v18  ;;  %v979_v38 = vadd.f32 1e-05, %v142_v22  ;;  %v233_v35 = vsub.f32 1.5, %v232_v21 }
 0x110   :  { %v214_v27 = vmul.f32 %v702_v56, %v213_v20  ;;  %v240_v29 = vmul.f32 %v706_v25, %v933_v60  ;;  %v981_v30 = vpop.eup %707  ;;  %vm246_vm3 = vweird.f32 %v706_v25  ;;  %v291_v62 = vadd.f32 %v1008_v33, %v277_v46 }
 0x111   :  { %711 = vrsqrt.f32 %v962_v23  ;;  %v989_v36 = vpop.eup %709  ;;  %v160_v43 = vmul.f32 %v981_v30, %v937_v63  ;;  %v258_v44 = vsel %vm969_vm11, %v930_v54, %v254_v28  ;;  %v234_v48 = vmul.f32 %v935_v61, %v233_v35  ;;  %vm247_vm7 = vmor %vm245_vm1, %vm246_vm3 }
 0x112   :  { %v218_v34 = vsel %vm217_vm12, %v702_v56, %v214_v27  ;;  %v241_v42 = vmul.f32 %v706_v25, %v240_v29  ;;  %v180_v45 = vmul.f32 %v989_v36, %v942_v3  ;;  %713 = vrsqrt.f32 %v979_v38 }
 0x113   :  { %v264_v41 = vmul.f32 %v218_v34, %v859_v52  ;;  %v161_v47 = vmul.f32 %v981_v30, %v160_v43  ;;  %v268_v54 = vmul.f32 %v258_v44, %v854_v49  ;;  %vm166_vm6 = vweird.f32 %v981_v30 }
 0x114   :  { %v242_v52 = vmul.f32 0.5, %v241_v42  ;;  %v181_v51 = vmul.f32 %v989_v36, %v180_v45  ;;  %v238_v8 = vsel %vm1025_vm5, %v935_v61, %v234_v48  ;;  %vm186_vm8 = vweird.f32 %v989_v36  ;;  %vm167_vm9 = vmor %vm165_vm2, %vm166_vm6  ;;  %v1085_v48 = vld [vmem:[%s1279_s4] ss:$0 sm:$0xff] }
 0x115   :  { %v278_v53 = vmul.f32 %v976_v24, %v264_v41  ;;  %v162_v56 = vmul.f32 0.5, %v161_v47  ;;  %v282_v16 = vmul.f32 %v976_v24, %v268_v54  ;;  %vm1048_vm10 = vmor %vm185_vm4, %vm186_vm8  ;;  %v266_v63 = vmul.f32 %v238_v8, %v856_v50 }
 0x116   :  { %v243_v55 = vsub.f32 1.5, %v242_v52  ;;  %v182_v59 = vmul.f32 0.5, %v181_v51  ;;  %vm175_vm11 = vweird.f32 %v962_v23  ;;  %vm195_vm13 = vweird.f32 %v979_v38 }
 0x117   :  { %v712_v57 = vpop.eup %711  ;;  %v292_v1 = vadd.f32 %v1008_v33, %v278_v53  ;;  %v163_v0 = vsub.f32 1.5, %v162_v56 }
 0x118   :  { %v244_v49 = vmul.f32 %v706_v25, %v243_v55  ;;  %v170_v7 = vmul.f32 %v712_v57, %v962_v23  ;;  %v183_v9 = vsub.f32 1.5, %v182_v59  ;;  %v714_v10 = vpop.eup %713  ;;  %vm176_vm12 = vweird.f32 %v712_v57 }
 0x119   :  { %v299_v40 = vpack.c.bf16 %v292_v1, %v291_v62  ;;  %v164_v12 = vmul.f32 %v981_v30, %v163_v0  ;;  %v190_v60 = vmul.f32 %v714_v10, %v979_v38  ;;  %vm177_vm14 = vmor %vm175_vm11, %vm176_vm12  ;;  %vm196_vm15 = vweird.f32 %v714_v10 }
 0x11a   :  { %v248_v11 = vsel %vm247_vm7, %v706_v25, %v244_v49  ;;  %v171_v13 = vmul.f32 %v712_v57, %v170_v7  ;;  %v184_v61 = vmul.f32 %v989_v36, %v183_v9  ;;  %v296_v25 = vadd.f32 %v1008_v33, %v282_v16  ;;  %vm197_vm1 = vmor %vm195_vm13, %vm196_vm15 }
 0x11b   :  { %v267_v17 = vmul.f32 %v248_v11, %v871_v58  ;;  %615 = vmatmul.msk.bf16.vlgmr.msra.gmra.mxu2 %vm41_vm0, %v299_v40  ;;  %v168_v18 = vsel %vm167_vm9, %v981_v30, %v164_v12  ;;  %v265_v58 = vmul.f32 %v228_v39, %v841_v37  ;;  %v191_v21 = vmul.f32 %v714_v10, %v190_v60 }
 0x11c   :  { %v172_v20 = vmul.f32 0.5, %v171_v13  ;;  %v259_v3 = vmul.f32 %v168_v18, %v879_v5  ;;  %v188_v26 = vsel %vm1048_vm10, %v989_v36, %v184_v61  ;;  %v280_v23 = vmul.f32 %v976_v24, %v266_v63 }
 0x11d   :  { %v281_v22 = vmul.f32 %v976_v24, %v267_v17  ;;  %v192_v27 = vmul.f32 0.5, %v191_v21  ;;  %v261_v29 = vmul.f32 %v188_v26, %v877_v4  ;;  %v279_v35 = vmul.f32 %v976_v24, %v265_v58 }
 0x11e   :  { %v173_v15 = vsub.f32 1.5, %v172_v20  ;;  %v273_v34 = vmul.f32 %v976_v24, %v259_v3  ;;  %v294_v39 = vadd.f32 %v1008_v33, %v280_v23 }
 0x11f   :  { %v295_v37 = vadd.f32 %v1008_v33, %v281_v22  ;;  %v193_v50 = vsub.f32 1.5, %v192_v27  ;;  %v275_v4 = vmul.f32 %v976_v24, %v261_v29  ;;  %v293_v43 = vadd.f32 %v1008_v33, %v279_v35 }
 0x120   :  { %v174_v28 = vmul.f32 %v712_v57, %v173_v15  ;;  %v287_v42 = vadd.f32 %v1008_v33, %v273_v34 }
 0x121   :  { %v301_v31 = vpack.c.bf16 %v296_v25, %v295_v37  ;;  %v194_v32 = vmul.f32 %v714_v10, %v193_v50  ;;  %v300_v46 = vpack.c.bf16 %v294_v39, %v293_v43  ;;  %v289_v52 = vadd.f32 %v1008_v33, %v275_v4 }
 0x122   :  { %v178_v30 = vsel %vm177_vm14, %v712_v57, %v174_v28 }
 0x123   :  { %v260_v5 = vmul.f32 %v178_v30, %v887_v6  ;;  %617 = vmatmul.msk.bf16.vlgmr.msra.gmra.mxu3 %vm41_vm0, %v301_v31  ;;  %v198_v38 = vsel %vm197_vm1, %v714_v10, %v194_v32 }
 0x124   :  { %v262_v41 = vmul.f32 %v198_v38, %v899_v14 }
 0x125   :  { %v274_v36 = vmul.f32 %v976_v24, %v260_v5 }
 0x126   :  { %v276_v44 = vmul.f32 %v976_v24, %v262_v41 }
 0x127   :  { %v288_v6 = vadd.f32 %v1008_v33, %v274_v36 }
 0x128   :  { %v290_v47 = vadd.f32 %v1008_v33, %v276_v44 }
 0x129   :  { %v297_v45 = vpack.c.bf16 %v288_v6, %v287_v42 }
 0x12a   :  { %v298_v14 = vpack.c.bf16 %v290_v47, %v289_v52 }
 0x12b   :  { %613 = vmatmul.msk.bf16.vlgmr.msra.gmra.mxu0 %vm41_vm0, %v297_v45  ;;  %616 = vmatmul.msk.bf16.gmra.mxu2 %vm41_vm0, %v300_v46 }
 0x12c   :  { %614 = vmatmul.msk.bf16.vlgmr.msra.gmra.mxu1 %vm41_vm0, %v298_v14 }
 0x19e   :  { %v356_v51 = vpop.f32.mrf.mxu2 }
 0x19f   :  { %v1088_v24 = vadd.f32 %v1085_v48, %v356_v51 }
 0x1a1   :  { %v622_v53 = vmul.f32 -1.702, %v1088_v24 }
 0x1a3   :  { %v399_v54 = vmul.f32 1.442695, %v622_v53 }
 0x1a5   :  { %715 = vpow2.f32 %v399_v54 }
 0x1a6   :  { %v358_v33 = vpop.f32.mrf.mxu2  ;;  %v366_v55 = vpop.f32.mrf.mxu3 }
 0x1a7   :  { %v1092_v56 = vadd.f32 %v1085_v48, %v358_v33  ;;  %v1095_v57 = vadd.f32 %v1085_v48, %v366_v55 }
 0x1a8   :  { %v346_v59 = vpop.f32.mrf.mxu0 }
 0x1a9   :  { %v623_v62 = vmul.f32 -1.702, %v1092_v56  ;;  %v626_v1 = vmul.f32 -1.702, %v1095_v57  ;;  %v1100_v2 = vadd.f32 %v1085_v48, %v346_v59  ;;  %v351_v9 = vpop.f32.mrf.mxu1 }
 0x1aa   :  { %v1106_v10 = vadd.f32 %v1085_v48, %v351_v9 }
 0x1ab   :  { %v716_v49 = vpop.eup %715  ;;  %v401_v0 = vmul.f32 1.442695, %v623_v62  ;;  %v407_v7 = vmul.f32 1.442695, %v626_v1  ;;  %v618_v8 = vmul.f32 -1.702, %v1100_v2 }
 0x1ac   :  { %v1103_v40 = vadd.f32 1.0, %v716_v49  ;;  %v620_v13 = vmul.f32 -1.702, %v1106_v10 }
 0x1ad   :  { %717 = vpow2.f32 %v401_v0  ;;  %v391_v11 = vmul.f32 1.442695, %v618_v8 }
 0x1ae   :  { %719 = vrcp.f32 %v1103_v40  ;;  %v368_v12 = vpop.f32.mrf.mxu3  ;;  %v361_v16 = vpop.f32.mrf.mxu2  ;;  %v395_v60 = vmul.f32 1.442695, %v620_v13  ;;  %v492_v4 = vand.u32 2147483648, %v1103_v40  ;;  %vm486_vm2 = vweird.f32 %v1103_v40 }
 0x1af   :  { %721 = vpow2.f32 %v407_v7  ;;  %v1111_v17 = vadd.f32 %v1085_v48, %v368_v12  ;;  %v1115_v19 = vadd.f32 %v1085_v48, %v361_v16  ;;  %v490_v6 = vand.u32 2147483647, %v1103_v40 }
 0x1b0   :  { %723 = vpow2.f32 %v391_v11  ;;  %v348_v61 = vpop.f32.mrf.mxu0  ;;  %v493_v54 = vor.u32 1.1754944e-38, %v492_v4 }
 0x1b1   :  { %v627_v18 = vmul.f32 -1.702, %v1111_v17  ;;  %v1118_v58 = vadd.f32 %v1085_v48, %v348_v61  ;;  %725 = vpow2.f32 %v395_v60  ;;  %v353_v3 = vpop.f32.mrf.mxu1  ;;  %v624_v27 = vmul.f32 -1.702, %v1115_v19 }
 0x1b2   :  { %v1128_v23 = vadd.f32 %v1085_v48, %v353_v3  ;;  %vm491_vm5 = vcmp.eq.f32.partialorder %v490_v6, 8.507059e+37 }
 0x1b3   :  { %v718_v20 = vpop.eup %717  ;;  %v409_v22 = vmul.f32 1.442695, %v627_v18  ;;  %v619_v50 = vmul.f32 -1.702, %v1118_v58  ;;  %v403_v5 = vmul.f32 1.442695, %v624_v27 }
 0x1b4   :  { %v720_v63 = vpop.eup %719  ;;  %v416_v21 = vadd.f32 1.0, %v718_v20  ;;  %v621_v35 = vmul.f32 -1.702, %v1128_v23 }
 0x1b5   :  { %v722_v15 = vpop.eup %721  ;;  %v482_v25 = vmul.f32 %v720_v63, %v1103_v40  ;;  %v393_v32 = vmul.f32 1.442695, %v619_v50  ;;  %vm487_vm0 = vweird.f32 %v720_v63 }
 0x1b6   :  { %v724_v26 = vpop.eup %723  ;;  %727 = vrcp.f32 %v416_v21  ;;  %v1122_v28 = vadd.f32 1.0, %v722_v15  ;;  %vm1140_vm3 = vmor %vm486_vm2, %vm487_vm0  ;;  %v505_v45 = vand.u32 2147483647, %v416_v21  ;;  %v507_v46 = vand.u32 2147483648, %v416_v21  ;;  %v363_v15 = vpop.f32.mrf.mxu2 }
 0x1b7   :  { %v483_v37 = vsub.f32 1.0, %v482_v25  ;;  %v1125_v31 = vadd.f32 1.0, %v724_v26  ;;  %729 = vpow2.f32 %v409_v22  ;;  %v726_v30 = vpop.eup %725  ;;  %v397_v47 = vmul.f32 1.442695, %v621_v35 }
 0x1b8   :  { %731 = vrcp.f32 %v1122_v28  ;;  %v1133_v39 = vadd.f32 1.0, %v726_v30  ;;  %vm501_vm6 = vweird.f32 %v416_v21  ;;  %v508_v49 = vor.u32 1.1754944e-38, %v507_v46 }
 0x1b9   :  { %v484_v29 = vmul.f32 %v720_v63, %v483_v37  ;;  %733 = vrcp.f32 %v1125_v31  ;;  %vm506_vm8 = vcmp.eq.f32.partialorder %v505_v45, 8.507059e+37  ;;  %v550_v60 = vand.u32 2147483647, %v1122_v28 }
 0x1ba   :  { %735 = vpow2.f32 %v403_v5  ;;  %vm546_vm10 = vweird.f32 %v1122_v28  ;;  %v552_v25 = vand.u32 2147483648, %v1122_v28  ;;  %v430_v3 = vand.u32 2147483647, %v1125_v31 }
 0x1bb   :  { %v485_v38 = vadd.f32 %v720_v63, %v484_v29  ;;  %737 = vpow2.f32 %v393_v32  ;;  %vm1178_vm11 = vcmp.eq.f32.partialorder %v550_v60, 8.507059e+37  ;;  %v1192_v5 = vadd.f32 %v1085_v48, %v363_v15 }
 0x1bc   :  { %v728_v34 = vpop.eup %727  ;;  %739 = vrcp.f32 %v1133_v39  ;;  %vm426_vm1 = vweird.f32 %v1125_v31  ;;  %vm1210_vm2 = vcmp.eq.f32.partialorder %v430_v3, 8.507059e+37 }
 0x1bd   :  { %v497_v36 = vmul.f32 %v728_v34, %v416_v21  ;;  %v730_v41 = vpop.eup %729  ;;  %v489_v14 = vsel %vm1140_vm3, %v720_v63, %v485_v38  ;;  %vm502_vm4 = vweird.f32 %v728_v34  ;;  %v553_v38 = vor.u32 1.1754944e-38, %v552_v25 }
 0x1be   :  { %v1136_v42 = vpop.eup %731  ;;  %v1151_v33 = vadd.f32 1.0, %v730_v41  ;;  %v494_v1 = vsel %vm491_vm5, %v493_v54, %v489_v14  ;;  %vm503_vm7 = vmor %vm501_vm6, %vm502_vm4  ;;  %v625_v48 = vmul.f32 -1.702, %v1192_v5 }
 0x1bf   :  { %v498_v43 = vsub.f32 1.0, %v497_v36  ;;  %v542_v52 = vmul.f32 %v1136_v42, %v1122_v28  ;;  %v1149_v53 = vpop.eup %733  ;;  %v575_v11 = vmul.f32 %v494_v1, %v1088_v24  ;;  %vm547_vm9 = vweird.f32 %v1136_v42 }
 0x1c0   :  { %v736_v62 = vpop.eup %735  ;;  %741 = vrcp.f32 %v1151_v33  ;;  %v422_v8 = vmul.f32 %v1149_v53, %v1125_v31  ;;  %vm1184_vm12 = vmor %vm546_vm10, %vm547_vm9  ;;  %v567_v28 = vand.u32 2147483648, %v1151_v33  ;;  %v565_v35 = vand.u32 2147483647, %v1151_v33 }
 0x1c1   :  { %v499_v51 = vmul.f32 %v728_v34, %v498_v43  ;;  %v543_v59 = vsub.f32 1.0, %v542_v52  ;;  %v738_v0 = vpop.eup %737  ;;  %743 = vpow2.f32 %v397_v47  ;;  %v1164_v20 = vadd.f32 1.0, %v736_v62 }
 0x1c2   :  { %v1156_v40 = vpop.eup %739  ;;  %v1161_v16 = vadd.f32 1.0, %v738_v0  ;;  %v423_v18 = vsub.f32 1.0, %v422_v8  ;;  %vm427_vm14 = vweird.f32 %v1149_v53  ;;  %v432_v36 = vand.u32 2147483648, %v1125_v31 }
 0x1c3   :  { %v500_v55 = vadd.f32 %v728_v34, %v499_v51  ;;  %v544_v13 = vmul.f32 %v1136_v42, %v543_v59  ;;  %v452_v21 = vmul.f32 %v1156_v40, %v1133_v39  ;;  %vm561_vm15 = vweird.f32 %v1151_v33  ;;  %vm1217_vm4 = vmor %vm426_vm1, %vm427_vm14 }
 0x1c4   :  { %745 = vrcp.f32 %v1161_v16  ;;  %v424_v27 = vmul.f32 %v1149_v53, %v423_v18  ;;  %v568_v44 = vor.u32 1.1754944e-38, %v567_v28  ;;  %vm566_vm3 = vcmp.eq.f32.partialorder %v565_v35, 8.507059e+37 }
 0x1c5   :  { %v504_v7 = vsel %vm503_vm7, %v728_v34, %v500_v55  ;;  %v545_v24 = vadd.f32 %v1136_v42, %v544_v13  ;;  %747 = vrcp.f32 %v1164_v20  ;;  %v453_v29 = vsub.f32 1.0, %v452_v21 }
 0x1c6   :  { %v509_v9 = vsel %vm506_vm8, %v508_v49, %v504_v7  ;;  %v742_v63 = vpop.eup %741  ;;  %v425_v41 = vadd.f32 %v1149_v53, %v424_v27  ;;  %v433_v31 = vor.u32 1.1754944e-38, %v432_v36  ;;  %vm457_vm5 = vweird.f32 %v1156_v40 }
 0x1c7   :  { %v576_v12 = vmul.f32 %v509_v9, %v1092_v56  ;;  %v744_v22 = vpop.eup %743  ;;  %v557_v56 = vmul.f32 %v742_v63, %v1151_v33  ;;  %v549_v32 = vsel %vm1184_vm12, %v1136_v42, %v545_v24  ;;  %vm562_vm13 = vweird.f32 %v742_v63 }
 0x1c8   :  { %v1189_v30 = vadd.f32 1.0, %v744_v22  ;;  %v554_v42 = vsel %vm1178_vm11, %v553_v38, %v549_v32  ;;  %v454_v43 = vmul.f32 %v1156_v40, %v453_v29  ;;  %vm563_vm0 = vmor %vm561_vm15, %vm562_vm13  ;;  %v405_v54 = vmul.f32 1.442695, %v625_v48 }
 0x1c9   :  { %v663_v61 = vpack.c.bf16 %v576_v12, %v575_v11  ;;  %v558_v37 = vsub.f32 1.0, %v557_v56  ;;  %v579_v33 = vmul.f32 %v554_v42, %v1095_v57  ;;  %v429_v55 = vsel %vm1217_vm4, %v1149_v53, %v425_v41 }
 0x1ca   :  { %749 = vrcp.f32 %v1189_v30  ;;  %v746_v6 = vpop.eup %745  ;;  %v455_v49 = vadd.f32 %v1156_v40, %v454_v43  ;;  %v445_v0 = vand.u32 2147483647, %v1161_v16  ;;  %v447_v7 = vand.u32 2147483648, %v1161_v16 }
 0x1cb   :  { %680 = vst [vmem:[%s1281_s5 + $0x10] sm:$0xff] %v663_v61   ;;  %v559_v34 = vmul.f32 %v742_v63, %v558_v37  ;;  %v1208_v45 = vpop.eup %747  ;;  %v437_v47 = vmul.f32 %v746_v6, %v1161_v16  ;;  %751 = vpow2.f32 %v405_v54  ;;  %vm442_vm6 = vweird.f32 %v746_v6 }
 0x1cc   :  { %vm456_vm7 = vweird.f32 %v1133_v39  ;;  %v460_v53 = vand.u32 2147483647, %v1133_v39  ;;  %v512_v11 = vmul.f32 %v1208_v45, %v1164_v20  ;;  %v434_v12 = vsel %vm1210_vm2, %v433_v31, %v429_v55 }
 0x1cd   :  { %v560_v4 = vadd.f32 %v742_v63, %v559_v34  ;;  %v438_v62 = vsub.f32 1.0, %v437_v47  ;;  %vm1240_vm8 = vmor %vm456_vm7, %vm457_vm5  ;;  %vm441_vm9 = vweird.f32 %v1161_v16  ;;  %vm446_vm11 = vcmp.eq.f32.partialorder %v445_v0, 8.507059e+37 }
 0x1ce   :  { %v459_v60 = vsel %vm1240_vm8, %v1156_v40, %v455_v49  ;;  %vm443_vm10 = vmor %vm441_vm9, %vm442_vm6  ;;  %v448_v18 = vor.u32 1.1754944e-38, %v447_v7  ;;  %v475_v24 = vand.u32 2147483647, %v1189_v30  ;;  %v571_v15 = vmul.f32 %v434_v12, %v1100_v2 }
 0x1cf   :  { %v564_v52 = vsel %vm563_vm0, %v742_v63, %v560_v4  ;;  %v439_v9 = vmul.f32 %v746_v6, %v438_v62  ;;  %v477_v63 = vand.u32 2147483648, %v1189_v30  ;;  %vm461_vm13 = vcmp.eq.f32.partialorder %v460_v53, 8.507059e+37 }
 0x1d0   :  { %v569_v51 = vsel %vm566_vm3, %v568_v44, %v564_v52  ;;  %v750_v1 = vpop.eup %749  ;;  %vm471_vm14 = vweird.f32 %v1189_v30  ;;  %v513_v37 = vsub.f32 1.0, %v512_v11  ;;  %vm476_vm1 = vcmp.eq.f32.partialorder %v475_v24, 8.507059e+37 }
 0x1d1   :  { %v580_v59 = vmul.f32 %v569_v51, %v1111_v17  ;;  %v467_v57 = vmul.f32 %v750_v1, %v1189_v30  ;;  %v462_v17 = vand.u32 2147483648, %v1133_v39  ;;  %v440_v61 = vadd.f32 %v746_v6, %v439_v9  ;;  %v752_v56 = vpop.eup %751 }
 0x1d2   :  { %vm472_vm12 = vweird.f32 %v750_v1  ;;  %v418_v40 = vadd.f32 1.0, %v752_v56  ;;  %v478_v50 = vor.u32 1.1754944e-38, %v477_v63  ;;  %v514_v30 = vmul.f32 %v1208_v45, %v513_v37 }
 0x1d3   :  { %v673_v8 = vpack.c.bf16 %v580_v59, %v579_v33  ;;  %v468_v39 = vsub.f32 1.0, %v467_v57  ;;  %v444_v21 = vsel %vm443_vm10, %v746_v6, %v440_v61  ;;  %v463_v16 = vor.u32 1.1754944e-38, %v462_v17  ;;  %vm473_vm15 = vmor %vm471_vm14, %vm472_vm12 }
 0x1d4   :  { %v449_v25 = vsel %vm446_vm11, %v448_v18, %v444_v21  ;;  %753 = vrcp.f32 %v418_v40  ;;  %v515_v38 = vadd.f32 %v1208_v45, %v514_v30  ;;  %vm517_vm0 = vweird.f32 %v1208_v45 }
 0x1d5   :  { %682 = vst [vmem:[%s1281_s5 + $0x20] sm:$0xff] %v673_v8   ;;  %v469_v22 = vmul.f32 %v750_v1, %v468_v39  ;;  %v572_v3 = vmul.f32 %v449_v25, %v1118_v58  ;;  %v464_v27 = vsel %vm461_vm13, %v463_v16, %v459_v60  ;;  %vm516_vm2 = vweird.f32 %v1164_v20 }
 0x1d6   :  { %v573_v2 = vmul.f32 %v464_v27, %v1106_v10  ;;  %v522_v10 = vand.u32 2147483648, %v1164_v20  ;;  %v520_v41 = vand.u32 2147483647, %v1164_v20  ;;  %vm518_vm3 = vmor %vm516_vm2, %vm517_vm0  ;;  %v537_v4 = vand.u32 2147483648, %v418_v40 }
 0x1d7   :  { %v470_v26 = vadd.f32 %v750_v1, %v469_v22  ;;  %v653_v29 = vpack.c.bf16 %v572_v3, %v571_v15  ;;  %v519_v48 = vsel %vm518_vm3, %v1208_v45, %v515_v38  ;;  %v535_v42 = vand.u32 2147483647, %v418_v40 }
 0x1d8   :  { %v523_v43 = vor.u32 1.1754944e-38, %v522_v10  ;;  %vm521_vm5 = vcmp.eq.f32.partialorder %v520_v41, 8.507059e+37  ;;  %vm531_vm6 = vweird.f32 %v418_v40  ;;  %v538_v52 = vor.u32 1.1754944e-38, %v537_v4 }
 0x1d9   :  { %v474_v28 = vsel %vm473_vm15, %v750_v1, %v470_v26  ;;  %654 = vst [vmem:[%s1281_s5] sm:$0xff] %v653_v29   ;;  %vm536_vm8 = vcmp.eq.f32.partialorder %v535_v42, 8.507059e+37 }
 0x1da   :  { %v479_v32 = vsel %vm476_vm1, %v478_v50, %v474_v28  ;;  %v754_v35 = vpop.eup %753  ;;  %v524_v46 = vsel %vm521_vm5, %v523_v43, %v519_v48 }
 0x1db   :  { %v574_v58 = vmul.f32 %v479_v32, %v1128_v23  ;;  %v527_v36 = vmul.f32 %v754_v35, %v418_v40  ;;  %vm532_vm4 = vweird.f32 %v754_v35  ;;  %v577_v20 = vmul.f32 %v524_v46, %v1115_v19 }
 0x1dc   :  { %vm533_vm7 = vmor %vm531_vm6, %vm532_vm4 }
 0x1dd   :  { %v658_v34 = vpack.c.bf16 %v574_v58, %v573_v2  ;;  %v528_v23 = vsub.f32 1.0, %v527_v36 }
 0x1df   :  { %679 = vst [vmem:[%s1281_s5 + $0x8] sm:$0xff] %v658_v34   ;;  %v529_v6 = vmul.f32 %v754_v35, %v528_v23 }
 0x1e1   :  { %v530_v44 = vadd.f32 %v754_v35, %v529_v6 }
 0x1e3   :  { %v534_v47 = vsel %vm533_vm7, %v754_v35, %v530_v44 }
 0x1e4   :  { %v539_v14 = vsel %vm536_vm8, %v538_v52, %v534_v47 }
 0x1e5   :  { %v578_v31 = vmul.f32 %v539_v14, %v1192_v5 }
 0x1e7   :  { %v668_v51 = vpack.c.bf16 %v578_v31, %v577_v20 }
 0x1e9   :  { %681 = vst [vmem:[%s1281_s5 + $0x18] sm:$0xff] %v668_v51  }

// kernel: run.10
= control target key start
LH: loop header
LB: loop body
LE: loop exit
PB: predicated region body
PF: predicated region fallthrough
CT: control target
= control target key end

     0   :  { %s4560_s18 = smov 96   ;;  %s4561_s10 = smov 64   ;;  %vm78_vm0 = vcmask 64512   ;;  %vm625_vm1 = vcmask 1041408   ;;  %vm626_vm2 = vcmask 1042432   ;;  %vm458_vm3 = vcmask 36864   ;;  %s6734_s0 = inlined_call_operand.vmem [shape: bf16[16,5,96], index: 0, kind: input, shape index: {}]   ;;  %s6735_s1 = inlined_call_operand.vmem [shape: bf16[16,5,32], index: 1, kind: output, shape index: {}]  }
   0x1   :  { %v4588_v0 = vld [vmem:[%s6734_s0 + $0x8] sm:$0x7]  ;;  %v4593_v1 = vld [vmem:[%s6734_s0] sm:$0x7]  ;;  %v4598_v2 = vld [vmem:[%s6734_s0 + $0x18] sm:$0x7] }
   0x2   :  { %v123_v3 = vunpack.c.l.b16 %v4588_v0  ;;  %v74_v4 = vunpack.c.l.b16 %v4593_v1  ;;  %v219_v5 = vunpack.c.l.b16 %v4598_v2  ;;  %v4606_v6 = vld [vmem:[%s6734_s0 + $0xc] sm:$0x7]  ;;  %v4611_v7 = vld [vmem:[%s6734_s0 + $0x4] sm:$0x7]  ;;  %v4622_v11 = vld [vmem:[%s6734_s0 + $0x1c] sm:$0x7]  ;;  %v25_v49 = vunpack.c.l.bf16 %v4593_v1 }
   0x3   :  { %v147_v12 = vunpack.c.l.b16 %v4606_v6  ;;  %v99_v13 = vunpack.c.l.b16 %v4611_v7  ;;  %v243_v14 = vunpack.c.l.b16 %v4622_v11  ;;  %v4642_v18 = vld [vmem:[%s6734_s0 + $0x28] sm:$0x7]  ;;  %v4647_v19 = vld [vmem:[%s6734_s0 + $0x10] sm:$0x7]  ;;  %v4652_v20 = vld [vmem:[%s6734_s0 + $0x2c] sm:$0x7]  ;;  %v32_v48 = vunpack.c.l.bf16 %v4622_v11 }
   0x4   :  { %v4613_v8 = vpack.c.b16 %v123_v3, %v123_v3  ;;  %v4615_v9 = vpack.c.b16 %v74_v4, %v74_v4  ;;  %v4617_v10 = vpack.c.b16 %v219_v5, %v219_v5  ;;  %v315_v21 = vunpack.c.l.b16 %v4642_v18  ;;  %v4672_v27 = vld [vmem:[%s6734_s0 + $0x14] sm:$0x7]  ;;  %v4677_v28 = vld [vmem:[%s6734_s0 + $0x3c] sm:$0x7]  ;;  %v4682_v29 = vld [vmem:[%s6734_s0 + $0x38] sm:$0x7] }
   0x5   :  { %v4633_v15 = vpack.c.b16 %v147_v12, %v147_v12  ;;  %v4635_v16 = vpack.c.b16 %v99_v13, %v99_v13  ;;  %v4637_v17 = vpack.c.b16 %v243_v14, %v243_v14  ;;  %v171_v22 = vunpack.c.l.b16 %v4647_v19  ;;  %v4702_v36 = vld [vmem:[%s6734_s0 + $0x30] sm:$0x7]  ;;  %v4707_v37 = vld [vmem:[%s6734_s0 + $0x20] sm:$0x7]  ;;  %v4712_v38 = vld [vmem:[%s6734_s0 + $0x24] sm:$0x7] }
   0x6   :  { %125 = vrot.lane.b32.xlu0 %v4613_v8, %s4560_s18  ;;  %76 = vrot.lane.b32.xlu2 %v4615_v9, %s4560_s18  ;;  %v339_v23 = vunpack.c.l.b16 %v4652_v20  ;;  %v4663_v24 = vpack.c.b16 %v315_v21, %v315_v21  ;;  %v195_v30 = vunpack.c.l.b16 %v4672_v27  ;;  %v435_v31 = vunpack.c.l.b16 %v4677_v28  ;;  %v4738_v45 = vld [vmem:[%s6734_s0 + $0x34] sm:$0x7]  ;;  %s4562_s0 = smov 88   ;;  %s4563_s11 = smov 120  }
   0x7   :  { %221 = vrot.lane.b32.xlu1 %v4617_v10, %s4560_s18  ;;  %6796 = vst [vmem:[#allocation2_spill] sm:$0xff] %v4633_v15  ;;  %v4665_v25 = vpack.c.b16 %v171_v22, %v171_v22  ;;  %v411_v32 = vunpack.c.l.b16 %v4682_v29  ;;  %v363_v39 = vunpack.c.l.b16 %v4702_v36  ;;  %v267_v40 = vunpack.c.l.b16 %v4707_v37  ;;  %s4565_s12 = smov 56   ;;  %s4566_s13 = smov 80  }
   0x8   :  { %6797 = vst [vmem:[#allocation3_spill] sm:$0xff] %v4637_v17  ;;  %v4667_v26 = vpack.c.b16 %v339_v23, %v339_v23  ;;  %v4693_v33 = vpack.c.b16 %v195_v30, %v195_v30  ;;  %v4695_v34 = vpack.c.b16 %v435_v31, %v435_v31  ;;  %v291_v41 = vunpack.c.l.b16 %v4712_v38  ;;  %s4567_s14 = smov 112   ;;  %s4568_s15 = smov 48  }
   0x9   :  { %v4697_v35 = vpack.c.b16 %v411_v32, %v411_v32  ;;  %v4723_v42 = vpack.c.b16 %v363_v39, %v363_v39  ;;  %v4725_v43 = vpack.c.b16 %v267_v40, %v267_v40  ;;  %v387_v46 = vunpack.c.l.b16 %v4738_v45  ;;  %s4569_s16 = smov 72   ;;  %s4570_s17 = smov 104  }
   0xa   :  { %v4727_v44 = vpack.c.b16 %v291_v41, %v291_v41  ;;  %v48_v50 = vmul.f32 0.35351563, %v32_v48  ;;  %v41_v54 = vmul.f32 0.35351563, %v25_v49  ;;  %v27_v55 = vunpack.c.l.bf16 %v4588_v0  ;;  %s4572_s19 = smov 8   ;;  %s4573_s20 = smov 16  }
   0xb   :  { %6798 = vst [vmem:[#allocation4_spill] sm:$0xff] %v4723_v42  ;;  %v4741_v47 = vpack.c.b16 %v387_v46, %v387_v46  ;;  %v26_v59 = vunpack.c.l.bf16 %v4611_v7  ;;  %v28_v1 = vunpack.c.l.bf16 %v4606_v6  ;;  %v29_v4 = vunpack.c.l.bf16 %v4647_v19  ;;  %s4574_s21 = smov 24  }
   0xc   :  { %6799 = vst [vmem:[#allocation5_spill] sm:$0xff] %v4725_v43  ;;  %v4783_v52 = vpack.c.bf16 %v48_v50, %v48_v50  ;;  %v4790_v58 = vpack.c.bf16 %v41_v54, %v41_v54  ;;  %v43_v60 = vmul.f32 0.35351563, %v27_v55  ;;  %v31_v22 = vunpack.c.l.bf16 %v4598_v2 }
   0xd   :  { %6800 = vst [vmem:[#allocation6_spill] sm:$0xff] %v4727_v44  ;;  %v42_v63 = vmul.f32 0.35351563, %v26_v59  ;;  %v44_v7 = vmul.f32 0.35351563, %v28_v1  ;;  %v45_v13 = vmul.f32 0.35351563, %v29_v4  ;;  %v39_v59 = vunpack.c.l.bf16 %v4682_v29 }
   0xe   :  { %149 = vrot.lane.b32.xlu0 %v4633_v15, %s4560_s18  ;;  %101 = vrot.lane.b32.xlu2 %v4635_v16, %s4560_s18  ;;  %6801 = vst [vmem:[#allocation7_spill] sm:$0xff] %v4741_v47  ;;  %v1175_v56 = vunpack.c.l.b16 %v4783_v52  ;;  %v59_v0 = vpack.c.bf16 %v43_v60, %v43_v60  ;;  %v47_v46 = vmul.f32 0.35351563, %v31_v22  ;;  %v34_v60 = vunpack.c.l.bf16 %v4712_v38 }
   0xf   :  { %245 = vrot.lane.b32.xlu1 %v4637_v17, %s4560_s18  ;;  %v58_v3 = vpack.c.bf16 %v42_v63, %v42_v63  ;;  %v60_v6 = vpack.c.bf16 %v44_v7, %v44_v7  ;;  %v61_v21 = vpack.c.bf16 %v45_v13, %v45_v13  ;;  %v30_v13 = vunpack.c.l.bf16 %v4672_v27 }
  0x10   :  { %v4788_v57 = vpack.c.b16 %v1175_v56, %v1175_v56  ;;  %v1045_v5 = vunpack.c.l.b16 %v59_v0  ;;  %v63_v2 = vpack.c.bf16 %v47_v46, %v47_v46  ;;  %vm621_vm4 = vcmask 39936  }
  0x11   :  { %v1071_v19 = vunpack.c.l.b16 %v60_v6  ;;  %v1097_v39 = vunpack.c.l.b16 %v61_v21  ;;  %v1019_v1 = vunpack.c.l.b16 %v58_v3  ;;  %vm3936_vm5 = vcmask 130048  }
  0x12   :  { %6802 = vst [vmem:[#allocation8_spill] sm:$0xff] %v4788_v57  ;;  %v4808_v14 = vpack.c.b16 %v1045_v5, %v1045_v5  ;;  %v50_v5 = vmul.f32 0.35351563, %v34_v60  ;;  %vm3953_vm6 = vcmask 195584   ;;  %vm3986_vm7 = vcmask 256000  }
  0x13   :  { %v4819_v40 = vpack.c.b16 %v1071_v19, %v1071_v19  ;;  %v4822_v48 = vpack.c.b16 %v1097_v39, %v1097_v39  ;;  %v4846_v7 = vpack.c.b16 %v1019_v1, %v1019_v1  ;;  %v4564_v1 = vmov 65535  }
  0x14   :  { %6803 = vst [vmem:[#allocation9_spill] sm:$0xff] %v4808_v14  ;;  %vm3987_vm8 = vsmask.f32 2304 }
  0x15   :  { %6804 = vst [vmem:[#allocation10_spill] sm:$0xff] %v4819_v40  ;;  %vm6518_vm9 = vmand %vm3986_vm7, %vm3987_vm8 }
  0x16   :  { %317 = vrot.lane.b32.xlu0 %v4663_v24, %s4560_s18  ;;  %173 = vrot.lane.b32.xlu2 %v4665_v25, %s4560_s18  ;;  %6805 = vst [vmem:[#allocation11_spill] sm:$0xff] %v4822_v48 }
  0x17   :  { %341 = vrot.lane.b32.xlu1 %v4667_v26, %s4560_s18  ;;  %6807 = vst [vmem:[#allocation13_spill] sm:$0xff] %v4846_v7 }
  0x1e   :  { %197 = vrot.lane.b32.xlu0 %v4693_v33, %s4560_s18  ;;  %437 = vrot.lane.b32.xlu2 %v4695_v34, %s4560_s18 }
  0x1f   :  { %413 = vrot.lane.b32.xlu1 %v4697_v35, %s4560_s18 }
  0x26   :  { %365 = vrot.lane.b32.xlu2 %v4723_v42, %s4560_s18  ;;  %269 = vrot.lane.b32.xlu0 %v4725_v43, %s4560_s18 }
  0x27   :  { %293 = vrot.lane.b32.xlu1 %v4727_v44, %s4560_s18 }
  0x2e   :  { %687 = vrot.lane.b32.xlu2 %v4633_v15, %s4561_s10  ;;  %389 = vrot.lane.b32.xlu0 %v4741_v47, %s4560_s18  ;;  %s4571_s18 = smov 40  }
  0x2f   :  { %666 = vrot.lane.b32.xlu1 %v4613_v8, %s4561_s10 }
  0x36   :  { %619 = vrot.lane.b32.xlu2 %v4615_v9, %s4561_s10  ;;  %750 = vrot.lane.b32.xlu0 %v4617_v10, %s4561_s10 }
  0x37   :  { %771 = vrot.lane.b32.xlu1 %v4637_v17, %s4561_s10 }
  0x3e   :  { %855 = vrot.lane.b32.xlu2 %v4667_v26, %s4561_s10  ;;  %834 = vrot.lane.b32.xlu0 %v4663_v24, %s4561_s10 }
  0x3f   :  { %645 = vrot.lane.b32.xlu1 %v4635_v16, %s4561_s10 }
  0x46   :  { %708 = vrot.lane.b32.xlu2 %v4665_v25, %s4561_s10  ;;  %1049 = vrot.lane.b32.xlu0 %v4613_v8, %s4562_s0 }
  0x47   :  { %813 = vrot.lane.b32.xlu1 %v4727_v44, %s4561_s10 }
  0x4e   :  { %729 = vrot.lane.b32.xlu2 %v4693_v33, %s4561_s10  ;;  %876 = vrot.lane.b32.xlu0 %v4723_v42, %s4561_s10 }
  0x4f   :  { %897 = vrot.lane.b32.xlu1 %v4741_v47, %s4561_s10 }
  0x56   :  { %918 = vrot.lane.b32.xlu2 %v4697_v35, %s4561_s10  ;;  %1179 = vrot.lane.b32.xlu0 %v4637_v17, %s4562_s0 }
  0x57   :  { %997 = vrot.lane.b32.xlu1 %v4615_v9, %s4562_s0 }
  0x5e   :  { %939 = vrot.lane.b32.xlu2 %v4695_v34, %s4561_s10 }
  0x5f   :  { %1177 = vrot.lane.b32.xlu1 %v4788_v57, %s4563_s11 }
  0x60   :  { %v77_v51 = vpop.permute.xlu2 %76 }
  0x61   :  { %v83_v53 = vsel %vm78_vm0, %v77_v51, 0 }
  0x62   :  { %92 = vmatpush.bf16.xpose.msra.mxu0 %v83_v53  ;;  %v1149_v53 = vunpack.c.l.b16 %v63_v2 }
  0x64   :  { %v4831_v56 = vpack.c.b16 %v1149_v53, %v1149_v53 }
  0x66   :  { %792 = vrot.lane.b32.xlu2 %v4725_v43, %s4561_s10  ;;  %6806 = vst [vmem:[#allocation12_spill] sm:$0xff] %v4831_v56  ;;  %1151 = vrot.lane.b32.xlu0 %v4831_v56, %s4563_s11 }
  0x67   :  { %1257 = vrot.lane.b32.xlu1 %v4663_v24, %s4562_s0 }
  0x68   :  { %v102_v61 = vpop.permute.xlu2 %101 }
  0x69   :  { %4041 = vmatmul.msk.bf16.vlgmr.msra.gmra.mxu0 %vm78_vm0, %v4790_v58  ;;  %v107_v62 = vsel %vm78_vm0, %v102_v61, 0  ;;  %v55_v61 = vmul.f32 0.35351563, %v39_v59 }
  0x6a   :  { %116 = vmatpush.bf16.xpose.msra.mxu1 %v107_v62 }
  0x6b   :  { %v4843_v4 = vpack.c.bf16 %v55_v61, %v55_v61 }
  0x6e   :  { %1075 = vrot.lane.b32.xlu2 %v4633_v15, %s4562_s0  ;;  %1021 = vrot.lane.b32.xlu0 %v4846_v7, %s4563_s11 }
  0x6f   :  { %1127 = vrot.lane.b32.xlu1 %v4693_v33, %s4562_s0 }
  0x70   :  { %v174_v11 = vpop.permute.xlu2 %173 }
  0x71   :  { %4042 = vmatmul.msk.bf16.vlgmr.msra.gmra.mxu1 %vm78_vm0, %v58_v3  ;;  %v179_v12 = vsel %vm78_vm0, %v174_v11, 0  ;;  %v1357_v11 = vunpack.c.l.b16 %v4843_v4 }
  0x72   :  { %188 = vmatpush.bf16.xpose.msrb.mxu0 %v179_v12  ;;  %v36_v12 = vunpack.c.l.bf16 %v4652_v20 }
  0x73   :  { %v4855_v3 = vpack.c.b16 %v1357_v11, %v1357_v11 }
  0x74   :  { %v52_v22 = vmul.f32 0.35351563, %v36_v12 }
  0x75   :  { %6808 = vst [vmem:[#allocation14_spill] sm:$0xff] %v4855_v3 }
  0x76   :  { %1047 = vrot.lane.b32.xlu2 %v4808_v14, %s4563_s11  ;;  %v68_v46 = vpack.c.bf16 %v52_v22, %v52_v22  ;;  %1101 = vrot.lane.b32.xlu0 %v4665_v25, %s4562_s0 }
  0x77   :  { %1099 = vrot.lane.b32.xlu1 %v4822_v48, %s4563_s11 }
  0x78   :  { %v126_v23 = vpop.permute.xlu0 %125  ;;  %v4815_v30 = vpop.permute.xlu2 %437  ;;  %v1279_v53 = vunpack.c.l.b16 %v68_v46 }
  0x79   :  { %4045 = vmatmul.msk.bf16.vlgmr.msrb.gmra.mxu0 %vm78_vm0, %v61_v21  ;;  %v131_v31 = vsel %vm78_vm0, %v126_v23, 0  ;;  %v222_v32 = vpop.permute.xlu1 %221  ;;  %v4860_v21 = vpack.c.bf16 %v50_v5, %v50_v5  ;;  %v46_v23 = vmul.f32 0.35351563, %v30_v13 }
  0x7a   :  { %140 = vmatpush.bf16.xpose.msra.mxu2 %v131_v31  ;;  %v227_v41 = vsel %vm78_vm0, %v222_v32, 0 }
  0x7b   :  { %v1227_v31 = vunpack.c.l.b16 %v4860_v21 }
  0x7d   :  { %v4870_v39 = vpack.c.b16 %v1227_v31, %v1227_v31 }
  0x7e   :  { %1073 = vrot.lane.b32.xlu2 %v4819_v40, %s4563_s11 }
  0x7f   :  { %1387 = vrot.lane.b32.xlu1 %v4695_v34, %s4562_s0  ;;  %6810 = vst [vmem:[#allocation16_spill] sm:$0xff] %v4870_v39 }
  0x80   :  { %v150_v49 = vpop.permute.xlu0 %149  ;;  %v366_v54 = vpop.permute.xlu2 %365 }
  0x81   :  { %4043 = vmatmul.msk.bf16.vlgmr.msra.gmra.mxu2 %vm78_vm0, %v59_v0  ;;  %v155_v50 = vsel %vm78_vm0, %v150_v49, 0  ;;  %v246_v51 = vpop.permute.xlu1 %245  ;;  %v62_v49 = vpack.c.bf16 %v46_v23, %v46_v23  ;;  %v371_v61 = vsel %vm78_vm0, %v366_v54, 0  ;;  %v627_v54 = vsel %vm625_vm1, 4294967295, %v4564_v1 }
  0x82   :  { %236 = vmatpush.bf16.xpose.msrb.mxu2 %v227_v41  ;;  %164 = vmatpush.bf16.xpose.msra.mxu3 %v155_v50  ;;  %v251_v55 = vsel %vm78_vm0, %v246_v51, 0  ;;  %v35_v41 = vunpack.c.l.bf16 %v4642_v18  ;;  %v33_v50 = vunpack.c.l.bf16 %v4707_v37  ;;  %v37_v51 = vunpack.c.l.bf16 %v4702_v36 }
  0x84   :  { %v53_v18 = vmul.f32 0.35351563, %v37_v51  ;;  %v51_v59 = vmul.f32 0.35351563, %v35_v41  ;;  %v1123_v41 = vunpack.c.l.b16 %v62_v49 }
  0x86   :  { %1153 = vrot.lane.b32.xlu2 %v4617_v10, %s4562_s0  ;;  %v67_v5 = vpack.c.bf16 %v51_v59, %v51_v59  ;;  %v4920_v51 = vpack.c.b16 %v1123_v41, %v1123_v41 }
  0x87   :  { %1359 = vrot.lane.b32.xlu1 %v4855_v3, %s4563_s11 }
  0x88   :  { %v318_v62 = vpop.permute.xlu0 %317  ;;  %v4849_v38 = vpop.permute.xlu2 %687  ;;  %v1253_v13 = vunpack.c.l.b16 %v67_v5  ;;  %6814 = vst [vmem:[#allocation20_spill] sm:$0xff] %v4920_v51 }
  0x89   :  { %v323_v63 = vsel %vm78_vm0, %v318_v62, 0  ;;  %4044 = vmatmul.msk.bf16.vlgmr.msra.gmra.mxu3 %vm78_vm0, %v60_v6  ;;  %v342_v0 = vpop.permute.xlu1 %341  ;;  %v993_v6 = vunpack.c.l.b16 %v4790_v58  ;;  %v49_v62 = vmul.f32 0.35351563, %v33_v50 }
  0x8a   :  { %260 = vmatpush.bf16.xpose.msrb.mxu3 %v251_v55  ;;  %332 = vmatpush.bf16.xpose.msra.mxu2 %v323_v63  ;;  %v347_v29 = vsel %vm78_vm0, %v342_v0, 0  ;;  %v443_v55 = vsel %vm78_vm0, %v4815_v30, 0  ;;  %v4888_v63 = vpack.c.b16 %v1279_v53, %v1279_v53  ;;  %v69_v30 = vpack.c.bf16 %v53_v18, %v53_v18 }
  0x8b   :  { %v4867_v32 = vpack.c.b16 %v993_v6, %v993_v6  ;;  %v65_v11 = vpack.c.bf16 %v49_v62, %v49_v62  ;;  %v4908_v23 = vpack.c.b16 %v1253_v13, %v1253_v13  ;;  %v40_v53 = vunpack.c.l.bf16 %v4677_v28 }
  0x8c   :  { %6811 = vst [vmem:[#allocation17_spill] sm:$0xff] %v4888_v63  ;;  %1281 = vrot.lane.b32.xlu0 %v4888_v63, %s4563_s11 }
  0x8d   :  { %6809 = vst [vmem:[#allocation15_spill] sm:$0xff] %v4867_v32  ;;  %v1201_v18 = vunpack.c.l.b16 %v65_v11 }
  0x8e   :  { %1023 = vrot.lane.b32.xlu2 %v4635_v16, %s4562_s0  ;;  %6813 = vst [vmem:[#allocation19_spill] sm:$0xff] %v4908_v23 }
  0x8f   :  { %1229 = vrot.lane.b32.xlu1 %v4870_v39, %s4563_s11  ;;  %v4932_v28 = vpack.c.b16 %v1201_v18, %v1201_v18 }
  0x90   :  { %v198_v19 = vpop.permute.xlu0 %197 }
  0x91   :  { %4047 = vmatmul.msk.bf16.vlgmr.msrb.gmra.mxu2 %vm78_vm0, %v63_v2  ;;  %v203_v20 = vsel %vm78_vm0, %v198_v19, 0  ;;  %v414_v27 = vpop.permute.xlu1 %413  ;;  %v620_v2 = vpop.permute.xlu2 %619  ;;  %6815 = vst [vmem:[#allocation21_spill] sm:$0xff] %v4932_v28 }
  0x92   :  { %356 = vmatpush.bf16.xpose.msra.mxu3 %v347_v29  ;;  %212 = vmatpush.bf16.xpose.msrb.mxu1 %v203_v20  ;;  %v419_v58 = vsel %vm78_vm0, %v414_v27, 0  ;;  %v1305_v29 = vunpack.c.l.b16 %v69_v30 }
  0x93   :  { %428 = vmatpush.bf16.xpose.msrb.mxu2 %v419_v58 }
  0x94   :  { %v4896_v12 = vpack.c.b16 %v1305_v29, %v1305_v29  ;;  %1361 = vrot.lane.b32.xlu0 %v4697_v35, %s4562_s0 }
  0x96   :  { %995 = vrot.lane.b32.xlu2 %v4867_v32, %s4563_s11  ;;  %6812 = vst [vmem:[#allocation18_spill] sm:$0xff] %v4896_v12 }
  0x97   :  { %1307 = vrot.lane.b32.xlu1 %v4896_v12, %s4563_s11 }
  0x98   :  { %v270_v60 = vpop.permute.xlu0 %269 }
  0x99   :  { %4046 = vmatmul.msk.bf16.vlgmr.msrb.gmra.mxu1 %vm78_vm0, %v62_v49  ;;  %4048 = vmatmul.msk.bf16.vlgmr.msrb.gmra.mxu3 %vm78_vm0, %v4783_v52  ;;  %v294_v36 = vpop.permute.xlu1 %293  ;;  %v275_v37 = vsel %vm78_vm0, %v270_v60, 0  ;;  %v4892_v52 = vsel %vm626_vm2, %v627_v54, 0  ;;  %v4903_v19 = vpop.permute.xlu2 %855 }
  0x9a   :  { %v299_v0 = vsel %vm78_vm0, %v294_v36, 0  ;;  %452 = vmatpush.bf16.xpose.msrb.mxu3 %v443_v55  ;;  %284 = vmatpush.bf16.xpose.msra.mxu0 %v275_v37  ;;  %v630_v6 = vand.u32 %v4892_v52, %v620_v2  ;;  %v693_v58 = vand.u32 %v4849_v38, %v4892_v52  ;;  %v38_v55 = vunpack.c.l.bf16 %v4738_v45 }
  0x9b   :  { %308 = vmatpush.bf16.xpose.msra.mxu1 %v299_v0  ;;  %v56_v38 = vmul.f32 0.35351563, %v40_v53 }
  0x9c   :  { %1231 = vrot.lane.b32.xlu0 %v4727_v44, %s4562_s0  ;;  %v54_v49 = vmul.f32 0.35351563, %v38_v55 }
  0x9d   :  { %v72_v59 = vpack.c.bf16 %v56_v38, %v56_v38 }
  0x9e   :  { %1283 = vrot.lane.b32.xlu2 %v4667_v26, %s4562_s0 }
  0xa0   :  { %v390_v22 = vpop.permute.xlu0 %389 }
  0xa1   :  { %4051 = vmatmul.msk.bf16.vlgmr.msra.gmra.mxu2 %vm78_vm0, %v67_v5  ;;  %4049 = vmatmul.msk.bf16.vlgmr.msra.gmra.mxu0 %vm78_vm0, %v65_v11  ;;  %v667_v20 = vpop.permute.xlu1 %666  ;;  %v395_v27 = vsel %vm78_vm0, %v390_v22, 0  ;;  %v709_v50 = vpop.permute.xlu2 %708 }
  0xa2   :  { %380 = vmatpush.bf16.xpose.msrb.mxu0 %v371_v61  ;;  %v672_v31 = vand.u32 %v667_v20, %v4892_v52  ;;  %v4935_v61 = vpack.c.bf16 %v54_v49, %v54_v49 }
  0xa3   :  { %404 = vmatpush.bf16.xpose.msrb.mxu1 %v395_v27 }
  0xa4   :  { %681 = vmatpush.bf16.msra.mxu2 %v672_v31  ;;  %1203 = vrot.lane.b32.xlu0 %v4932_v28, %s4563_s11 }
  0xa6   :  { %1255 = vrot.lane.b32.xlu2 %v4908_v23, %s4563_s11 }
  0xa8   :  { %v751_v54 = vpop.permute.xlu0 %750 }
  0xa9   :  { %4050 = vmatmul.msk.bf16.vlgmr.msra.gmra.mxu1 %vm78_vm0, %v4860_v21  ;;  %4052 = vmatmul.msk.bf16.vlgmr.msra.gmra.mxu3 %vm78_vm0, %v68_v46  ;;  %v772_v2 = vpop.permute.xlu1 %771  ;;  %v714_v21 = vand.u32 %v709_v50, %v4892_v52  ;;  %v730_v60 = vpop.permute.xlu2 %729  ;;  %v756_v29 = vand.u32 %v751_v54, %v4892_v52 }
  0xaa   :  { %639 = vmatpush.bf16.msra.mxu0 %v630_v6  ;;  %702 = vmatpush.bf16.msra.mxu3 %v693_v58  ;;  %v777_v36 = vand.u32 %v772_v2, %v4892_v52  ;;  %v735_v37 = vand.u32 %v730_v60, %v4892_v52 }
  0xac   :  { %1335 = vrot.lane.b32.xlu0 %v4741_v47, %s4562_s0 }
  0xae   :  { %1125 = vrot.lane.b32.xlu2 %v4920_v51, %s4563_s11 }
  0xb0   :  { %v4985_v38 = vpop.permute.xlu0 %834 }
  0xb1   :  { %4055 = vmatmul.msk.bf16.vlgmr.msrb.gmra.mxu2 %vm78_vm0, %v4843_v4  ;;  %4053 = vmatmul.msk.bf16.vlgmr.msrb.gmra.mxu0 %vm78_vm0, %v69_v30  ;;  %v646_v46 = vpop.permute.xlu1 %645  ;;  %v1383_v4 = vunpack.c.l.b16 %v72_v59  ;;  %v4954_v30 = vpop.permute.xlu2 %918 }
  0xb2   :  { %723 = vmatpush.bf16.msrb.mxu0 %v714_v21  ;;  %v651_v45 = vand.u32 %v646_v46, %v4892_v52  ;;  %765 = vmatpush.bf16.msrb.mxu2 %v756_v29 }
  0xb3   :  { %v4946_v62 = vpack.c.b16 %v1383_v4, %v1383_v4 }
  0xb4   :  { %660 = vmatpush.bf16.msra.mxu1 %v651_v45 }
  0xb5   :  { %6816 = vst [vmem:[#allocation22_spill] sm:$0xff] %v4946_v62 }
  0xb6   :  { %1205 = vrot.lane.b32.xlu2 %v4725_v43, %s4562_s0 }
  0xb9   :  { %4054 = vmatmul.msk.bf16.vlgmr.msrb.gmra.mxu1 %vm78_vm0, %v4935_v61  ;;  %4056 = vmatmul.msk.bf16.vlgmr.msrb.gmra.mxu3 %vm78_vm0, %v72_v59  ;;  %v4956_v0 = vpop.permute.xlu2 %939  ;;  %v4967_v6 = vpop.permute.xlu1 %813 }
  0xba   :  { %744 = vmatpush.bf16.msrb.mxu1 %v735_v37  ;;  %786 = vmatpush.bf16.msrb.mxu3 %v777_v36  ;;  %v4999_v36 = vpop.permute.xlu0 %1049 }
  0xbe   :  { %1385 = vrot.lane.b32.xlu2 %v4946_v62, %s4563_s11 }
  0xc1   :  { %v4958_v1 = vpop.permute.xlu2 %792  ;;  %v4975_v58 = vpop.permute.xlu1 %897 }
  0xc6   :  { %1309 = vrot.lane.b32.xlu2 %v4723_v42, %s4562_s0 }
  0xc9   :  { %v4965_v13 = vpop.permute.xlu2 %1075  ;;  %v4983_v18 = vpop.permute.xlu1 %997 }
  0xd1   :  { %v4973_v31 = vpop.permute.xlu2 %1047  ;;  %v4993_v59 = vpop.permute.xlu1 %1177 }
  0xd2   :  { %6818 = vst [vmem:[#allocation24_spill] sm:$0xff] %v4993_v59 }
  0xd9   :  { %v4981_v55 = vpop.permute.xlu2 %1073  ;;  %v5003_v54 = vpop.permute.xlu1 %1257 }
  0xda   :  { %6817 = vst [vmem:[#allocation23_spill] sm:$0xff] %v4981_v55 }
  0xe1   :  { %v4991_v49 = vpop.permute.xlu2 %1153  ;;  %v5021_v12 = vpop.permute.xlu1 %1127 }
  0xe6   :  { %v4961_v5 = vpop.f32.mrf.mxu0 }
  0xe7   :  { %v459_v11 = vsel %vm458_vm3, %v4961_v5, -inf }
  0xe8   :  { %460 = vmax.xlane.f32.xlu1 %v459_v11 }
  0xe9   :  { %v5001_v37 = vpop.permute.xlu2 %1023 }
  0xee   :  { %v96_v22 = vpop.f32.mrf.mxu0  ;;  %v4969_v20 = vpop.f32.mrf.mxu1 }
  0xef   :  { %v462_v27 = vsel %vm458_vm3, %v4969_v20, -inf }
  0xf0   :  { %463 = vmax.xlane.f32.xlu2 %v462_v27 }
  0xf6   :  { %v4977_v41 = vpop.f32.mrf.mxu0  ;;  %v120_v2 = vpop.f32.mrf.mxu1 }
  0xf7   :  { %v471_v50 = vsel %vm458_vm3, %v4977_v41, -inf }
  0xf8   :  { %472 = vmax.xlane.f32.xlu1 %v471_v50  ;;  %v5013_v50 = vpop.permute.xlu0 %876 }
  0xfe   :  { %v192_v53 = vpop.f32.mrf.mxu0 }
 0x104   :  { %v4987_v21 = vpop.f32.mrf.mxu2 }
 0x105   :  { %v465_v46 = vsel %vm458_vm3, %v4987_v21, -inf }
 0x106   :  { %466 = vmax.xlane.f32.xlu0 %v465_v46 }
 0x10c   :  { %v144_v45 = vpop.f32.mrf.mxu2  ;;  %v4995_v60 = vpop.f32.mrf.mxu3 }
 0x10d   :  { %v468_v4 = vsel %vm458_vm3, %v4995_v60, -inf  ;;  %v5017_v45 = vpop.permute.xlu2 %995 }
 0x10e   :  { %469 = vmax.xlane.f32.xlu2 %v468_v4 }
 0x114   :  { %v168_v29 = vpop.f32.mrf.mxu3  ;;  %v5005_v11 = vpop.f32.mrf.mxu2 }
 0x115   :  { %v477_v22 = vsel %vm458_vm3, %v5005_v11, -inf  ;;  %v5031_v62 = vpop.permute.xlu2 %1283 }
 0x116   :  { %478 = vmax.xlane.f32.xlu0 %v477_v22  ;;  %v5009_v27 = vpop.f32.mrf.mxu1  ;;  %v5023_v22 = vpop.permute.xlu0 %1179 }
 0x117   :  { %v474_v2 = vsel %vm458_vm3, %v5009_v27, -inf }
 0x118   :  { %475 = vmax.xlane.f32.xlu2 %v474_v2 }
 0x11c   :  { %v240_v53 = vpop.f32.mrf.mxu2  ;;  %v5015_v46 = vpop.f32.mrf.mxu3 }
 0x11d   :  { %v480_v4 = vsel %vm458_vm3, %v5015_v46, -inf }
 0x11e   :  { %v216_v29 = vpop.f32.mrf.mxu1  ;;  %481 = vmax.xlane.f32.xlu1 %v480_v4  ;;  %v1331_v4 = vunpack.c.l.b16 %v4935_v61  ;;  %v5038_v51 = vpop.permute.xlu0 %1151 }
 0x11f   :  { %v5036_v29 = vpop.permute.xlu1 %1099  ;;  %v5042_v28 = vpop.f32.mrf.mxu0 }
 0x120   :  { %6819 = vst [vmem:[#allocation25_spill] sm:$0xff] %v5036_v29 }
 0x124   :  { %v5025_v39 = vpop.f32.mrf.mxu2  ;;  %v264_v3 = vpop.f32.mrf.mxu3 }
 0x125   :  { %v489_v2 = vsel %vm458_vm3, %v5025_v39, -inf  ;;  %v5040_v3 = vpack.c.b16 %v1331_v4, %v1331_v4 }
 0x126   :  { %v5029_v53 = vpop.f32.mrf.mxu1  ;;  %490 = vmax.xlane.f32.xlu1 %v489_v2  ;;  %v5046_v2 = vpop.permute.xlu2 %1255 }
 0x127   :  { %v486_v48 = vsel %vm458_vm3, %v5029_v53, -inf  ;;  %6820 = vst [vmem:[#allocation26_spill] sm:$0xff] %v5040_v3  ;;  %v5048_v7 = vpop.permute.xlu1 %1387  ;;  %v5054_v56 = vpop.permute.xlu0 %1021 }
 0x128   :  { %487 = vmax.xlane.f32.xlu0 %v486_v48  ;;  %6821 = vst [vmem:[#allocation27_spill] sm:$0xff] %v5048_v7 }
 0x12c   :  { %v336_v23 = vpop.f32.mrf.mxu2  ;;  %v5062_v57 = vpop.f32.mrf.mxu3 }
 0x12d   :  { %v288_v23 = vpop.f32.mrf.mxu0 }
 0x12e   :  { %v312_v63 = vpop.f32.mrf.mxu1  ;;  %v5056_v4 = vpop.permute.xlu2 %1125 }
 0x12f   :  { %6822 = vst [vmem:[#allocation28_spill] sm:$0xff] %v5056_v4  ;;  %v5060_v63 = vpop.permute.xlu1 %1359  ;;  %v5066_v14 = vpop.permute.xlu0 %1101 }
 0x130   :  { %1333 = vrot.lane.b32.xlu2 %v5040_v3, %s4563_s11 }
 0x134   :  { %v5050_v48 = vpop.f32.mrf.mxu2  ;;  %v360_v47 = vpop.f32.mrf.mxu3 }
 0x135   :  { %v501_v61 = vsel %vm458_vm3, %v5050_v48, -inf  ;;  %v5064_v32 = vpop.f32.mrf.mxu0 }
 0x136   :  { %502 = vmax.xlane.f32.xlu1 %v501_v61  ;;  %v5068_v42 = vpop.f32.mrf.mxu1  ;;  %v5070_v61 = vpop.permute.xlu2 %1205 }
 0x137   :  { %v5072_v40 = vpop.permute.xlu1 %1229  ;;  %v5074_v59 = vpop.permute.xlu0 %1281 }
 0x138   :  { %6823 = vst [vmem:[#allocation29_spill] sm:$0xff] %v5072_v40 }
 0x139   :  { %6824 = vst [vmem:[#allocation30_spill] sm:$0xff] %v5074_v59 }
 0x13c   :  { %1631 = vrot.lane.b32.xlu0 %v4633_v15, %s4565_s12  ;;  %v432_v3 = vpop.f32.mrf.mxu2  ;;  %v5076_v15 = vpop.f32.mrf.mxu3 }
 0x13d   :  { %v384_v23 = vpop.f32.mrf.mxu0 }
 0x13e   :  { %v408_v7 = vpop.f32.mrf.mxu1  ;;  %v5080_v3 = vpop.permute.xlu2 %1385  ;;  %v483_v23 = vsel %vm458_vm3, %v5042_v28, -inf }
 0x13f   :  { %6825 = vst [vmem:[#allocation31_spill] sm:$0xff] %v5080_v3  ;;  %v5082_v43 = vpop.permute.xlu1 %1307  ;;  %v5084_v47 = vpop.permute.xlu0 %1361 }
 0x140   :  { %6826 = vst [vmem:[#allocation32_spill] sm:$0xff] %v5082_v43 }
 0x144   :  { %v456_v4 = vpop.f32.mrf.mxu3 }
 0x145   :  { %v495_v4 = vsel %vm458_vm3, %v5064_v32, -inf }
 0x146   :  { %v5088_v40 = vpop.permute.xlu2 %1309 }
 0x147   :  { %6827 = vst [vmem:[#allocation33_spill] sm:$0xff] %v5088_v40  ;;  %v5091_v7 = vpop.permute.xlu0 %1231 }
 0x14f   :  { %1715 = vrot.lane.b32.xlu1 %v4637_v17, %s4565_s12  ;;  %v492_v17 = vsel %vm458_vm3, %v5062_v57, -inf }
 0x159   :  { %484 = vmax.xlane.f32.xlu2 %v483_v23 }
 0x15b   :  { %v461_v59 = vpop.xlane.xlu1 %460 }
 0x15c   :  { %v507_v29 = vsub.f32 %v4961_v5, %v461_v59  ;;  %v5102_v59 = vpop.permute.xlu0 %1203 }
 0x15d   :  { %6828 = vst [vmem:[#allocation34_spill] sm:$0xff] %v5102_v59  ;;  %v819_v59 = vand.u32 %v4967_v6, %v4892_v52 }
 0x15e   :  { %v523_v44 = vmul.f32 1.442695, %v507_v29 }
 0x160   :  { %4304 = vpow2.f32 %v523_v44  ;;  %v798_v44 = vand.u32 %v4958_v1, %v4892_v52 }
 0x161   :  { %493 = vmax.xlane.f32.xlu2 %v492_v17 }
 0x163   :  { %v464_v3 = vpop.xlane.xlu2 %463 }
 0x164   :  { %v508_v43 = vsub.f32 %v4969_v20, %v464_v3  ;;  %v498_v20 = vsel %vm458_vm3, %v5068_v42, -inf  ;;  %v5112_v55 = vpop.permute.xlu0 %1335 }
 0x166   :  { %v5098_v23 = vpop.eup %4304  ;;  %v525_v40 = vmul.f32 1.442695, %v508_v43  ;;  %496 = vmax.xlane.f32.xlu0 %v495_v4 }
 0x167   :  { %v603_v5 = vpack.c.bf16 %v5098_v23, %v5098_v23 }
 0x168   :  { %4306 = vpow2.f32 %v525_v40  ;;  %v504_v40 = vsel %vm458_vm3, %v5076_v15, -inf }
 0x169   :  { %4057 = vmatmul.msk.bf16.vlgmr.msra.gmra.mxu0 %vm621_vm4, %v603_v5 }
 0x16a   :  { %807 = vmatpush.bf16.msra.mxu0 %v798_v44 }
 0x16b   :  { %v473_v17 = vpop.xlane.xlu1 %472 }
 0x16c   :  { %v511_v43 = vsub.f32 %v4977_v41, %v473_v17  ;;  %v882_v41 = vand.u32 %v5013_v50, %v4892_v52 }
 0x16e   :  { %v4307_v29 = vpop.eup %4306  ;;  %v531_v3 = vmul.f32 1.442695, %v511_v43  ;;  %499 = vmax.xlane.f32.xlu0 %v498_v20 }
 0x16f   :  { %v604_v4 = vpack.c.bf16 %v4307_v29, %v4307_v29  ;;  %v558_v44 = vsel %vm458_vm3, %v4307_v29, 0.0 }
 0x170   :  { %4308 = vpow2.f32 %v531_v3 }
 0x171   :  { %4058 = vmatmul.msk.bf16.vlgmr.msra.gmra.mxu1 %vm621_vm4, %v604_v4  ;;  %v840_v4 = vand.u32 %v4985_v38, %v4892_v52 }
 0x172   :  { %828 = vmatpush.bf16.msra.mxu1 %v819_v59 }
 0x176   :  { %v4309_v1 = vpop.eup %4308  ;;  %505 = vmax.xlane.f32.xlu0 %v504_v40 }
 0x177   :  { %v607_v5 = vpack.c.bf16 %v4309_v1, %v4309_v1  ;;  %v567_v20 = vsel %vm458_vm3, %v4309_v1, 0.0 }
 0x179   :  { %v467_v17 = vpop.xlane.xlu0 %466  ;;  %559 = vadd.xlane.f32.xlu1 %v558_v44  ;;  %4061 = vmatmul.msk.bf16.vlgmr.msrb.gmra.mxu0 %vm621_vm4, %v607_v5 }
 0x17a   :  { %v509_v6 = vsub.f32 %v4987_v21, %v467_v17  ;;  %891 = vmatpush.bf16.msrb.mxu0 %v882_v41  ;;  %1610 = vrot.lane.b32.xlu2 %v4613_v8, %s4565_s12  ;;  %v861_v17 = vand.u32 %v4903_v19, %v4892_v52 }
 0x17c   :  { %v527_v59 = vmul.f32 1.442695, %v509_v6 }
 0x17e   :  { %4310 = vpow2.f32 %v527_v59 }
 0x181   :  { %v470_v43 = vpop.xlane.xlu2 %469  ;;  %568 = vadd.xlane.f32.xlu1 %v567_v20 }
 0x182   :  { %v510_v50 = vsub.f32 %v4995_v60, %v470_v43  ;;  %1694 = vrot.lane.b32.xlu2 %v4617_v10, %s4565_s12 }
 0x184   :  { %v5128_v29 = vpop.eup %4310  ;;  %v529_v3 = vmul.f32 1.442695, %v510_v50 }
 0x185   :  { %v605_v21 = vpack.c.bf16 %v5128_v29, %v5128_v29 }
 0x186   :  { %4312 = vpow2.f32 %v529_v3  ;;  %v924_v3 = vand.u32 %v4954_v30, %v4892_v52 }
 0x187   :  { %4059 = vmatmul.msk.bf16.vlgmr.msra.gmra.mxu2 %vm621_vm4, %v605_v21  ;;  %v903_v21 = vand.u32 %v4975_v58, %v4892_v52 }
 0x188   :  { %849 = vmatpush.bf16.msra.mxu2 %v840_v4 }
 0x189   :  { %v479_v40 = vpop.xlane.xlu0 %478 }
 0x18a   :  { %v513_v1 = vsub.f32 %v5005_v11, %v479_v40  ;;  %1568 = vrot.lane.b32.xlu2 %v4615_v9, %s4565_s12  ;;  %1778 = vrot.lane.b32.xlu0 %v4663_v24, %s4565_s12 }
 0x18b   :  { %v476_v60 = vpop.xlane.xlu2 %475 }
 0x18c   :  { %v5140_v5 = vpop.eup %4312  ;;  %v535_v41 = vmul.f32 1.442695, %v513_v1  ;;  %v512_v44 = vsub.f32 %v5009_v27, %v476_v60 }
 0x18d   :  { %v606_v38 = vpack.c.bf16 %v5140_v5, %v5140_v5 }
 0x18e   :  { %4314 = vpow2.f32 %v535_v41  ;;  %v533_v11 = vmul.f32 1.442695, %v512_v44 }
 0x18f   :  { %4060 = vmatmul.msk.bf16.vlgmr.msra.gmra.mxu3 %vm621_vm4, %v606_v38  ;;  %v945_v38 = vand.u32 %v4956_v0, %v4892_v52  ;;  %v1029_v0 = vsel %vm78_vm0, %v5001_v37, 0  ;;  %v1159_v37 = vsel %vm78_vm0, %v4991_v49, 0 }
 0x190   :  { %4316 = vpow2.f32 %v533_v11  ;;  %870 = vmatpush.bf16.msra.mxu3 %v861_v17 }
 0x191   :  { %v482_v6 = vpop.xlane.xlu1 %481 }
 0x192   :  { %v514_v59 = vsub.f32 %v5015_v46, %v482_v6  ;;  %1589 = vrot.lane.b32.xlu2 %v4635_v16, %s4565_s12 }
 0x193   :  { %v5188_v49 = vpop.permute.xlu2 %1333 }
 0x194   :  { %v4315_v20 = vpop.eup %4314  ;;  %v537_v27 = vmul.f32 1.442695, %v514_v59 }
 0x195   :  { %v609_v43 = vpack.c.bf16 %v4315_v20, %v4315_v20 }
 0x196   :  { %v4317_v50 = vpop.eup %4316  ;;  %4318 = vpow2.f32 %v537_v27 }
 0x197   :  { %v608_v19 = vpack.c.bf16 %v4317_v50, %v4317_v50  ;;  %4063 = vmatmul.msk.bf16.vlgmr.msrb.gmra.mxu2 %vm621_vm4, %v609_v43 }
 0x198   :  { %933 = vmatpush.bf16.msrb.mxu2 %v924_v3 }
 0x199   :  { %4062 = vmatmul.msk.bf16.vlgmr.msrb.gmra.mxu1 %vm621_vm4, %v608_v19  ;;  %v491_v46 = vpop.xlane.xlu1 %490  ;;  %v555_v19 = vsel %vm458_vm3, %v5098_v23, 0.0  ;;  %v570_v23 = vsel %vm458_vm3, %v4317_v50, 0.0 }
 0x19a   :  { %912 = vmatpush.bf16.msrb.mxu1 %v903_v21  ;;  %v517_v4 = vsub.f32 %v5025_v39, %v491_v46  ;;  %v564_v46 = vsel %vm458_vm3, %v5140_v5, 0.0 }
 0x19b   :  { %v488_v40 = vpop.xlane.xlu0 %487 }
 0x19c   :  { %v4319_v1 = vpop.eup %4318  ;;  %v543_v60 = vmul.f32 1.442695, %v517_v4  ;;  %v516_v41 = vsub.f32 %v5029_v53, %v488_v40  ;;  %v1055_v53 = vsel %vm78_vm0, %v4999_v36, 0  ;;  %v573_v4 = vsel %vm458_vm3, %v4315_v20, 0.0 }
 0x19d   :  { %v610_v30 = vpack.c.bf16 %v4319_v1, %v4319_v1  ;;  %v576_v44 = vsel %vm458_vm3, %v4319_v1, 0.0  ;;  %v1263_v40 = vsel %vm78_vm0, %v5003_v54, 0  ;;  %v1367_v54 = vsel %vm78_vm0, %v5084_v47, 0 }
 0x19e   :  { %4320 = vpow2.f32 %v543_v60  ;;  %v541_v58 = vmul.f32 1.442695, %v516_v41  ;;  %577 = vadd.xlane.f32.xlu1 %v576_v44 }
 0x19f   :  { %4064 = vmatmul.msk.bf16.vlgmr.msrb.gmra.mxu3 %vm621_vm4, %v610_v30 }
 0x1a0   :  { %4322 = vpow2.f32 %v541_v58  ;;  %954 = vmatpush.bf16.msrb.mxu3 %v945_v38  ;;  %v1003_v58 = vsel %vm78_vm0, %v4983_v18, 0 }
 0x1a4   :  { %v4321_v17 = vpop.eup %4320 }
 0x1a5   :  { %v613_v39 = vpack.c.bf16 %v4321_v17, %v4321_v17  ;;  %v585_v11 = vsel %vm458_vm3, %v4321_v17, 0.0 }
 0x1a6   :  { %v4323_v6 = vpop.eup %4322  ;;  %586 = vadd.xlane.f32.xlu1 %v585_v11 }
 0x1a7   :  { %v612_v59 = vpack.c.bf16 %v4323_v6, %v4323_v6  ;;  %4067 = vmatmul.msk.bf16.vlgmr.msra.gmra.mxu2 %vm621_vm4, %v613_v39 }
 0x1a8   :  { %1064 = vmatpush.bf16.xpose.msra.mxu2 %v1055_v53 }
 0x1a9   :  { %4066 = vmatmul.msk.bf16.vlgmr.msra.gmra.mxu1 %vm621_vm4, %v612_v59  ;;  %v503_v27 = vpop.xlane.xlu1 %502 }
 0x1aa   :  { %1038 = vmatpush.bf16.xpose.msra.mxu1 %v1029_v0  ;;  %v521_v43 = vsub.f32 %v5050_v48, %v503_v27  ;;  %v561_v48 = vsel %vm458_vm3, %v5128_v29, 0.0  ;;  %v582_v29 = vsel %vm458_vm3, %v4323_v6, 0.0  ;;  %v1081_v6 = vsel %vm78_vm0, %v4965_v13, 0 }
 0x1ab   :  { %v1107_v13 = vsel %vm78_vm0, %v5066_v14, 0 }
 0x1ac   :  { %v551_v3 = vmul.f32 1.442695, %v521_v43 }
 0x1ae   :  { %4324 = vpow2.f32 %v551_v3  ;;  %v5196_v60 = vpop.permute.xlu0 %1631 }
 0x1b4   :  { %v5173_v21 = vpop.eup %4324  ;;  %556 = vadd.xlane.f32.xlu0 %v555_v19 }
 0x1b5   :  { %v617_v36 = vpack.c.bf16 %v5173_v21, %v5173_v21 }
 0x1b7   :  { %4071 = vmatmul.msk.bf16.vlgmr.msrb.gmra.mxu2 %vm621_vm4, %v617_v36 }
 0x1b8   :  { %1168 = vmatpush.bf16.xpose.msrb.mxu2 %v1159_v37 }
 0x1bb   :  { %562 = vadd.xlane.f32.xlu2 %v561_v48 }
 0x1bc   :  { %565 = vadd.xlane.f32.xlu0 %v564_v46 }
 0x1bf   :  { %1652 = vrot.lane.b32.xlu1 %v4665_v25, %s4565_s12 }
 0x1c3   :  { %571 = vadd.xlane.f32.xlu2 %v570_v23 }
 0x1c4   :  { %574 = vadd.xlane.f32.xlu0 %v573_v4 }
 0x1c7   :  { %4075 = vmatmul.msk.bf16.vlgmr.msra.gmra.mxu2 %vm78_vm0, %v4973_v31 }
 0x1c8   :  { %1272 = vmatpush.bf16.xpose.msra.mxu2 %v1263_v40 }
 0x1cc   :  { %v485_v5 = vpop.xlane.xlu2 %484  ;;  %583 = vadd.xlane.f32.xlu0 %v582_v29  ;;  %v597_v29 = vsel %vm458_vm3, %v5173_v21, 0.0  ;;  %v1211_v21 = vsel %vm78_vm0, %v5070_v61, 0  ;;  %v6835_v61 = vld [vmem:[#allocation33_spill] sm:$0xff] }
 0x1cd   :  { %v515_v1 = vsub.f32 %v5042_v28, %v485_v5 }
 0x1cf   :  { %v539_v50 = vmul.f32 1.442695, %v515_v1 }
 0x1d1   :  { %4326 = vpow2.f32 %v539_v50 }
 0x1d4   :  { %v494_v20 = vpop.xlane.xlu2 %493 }
 0x1d5   :  { %v518_v41 = vsub.f32 %v5062_v57, %v494_v20  ;;  %v6833_v20 = vld [vmem:[#allocation23_spill] sm:$0xff] }
 0x1d7   :  { %v4327_v30 = vpop.eup %4326  ;;  %v545_v44 = vmul.f32 1.442695, %v518_v41  ;;  %4079 = vmatmul.msk.bf16.vlgmr.msrb.gmra.mxu2 %vm78_vm0, %v5038_v51  ;;  %v1716_v41 = vpop.permute.xlu1 %1715 }
 0x1d8   :  { %v611_v31 = vpack.c.bf16 %v4327_v30, %v4327_v30  ;;  %1376 = vmatpush.bf16.xpose.msrb.mxu2 %v1367_v54  ;;  %v579_v38 = vsel %vm458_vm3, %v4327_v30, 0.0  ;;  %v6838_v54 = vld [vmem:[#allocation28_spill] sm:$0xff] }
 0x1d9   :  { %4328 = vpow2.f32 %v545_v44  ;;  %580 = vadd.xlane.f32.xlu2 %v579_v38  ;;  %v497_v28 = vpop.xlane.xlu0 %496  ;;  %v6839_v44 = vld [vmem:[#allocation5_spill] sm:$0xff] }
 0x1da   :  { %v519_v57 = vsub.f32 %v5064_v32, %v497_v28  ;;  %4065 = vmatmul.msk.bf16.vlgmr.msra.gmra.mxu0 %vm621_vm4, %v611_v31 }
 0x1db   :  { %1012 = vmatpush.bf16.xpose.msra.mxu0 %v1003_v58 }
 0x1dc   :  { %v547_v47 = vmul.f32 1.442695, %v519_v57  ;;  %v1611_v43 = vpop.permute.xlu2 %1610 }
 0x1dd   :  { %v1616_v36 = vand.u32 %v1611_v43, %v4892_v52 }
 0x1de   :  { %4330 = vpow2.f32 %v547_v47  ;;  %v6843_v47 = vld [vmem:[#allocation27_spill] sm:$0xff] }
 0x1df   :  { %v4329_v17 = vpop.eup %4328 }
 0x1e0   :  { %v614_v39 = vpack.c.bf16 %v4329_v17, %v4329_v17  ;;  %1673 = vrot.lane.b32.xlu0 %v4693_v33, %s4565_s12  ;;  %v588_v51 = vsel %vm458_vm3, %v4329_v17, 0.0  ;;  %v1393_v17 = vsel %vm78_vm0, %v6843_v47, 0 }
 0x1e1   :  { %589 = vadd.xlane.f32.xlu2 %v588_v51  ;;  %v500_v11 = vpop.xlane.xlu0 %499 }
 0x1e2   :  { %v520_v18 = vsub.f32 %v5068_v42, %v500_v11  ;;  %4068 = vmatmul.msk.bf16.vlgmr.msra.gmra.mxu3 %vm621_vm4, %v614_v39  ;;  %v6844_v39 = vld [vmem:[#allocation24_spill] sm:$0xff] }
 0x1e3   :  { %1090 = vmatpush.bf16.xpose.msra.mxu3 %v1081_v6 }
 0x1e4   :  { %v549_v32 = vmul.f32 1.442695, %v520_v18  ;;  %v4331_v53 = vpop.eup %4330  ;;  %v1695_v14 = vpop.permute.xlu2 %1694  ;;  %v6846_v18 = vld [vmem:[#allocation34_spill] sm:$0xff] }
 0x1e5   :  { %v615_v0 = vpack.c.bf16 %v4331_v53, %v4331_v53  ;;  %v1700_v4 = vand.u32 %v1695_v14, %v4892_v52  ;;  %v591_v31 = vsel %vm458_vm3, %v4331_v53, 0.0  ;;  %v6855_v14 = vld [vmem:[#allocation4_spill] sm:$0xff] }
 0x1e6   :  { %4332 = vpow2.f32 %v549_v32  ;;  %v5215_v59 = vpop.f32.mrf.mxu0 }
 0x1e7   :  { %6829 = vst [vmem:[#allocation35_spill] sm:$0xff] %v5215_v59  ;;  %4083 = vmatmul.msk.bf16.vlgmr.msra.gmra.mxu2 %vm78_vm0, %v5046_v2 }
 0x1e8   :  { %1883 = vrot.lane.b32.xlu0 %v4695_v34, %s4565_s12  ;;  %1625 = vmatpush.bf16.msra.mxu2 %v1616_v36  ;;  %v1637_v36 = vand.u32 %v5196_v60, %v4892_v52 }
 0x1e9   :  { %v506_v27 = vpop.xlane.xlu0 %505 }
 0x1ea   :  { %v522_v42 = vsub.f32 %v5076_v15, %v506_v27  ;;  %4069 = vmatmul.msk.bf16.vlgmr.msrb.gmra.mxu0 %vm621_vm4, %v615_v0  ;;  %v1133_v15 = vsel %vm78_vm0, %v5021_v12, 0  ;;  %v1185_v12 = vsel %vm78_vm0, %v5023_v22, 0  ;;  %v1237_v22 = vsel %vm78_vm0, %v5091_v7, 0 }
 0x1eb   :  { %1116 = vmatpush.bf16.xpose.msrb.mxu0 %v1107_v13  ;;  %v1315_v7 = vsel %vm78_vm0, %v6835_v61, 0  ;;  %v6848_v13 = vld [vmem:[#allocation29_spill] sm:$0xff] }
 0x1ec   :  { %v4333_v3 = vpop.eup %4332  ;;  %v553_v19 = vmul.f32 1.442695, %v522_v42  ;;  %v1569_v38 = vpop.permute.xlu2 %1568  ;;  %v6849_v42 = vld [vmem:[#allocation2_spill] sm:$0xff] }
 0x1ed   :  { %v616_v37 = vpack.c.bf16 %v4333_v3, %v4333_v3  ;;  %v594_v2 = vsel %vm458_vm3, %v4333_v3, 0.0  ;;  %v5281_v57 = vpop.xlane.xlu1 %559  ;;  %v1574_v51 = vand.u32 %v1569_v38, %v4892_v52 }
 0x1ee   :  { %4334 = vpow2.f32 %v553_v19  ;;  %v5227_v48 = vpop.f32.mrf.mxu1  ;;  %595 = vadd.xlane.f32.xlu1 %v594_v2  ;;  %v643_v46 = vpop.f32.mrf.mxu0  ;;  %6841 = vst [vmem:[#allocation33_spill] sm:$0xff] %v5281_v57 }
 0x1ef   :  { %6830 = vst [vmem:[#allocation36_spill] sm:$0xff] %v5227_v48  ;;  %4070 = vmatmul.msk.bf16.vlgmr.msrb.gmra.mxu1 %vm621_vm4, %v616_v37  ;;  %v6853_v46 = vld [vmem:[#allocation10_spill] sm:$0xff] }
 0x1f0   :  { %1142 = vmatpush.bf16.xpose.msrb.mxu1 %v1133_v15  ;;  %v6854_v15 = vld [vmem:[#allocation30_spill] sm:$0xff] }
 0x1f4   :  { %v5232_v23 = vpop.eup %4334  ;;  %v1590_v32 = vpop.permute.xlu2 %1589 }
 0x1f5   :  { %6831 = vst [vmem:[#allocation37_spill] sm:$0xff] %v5232_v23  ;;  %v618_v40 = vpack.c.bf16 %v5232_v23, %v5232_v23  ;;  %v1595_v53 = vand.u32 %v1590_v32, %v4892_v52  ;;  %v5297_v0 = vpop.xlane.xlu1 %568 }
 0x1f6   :  { %v664_v5 = vpop.f32.mrf.mxu1  ;;  %598 = vadd.xlane.f32.xlu1 %v597_v29  ;;  %v5239_v1 = vpop.f32.mrf.mxu0  ;;  %6847 = vst [vmem:[#allocation5_spill] sm:$0xff] %v5297_v0  ;;  %v6857_v29 = vld [vmem:[#allocation32_spill] sm:$0xff] }
 0x1f7   :  { %6832 = vst [vmem:[#allocation38_spill] sm:$0xff] %v5239_v1  ;;  %4072 = vmatmul.msk.bf16.vlgmr.msrb.gmra.mxu3 %vm621_vm4, %v618_v40  ;;  %4087 = vmatmul.msk.bf16.vlgmr.msrb.gmra.mxu2 %vm78_vm0, %v5060_v63  ;;  %v1289_v63 = vsel %vm78_vm0, %v5031_v62, 0  ;;  %v1341_v62 = vsel %vm78_vm0, %v5112_v55, 0 }
 0x1f8   :  { %1194 = vmatpush.bf16.xpose.msrb.mxu3 %v1185_v12  ;;  %1709 = vmatpush.bf16.msrb.mxu2 %v1700_v4  ;;  %v6859_v12 = vld [vmem:[#allocation7_spill] sm:$0xff] }
 0x1f9   :  { %1799 = vrot.lane.b32.xlu2 %v4667_v26, %s4565_s12 }
 0x1fa   :  { %4073 = vmatmul.msk.bf16.vlgmr.msra.gmra.mxu0 %vm78_vm0, %v5017_v45  ;;  %v6834_v45 = vld [vmem:[#allocation6_spill] sm:$0xff] }
 0x1fb   :  { %1220 = vmatpush.bf16.xpose.msra.mxu0 %v1211_v21 }
 0x1fc   :  { %v5305_v19 = vpop.permute.xlu0 %1778 }
 0x1fe   :  { %v727_v50 = vpop.f32.mrf.mxu0 }
 0x1ff   :  { %4074 = vmatmul.msk.bf16.vlgmr.msra.gmra.mxu1 %vm78_vm0, %v5054_v56  ;;  %v6837_v56 = vld [vmem:[#allocation25_spill] sm:$0xff] }
 0x200   :  { %1246 = vmatpush.bf16.xpose.msra.mxu1 %v1237_v22  ;;  %v1721_v22 = vand.u32 %v1716_v41, %v4892_v52 }
 0x201   :  { %1862 = vrot.lane.b32.xlu2 %v4697_v35, %s4565_s12 }
 0x207   :  { %4076 = vmatmul.msk.bf16.vlgmr.msra.gmra.mxu3 %vm78_vm0, %v6833_v20  ;;  %v6862_v20 = vld [vmem:[#allocation9_spill] sm:$0xff] }
 0x208   :  { %1298 = vmatpush.bf16.xpose.msra.mxu3 %v1289_v63  ;;  %v6861_v63 = vld [vmem:[#allocation31_spill] sm:$0xff] }
 0x209   :  { %1757 = vrot.lane.b32.xlu2 %v6834_v45, %s4565_s12 }
 0x20a   :  { %v5266_v30 = vpop.f32.mrf.mxu2  ;;  %4077 = vmatmul.msk.bf16.vlgmr.msrb.gmra.mxu0 %vm78_vm0, %v6837_v56 }
 0x20b   :  { %6836 = vst [vmem:[#allocation23_spill] sm:$0xff] %v5266_v30  ;;  %1324 = vmatpush.bf16.xpose.msrb.mxu0 %v1315_v7 }
 0x20f   :  { %4078 = vmatmul.msk.bf16.vlgmr.msrb.gmra.mxu1 %vm78_vm0, %v6838_v54  ;;  %1736 = vrot.lane.b32.xlu1 %v6839_v44, %s4565_s12 }
 0x210   :  { %1350 = vmatpush.bf16.xpose.msrb.mxu1 %v1341_v62  ;;  %v6865_v62 = vld [vmem:[#allocation3_spill] sm:$0xff] }
 0x211   :  { %2076 = vrot.lane.b32.xlu2 %v4617_v10, %s4566_s13  ;;  %v5309_v37 = vpop.xlane.xlu1 %577 }
 0x212   :  { %v685_v28 = vpop.f32.mrf.mxu2  ;;  %v5279_v58 = vpop.f32.mrf.mxu3  ;;  %592 = vadd.xlane.f32.xlu0 %v591_v31  ;;  %6851 = vst [vmem:[#allocation24_spill] sm:$0xff] %v5309_v37 }
 0x213   :  { %6840 = vst [vmem:[#allocation6_spill] sm:$0xff] %v5279_v58 }
 0x216   :  { %v5283_v55 = vpop.f32.mrf.mxu1 }
 0x217   :  { %6842 = vst [vmem:[#allocation25_spill] sm:$0xff] %v5283_v55  ;;  %4080 = vmatmul.msk.bf16.vlgmr.msrb.gmra.mxu3 %vm78_vm0, %v6844_v39  ;;  %1984 = vrot.lane.b32.xlu1 %v4613_v8, %s4566_s13 }
 0x218   :  { %1402 = vmatpush.bf16.xpose.msrb.mxu3 %v1393_v17 }
 0x219   :  { %v5329_v21 = vpop.xlane.xlu1 %586 }
 0x21a   :  { %v706_v11 = vpop.f32.mrf.mxu3  ;;  %v5292_v6 = vpop.f32.mrf.mxu2  ;;  %4081 = vmatmul.msk.bf16.vlgmr.msra.gmra.mxu0 %vm78_vm0, %v6846_v18  ;;  %6860 = vst [vmem:[#allocation10_spill] sm:$0xff] %v5329_v21 }
 0x21b   :  { %6845 = vst [vmem:[#allocation28_spill] sm:$0xff] %v5292_v6  ;;  %1583 = vmatpush.bf16.msra.mxu0 %v1574_v51 }
 0x21e   :  { %v748_v27 = vpop.f32.mrf.mxu1 }
 0x21f   :  { %4082 = vmatmul.msk.bf16.vlgmr.msra.gmra.mxu1 %vm78_vm0, %v6848_v13  ;;  %2007 = vrot.lane.b32.xlu1 %v6849_v42, %s4566_s13 }
 0x220   :  { %1604 = vmatpush.bf16.msra.mxu1 %v1595_v53 }
 0x222   :  { %v769_v43 = vpop.f32.mrf.mxu2  ;;  %v5303_v3 = vpop.f32.mrf.mxu3 }
 0x223   :  { %6850 = vst [vmem:[#allocation27_spill] sm:$0xff] %v5303_v3 }
 0x226   :  { %v5311_v2 = vpop.f32.mrf.mxu1  ;;  %2005 = vrot.lane.b32.xlu0 %v6853_v46, %s4567_s14 }
 0x227   :  { %6852 = vst [vmem:[#allocation34_spill] sm:$0xff] %v5311_v2  ;;  %4084 = vmatmul.msk.bf16.vlgmr.msra.gmra.mxu3 %vm78_vm0, %v6854_v15  ;;  %1820 = vrot.lane.b32.xlu1 %v6855_v14, %s4565_s12  ;;  %v5323_v60 = vpop.xlane.xlu0 %556 }
 0x228   :  { %1646 = vmatpush.bf16.msra.mxu3 %v1637_v36  ;;  %6858 = vst [vmem:[#allocation2_spill] sm:$0xff] %v5323_v60 }
 0x22a   :  { %v790_v4 = vpop.f32.mrf.mxu3  ;;  %v5319_v40 = vpop.f32.mrf.mxu2  ;;  %4085 = vmatmul.msk.bf16.vlgmr.msrb.gmra.mxu0 %vm78_vm0, %v6857_v29 }
 0x22b   :  { %6856 = vst [vmem:[#allocation29_spill] sm:$0xff] %v5319_v40 }
 0x22e   :  { %v832_v5 = vpop.f32.mrf.mxu1 }
 0x22f   :  { %4086 = vmatmul.msk.bf16.vlgmr.msrb.gmra.mxu1 %vm78_vm0, %v5188_v49  ;;  %1841 = vrot.lane.b32.xlu1 %v6859_v12, %s4565_s12  ;;  %v5336_v61 = vpop.xlane.xlu0 %565 }
 0x230   :  { %6863 = vst [vmem:[#allocation30_spill] sm:$0xff] %v5336_v61 }
 0x231   :  { %v1653_v7 = vpop.permute.xlu1 %1652 }
 0x232   :  { %v853_v50 = vpop.f32.mrf.mxu2  ;;  %v1658_v49 = vand.u32 %v1653_v7, %v4892_v52 }
 0x233   :  { %v5366_v50 = vpop.xlane.xlu2 %562 }
 0x234   :  { %1667 = vmatpush.bf16.msrb.mxu0 %v1658_v49  ;;  %6872 = vst [vmem:[#allocation40_spill] sm:$0xff] %v5366_v50 }
 0x237   :  { %4088 = vmatmul.msk.bf16.vlgmr.msrb.gmra.mxu3 %vm78_vm0, %v6861_v63  ;;  %1982 = vrot.lane.b32.xlu1 %v6862_v20, %s4567_s14  ;;  %v5343_v54 = vpop.xlane.xlu0 %574 }
 0x238   :  { %1730 = vmatpush.bf16.msrb.mxu3 %v1721_v22  ;;  %6866 = vst [vmem:[#allocation32_spill] sm:$0xff] %v5343_v54 }
 0x23a   :  { %v5339_v56 = vpop.f32.mrf.mxu2 }
 0x23b   :  { %6864 = vst [vmem:[#allocation4_spill] sm:$0xff] %v5339_v56 }
 0x23f   :  { %2099 = vrot.lane.b32.xlu1 %v6865_v62, %s4566_s13  ;;  %v5349_v28 = vpop.xlane.xlu0 %583 }
 0x240   :  { %6867 = vst [vmem:[#allocation7_spill] sm:$0xff] %v5349_v28  ;;  %v6880_v28 = vld [vmem:[#allocation8_spill] sm:$0xff] }
 0x242   :  { %v937_v41 = vpop.f32.mrf.mxu2 }
 0x24a   :  { %v5345_v31 = vpop.f32.mrf.mxu2 }
 0x24b   :  { %v1414_v38 = vsel %vm458_vm3, %v5345_v31, -inf }
 0x24c   :  { %1415 = vmax.xlane.f32.xlu2 %v1414_v38 }
 0x252   :  { %v1068_v47 = vpop.f32.mrf.mxu2  ;;  %v1674_v17 = vpop.permute.xlu0 %1673 }
 0x253   :  { %v1679_v39 = vand.u32 %v1674_v17, %v4892_v52  ;;  %v5380_v47 = vpop.xlane.xlu2 %571 }
 0x254   :  { %6874 = vst [vmem:[#allocation42_spill] sm:$0xff] %v5380_v47 }
 0x255   :  { %1688 = vmatpush.bf16.msrb.mxu1 %v1679_v39 }
 0x257   :  { %v5352_v51 = vpop.f32.mrf.mxu0 }
 0x258   :  { %6868 = vst [vmem:[#allocation31_spill] sm:$0xff] %v5352_v51 }
 0x25a   :  { %v5354_v11 = vpop.f32.mrf.mxu2 }
 0x25b   :  { %v1426_v39 = vsel %vm458_vm3, %v5354_v11, -inf }
 0x25f   :  { %v811_v18 = vpop.f32.mrf.mxu0 }
 0x262   :  { %v1172_v32 = vpop.f32.mrf.mxu2 }
 0x265   :  { %v5356_v53 = vpop.f32.mrf.mxu3 }
 0x266   :  { %6869 = vst [vmem:[#allocation9_spill] sm:$0xff] %v5356_v53 }
 0x267   :  { %v5358_v27 = vpop.f32.mrf.mxu0 }
 0x268   :  { %6870 = vst [vmem:[#allocation3_spill] sm:$0xff] %v5358_v27 }
 0x26a   :  { %v5360_v13 = vpop.f32.mrf.mxu2 }
 0x26b   :  { %v1438_v43 = vsel %vm458_vm3, %v5360_v13, -inf }
 0x26c   :  { %1439 = vmax.xlane.f32.xlu2 %v1438_v43  ;;  %v5364_v36 = vpop.f32.mrf.mxu1 }
 0x26d   :  { %6871 = vst [vmem:[#allocation39_spill] sm:$0xff] %v5364_v36  ;;  %v874_v15 = vpop.f32.mrf.mxu3 }
 0x26e   :  { %v6875_v15 = vld [vmem:[#allocation15_spill] sm:$0xff] }
 0x26f   :  { %v895_v4 = vpop.f32.mrf.mxu0 }
 0x270   :  { %v5386_v4 = vpop.xlane.xlu2 %580 }
 0x271   :  { %6876 = vst [vmem:[#allocation15_spill] sm:$0xff] %v5386_v4 }
 0x272   :  { %v1276_v29 = vpop.f32.mrf.mxu2 }
 0x274   :  { %v916_v5 = vpop.f32.mrf.mxu1 }
 0x277   :  { %v5368_v22 = vpop.f32.mrf.mxu0 }
 0x278   :  { %v1408_v63 = vsel %vm458_vm3, %v5368_v22, -inf }
 0x279   :  { %1409 = vmax.xlane.f32.xlu1 %v1408_v63 }
 0x27a   :  { %v5372_v7 = vpop.f32.mrf.mxu3  ;;  %v5374_v49 = vpop.f32.mrf.mxu2 }
 0x27b   :  { %6873 = vst [vmem:[#allocation41_spill] sm:$0xff] %v5372_v7  ;;  %v1450_v53 = vsel %vm458_vm3, %v5374_v49, -inf }
 0x27c   :  { %v5376_v41 = vpop.f32.mrf.mxu1 }
 0x27d   :  { %v1411_v38 = vsel %vm458_vm3, %v5376_v41, -inf }
 0x27e   :  { %1412 = vmax.xlane.f32.xlu0 %v1411_v38 }
 0x27f   :  { %v1016_v17 = vpop.f32.mrf.mxu0 }
 0x281   :  { %1427 = vmax.xlane.f32.xlu1 %v1426_v39  ;;  %v5396_v39 = vpop.xlane.xlu2 %589 }
 0x282   :  { %v958_v18 = vpop.f32.mrf.mxu3  ;;  %v1380_v32 = vpop.f32.mrf.mxu2  ;;  %6877 = vst [vmem:[#allocation43_spill] sm:$0xff] %v5396_v39 }
 0x284   :  { %v1042_v43 = vpop.f32.mrf.mxu1  ;;  %1936 = vrot.lane.b32.xlu2 %v6875_v15, %s4567_s14 }
 0x285   :  { %v5400_v43 = vpop.xlane.xlu1 %595 }
 0x286   :  { %6878 = vst [vmem:[#allocation44_spill] sm:$0xff] %v5400_v43 }
 0x287   :  { %v5388_v29 = vpop.f32.mrf.mxu0 }
 0x288   :  { %v1420_v32 = vsel %vm458_vm3, %v5388_v29, -inf }
 0x289   :  { %v5404_v7 = vpop.permute.xlu2 %1799 }
 0x28a   :  { %v5390_v5 = vpop.f32.mrf.mxu3 }
 0x28b   :  { %v1417_v63 = vsel %vm458_vm3, %v5390_v5, -inf }
 0x28c   :  { %v5394_v38 = vpop.f32.mrf.mxu1  ;;  %1418 = vmax.xlane.f32.xlu0 %v1417_v63 }
 0x28d   :  { %v5414_v55 = vpop.xlane.xlu1 %598 }
 0x28e   :  { %6879 = vst [vmem:[#allocation45_spill] sm:$0xff] %v5414_v55 }
 0x28f   :  { %v1120_v17 = vpop.f32.mrf.mxu0 }
 0x290   :  { %v1423_v17 = vsel %vm458_vm3, %v5394_v38, -inf }
 0x291   :  { %v5416_v1 = vpop.permute.xlu2 %1862 }
 0x292   :  { %v1094_v18 = vpop.f32.mrf.mxu3 }
 0x294   :  { %v1146_v27 = vpop.f32.mrf.mxu1  ;;  %1421 = vmax.xlane.f32.xlu0 %v1420_v32 }
 0x295   :  { %v5422_v51 = vpop.permute.xlu1 %1736 }
 0x297   :  { %v5402_v36 = vpop.f32.mrf.mxu0 }
 0x298   :  { %v1432_v6 = vsel %vm458_vm3, %v5402_v36, -inf }
 0x29a   :  { %v5406_v56 = vpop.f32.mrf.mxu3 }
 0x29b   :  { %v1429_v63 = vsel %vm458_vm3, %v5406_v56, -inf }
 0x29c   :  { %v5412_v18 = vpop.f32.mrf.mxu1  ;;  %1430 = vmax.xlane.f32.xlu1 %v1429_v63  ;;  %1424 = vmax.xlane.f32.xlu0 %v1423_v17 }
 0x29d   :  { %v1435_v43 = vsel %vm458_vm3, %v5412_v18, -inf }
 0x29f   :  { %v1224_v27 = vpop.f32.mrf.mxu0 }
 0x2a2   :  { %v1198_v32 = vpop.f32.mrf.mxu3 }
 0x2a3   :  { %v5432_v32 = vpop.permute.xlu2 %1757 }
 0x2a4   :  { %v1250_v3 = vpop.f32.mrf.mxu1  ;;  %1436 = vmax.xlane.f32.xlu0 %v1435_v43  ;;  %1433 = vmax.xlane.f32.xlu1 %v1432_v6  ;;  %v5436_v6 = vpop.permute.xlu1 %1984 }
 0x2a7   :  { %v5424_v2 = vpop.f32.mrf.mxu0 }
 0x2a8   :  { %v1444_v30 = vsel %vm458_vm3, %v5424_v2, -inf }
 0x2aa   :  { %v5426_v63 = vpop.f32.mrf.mxu3 }
 0x2ab   :  { %v1441_v17 = vsel %vm458_vm3, %v5426_v63, -inf  ;;  %v5438_v37 = vpop.permute.xlu2 %2076 }
 0x2ac   :  { %v5430_v27 = vpop.f32.mrf.mxu1  ;;  %1442 = vmax.xlane.f32.xlu1 %v1441_v17  ;;  %v5444_v54 = vpop.permute.xlu1 %2007 }
 0x2ad   :  { %v1447_v55 = vsel %vm458_vm3, %v5430_v27, -inf }
 0x2ae   :  { %1448 = vmax.xlane.f32.xlu2 %v1447_v55 }
 0x2af   :  { %v1328_v3 = vpop.f32.mrf.mxu0 }
 0x2b2   :  { %v1302_v43 = vpop.f32.mrf.mxu3 }
 0x2b4   :  { %v1354_v47 = vpop.f32.mrf.mxu1  ;;  %v5449_v43 = vpop.permute.xlu1 %1820 }
 0x2b8   :  { %1961 = vrot.lane.b32.xlu0 %v4635_v16, %s4566_s13 }
 0x2ba   :  { %v5442_v0 = vpop.f32.mrf.mxu3 }
 0x2bf   :  { %v1416_v17 = vpop.xlane.xlu2 %1415 }
 0x2c0   :  { %v1458_v4 = vsub.f32 %v5345_v31, %v1416_v17  ;;  %2097 = vrot.lane.b32.xlu0 %v6880_v28, %s4567_s14  ;;  %v1784_v31 = vand.u32 %v5305_v19, %v4892_v52  ;;  %v5464_v17 = vpop.permute.xlu1 %1841 }
 0x2c2   :  { %v1476_v55 = vmul.f32 1.442695, %v1458_v4  ;;  %v1406_v3 = vpop.f32.mrf.mxu3  ;;  %v6882_v4 = vld [vmem:[#allocation12_spill] sm:$0xff] }
 0x2c3   :  { %v5468_v3 = vpop.permute.xlu0 %1883 }
 0x2c4   :  { %4336 = vpow2.f32 %v1476_v55  ;;  %v6883_v55 = vld [vmem:[#allocation13_spill] sm:$0xff] }
 0x2c5   :  { %1938 = vrot.lane.b32.xlu1 %v4615_v9, %s4566_s13 }
 0x2c6   :  { %2191 = vrot.lane.b32.xlu2 %v4667_v26, %s4566_s13 }
 0x2c8   :  { %v5470_v48 = vpop.permute.xlu1 %1982 }
 0x2ca   :  { %v5455_v47 = vpop.eup %4336 }
 0x2cb   :  { %6881 = vst [vmem:[#allocation8_spill] sm:$0xff] %v5455_v47  ;;  %v1554_v59 = vpack.c.bf16 %v5455_v47, %v5455_v47  ;;  %v5474_v58 = vpop.xlane.xlu0 %592 }
 0x2cc   :  { %6884 = vst [vmem:[#allocation12_spill] sm:$0xff] %v5474_v58  ;;  %v1453_v58 = vsel %vm458_vm3, %v5442_v0, -inf }
 0x2cd   :  { %4091 = vmatmul.msk.bf16.vlgmr.msra.gmra.mxu2 %vm621_vm4, %v1554_v59  ;;  %2074 = vrot.lane.b32.xlu1 %v6882_v4, %s4567_s14  ;;  %v6885_v59 = vld [vmem:[#allocation17_spill] sm:$0xff] }
 0x2ce   :  { %1793 = vmatpush.bf16.msra.mxu2 %v1784_v31 }
 0x2d0   :  { %v5476_v19 = vpop.permute.xlu1 %2099 }
 0x2d3   :  { %v5480_v31 = vpop.permute.xlu0 %2005 }
 0x2d5   :  { %1959 = vrot.lane.b32.xlu1 %v6883_v55, %s4567_s14 }
 0x2dd   :  { %2030 = vrot.lane.b32.xlu1 %v4665_v25, %s4566_s13 }
 0x2e5   :  { %2189 = vrot.lane.b32.xlu1 %v6885_v59, %s4567_s14 }
 0x2ea   :  { %1445 = vmax.xlane.f32.xlu0 %v1444_v30 }
 0x2ec   :  { %v1410_v60 = vpop.xlane.xlu1 %1409 }
 0x2ed   :  { %v1456_v57 = vsub.f32 %v5368_v22, %v1410_v60  ;;  %2260 = vrot.lane.b32.xlu1 %v4697_v35, %s4566_s13 }
 0x2ef   :  { %v1472_v61 = vmul.f32 1.442695, %v1456_v57  ;;  %1454 = vmax.xlane.f32.xlu2 %v1453_v58 }
 0x2f1   :  { %4338 = vpow2.f32 %v1472_v61  ;;  %v1413_v50 = vpop.xlane.xlu0 %1412  ;;  %v1742_v61 = vand.u32 %v5422_v51, %v4892_v52 }
 0x2f2   :  { %v1457_v40 = vsub.f32 %v5376_v41, %v1413_v50  ;;  %1451 = vmax.xlane.f32.xlu0 %v1450_v53  ;;  %v6887_v50 = vld [vmem:[#allocation21_spill] sm:$0xff]  ;;  %v1763_v41 = vand.u32 %v5432_v32, %v4892_v52 }
 0x2f4   :  { %v1474_v30 = vmul.f32 1.442695, %v1457_v40  ;;  %v1428_v39 = vpop.xlane.xlu1 %1427 }
 0x2f5   :  { %v1462_v60 = vsub.f32 %v5354_v11, %v1428_v39  ;;  %2145 = vrot.lane.b32.xlu1 %v6834_v45, %s4566_s13  ;;  %v1440_v11 = vpop.xlane.xlu2 %1439 }
 0x2f6   :  { %4340 = vpow2.f32 %v1474_v30  ;;  %v1466_v51 = vsub.f32 %v5360_v13, %v1440_v11  ;;  %v6889_v11 = vld [vmem:[#allocation19_spill] sm:$0xff] }
 0x2f7   :  { %v5495_v22 = vpop.eup %4338  ;;  %v1484_v57 = vmul.f32 1.442695, %v1462_v60 }
 0x2f8   :  { %v1552_v58 = vpack.c.bf16 %v5495_v22, %v5495_v22  ;;  %v1492_v32 = vmul.f32 1.442695, %v1466_v51  ;;  %v1805_v51 = vand.u32 %v5404_v7, %v4892_v52 }
 0x2f9   :  { %4342 = vpow2.f32 %v1484_v57 }
 0x2fa   :  { %4089 = vmatmul.msk.bf16.vlgmr.msra.gmra.mxu0 %vm621_vm4, %v1552_v58  ;;  %v1868_v58 = vand.u32 %v5416_v1, %v4892_v52 }
 0x2fb   :  { %1751 = vmatpush.bf16.msra.mxu0 %v1742_v61 }
 0x2fc   :  { %v5502_v40 = vpop.eup %4340 }
 0x2fd   :  { %6886 = vst [vmem:[#allocation13_spill] sm:$0xff] %v5502_v40  ;;  %v1553_v53 = vpack.c.bf16 %v5502_v40, %v5502_v40  ;;  %2120 = vrot.lane.b32.xlu1 %v6887_v50, %s4567_s14 }
 0x2ff   :  { %v5510_v39 = vpop.eup %4342  ;;  %4090 = vmatmul.msk.bf16.vlgmr.msra.gmra.mxu1 %vm621_vm4, %v1553_v53  ;;  %v1419_v30 = vpop.xlane.xlu0 %1418 }
 0x300   :  { %6888 = vst [vmem:[#allocation17_spill] sm:$0xff] %v5510_v39  ;;  %v1558_v60 = vpack.c.bf16 %v5510_v39, %v5510_v39  ;;  %1772 = vmatpush.bf16.msra.mxu1 %v1763_v41  ;;  %v1459_v57 = vsub.f32 %v5390_v5, %v1419_v30 }
 0x302   :  { %v1478_v61 = vmul.f32 1.442695, %v1459_v57  ;;  %4095 = vmatmul.msk.bf16.vlgmr.msrb.gmra.mxu2 %vm621_vm4, %v1558_v60  ;;  %v6892_v57 = vld [vmem:[#allocation20_spill] sm:$0xff] }
 0x303   :  { %1877 = vmatpush.bf16.msrb.mxu2 %v1868_v58 }
 0x304   :  { %4344 = vpow2.f32 %v1478_v61 }
 0x305   :  { %2237 = vrot.lane.b32.xlu1 %v6859_v12, %s4566_s13  ;;  %4346 = vpow2.f32 %v1492_v32 }
 0x306   :  { %2168 = vrot.lane.b32.xlu0 %v4663_v24, %s4566_s13 }
 0x307   :  { %v1422_v13 = vpop.xlane.xlu0 %1421  ;;  %2166 = vrot.lane.b32.xlu2 %v6889_v11, %s4567_s14 }
 0x308   :  { %v1460_v5 = vsub.f32 %v5388_v29, %v1422_v13  ;;  %v1990_v13 = vsel %vm78_vm0, %v5436_v6, 0 }
 0x30a   :  { %v5527_v1 = vpop.eup %4344  ;;  %v1480_v53 = vmul.f32 1.442695, %v1460_v5 }
 0x30b   :  { %6890 = vst [vmem:[#allocation21_spill] sm:$0xff] %v5527_v1  ;;  %v1555_v41 = vpack.c.bf16 %v5527_v1, %v5527_v1  ;;  %v5533_v30 = vpop.eup %4346 }
 0x30c   :  { %4348 = vpow2.f32 %v1480_v53  ;;  %6891 = vst [vmem:[#allocation19_spill] sm:$0xff] %v5533_v30  ;;  %v1562_v7 = vpack.c.bf16 %v5533_v30, %v5533_v30 }
 0x30d   :  { %4092 = vmatmul.msk.bf16.vlgmr.msra.gmra.mxu3 %vm621_vm4, %v1555_v41  ;;  %2485 = vrot.lane.b32.xlu1 %v4635_v16, %s4568_s15 }
 0x30e   :  { %1814 = vmatpush.bf16.msra.mxu3 %v1805_v51  ;;  %2053 = vrot.lane.b32.xlu0 %v4693_v33, %s4566_s13  ;;  %v1826_v51 = vand.u32 %v5449_v43, %v4892_v52 }
 0x30f   :  { %v1431_v29 = vpop.xlane.xlu1 %1430  ;;  %v1425_v60 = vpop.xlane.xlu0 %1424  ;;  %2051 = vrot.lane.b32.xlu2 %v6892_v57, %s4567_s14 }
 0x310   :  { %v1463_v58 = vsub.f32 %v5406_v56, %v1431_v29  ;;  %v1461_v61 = vsub.f32 %v5394_v38, %v1425_v60  ;;  %v6894_v56 = vld [vmem:[#allocation11_spill] sm:$0xff] }
 0x312   :  { %v5546_v32 = vpop.eup %4348  ;;  %v1486_v5 = vmul.f32 1.442695, %v1463_v58  ;;  %v1482_v53 = vmul.f32 1.442695, %v1461_v61  ;;  %4099 = vmatmul.msk.bf16.vlgmr.msra.gmra.mxu2 %vm621_vm4, %v1562_v7 }
 0x313   :  { %6893 = vst [vmem:[#allocation20_spill] sm:$0xff] %v5546_v32  ;;  %v1556_v41 = vpack.c.bf16 %v5546_v32, %v5546_v32  ;;  %1999 = vmatpush.bf16.xpose.msra.mxu2 %v1990_v13  ;;  %v1889_v13 = vand.u32 %v5468_v3, %v4892_v52  ;;  %v5582_v3 = vpop.permute.xlu2 %1936 }
 0x314   :  { %4350 = vpow2.f32 %v1486_v5 }
 0x315   :  { %4352 = vpow2.f32 %v1482_v53  ;;  %4093 = vmatmul.msk.bf16.vlgmr.msrb.gmra.mxu0 %vm621_vm4, %v1556_v41  ;;  %2548 = vrot.lane.b32.xlu1 %v4665_v25, %s4568_s15  ;;  %v1847_v53 = vand.u32 %v5464_v17, %v4892_v52  ;;  %v6897_v17 = vld [vmem:[#allocation22_spill] sm:$0xff] }
 0x316   :  { %1835 = vmatpush.bf16.msrb.mxu0 %v1826_v51  ;;  %2028 = vrot.lane.b32.xlu0 %v6894_v56, %s4567_s14 }
 0x317   :  { %v1434_v38 = vpop.xlane.xlu1 %1433  ;;  %2122 = vrot.lane.b32.xlu2 %v6839_v44, %s4566_s13  ;;  %v1437_v6 = vpop.xlane.xlu0 %1436 }
 0x318   :  { %v1464_v29 = vsub.f32 %v5402_v36, %v1434_v38  ;;  %v1465_v61 = vsub.f32 %v5412_v18, %v1437_v6 }
 0x31a   :  { %v5563_v60 = vpop.eup %4350  ;;  %v1488_v43 = vmul.f32 1.442695, %v1464_v29  ;;  %v1490_v36 = vmul.f32 1.442695, %v1465_v61  ;;  %v6899_v29 = vld [vmem:[#allocation14_spill] sm:$0xff] }
 0x31b   :  { %6895 = vst [vmem:[#allocation11_spill] sm:$0xff] %v5563_v60  ;;  %v5565_v7 = vpop.eup %4352  ;;  %v1559_v58 = vpack.c.bf16 %v5563_v60, %v5563_v60 }
 0x31c   :  { %6896 = vst [vmem:[#allocation46_spill] sm:$0xff] %v5565_v7  ;;  %v1557_v5 = vpack.c.bf16 %v5565_v7, %v5565_v7  ;;  %4354 = vpow2.f32 %v1488_v43 }
 0x31d   :  { %4096 = vmatmul.msk.bf16.vlgmr.msrb.gmra.mxu3 %vm621_vm4, %v1559_v58  ;;  %2695 = vrot.lane.b32.xlu1 %v4667_v26, %s4568_s15  ;;  %4356 = vpow2.f32 %v1490_v36 }
 0x31e   :  { %4094 = vmatmul.msk.bf16.vlgmr.msrb.gmra.mxu1 %vm621_vm4, %v1557_v5  ;;  %1898 = vmatpush.bf16.msrb.mxu3 %v1889_v13 }
 0x31f   :  { %1856 = vmatpush.bf16.msrb.mxu1 %v1847_v53  ;;  %2283 = vrot.lane.b32.xlu0 %v4695_v34, %s4566_s13  ;;  %v1443_v18 = vpop.xlane.xlu1 %1442 }
 0x320   :  { %v1467_v41 = vsub.f32 %v5426_v63, %v1443_v18  ;;  %2281 = vrot.lane.b32.xlu2 %v6897_v17, %s4567_s14  ;;  %v2013_v18 = vsel %vm78_vm0, %v5444_v54, 0 }
 0x321   :  { %v1449_v63 = vpop.xlane.xlu2 %1448 }
 0x322   :  { %v1494_v51 = vmul.f32 1.442695, %v1467_v41  ;;  %v5587_v38 = vpop.eup %4354  ;;  %v1469_v5 = vsub.f32 %v5430_v27, %v1449_v63  ;;  %v6903_v27 = vld [vmem:[#allocation26_spill] sm:$0xff] }
 0x323   :  { %6898 = vst [vmem:[#allocation22_spill] sm:$0xff] %v5587_v38  ;;  %v1560_v6 = vpack.c.bf16 %v5587_v38, %v5587_v38  ;;  %v5598_v43 = vpop.eup %4356  ;;  %v6904_v63 = vld [vmem:[#allocation18_spill] sm:$0xff] }
 0x324   :  { %4358 = vpow2.f32 %v1494_v51  ;;  %6900 = vst [vmem:[#allocation14_spill] sm:$0xff] %v5598_v43  ;;  %v1561_v53 = vpack.c.bf16 %v5598_v43, %v5598_v43  ;;  %v1498_v41 = vmul.f32 1.442695, %v1469_v5  ;;  %v6902_v51 = vld [vmem:[#allocation16_spill] sm:$0xff] }
 0x325   :  { %2653 = vrot.lane.b32.xlu1 %v6834_v45, %s4568_s15  ;;  %4097 = vmatmul.msk.bf16.vlgmr.msra.gmra.mxu0 %vm621_vm4, %v1560_v6 }
 0x326   :  { %4360 = vpow2.f32 %v1498_v41 }
 0x327   :  { %2258 = vrot.lane.b32.xlu0 %v6899_v29, %s4567_s14 }
 0x328   :  { %2214 = vrot.lane.b32.xlu2 %v6855_v14, %s4566_s13 }
 0x32a   :  { %v5600_v58 = vpop.eup %4358  ;;  %v1962_v61 = vpop.permute.xlu0 %1961 }
 0x32b   :  { %6901 = vst [vmem:[#allocation47_spill] sm:$0xff] %v5600_v58  ;;  %v1563_v13 = vpack.c.bf16 %v5600_v58, %v5600_v58  ;;  %v1967_v36 = vsel %vm78_vm0, %v1962_v61, 0 }
 0x32c   :  { %v5621_v61 = vpop.eup %4360 }
 0x32d   :  { %4100 = vmatmul.msk.bf16.vlgmr.msra.gmra.mxu3 %vm621_vm4, %v1563_v13  ;;  %6905 = vst [vmem:[#allocation16_spill] sm:$0xff] %v5621_v61  ;;  %v1565_v13 = vpack.c.bf16 %v5621_v61, %v5621_v61 }
 0x32e   :  { %4098 = vmatmul.msk.bf16.vlgmr.msra.gmra.mxu1 %vm621_vm4, %v1561_v53  ;;  %2022 = vmatpush.bf16.xpose.msra.mxu3 %v2013_v18 }
 0x32f   :  { %2143 = vrot.lane.b32.xlu0 %v6902_v51, %s4567_s14  ;;  %1976 = vmatpush.bf16.xpose.msra.mxu1 %v1967_v36 }
 0x330   :  { %2235 = vrot.lane.b32.xlu2 %v6903_v27, %s4567_s14 }
 0x332   :  { %v5643_v18 = vpop.permute.xlu0 %2097 }
 0x337   :  { %v1939_v6 = vpop.permute.xlu1 %1938  ;;  %2212 = vrot.lane.b32.xlu0 %v6904_v63, %s4567_s14 }
 0x338   :  { %v1944_v54 = vsel %vm78_vm0, %v1939_v6, 0  ;;  %2506 = vrot.lane.b32.xlu2 %v4613_v8, %s4568_s15 }
 0x339   :  { %1953 = vmatpush.bf16.xpose.msra.mxu0 %v1944_v54  ;;  %v2192_v54 = vpop.permute.xlu2 %2191 }
 0x33e   :  { %4102 = vmatmul.msk.bf16.vlgmr.msrb.gmra.mxu1 %vm621_vm4, %v1565_v13 }
 0x33f   :  { %2464 = vrot.lane.b32.xlu0 %v4615_v9, %s4568_s15  ;;  %v5630_v5 = vpop.permute.xlu1 %2074 }
 0x340   :  { %2527 = vrot.lane.b32.xlu2 %v6849_v42, %s4568_s15 }
 0x347   :  { %2611 = vrot.lane.b32.xlu0 %v6865_v62, %s4568_s15  ;;  %v1960_v53 = vpop.permute.xlu1 %1959 }
 0x348   :  { %2590 = vrot.lane.b32.xlu2 %v4617_v10, %s4568_s15 }
 0x34e   :  { %4106 = vmatmul.msk.bf16.vlgmr.msra.gmra.mxu1 %vm78_vm0, %v1960_v53 }
 0x34f   :  { %2674 = vrot.lane.b32.xlu0 %v4663_v24, %s4568_s15  ;;  %v2031_v6 = vpop.permute.xlu1 %2030 }
 0x350   :  { %v5639_v36 = vpop.f32.mrf.mxu2  ;;  %2569 = vrot.lane.b32.xlu2 %v4693_v33, %s4568_s15 }
 0x351   :  { %6906 = vst [vmem:[#allocation26_spill] sm:$0xff] %v5639_v36 }
 0x357   :  { %2632 = vrot.lane.b32.xlu0 %v6839_v44, %s4568_s15  ;;  %v5654_v61 = vpop.permute.xlu1 %2189 }
 0x358   :  { %v1629_v41 = vpop.f32.mrf.mxu2  ;;  %2758 = vrot.lane.b32.xlu2 %v4697_v35, %s4568_s15 }
 0x35d   :  { %v1446_v13 = vpop.xlane.xlu0 %1445 }
 0x35e   :  { %v1468_v53 = vsub.f32 %v5424_v2, %v1446_v13 }
 0x35f   :  { %2779 = vrot.lane.b32.xlu0 %v4695_v34, %s4568_s15 }
 0x360   :  { %v1496_v21 = vmul.f32 1.442695, %v1468_v53  ;;  %2716 = vrot.lane.b32.xlu2 %v6855_v14, %s4568_s15 }
 0x362   :  { %4362 = vpow2.f32 %v1496_v21  ;;  %v1455_v36 = vpop.xlane.xlu2 %1454  ;;  %v2036_v21 = vsel %vm78_vm0, %v2031_v6, 0 }
 0x363   :  { %v1471_v41 = vsub.f32 %v5442_v0, %v1455_v36  ;;  %v2261_v0 = vpop.permute.xlu1 %2260 }
 0x365   :  { %v1502_v30 = vmul.f32 1.442695, %v1471_v41  ;;  %v1452_v60 = vpop.xlane.xlu0 %1451  ;;  %v2082_v41 = vsel %vm78_vm0, %v5438_v37, 0 }
 0x366   :  { %v1470_v58 = vsub.f32 %v5374_v49, %v1452_v60 }
 0x367   :  { %4364 = vpow2.f32 %v1502_v30 }
 0x368   :  { %v5658_v32 = vpop.eup %4362  ;;  %v1500_v2 = vmul.f32 1.442695, %v1470_v58  ;;  %2737 = vrot.lane.b32.xlu2 %v6859_v12, %s4568_s15  ;;  %v2105_v58 = vsel %vm78_vm0, %v5476_v19, 0 }
 0x369   :  { %6907 = vst [vmem:[#allocation18_spill] sm:$0xff] %v5658_v32  ;;  %v1564_v13 = vpack.c.bf16 %v5658_v32, %v5658_v32 }
 0x36a   :  { %4366 = vpow2.f32 %v1500_v2  ;;  %v5665_v53 = vpop.permute.xlu2 %2166 }
 0x36b   :  { %4101 = vmatmul.msk.bf16.vlgmr.msrb.gmra.mxu0 %vm621_vm4, %v1564_v13  ;;  %v2146_v2 = vpop.permute.xlu1 %2145 }
 0x36c   :  { %2045 = vmatpush.bf16.xpose.msrb.mxu0 %v2036_v21 }
 0x36d   :  { %v5668_v49 = vpop.eup %4364 }
 0x36e   :  { %6908 = vst [vmem:[#allocation48_spill] sm:$0xff] %v5668_v49  ;;  %v1567_v30 = vpack.c.bf16 %v5668_v49, %v5668_v49 }
 0x370   :  { %v5672_v60 = vpop.eup %4366  ;;  %4104 = vmatmul.msk.bf16.vlgmr.msrb.gmra.mxu3 %vm621_vm4, %v1567_v30  ;;  %2880 = vrot.lane.b32.xlu2 %v4613_v8, %s4569_s16 }
 0x371   :  { %6909 = vst [vmem:[#allocation49_spill] sm:$0xff] %v5672_v60  ;;  %v1566_v36 = vpack.c.bf16 %v5672_v60, %v5672_v60  ;;  %2114 = vmatpush.bf16.xpose.msrb.mxu3 %v2105_v58 }
 0x372   :  { %v2052_v6 = vpop.permute.xlu2 %2051 }
 0x373   :  { %4103 = vmatmul.msk.bf16.vlgmr.msrb.gmra.mxu2 %vm621_vm4, %v1566_v36  ;;  %v2197_v36 = vsel %vm78_vm0, %v2192_v54, 0  ;;  %v2121_v49 = vpop.permute.xlu1 %2120 }
 0x374   :  { %2091 = vmatpush.bf16.xpose.msrb.mxu2 %v2082_v41 }
 0x377   :  { %v5684_v13 = vpop.f32.mrf.mxu0 }
 0x378   :  { %6910 = vst [vmem:[#allocation50_spill] sm:$0xff] %v5684_v13  ;;  %v2169_v19 = vpop.permute.xlu0 %2168  ;;  %2903 = vrot.lane.b32.xlu2 %v6849_v42, %s4569_s16  ;;  %v2151_v13 = vsel %vm78_vm0, %v2146_v2, 0 }
 0x37a   :  { %v2123_v21 = vpop.permute.xlu2 %2122 }
 0x37b   :  { %4105 = vmatmul.msk.bf16.vlgmr.msra.gmra.mxu0 %vm78_vm0, %v5582_v3  ;;  %v2128_v30 = vsel %vm78_vm0, %v2123_v21, 0  ;;  %v2174_v3 = vsel %vm78_vm0, %v2169_v19, 0 }
 0x37c   :  { %v5691_v58 = vpop.f32.mrf.mxu1  ;;  %2137 = vmatpush.bf16.xpose.msra.mxu0 %v2128_v30 }
 0x37d   :  { %6911 = vst [vmem:[#allocation51_spill] sm:$0xff] %v5691_v58 }
 0x37f   :  { %v1587_v37 = vpop.f32.mrf.mxu0 }
 0x380   :  { %4108 = vmatmul.msk.bf16.vlgmr.msra.gmra.mxu3 %vm78_vm0, %v5480_v31  ;;  %v2054_v41 = vpop.permute.xlu0 %2053  ;;  %2878 = vrot.lane.b32.xlu2 %v6862_v20, %s4570_s17  ;;  %v2238_v37 = vpop.permute.xlu1 %2237 }
 0x381   :  { %2206 = vmatpush.bf16.xpose.msra.mxu3 %v2197_v36  ;;  %v2059_v21 = vsel %vm78_vm0, %v2054_v41, 0  ;;  %v2243_v20 = vsel %vm78_vm0, %v2238_v37, 0 }
 0x382   :  { %2068 = vmatpush.bf16.xpose.msrb.mxu1 %v2059_v21  ;;  %v2282_v30 = vpop.permute.xlu2 %2281 }
 0x383   :  { %4107 = vmatmul.msk.bf16.vlgmr.msra.gmra.mxu2 %vm78_vm0, %v5470_v48 }
 0x384   :  { %v1608_v31 = vpop.f32.mrf.mxu1  ;;  %2183 = vmatpush.bf16.xpose.msra.mxu2 %v2174_v3 }
 0x385   :  { %v5703_v54 = vpop.f32.mrf.mxu2 }
 0x386   :  { %6912 = vst [vmem:[#allocation52_spill] sm:$0xff] %v5703_v54 }
 0x388   :  { %v2029_v2 = vpop.permute.xlu0 %2028 }
 0x389   :  { %4110 = vmatmul.msk.bf16.vlgmr.msrb.gmra.mxu1 %vm78_vm0, %v2052_v6 }
 0x38a   :  { %2160 = vmatpush.bf16.xpose.msra.mxu1 %v2151_v13  ;;  %v2215_v19 = vpop.permute.xlu2 %2214  ;;  %v2266_v13 = vsel %vm78_vm0, %v2261_v0, 0 }
 0x38b   :  { %4109 = vmatmul.msk.bf16.vlgmr.msrb.gmra.mxu0 %vm78_vm0, %v2029_v2  ;;  %v2220_v36 = vsel %vm78_vm0, %v2215_v19, 0 }
 0x38c   :  { %2229 = vmatpush.bf16.xpose.msrb.mxu0 %v2220_v36 }
 0x38d   :  { %v1713_v41 = vpop.f32.mrf.mxu2 }
 0x390   :  { %v5709_v48 = vpop.f32.mrf.mxu3  ;;  %4112 = vmatmul.msk.bf16.vlgmr.msrb.gmra.mxu3 %vm78_vm0, %v5643_v18 }
 0x391   :  { %6913 = vst [vmem:[#allocation53_spill] sm:$0xff] %v5709_v48  ;;  %v2284_v3 = vpop.permute.xlu0 %2283 }
 0x392   :  { %2252 = vmatpush.bf16.xpose.msrb.mxu1 %v2243_v20  ;;  %v2289_v6 = vsel %vm78_vm0, %v2284_v3, 0  ;;  %v5715_v21 = vpop.f32.mrf.mxu0 }
 0x393   :  { %6914 = vst [vmem:[#allocation54_spill] sm:$0xff] %v5715_v21  ;;  %4111 = vmatmul.msk.bf16.vlgmr.msrb.gmra.mxu2 %vm78_vm0, %v5630_v5  ;;  %2298 = vmatpush.bf16.xpose.msrb.mxu3 %v2289_v6 }
 0x394   :  { %2275 = vmatpush.bf16.xpose.msrb.mxu2 %v2266_v13 }
 0x395   :  { %v5719_v31 = vpop.f32.mrf.mxu2 }
 0x396   :  { %6915 = vst [vmem:[#allocation55_spill] sm:$0xff] %v5719_v31 }
 0x398   :  { %v1650_v2 = vpop.f32.mrf.mxu3 }
 0x399   :  { %v2259_v37 = vpop.permute.xlu0 %2258 }
 0x39a   :  { %v1671_v20 = vpop.f32.mrf.mxu0 }
 0x39b   :  { %v5721_v19 = vpop.f32.mrf.mxu1  ;;  %4113 = vmatmul.msk.bf16.vlgmr.msra.gmra.mxu0 %vm78_vm0, %v2121_v49  ;;  %v2236_v49 = vpop.permute.xlu2 %2235 }
 0x39c   :  { %6916 = vst [vmem:[#allocation56_spill] sm:$0xff] %v5721_v19 }
 0x39d   :  { %v1797_v18 = vpop.f32.mrf.mxu2 }
 0x3a0   :  { %v5724_v0 = vpop.f32.mrf.mxu3  ;;  %4116 = vmatmul.msk.bf16.vlgmr.msra.gmra.mxu3 %vm78_vm0, %v5654_v61 }
 0x3a1   :  { %6917 = vst [vmem:[#allocation57_spill] sm:$0xff] %v5724_v0  ;;  %v2144_v36 = vpop.permute.xlu0 %2143 }
 0x3a2   :  { %4114 = vmatmul.msk.bf16.vlgmr.msra.gmra.mxu1 %vm78_vm0, %v2144_v36  ;;  %v5729_v41 = vpop.f32.mrf.mxu0 }
 0x3a3   :  { %v1692_v5 = vpop.f32.mrf.mxu1  ;;  %6918 = vst [vmem:[#allocation58_spill] sm:$0xff] %v5729_v41  ;;  %4115 = vmatmul.msk.bf16.vlgmr.msra.gmra.mxu2 %vm78_vm0, %v5665_v53 }
 0x3a8   :  { %v1734_v13 = vpop.f32.mrf.mxu3 }
 0x3a9   :  { %v2213_v3 = vpop.permute.xlu0 %2212 }
 0x3aa   :  { %v1755_v6 = vpop.f32.mrf.mxu0 }
 0x3ab   :  { %v5733_v2 = vpop.f32.mrf.mxu1  ;;  %4117 = vmatmul.msk.bf16.vlgmr.msrb.gmra.mxu0 %vm78_vm0, %v2213_v3  ;;  %v2507_v6 = vpop.permute.xlu2 %2506 }
 0x3ac   :  { %6919 = vst [vmem:[#allocation59_spill] sm:$0xff] %v5733_v2  ;;  %v2512_v31 = vand.u32 %v2507_v6, %v4892_v52 }
 0x3ae   :  { %2521 = vmatpush.bf16.msra.mxu2 %v2512_v31 }
 0x3b0   :  { %v5736_v20 = vpop.f32.mrf.mxu3  ;;  %4120 = vmatmul.msk.bf16.vlgmr.msrb.gmra.mxu3 %vm78_vm0, %v2282_v30 }
 0x3b1   :  { %6920 = vst [vmem:[#allocation60_spill] sm:$0xff] %v5736_v20 }
 0x3b2   :  { %4118 = vmatmul.msk.bf16.vlgmr.msrb.gmra.mxu1 %vm78_vm0, %v2236_v49 }
 0x3b3   :  { %v1776_v61 = vpop.f32.mrf.mxu1  ;;  %4119 = vmatmul.msk.bf16.vlgmr.msrb.gmra.mxu2 %vm78_vm0, %v2259_v37  ;;  %v2528_v49 = vpop.permute.xlu2 %2527 }
 0x3b4   :  { %v2533_v37 = vand.u32 %v2528_v49, %v4892_v52 }
 0x3b6   :  { %2542 = vmatpush.bf16.msra.mxu3 %v2533_v37 }
 0x3b8   :  { %v1818_v18 = vpop.f32.mrf.mxu3 }
 0x3bb   :  { %v5741_v36 = vpop.f32.mrf.mxu1 }
 0x3bc   :  { %6921 = vst [vmem:[#allocation61_spill] sm:$0xff] %v5741_v36 }
 0x3c3   :  { %v1860_v53 = vpop.f32.mrf.mxu1 }
 0x3c4   :  { %v2591_v53 = vpop.permute.xlu2 %2590 }
 0x3c5   :  { %v2596_v36 = vand.u32 %v2591_v53, %v4892_v52 }
 0x3c7   :  { %2605 = vmatpush.bf16.msrb.mxu2 %v2596_v36 }
 0x3cb   :  { %v5743_v5 = vpop.f32.mrf.mxu1 }
 0x3cc   :  { %v2307_v13 = vsel %vm458_vm3, %v5743_v5, -inf  ;;  %v2570_v37 = vpop.permute.xlu2 %2569 }
 0x3cd   :  { %2308 = vmax.xlane.f32.xlu1 %v2307_v13 }
 0x3d3   :  { %v1980_v3 = vpop.f32.mrf.mxu1 }
 0x3d4   :  { %v2486_v3 = vpop.permute.xlu1 %2485  ;;  %v5810_v43 = vpop.permute.xlu2 %2758 }
 0x3d5   :  { %v2491_v49 = vand.u32 %v2486_v3, %v4892_v52 }
 0x3d7   :  { %2500 = vmatpush.bf16.msra.mxu1 %v2491_v49 }
 0x3dc   :  { %v2549_v41 = vpop.permute.xlu1 %2548 }
 0x3e4   :  { %v5802_v58 = vpop.permute.xlu1 %2695 }
 0x3e8   :  { %v5748_v30 = vpop.f32.mrf.mxu0 }
 0x3e9   :  { %6922 = vst [vmem:[#allocation62_spill] sm:$0xff] %v5748_v30 }
 0x3f0   :  { %v1839_v61 = vpop.f32.mrf.mxu0 }
 0x3f1   :  { %v2575_v61 = vand.u32 %v2570_v37, %v4892_v52 }
 0x3f3   :  { %v5751_v18 = vpop.f32.mrf.mxu3  ;;  %2584 = vmatpush.bf16.msrb.mxu1 %v2575_v61 }
 0x3f4   :  { %6923 = vst [vmem:[#allocation63_spill] sm:$0xff] %v5751_v18 }
 0x3f6   :  { %v5754_v20 = vpop.f32.mrf.mxu2 }
 0x3f7   :  { %6924 = vst [vmem:[#allocation64_spill] sm:$0xff] %v5754_v20 }
 0x3f8   :  { %v5756_v13 = vpop.f32.mrf.mxu0 }
 0x3f9   :  { %v2304_v31 = vsel %vm458_vm3, %v5756_v13, -inf }
 0x3fa   :  { %2305 = vmax.xlane.f32.xlu2 %v2304_v31 }
 0x3fb   :  { %v1902_v6 = vpop.f32.mrf.mxu3 }
 0x3fe   :  { %v1881_v30 = vpop.f32.mrf.mxu2 }
 0x400   :  { %v1957_v53 = vpop.f32.mrf.mxu0 }
 0x403   :  { %v5762_v18 = vpop.f32.mrf.mxu3 }
 0x404   :  { %v2313_v48 = vsel %vm458_vm3, %v5762_v18, -inf }
 0x406   :  { %v5764_v36 = vpop.f32.mrf.mxu2  ;;  %v5766_v20 = vpop.f32.mrf.mxu1 }
 0x407   :  { %v2319_v31 = vsel %vm458_vm3, %v5766_v20, -inf  ;;  %v2310_v61 = vsel %vm458_vm3, %v5764_v36, -inf }
 0x408   :  { %2320 = vmax.xlane.f32.xlu1 %v2319_v31  ;;  %v5770_v6 = vpop.f32.mrf.mxu0 }
 0x409   :  { %v2316_v3 = vsel %vm458_vm3, %v5770_v6, -inf }
 0x40a   :  { %2317 = vmax.xlane.f32.xlu0 %v2316_v3 }
 0x40b   :  { %v2026_v49 = vpop.f32.mrf.mxu3 }
 0x40e   :  { %v2003_v30 = vpop.f32.mrf.mxu2  ;;  %v2072_v37 = vpop.f32.mrf.mxu1 }
 0x410   :  { %2311 = vmax.xlane.f32.xlu1 %v2310_v61  ;;  %v2049_v53 = vpop.f32.mrf.mxu0 }
 0x412   :  { %2314 = vmax.xlane.f32.xlu0 %v2313_v48 }
 0x413   :  { %v5778_v0 = vpop.f32.mrf.mxu3 }
 0x414   :  { %v2325_v54 = vsel %vm458_vm3, %v5778_v0, -inf }
 0x416   :  { %v5780_v31 = vpop.f32.mrf.mxu2 }
 0x418   :  { %2326 = vmax.xlane.f32.xlu1 %v2325_v54  ;;  %v5784_v3 = vpop.f32.mrf.mxu0 }
 0x419   :  { %v2328_v49 = vsel %vm458_vm3, %v5784_v3, -inf }
 0x41a   :  { %2329 = vmax.xlane.f32.xlu2 %v2328_v49  ;;  %v2322_v49 = vsel %vm458_vm3, %v5780_v31, -inf }
 0x41b   :  { %v2118_v30 = vpop.f32.mrf.mxu3 }
 0x41e   :  { %v2095_v37 = vpop.f32.mrf.mxu2 }
 0x41f   :  { %v5788_v61 = vpop.f32.mrf.mxu1 }
 0x420   :  { %v2331_v48 = vsel %vm458_vm3, %v5788_v61, -inf  ;;  %v2141_v53 = vpop.f32.mrf.mxu0 }
 0x421   :  { %2332 = vmax.xlane.f32.xlu0 %v2331_v48 }
 0x423   :  { %v5792_v21 = vpop.f32.mrf.mxu3 }
 0x426   :  { %v5794_v19 = vpop.f32.mrf.mxu2 }
 0x427   :  { %v2164_v54 = vpop.f32.mrf.mxu1  ;;  %v2334_v2 = vsel %vm458_vm3, %v5794_v19, -inf }
 0x428   :  { %2335 = vmax.xlane.f32.xlu2 %v2334_v2  ;;  %v5800_v30 = vpop.f32.mrf.mxu0 }
 0x429   :  { %2323 = vmax.xlane.f32.xlu0 %v2322_v49  ;;  %v2340_v53 = vsel %vm458_vm3, %v5800_v30, -inf  ;;  %v2465_v49 = vpop.permute.xlu0 %2464 }
 0x42a   :  { %v2470_v47 = vand.u32 %v2465_v49, %v4892_v52 }
 0x42b   :  { %v2210_v37 = vpop.f32.mrf.mxu3 }
 0x42c   :  { %v2554_v37 = vand.u32 %v2549_v41, %v4892_v52  ;;  %2479 = vmatpush.bf16.msra.mxu0 %v2470_v47 }
 0x42e   :  { %v2187_v48 = vpop.f32.mrf.mxu2 }
 0x42f   :  { %v5806_v60 = vpop.f32.mrf.mxu1  ;;  %v2654_v48 = vpop.permute.xlu1 %2653 }
 0x430   :  { %v2343_v54 = vsel %vm458_vm3, %v5806_v60, -inf  ;;  %v2233_v32 = vpop.f32.mrf.mxu0  ;;  %2563 = vmatpush.bf16.msrb.mxu0 %v2554_v37 }
 0x431   :  { %2344 = vmax.xlane.f32.xlu1 %v2343_v54  ;;  %2341 = vmax.xlane.f32.xlu0 %v2340_v53  ;;  %v2337_v32 = vsel %vm458_vm3, %v5792_v21, -inf  ;;  %v5822_v54 = vpop.permute.xlu2 %2716  ;;  %v2612_v41 = vpop.permute.xlu0 %2611 }
 0x432   :  { %v2617_v1 = vand.u32 %v2612_v41, %v4892_v52 }
 0x433   :  { %v5812_v2 = vpop.f32.mrf.mxu3 }
 0x434   :  { %2626 = vmatpush.bf16.msrb.mxu3 %v2617_v1  ;;  %v2349_v41 = vsel %vm458_vm3, %v5812_v2, -inf }
 0x436   :  { %v5815_v38 = vpop.f32.mrf.mxu2 }
 0x437   :  { %v2346_v39 = vsel %vm458_vm3, %v5815_v38, -inf  ;;  %v2256_v7 = vpop.f32.mrf.mxu1 }
 0x439   :  { %2347 = vmax.xlane.f32.xlu1 %v2346_v39  ;;  %2338 = vmax.xlane.f32.xlu0 %v2337_v32  ;;  %v5828_v47 = vpop.permute.xlu2 %2737 }
 0x43b   :  { %v2302_v53 = vpop.f32.mrf.mxu3 }
 0x43e   :  { %v2279_v23 = vpop.f32.mrf.mxu2 }
 0x43f   :  { %v2659_v23 = vand.u32 %v2654_v48, %v4892_v52 }
 0x440   :  { %v2309_v40 = vpop.xlane.xlu1 %2308  ;;  %2834 = vrot.lane.b32.xlu2 %v4615_v9, %s4569_s16 }
 0x441   :  { %v2353_v7 = vsub.f32 %v5743_v5, %v2309_v40  ;;  %v5842_v40 = vpop.permute.xlu2 %2880 }
 0x443   :  { %v2370_v49 = vmul.f32 1.442695, %v2353_v7 }
 0x445   :  { %4368 = vpow2.f32 %v2370_v49 }
 0x448   :  { %2972 = vrot.lane.b32.xlu2 %v4617_v10, %s4569_s16 }
 0x449   :  { %v5850_v1 = vpop.permute.xlu2 %2903 }
 0x44b   :  { %v5832_v39 = vpop.eup %4368 }
 0x44c   :  { %v2449_v37 = vpack.c.bf16 %v5832_v39, %v5832_v39 }
 0x44d   :  { %2901 = vrot.lane.b32.xlu0 %v6853_v46, %s4570_s17  ;;  %v5854_v46 = vpop.permute.xlu0 %2674 }
 0x44e   :  { %4122 = vmatmul.msk.bf16.vlgmr.msra.gmra.mxu1 %vm621_vm4, %v2449_v37 }
 0x44f   :  { %2668 = vmatpush.bf16.msra.mxu1 %v2659_v23 }
 0x450   :  { %2995 = vrot.lane.b32.xlu2 %v6865_v62, %s4569_s16 }
 0x451   :  { %v5858_v5 = vpop.permute.xlu2 %2878 }
 0x452   :  { %2857 = vrot.lane.b32.xlu1 %v4635_v16, %s4569_s16 }
 0x455   :  { %2832 = vrot.lane.b32.xlu0 %v6875_v15, %s4570_s17  ;;  %v2633_v48 = vpop.permute.xlu0 %2632 }
 0x45a   :  { %2970 = vrot.lane.b32.xlu1 %v6882_v4, %s4570_s17 }
 0x45d   :  { %2993 = vrot.lane.b32.xlu0 %v6880_v28, %s4570_s17  ;;  %v5869_v32 = vpop.permute.xlu0 %2779 }
 0x462   :  { %2949 = vrot.lane.b32.xlu1 %v4693_v33, %s4569_s16 }
 0x465   :  { %3064 = vrot.lane.b32.xlu0 %v4663_v24, %s4569_s16 }
 0x46a   :  { %2924 = vrot.lane.b32.xlu1 %v6894_v56, %s4570_s17  ;;  %v2638_v56 = vand.u32 %v2633_v48, %v4892_v52 }
 0x46d   :  { %v2306_v15 = vpop.xlane.xlu2 %2305  ;;  %2947 = vrot.lane.b32.xlu0 %v6892_v57, %s4570_s17 }
 0x46e   :  { %v2352_v28 = vsub.f32 %v5756_v13, %v2306_v15 }
 0x470   :  { %v2368_v4 = vmul.f32 1.442695, %v2352_v28 }
 0x472   :  { %4370 = vpow2.f32 %v2368_v4  ;;  %3085 = vrot.lane.b32.xlu1 %v6885_v59, %s4570_s17 }
 0x475   :  { %3018 = vrot.lane.b32.xlu0 %v6839_v44, %s4569_s16 }
 0x478   :  { %v5873_v53 = vpop.eup %4370 }
 0x479   :  { %v2448_v57 = vpack.c.bf16 %v5873_v53, %v5873_v53  ;;  %2350 = vmax.xlane.f32.xlu2 %v2349_v41 }
 0x47a   :  { %3156 = vrot.lane.b32.xlu1 %v4697_v35, %s4569_s16 }
 0x47b   :  { %v2321_v59 = vpop.xlane.xlu1 %2320  ;;  %4121 = vmatmul.msk.bf16.vlgmr.msra.gmra.mxu0 %vm621_vm4, %v2448_v57 }
 0x47c   :  { %v2357_v13 = vsub.f32 %v5766_v20, %v2321_v59  ;;  %2647 = vmatpush.bf16.msra.mxu0 %v2638_v56 }
 0x47d   :  { %v2318_v7 = vpop.xlane.xlu0 %2317  ;;  %3179 = vrot.lane.b32.xlu0 %v4695_v34, %s4569_s16 }
 0x47e   :  { %v2378_v49 = vmul.f32 1.442695, %v2357_v13  ;;  %v2356_v23 = vsub.f32 %v5770_v6, %v2318_v7 }
 0x480   :  { %4372 = vpow2.f32 %v2378_v49  ;;  %v2376_v37 = vmul.f32 1.442695, %v2356_v23  ;;  %v2680_v49 = vand.u32 %v5854_v46, %v4892_v52 }
 0x482   :  { %4374 = vpow2.f32 %v2376_v37  ;;  %3039 = vrot.lane.b32.xlu1 %v6902_v51, %s4570_s17  ;;  %v2743_v51 = vand.u32 %v5828_v47, %v4892_v52 }
 0x483   :  { %v2312_v48 = vpop.xlane.xlu1 %2311 }
 0x484   :  { %v2354_v15 = vsub.f32 %v5764_v36, %v2312_v48 }
 0x485   :  { %v2315_v28 = vpop.xlane.xlu0 %2314  ;;  %3154 = vrot.lane.b32.xlu0 %v6899_v29, %s4570_s17  ;;  %v2722_v29 = vand.u32 %v5822_v54, %v4892_v52 }
 0x486   :  { %v5892_v20 = vpop.eup %4372  ;;  %v2372_v4 = vmul.f32 1.442695, %v2354_v15  ;;  %v2355_v56 = vsub.f32 %v5762_v18, %v2315_v28 }
 0x487   :  { %v2453_v6 = vpack.c.bf16 %v5892_v20, %v5892_v20 }
 0x488   :  { %v5897_v41 = vpop.eup %4374  ;;  %4376 = vpow2.f32 %v2372_v4  ;;  %v2374_v57 = vmul.f32 1.442695, %v2355_v56 }
 0x489   :  { %v2452_v36 = vpack.c.bf16 %v5897_v41, %v5897_v41  ;;  %4126 = vmatmul.msk.bf16.vlgmr.msrb.gmra.mxu1 %vm621_vm4, %v2453_v6 }
 0x48a   :  { %4378 = vpow2.f32 %v2374_v57  ;;  %2752 = vmatpush.bf16.msrb.mxu1 %v2743_v51  ;;  %3110 = vrot.lane.b32.xlu1 %v6855_v14, %s4569_s16 }
 0x48b   :  { %4125 = vmatmul.msk.bf16.vlgmr.msrb.gmra.mxu0 %vm621_vm4, %v2452_v36  ;;  %v2327_v18 = vpop.xlane.xlu1 %2326 }
 0x48c   :  { %2731 = vmatpush.bf16.msrb.mxu0 %v2722_v29  ;;  %v2359_v23 = vsub.f32 %v5778_v0, %v2327_v18 }
 0x48d   :  { %v2330_v47 = vpop.xlane.xlu2 %2329  ;;  %3133 = vrot.lane.b32.xlu0 %v6859_v12, %s4569_s16 }
 0x48e   :  { %v5911_v59 = vpop.eup %4376  ;;  %v2360_v13 = vsub.f32 %v5784_v3, %v2330_v47  ;;  %v2701_v3 = vand.u32 %v5802_v58, %v4892_v52  ;;  %v2382_v0 = vmul.f32 1.442695, %v2359_v23  ;;  %v2764_v23 = vand.u32 %v5810_v43, %v4892_v52 }
 0x48f   :  { %v2450_v54 = vpack.c.bf16 %v5911_v59, %v5911_v59 }
 0x490   :  { %v5916_v7 = vpop.eup %4378  ;;  %v2384_v37 = vmul.f32 1.442695, %v2360_v13 }
 0x491   :  { %v2451_v48 = vpack.c.bf16 %v5916_v7, %v5916_v7  ;;  %4123 = vmatmul.msk.bf16.vlgmr.msra.gmra.mxu2 %vm621_vm4, %v2450_v54  ;;  %2855 = vrot.lane.b32.xlu2 %v6883_v55, %s4570_s17 }
 0x492   :  { %4380 = vpow2.f32 %v2384_v37  ;;  %2689 = vmatpush.bf16.msra.mxu2 %v2680_v49  ;;  %3131 = vrot.lane.b32.xlu1 %v6903_v27, %s4570_s17 }
 0x493   :  { %4124 = vmatmul.msk.bf16.vlgmr.msra.gmra.mxu3 %vm621_vm4, %v2451_v48  ;;  %4382 = vpow2.f32 %v2382_v0 }
 0x494   :  { %2710 = vmatpush.bf16.msra.mxu3 %v2701_v3  ;;  %v2333_v46 = vpop.xlane.xlu0 %2332 }
 0x495   :  { %v2361_v15 = vsub.f32 %v5788_v61, %v2333_v46  ;;  %3360 = vrot.lane.b32.xlu0 %v4615_v9, %s4571_s18 }
 0x497   :  { %v2386_v55 = vmul.f32 1.442695, %v2361_v15  ;;  %v2886_v15 = vsel %vm78_vm0, %v5842_v40, 0 }
 0x498   :  { %v5934_v28 = vpop.eup %4380 }
 0x499   :  { %v2456_v58 = vpack.c.bf16 %v5934_v28, %v5934_v28  ;;  %4384 = vpow2.f32 %v2386_v55  ;;  %2926 = vrot.lane.b32.xlu2 %v4665_v25, %s4569_s16  ;;  %v5946_v4 = vpop.eup %4382  ;;  %v2909_v55 = vsel %vm78_vm0, %v5850_v1, 0 }
 0x49a   :  { %3423 = vrot.lane.b32.xlu1 %v6849_v42, %s4571_s18  ;;  %v2455_v42 = vpack.c.bf16 %v5946_v4, %v5946_v4 }
 0x49b   :  { %4129 = vmatmul.msk.bf16.vlgmr.msra.gmra.mxu0 %vm621_vm4, %v2456_v58  ;;  %v2336_v27 = vpop.xlane.xlu2 %2335 }
 0x49c   :  { %v2324_v61 = vpop.xlane.xlu0 %2323 }
 0x49d   :  { %v2358_v9 = vsub.f32 %v5780_v31, %v2324_v61  ;;  %3444 = vrot.lane.b32.xlu0 %v4665_v25, %s4571_s18  ;;  %v2785_v31 = vand.u32 %v5869_v32, %v4892_v52 }
 0x49f   :  { %v5948_v56 = vpop.eup %4384  ;;  %v2380_v6 = vmul.f32 1.442695, %v2358_v9 }
 0x4a0   :  { %v2457_v51 = vpack.c.bf16 %v5948_v56, %v5948_v56 }
 0x4a1   :  { %4386 = vpow2.f32 %v2380_v6  ;;  %3087 = vrot.lane.b32.xlu2 %v4667_v26, %s4569_s16 }
 0x4a2   :  { %4130 = vmatmul.msk.bf16.vlgmr.msra.gmra.mxu1 %vm621_vm4, %v2457_v51  ;;  %3486 = vrot.lane.b32.xlu1 %v4617_v10, %s4571_s18  ;;  %v2362_v10 = vsub.f32 %v5794_v19, %v2336_v27 }
 0x4a3   :  { %4128 = vmatmul.msk.bf16.vlgmr.msrb.gmra.mxu3 %vm621_vm4, %v2455_v42  ;;  %v2835_v25 = vpop.permute.xlu2 %2834 }
 0x4a4   :  { %v2345_v57 = vpop.xlane.xlu1 %2344  ;;  %2794 = vmatpush.bf16.msrb.mxu3 %v2785_v31  ;;  %v2840_v36 = vsel %vm78_vm0, %v2835_v25, 0  ;;  %v2342_v29 = vpop.xlane.xlu0 %2341 }
 0x4a5   :  { %v2365_v18 = vsub.f32 %v5806_v60, %v2345_v57  ;;  %v2364_v47 = vsub.f32 %v5800_v30, %v2342_v29  ;;  %2849 = vmatpush.bf16.xpose.msra.mxu0 %v2840_v36  ;;  %3465 = vrot.lane.b32.xlu0 %v4693_v33, %s4571_s18  ;;  %v2388_v33 = vmul.f32 1.442695, %v2362_v10 }
 0x4a7   :  { %v5967_v32 = vpop.eup %4386  ;;  %v2394_v13 = vmul.f32 1.442695, %v2365_v18  ;;  %v2392_v54 = vmul.f32 1.442695, %v2364_v47 }
 0x4a8   :  { %v2454_v49 = vpack.c.bf16 %v5967_v32, %v5967_v32 }
 0x4a9   :  { %4388 = vpow2.f32 %v2394_v13  ;;  %3062 = vrot.lane.b32.xlu2 %v6889_v11, %s4570_s17 }
 0x4aa   :  { %4390 = vpow2.f32 %v2392_v54  ;;  %4127 = vmatmul.msk.bf16.vlgmr.msrb.gmra.mxu2 %vm621_vm4, %v2454_v49  ;;  %3528 = vrot.lane.b32.xlu1 %v6839_v44, %s4571_s18 }
 0x4ab   :  { %2773 = vmatpush.bf16.msrb.mxu2 %v2764_v23  ;;  %4392 = vpow2.f32 %v2388_v33  ;;  %v2973_v61 = vpop.permute.xlu2 %2972 }
 0x4ac   :  { %v2339_v60 = vpop.xlane.xlu0 %2338  ;;  %v2978_v6 = vsel %vm78_vm0, %v2973_v61, 0 }
 0x4ad   :  { %v2363_v19 = vsub.f32 %v5792_v21, %v2339_v60  ;;  %3591 = vrot.lane.b32.xlu0 %v4667_v26, %s4571_s18  ;;  %v2348_v26 = vpop.xlane.xlu1 %2347 }
 0x4ae   :  { %v2366_v48 = vsub.f32 %v5815_v38, %v2348_v26 }
 0x4af   :  { %v5982_v30 = vpop.eup %4388  ;;  %v2390_v43 = vmul.f32 1.442695, %v2363_v19 }
 0x4b0   :  { %v5984_v37 = vpop.eup %4390  ;;  %v2461_v11 = vpack.c.bf16 %v5982_v30, %v5982_v30  ;;  %v2396_v38 = vmul.f32 1.442695, %v2366_v48 }
 0x4b1   :  { %v2460_v44 = vpack.c.bf16 %v5984_v37, %v5984_v37  ;;  %3041 = vrot.lane.b32.xlu2 %v6834_v45, %s4569_s16  ;;  %4394 = vpow2.f32 %v2390_v43  ;;  %v5994_v21 = vpop.eup %4392 }
 0x4b2   :  { %4134 = vmatmul.msk.bf16.vlgmr.msrb.gmra.mxu1 %vm621_vm4, %v2461_v11  ;;  %v2458_v0 = vpack.c.bf16 %v5994_v21, %v5994_v21  ;;  %4396 = vpow2.f32 %v2396_v38 }
 0x4b3   :  { %4133 = vmatmul.msk.bf16.vlgmr.msrb.gmra.mxu0 %vm621_vm4, %v2460_v44 }
 0x4b7   :  { %v5997_v3 = vpop.eup %4394 }
 0x4b8   :  { %v2459_v46 = vpack.c.bf16 %v5997_v3, %v5997_v3  ;;  %v6015_v27 = vpop.eup %4396 }
 0x4b9   :  { %3016 = vrot.lane.b32.xlu2 %v6887_v50, %s4570_s17  ;;  %v2462_v1 = vpack.c.bf16 %v6015_v27, %v6015_v27 }
 0x4ba   :  { %4131 = vmatmul.msk.bf16.vlgmr.msra.gmra.mxu2 %vm621_vm4, %v2458_v0  ;;  %4132 = vmatmul.msk.bf16.vlgmr.msra.gmra.mxu3 %vm621_vm4, %v2459_v46 }
 0x4bb   :  { %2895 = vmatpush.bf16.xpose.msra.mxu2 %v2886_v15  ;;  %2918 = vmatpush.bf16.xpose.msra.mxu3 %v2909_v55 }
 0x4bf   :  { %v6011_v58 = vpop.permute.xlu0 %2901 }
 0x4c1   :  { %3177 = vrot.lane.b32.xlu2 %v6897_v17, %s4570_s17 }
 0x4c4   :  { %v2858_v50 = vpop.permute.xlu1 %2857 }
 0x4c5   :  { %v2863_v40 = vsel %vm78_vm0, %v2858_v50, 0 }
 0x4c6   :  { %2872 = vmatpush.bf16.xpose.msra.mxu1 %v2863_v40 }
 0x4c7   :  { %v2833_v9 = vpop.permute.xlu0 %2832 }
 0x4c8   :  { %4137 = vmatmul.msk.bf16.vlgmr.msra.gmra.mxu0 %vm78_vm0, %v2833_v9 }
 0x4c9   :  { %3108 = vrot.lane.b32.xlu2 %v6904_v63, %s4570_s17 }
 0x4ca   :  { %4135 = vmatmul.msk.bf16.vlgmr.msrb.gmra.mxu2 %vm621_vm4, %v2462_v1 }
 0x4cb   :  { %2987 = vmatpush.bf16.xpose.msrb.mxu2 %v2978_v6  ;;  %v6025_v17 = vpop.f32.mrf.mxu1 }
 0x4cc   :  { %v2971_v42 = vpop.permute.xlu1 %2970 }
 0x4cf   :  { %v6029_v31 = vpop.permute.xlu0 %2993 }
 0x4d1   :  { %3402 = vrot.lane.b32.xlu2 %v4613_v8, %s4571_s18  ;;  %v2996_v8 = vpop.permute.xlu2 %2995 }
 0x4d2   :  { %v3001_v33 = vsel %vm78_vm0, %v2996_v8, 0 }
 0x4d3   :  { %v2504_v51 = vpop.f32.mrf.mxu1 }
 0x4d4   :  { %v2950_v63 = vpop.permute.xlu1 %2949 }
 0x4d5   :  { %v2955_v57 = vsel %vm78_vm0, %v2950_v63, 0 }
 0x4d6   :  { %2964 = vmatpush.bf16.xpose.msrb.mxu1 %v2955_v57 }
 0x4d7   :  { %v3065_v25 = vpop.permute.xlu0 %3064 }
 0x4d8   :  { %v3070_v36 = vsel %vm78_vm0, %v3065_v25, 0 }
 0x4d9   :  { %3381 = vrot.lane.b32.xlu2 %v4635_v16, %s4571_s18 }
 0x4da   :  { %4139 = vmatmul.msk.bf16.vlgmr.msra.gmra.mxu2 %vm78_vm0, %v5858_v5 }
 0x4db   :  { %3079 = vmatpush.bf16.xpose.msra.mxu2 %v3070_v36 }
 0x4dc   :  { %v2925_v29 = vpop.permute.xlu1 %2924 }
 0x4df   :  { %v2948_v18 = vpop.permute.xlu0 %2947 }
 0x4e1   :  { %3507 = vrot.lane.b32.xlu2 %v6865_v62, %s4571_s18 }
 0x4e4   :  { %v3086_v10 = vpop.permute.xlu1 %3085 }
 0x4e7   :  { %v3019_v13 = vpop.permute.xlu0 %3018 }
 0x4e8   :  { %v3024_v60 = vsel %vm78_vm0, %v3019_v13, 0 }
 0x4e9   :  { %3570 = vrot.lane.b32.xlu2 %v4663_v24, %s4571_s18 }
 0x4ea   :  { %4143 = vmatmul.msk.bf16.vlgmr.msrb.gmra.mxu2 %vm78_vm0, %v2971_v42 }
 0x4ec   :  { %v2351_v16 = vpop.xlane.xlu2 %2350  ;;  %v3157_v49 = vpop.permute.xlu1 %3156 }
 0x4ed   :  { %v2367_v5 = vsub.f32 %v5812_v2, %v2351_v16  ;;  %v3162_v2 = vsel %vm78_vm0, %v3157_v49, 0 }
 0x4ee   :  { %3171 = vmatpush.bf16.xpose.msrb.mxu2 %v3162_v2 }
 0x4ef   :  { %v2398_v47 = vmul.f32 1.442695, %v2367_v5  ;;  %v3180_v43 = vpop.permute.xlu0 %3179 }
 0x4f1   :  { %4398 = vpow2.f32 %v2398_v47  ;;  %3549 = vrot.lane.b32.xlu2 %v6834_v45, %s4571_s18 }
 0x4f4   :  { %v2856_v54 = vpop.permute.xlu2 %2855  ;;  %v3040_v11 = vpop.permute.xlu1 %3039 }
 0x4f5   :  { %4138 = vmatmul.msk.bf16.vlgmr.msra.gmra.mxu1 %vm78_vm0, %v2856_v54 }
 0x4f7   :  { %v6046_v62 = vpop.eup %4398  ;;  %v3155_v0 = vpop.permute.xlu0 %3154 }
 0x4f8   :  { %v2463_v23 = vpack.c.bf16 %v6046_v62, %v6046_v62  ;;  %v6050_v24 = vpop.f32.mrf.mxu0 }
 0x4fa   :  { %4136 = vmatmul.msk.bf16.vlgmr.msrb.gmra.mxu3 %vm621_vm4, %v2463_v23 }
 0x4fb   :  { %3010 = vmatpush.bf16.xpose.msrb.mxu3 %v3001_v33 }
 0x4fc   :  { %v2927_v45 = vpop.permute.xlu2 %2926  ;;  %v3111_v46 = vpop.permute.xlu1 %3110 }
 0x4fd   :  { %v2932_v19 = vsel %vm78_vm0, %v2927_v45, 0  ;;  %v3116_v38 = vsel %vm78_vm0, %v3111_v46, 0 }
 0x4fe   :  { %2941 = vmatpush.bf16.xpose.msrb.mxu0 %v2932_v19 }
 0x4ff   :  { %v3134_v9 = vpop.permute.xlu0 %3133 }
 0x500   :  { %v2483_v44 = vpop.f32.mrf.mxu0  ;;  %v3139_v51 = vsel %vm78_vm0, %v3134_v9, 0 }
 0x504   :  { %v3088_v26 = vpop.permute.xlu2 %3087 }
 0x505   :  { %4141 = vmatmul.msk.bf16.vlgmr.msrb.gmra.mxu0 %vm78_vm0, %v2925_v29  ;;  %4142 = vmatmul.msk.bf16.vlgmr.msrb.gmra.mxu1 %vm78_vm0, %v2948_v18  ;;  %v3093_v15 = vsel %vm78_vm0, %v3088_v26, 0 }
 0x506   :  { %3033 = vmatpush.bf16.xpose.msra.mxu0 %v3024_v60  ;;  %v6059_v48 = vpop.f32.mrf.mxu1 }
 0x508   :  { %v6062_v55 = vpop.f32.mrf.mxu0 }
 0x50a   :  { %4140 = vmatmul.msk.bf16.vlgmr.msra.gmra.mxu3 %vm78_vm0, %v6011_v58  ;;  %v3185_v58 = vsel %vm78_vm0, %v3180_v43, 0 }
 0x50b   :  { %3102 = vmatpush.bf16.xpose.msra.mxu3 %v3093_v15 }
 0x50c   :  { %v3063_v50 = vpop.permute.xlu2 %3062 }
 0x50d   :  { %4147 = vmatmul.msk.bf16.vlgmr.msra.gmra.mxu2 %vm78_vm0, %v3063_v50 }
 0x50e   :  { %3125 = vmatpush.bf16.xpose.msrb.mxu0 %v3116_v38  ;;  %v2588_v40 = vpop.f32.mrf.mxu1 }
 0x510   :  { %v2567_v61 = vpop.f32.mrf.mxu0 }
 0x514   :  { %v6068_v1 = vpop.f32.mrf.mxu2  ;;  %v3042_v6 = vpop.permute.xlu2 %3041 }
 0x515   :  { %v3047_v42 = vsel %vm78_vm0, %v3042_v6, 0 }
 0x516   :  { %v6072_v63 = vpop.f32.mrf.mxu3  ;;  %3056 = vmatpush.bf16.xpose.msra.mxu1 %v3047_v42 }
 0x518   :  { %v6075_v25 = vpop.f32.mrf.mxu0 }
 0x51a   :  { %4144 = vmatmul.msk.bf16.vlgmr.msrb.gmra.mxu3 %vm78_vm0, %v6029_v31  ;;  %v3132_v31 = vpop.permute.xlu1 %3131 }
 0x51b   :  { %3194 = vmatpush.bf16.xpose.msrb.mxu3 %v3185_v58 }
 0x51c   :  { %v2525_v57 = vpop.f32.mrf.mxu2  ;;  %v3017_v36 = vpop.permute.xlu2 %3016 }
 0x51d   :  { %4145 = vmatmul.msk.bf16.vlgmr.msra.gmra.mxu0 %vm78_vm0, %v3017_v36  ;;  %4146 = vmatmul.msk.bf16.vlgmr.msra.gmra.mxu1 %vm78_vm0, %v3040_v11 }
 0x51e   :  { %3148 = vmatpush.bf16.xpose.msrb.mxu1 %v3139_v51  ;;  %v2546_v8 = vpop.f32.mrf.mxu3  ;;  %4151 = vmatmul.msk.bf16.vlgmr.msrb.gmra.mxu2 %vm78_vm0, %v3155_v0 }
 0x51f   :  { %v6082_v29 = vpop.f32.mrf.mxu1 }
 0x520   :  { %v2651_v18 = vpop.f32.mrf.mxu0 }
 0x522   :  { %v3424_v58 = vpop.permute.xlu1 %3423 }
 0x523   :  { %v3429_v57 = vand.u32 %v3424_v58, %v4892_v52 }
 0x524   :  { %v3178_v16 = vpop.permute.xlu2 %3177 }
 0x526   :  { %v6084_v5 = vpop.f32.mrf.mxu3 }
 0x527   :  { %v2672_v47 = vpop.f32.mrf.mxu1 }
 0x52a   :  { %4148 = vmatmul.msk.bf16.vlgmr.msra.gmra.mxu3 %vm78_vm0, %v3086_v10 }
 0x52b   :  { %3438 = vmatpush.bf16.msra.mxu3 %v3429_v57 }
 0x52c   :  { %v3109_v13 = vpop.permute.xlu2 %3108 }
 0x52d   :  { %v6087_v54 = vpop.f32.mrf.mxu2  ;;  %4150 = vmatmul.msk.bf16.vlgmr.msrb.gmra.mxu1 %vm78_vm0, %v3132_v31  ;;  %4149 = vmatmul.msk.bf16.vlgmr.msrb.gmra.mxu0 %vm78_vm0, %v3109_v13 }
 0x52e   :  { %v2630_v49 = vpop.f32.mrf.mxu3 }
 0x52f   :  { %v6091_v23 = vpop.f32.mrf.mxu1 }
 0x530   :  { %v6093_v2 = vpop.f32.mrf.mxu0 }
 0x535   :  { %v2609_v33 = vpop.f32.mrf.mxu2 }
 0x537   :  { %v2756_v45 = vpop.f32.mrf.mxu1 }
 0x538   :  { %v2735_v60 = vpop.f32.mrf.mxu0 }
 0x53a   :  { %4152 = vmatmul.msk.bf16.vlgmr.msrb.gmra.mxu3 %vm78_vm0, %v3178_v16 }
 0x53d   :  { %v6096_v19 = vpop.f32.mrf.mxu2  ;;  %v6098_v10 = vpop.f32.mrf.mxu3 }
 0x545   :  { %v2693_v43 = vpop.f32.mrf.mxu2  ;;  %v6100_v11 = vpop.f32.mrf.mxu0 }
 0x546   :  { %v2714_v44 = vpop.f32.mrf.mxu3  ;;  %v3200_v26 = vsel %vm458_vm3, %v6100_v11, -inf }
 0x547   :  { %3201 = vmax.xlane.f32.xlu1 %v3200_v26  ;;  %v3487_v26 = vpop.permute.xlu1 %3486 }
 0x54d   :  { %v6104_v0 = vpop.f32.mrf.mxu2  ;;  %v2853_v46 = vpop.f32.mrf.mxu0 }
 0x555   :  { %v2777_v15 = vpop.f32.mrf.mxu2 }
 0x55d   :  { %v6106_v38 = vpop.f32.mrf.mxu2 }
 0x55e   :  { %v3206_v49 = vsel %vm458_vm3, %v6106_v38, -inf }
 0x565   :  { %v2899_v50 = vpop.f32.mrf.mxu2 }
 0x56d   :  { %v6108_v40 = vpop.f32.mrf.mxu2 }
 0x572   :  { %v6110_v61 = vpop.f32.mrf.mxu1 }
 0x573   :  { %v3203_v9 = vsel %vm458_vm3, %v6110_v61, -inf }
 0x574   :  { %3204 = vmax.xlane.f32.xlu0 %v3203_v9 }
 0x575   :  { %v2991_v6 = vpop.f32.mrf.mxu2 }
 0x576   :  { %v3492_v6 = vand.u32 %v3487_v26, %v4892_v52 }
 0x57a   :  { %v2876_v51 = vpop.f32.mrf.mxu1 }
 0x57b   :  { %v3403_v51 = vpop.permute.xlu2 %3402 }
 0x57c   :  { %v3408_v58 = vand.u32 %v3403_v51, %v4892_v52 }
 0x57d   :  { %v6114_v42 = vpop.f32.mrf.mxu3 }
 0x57e   :  { %6925 = vst [vmem:[#allocation65_spill] sm:$0xff] %v6114_v42  ;;  %3417 = vmatpush.bf16.msra.mxu2 %v3408_v58 }
 0x582   :  { %v6117_v36 = vpop.f32.mrf.mxu0  ;;  %v6119_v8 = vpop.f32.mrf.mxu1  ;;  %3501 = vmatpush.bf16.msrb.mxu2 %v3492_v6 }
 0x583   :  { %v3215_v18 = vsel %vm458_vm3, %v6119_v8, -inf  ;;  %v3212_v16 = vsel %vm458_vm3, %v6117_v36, -inf }
 0x584   :  { %3216 = vmax.xlane.f32.xlu0 %v3215_v18  ;;  %3213 = vmax.xlane.f32.xlu2 %v3212_v16 }
 0x585   :  { %v2798_v47 = vpop.f32.mrf.mxu3 }
 0x58a   :  { %v2968_v31 = vpop.f32.mrf.mxu1  ;;  %v2945_v13 = vpop.f32.mrf.mxu0 }
 0x58b   :  { %v3218_v13 = vsel %vm458_vm3, %v6108_v40, -inf }
 0x58c   :  { %3207 = vmax.xlane.f32.xlu0 %v3206_v49  ;;  %v3382_v49 = vpop.permute.xlu2 %3381 }
 0x58d   :  { %v6127_v33 = vpop.f32.mrf.mxu3 }
 0x58e   :  { %v3209_v45 = vsel %vm458_vm3, %v6127_v33, -inf }
 0x58f   :  { %3210 = vmax.xlane.f32.xlu2 %v3209_v45  ;;  %v3361_v45 = vpop.permute.xlu0 %3360 }
 0x590   :  { %v6131_v60 = vpop.f32.mrf.mxu2  ;;  %v3366_v26 = vand.u32 %v3361_v45, %v4892_v52 }
 0x591   :  { %v3230_v51 = vsel %vm458_vm3, %v6131_v60, -inf }
 0x592   :  { %3375 = vmatpush.bf16.msra.mxu0 %v3366_v26 }
 0x595   :  { %v2922_v43 = vpop.f32.mrf.mxu3 }
 0x596   :  { %v3387_v43 = vand.u32 %v3382_v49, %v4892_v52 }
 0x598   :  { %v3083_v44 = vpop.f32.mrf.mxu2  ;;  %3396 = vmatpush.bf16.msra.mxu1 %v3387_v43  ;;  %v3529_v43 = vpop.permute.xlu1 %3528 }
 0x59a   :  { %v6133_v46 = vpop.f32.mrf.mxu0  ;;  %v6135_v15 = vpop.f32.mrf.mxu1 }
 0x59b   :  { %v3227_v50 = vsel %vm458_vm3, %v6135_v15, -inf  ;;  %v3224_v9 = vsel %vm458_vm3, %v6133_v46, -inf }
 0x59c   :  { %3228 = vmax.xlane.f32.xlu1 %v3227_v50  ;;  %3225 = vmax.xlane.f32.xlu0 %v3224_v9 }
 0x59d   :  { %v6143_v57 = vpop.f32.mrf.mxu3 }
 0x59e   :  { %v3221_v31 = vsel %vm458_vm3, %v6143_v57, -inf }
 0x5a1   :  { %v6145_v18 = vpop.f32.mrf.mxu2 }
 0x5a2   :  { %v3060_v16 = vpop.f32.mrf.mxu1  ;;  %v3037_v47 = vpop.f32.mrf.mxu0 }
 0x5a3   :  { %v3508_v16 = vpop.permute.xlu2 %3507 }
 0x5a4   :  { %3222 = vmax.xlane.f32.xlu1 %v3221_v31  ;;  %3219 = vmax.xlane.f32.xlu0 %v3218_v13  ;;  %v3513_v47 = vand.u32 %v3508_v16, %v4892_v52  ;;  %v3445_v13 = vpop.permute.xlu0 %3444 }
 0x5a5   :  { %v3014_v44 = vpop.f32.mrf.mxu3  ;;  %v3450_v45 = vand.u32 %v3445_v13, %v4892_v52 }
 0x5a6   :  { %3522 = vmatpush.bf16.msrb.mxu3 %v3513_v47 }
 0x5a7   :  { %3459 = vmatpush.bf16.msrb.mxu0 %v3450_v45 }
 0x5a9   :  { %v3175_v50 = vpop.f32.mrf.mxu2 }
 0x5aa   :  { %v6153_v9 = vpop.f32.mrf.mxu1  ;;  %v6155_v6 = vpop.f32.mrf.mxu0 }
 0x5ab   :  { %v3239_v58 = vsel %vm458_vm3, %v6153_v9, -inf  ;;  %v3236_v44 = vsel %vm458_vm3, %v6155_v6, -inf }
 0x5ac   :  { %3231 = vmax.xlane.f32.xlu1 %v3230_v51  ;;  %3240 = vmax.xlane.f32.xlu0 %v3239_v58  ;;  %v3242_v51 = vsel %vm458_vm3, %v6145_v18, -inf  ;;  %v3466_v16 = vpop.permute.xlu0 %3465 }
 0x5ad   :  { %v6162_v31 = vpop.f32.mrf.mxu3  ;;  %v3471_v42 = vand.u32 %v3466_v16, %v4892_v52 }
 0x5ae   :  { %v3233_v49 = vsel %vm458_vm3, %v6162_v31, -inf }
 0x5af   :  { %3234 = vmax.xlane.f32.xlu2 %v3233_v49  ;;  %3480 = vmatpush.bf16.msrb.mxu1 %v3471_v42  ;;  %v3571_v42 = vpop.permute.xlu2 %3570 }
 0x5b2   :  { %v3152_v26 = vpop.f32.mrf.mxu1  ;;  %v3129_v50 = vpop.f32.mrf.mxu0 }
 0x5b4   :  { %3243 = vmax.xlane.f32.xlu0 %v3242_v51  ;;  %3237 = vmax.xlane.f32.xlu1 %v3236_v44  ;;  %v3534_v44 = vand.u32 %v3529_v43, %v4892_v52 }
 0x5b5   :  { %v3106_v58 = vpop.f32.mrf.mxu3 }
 0x5ba   :  { %v3202_v13 = vpop.xlane.xlu1 %3201 }
 0x5bb   :  { %v3248_v47 = vsub.f32 %v6100_v11, %v3202_v13  ;;  %v6191_v11 = vpop.permute.xlu0 %3591 }
 0x5bd   :  { %v3264_v49 = vmul.f32 1.442695, %v3248_v47  ;;  %v6173_v45 = vpop.f32.mrf.mxu3  ;;  %v3550_v47 = vpop.permute.xlu2 %3549 }
 0x5be   :  { %v3245_v26 = vsel %vm458_vm3, %v6173_v45, -inf }
 0x5bf   :  { %4400 = vpow2.f32 %v3264_v49  ;;  %3246 = vmax.xlane.f32.xlu2 %v3245_v26  ;;  %v3555_v49 = vand.u32 %v3550_v47, %v4892_v52 }
 0x5c5   :  { %v6177_v50 = vpop.eup %4400  ;;  %v3198_v51 = vpop.f32.mrf.mxu3 }
 0x5c6   :  { %v3344_v58 = vpack.c.bf16 %v6177_v50, %v6177_v50  ;;  %v6926_v51 = vld [vmem:[#allocation13_spill] sm:$0xff] }
 0x5c8   :  { %4153 = vmatmul.msk.bf16.vlgmr.msra.gmra.mxu0 %vm621_vm4, %v3344_v58  ;;  %3612 = vrot.lane.b32.xlu0 %v6855_v14, %s4571_s18  ;;  %v1507_v58 = vsel %vm458_vm3, %v6926_v51, 0.0 }
 0x5c9   :  { %3543 = vmatpush.bf16.msra.mxu0 %v3534_v44 }
 0x5cd   :  { %3675 = vrot.lane.b32.xlu1 %v4695_v34, %s4571_s18 }
 0x5d0   :  { %3633 = vrot.lane.b32.xlu0 %v6859_v12, %s4571_s18 }
 0x5d7   :  { %3654 = vrot.lane.b32.xlu2 %v4697_v35, %s4571_s18  ;;  %v1504_v35 = vsel %vm458_vm3, %v5495_v22, 0.0  ;;  %v6928_v22 = vld [vmem:[#allocation37_spill] sm:$0xff] }
 0x5e7   :  { %v3205_v43 = vpop.xlane.xlu0 %3204 }
 0x5e8   :  { %v3249_v16 = vsub.f32 %v6110_v61, %v3205_v43 }
 0x5ea   :  { %v3266_v13 = vmul.f32 1.442695, %v3249_v16 }
 0x5ec   :  { %4402 = vpow2.f32 %v3266_v13  ;;  %v6927_v13 = vld [vmem:[#allocation21_spill] sm:$0xff] }
 0x5ed   :  { %v1513_v47 = vsel %vm458_vm3, %v6927_v13, 0.0 }
 0x5f2   :  { %v6194_v14 = vpop.eup %4402 }
 0x5f3   :  { %v3345_v34 = vpack.c.bf16 %v6194_v14, %v6194_v14 }
 0x5f5   :  { %4154 = vmatmul.msk.bf16.vlgmr.msra.gmra.mxu1 %vm621_vm4, %v3345_v34 }
 0x5f6   :  { %3564 = vmatpush.bf16.msra.mxu1 %v3555_v49  ;;  %v600_v49 = vsel %vm458_vm3, %v6928_v22, 0.0  ;;  %v6932_v22 = vld [vmem:[#allocation22_spill] sm:$0xff] }
 0x5f7   :  { %v3217_v12 = vpop.xlane.xlu0 %3216  ;;  %v3214_v26 = vpop.xlane.xlu2 %3213  ;;  %1505 = vadd.xlane.f32.xlu1 %v1504_v35 }
 0x5f8   :  { %v3253_v61 = vsub.f32 %v6119_v8, %v3217_v12  ;;  %v3252_v44 = vsub.f32 %v6117_v36, %v3214_v26  ;;  %v6929_v36 = vld [vmem:[#allocation46_spill] sm:$0xff] }
 0x5f9   :  { %v1519_v35 = vsel %vm458_vm3, %v6929_v36, 0.0  ;;  %v3576_v36 = vand.u32 %v3571_v42, %v4892_v52 }
 0x5fa   :  { %v3274_v43 = vmul.f32 1.442695, %v3253_v61  ;;  %v3272_v16 = vmul.f32 1.442695, %v3252_v44  ;;  %1508 = vadd.xlane.f32.xlu0 %v1507_v58 }
 0x5fc   :  { %4404 = vpow2.f32 %v3274_v43 }
 0x5fd   :  { %4406 = vpow2.f32 %v3272_v16  ;;  %v6930_v16 = vld [vmem:[#allocation17_spill] sm:$0xff] }
 0x5fe   :  { %v1522_v13 = vsel %vm458_vm3, %v6930_v16, 0.0  ;;  %v6934_v16 = vld [vmem:[#allocation20_spill] sm:$0xff] }
 0x5ff   :  { %v3208_v34 = vpop.xlane.xlu0 %3207  ;;  %1514 = vadd.xlane.f32.xlu1 %v1513_v47  ;;  %v6931_v47 = vld [vmem:[#allocation8_spill] sm:$0xff]  ;;  %v1516_v42 = vsel %vm458_vm3, %v6934_v16, 0.0 }
 0x600   :  { %v3250_v8 = vsub.f32 %v6106_v38, %v3208_v34  ;;  %601 = vadd.xlane.f32.xlu2 %v600_v49  ;;  %v1510_v34 = vsel %vm458_vm3, %v6931_v47, 0.0 }
 0x602   :  { %v6213_v12 = vpop.eup %4404  ;;  %v3268_v26 = vmul.f32 1.442695, %v3250_v8  ;;  %v3211_v61 = vpop.xlane.xlu2 %3210  ;;  %1520 = vadd.xlane.f32.xlu0 %v1519_v35 }
 0x603   :  { %v6215_v44 = vpop.eup %4406  ;;  %v3349_v51 = vpack.c.bf16 %v6213_v12, %v6213_v12  ;;  %v3251_v58 = vsub.f32 %v6127_v33, %v3211_v61  ;;  %v1528_v33 = vsel %vm458_vm3, %v6932_v22, 0.0  ;;  %v6933_v61 = vld [vmem:[#allocation14_spill] sm:$0xff] }
 0x604   :  { %v3348_v43 = vpack.c.bf16 %v6215_v44, %v6215_v44  ;;  %4408 = vpow2.f32 %v3268_v26 }
 0x605   :  { %v3270_v38 = vmul.f32 1.442695, %v3251_v58  ;;  %4158 = vmatmul.msk.bf16.vlgmr.msrb.gmra.mxu1 %vm621_vm4, %v3349_v51  ;;  %v1531_v51 = vsel %vm458_vm3, %v6933_v61, 0.0  ;;  %v3597_v58 = vand.u32 %v6191_v11, %v4892_v52  ;;  %v6936_v11 = vld [vmem:[#allocation18_spill] sm:$0xff] }
 0x606   :  { %4157 = vmatmul.msk.bf16.vlgmr.msrb.gmra.mxu0 %vm621_vm4, %v3348_v43 }
 0x607   :  { %4410 = vpow2.f32 %v3270_v38  ;;  %1523 = vadd.xlane.f32.xlu1 %v1522_v13 }
 0x608   :  { %1511 = vadd.xlane.f32.xlu2 %v1510_v34  ;;  %v6935_v34 = vld [vmem:[#allocation47_spill] sm:$0xff] }
 0x609   :  { %v1537_v22 = vsel %vm458_vm3, %v6935_v34, 0.0 }
 0x60a   :  { %v6230_v49 = vpop.eup %4408  ;;  %1529 = vadd.xlane.f32.xlu0 %v1528_v33 }
 0x60b   :  { %v3346_v8 = vpack.c.bf16 %v6230_v49, %v6230_v49 }
 0x60d   :  { %v6235_v35 = vpop.eup %4410  ;;  %4155 = vmatmul.msk.bf16.vlgmr.msra.gmra.mxu2 %vm621_vm4, %v3346_v8 }
 0x60e   :  { %v3347_v26 = vpack.c.bf16 %v6235_v35, %v6235_v35  ;;  %3585 = vmatpush.bf16.msra.mxu2 %v3576_v36  ;;  %v1540_v36 = vsel %vm458_vm3, %v6936_v11, 0.0 }
 0x60f   :  { %v3229_v43 = vpop.xlane.xlu1 %3228  ;;  %v3226_v38 = vpop.xlane.xlu0 %3225  ;;  %1532 = vadd.xlane.f32.xlu1 %v1531_v51 }
 0x610   :  { %v3257_v13 = vsub.f32 %v6135_v15, %v3229_v43  ;;  %v3256_v47 = vsub.f32 %v6133_v46, %v3226_v38  ;;  %1517 = vadd.xlane.f32.xlu2 %v1516_v42  ;;  %4156 = vmatmul.msk.bf16.vlgmr.msra.gmra.mxu3 %vm621_vm4, %v3347_v26  ;;  %v6937_v15 = vld [vmem:[#allocation11_spill] sm:$0xff]  ;;  %v6938_v43 = vld [vmem:[#allocation49_spill] sm:$0xff] }
 0x611   :  { %3606 = vmatpush.bf16.msra.mxu3 %v3597_v58  ;;  %v1525_v46 = vsel %vm458_vm3, %v6937_v15, 0.0  ;;  %v1546_v38 = vsel %vm458_vm3, %v6938_v43, 0.0 }
 0x612   :  { %v3282_v33 = vmul.f32 1.442695, %v3257_v13  ;;  %v3280_v8 = vmul.f32 1.442695, %v3256_v47  ;;  %1538 = vadd.xlane.f32.xlu0 %v1537_v22 }
 0x614   :  { %4412 = vpow2.f32 %v3282_v33  ;;  %v6940_v33 = vld [vmem:[#allocation19_spill] sm:$0xff] }
 0x615   :  { %4414 = vpow2.f32 %v3280_v8  ;;  %v1534_v8 = vsel %vm458_vm3, %v6940_v33, 0.0 }
 0x617   :  { %v3223_v61 = vpop.xlane.xlu1 %3222  ;;  %v3220_v51 = vpop.xlane.xlu0 %3219  ;;  %1541 = vadd.xlane.f32.xlu1 %v1540_v36  ;;  %v2403_v36 = vsel %vm458_vm3, %v5832_v39, 0.0 }
 0x618   :  { %v3255_v26 = vsub.f32 %v6143_v57, %v3223_v61  ;;  %v3254_v58 = vsub.f32 %v6108_v40, %v3220_v51  ;;  %1526 = vadd.xlane.f32.xlu2 %v1525_v46  ;;  %v6939_v40 = vld [vmem:[#allocation48_spill] sm:$0xff] }
 0x619   :  { %v1549_v57 = vsel %vm458_vm3, %v6939_v40, 0.0 }
 0x61a   :  { %v6259_v16 = vpop.eup %4412  ;;  %v3278_v42 = vmul.f32 1.442695, %v3255_v26  ;;  %v3276_v13 = vmul.f32 1.442695, %v3254_v58  ;;  %1547 = vadd.xlane.f32.xlu0 %v1546_v38 }
 0x61b   :  { %v6261_v47 = vpop.eup %4414  ;;  %v3353_v34 = vpack.c.bf16 %v6259_v16, %v6259_v16 }
 0x61c   :  { %v3352_v22 = vpack.c.bf16 %v6261_v47, %v6261_v47  ;;  %4416 = vpow2.f32 %v3278_v42  ;;  %v2406_v42 = vsel %vm458_vm3, %v5911_v59, 0.0  ;;  %v2400_v59 = vsel %vm458_vm3, %v5873_v53, 0.0 }
 0x61d   :  { %4418 = vpow2.f32 %v3276_v13  ;;  %4162 = vmatmul.msk.bf16.vlgmr.msra.gmra.mxu1 %vm621_vm4, %v3353_v34  ;;  %v6941_v34 = vld [vmem:[#allocation16_spill] sm:$0xff] }
 0x61e   :  { %4161 = vmatmul.msk.bf16.vlgmr.msra.gmra.mxu0 %vm621_vm4, %v3352_v22  ;;  %v1543_v22 = vsel %vm458_vm3, %v6941_v34, 0.0 }
 0x61f   :  { %1550 = vadd.xlane.f32.xlu1 %v1549_v57  ;;  %v3232_v11 = vpop.xlane.xlu1 %3231  ;;  %v3241_v38 = vpop.xlane.xlu0 %3240  ;;  %v2415_v57 = vsel %vm458_vm3, %v5892_v20, 0.0 }
 0x620   :  { %1535 = vadd.xlane.f32.xlu2 %v1534_v8  ;;  %v3258_v26 = vsub.f32 %v6131_v60, %v3232_v11  ;;  %v2412_v60 = vsel %vm458_vm3, %v5897_v41, 0.0 }
 0x622   :  { %v6275_v61 = vpop.eup %4416  ;;  %v3235_v51 = vpop.xlane.xlu2 %3234  ;;  %2404 = vadd.xlane.f32.xlu0 %v2403_v36  ;;  %v3284_v13 = vmul.f32 1.442695, %v3258_v26  ;;  %v2421_v36 = vsel %vm458_vm3, %v5946_v4, 0.0  ;;  %v3261_v26 = vsub.f32 %v6153_v9, %v3241_v38  ;;  %v2424_v4 = vsel %vm458_vm3, %v5934_v28, 0.0 }
 0x623   :  { %v6277_v15 = vpop.eup %4418  ;;  %v3351_v46 = vpack.c.bf16 %v6275_v61, %v6275_v61  ;;  %v3259_v58 = vsub.f32 %v6162_v31, %v3235_v51 }
 0x624   :  { %v3350_v43 = vpack.c.bf16 %v6277_v15, %v6277_v15 }
 0x625   :  { %4160 = vmatmul.msk.bf16.vlgmr.msrb.gmra.mxu3 %vm621_vm4, %v3351_v46  ;;  %v3286_v39 = vmul.f32 1.442695, %v3259_v58 }
 0x626   :  { %4159 = vmatmul.msk.bf16.vlgmr.msrb.gmra.mxu2 %vm621_vm4, %v3350_v43 }
 0x627   :  { %2407 = vadd.xlane.f32.xlu1 %v2406_v42  ;;  %4420 = vpow2.f32 %v3286_v39  ;;  %v3238_v31 = vpop.xlane.xlu1 %3237  ;;  %v3244_v8 = vpop.xlane.xlu0 %3243  ;;  %v2430_v39 = vsel %vm458_vm3, %v5994_v21, 0.0  ;;  %v2418_v21 = vsel %vm458_vm3, %v5967_v32, 0.0 }
 0x628   :  { %1544 = vadd.xlane.f32.xlu2 %v1543_v22  ;;  %4422 = vpow2.f32 %v3284_v13  ;;  %v3260_v40 = vsub.f32 %v6155_v6, %v3238_v31  ;;  %v3262_v20 = vsub.f32 %v6145_v18, %v3244_v8  ;;  %v2409_v18 = vsel %vm458_vm3, %v5916_v7, 0.0 }
 0x629   :  { %v2433_v7 = vsel %vm458_vm3, %v5997_v3, 0.0 }
 0x62a   :  { %2413 = vadd.xlane.f32.xlu0 %v2412_v60  ;;  %v3288_v41 = vmul.f32 1.442695, %v3260_v40  ;;  %v3292_v43 = vmul.f32 1.442695, %v3262_v20 }
 0x62c   :  { %4424 = vpow2.f32 %v3288_v41 }
 0x62d   :  { %v6298_v33 = vpop.eup %4420 }
 0x62e   :  { %v6300_v11 = vpop.eup %4422  ;;  %v3355_v6 = vpack.c.bf16 %v6298_v33, %v6298_v33 }
 0x62f   :  { %2416 = vadd.xlane.f32.xlu1 %v2415_v57  ;;  %v3354_v53 = vpack.c.bf16 %v6300_v11, %v6300_v11  ;;  %v2439_v57 = vsel %vm458_vm3, %v5982_v30, 0.0  ;;  %v2442_v30 = vsel %vm458_vm3, %v6015_v27, 0.0  ;;  %v3305_v27 = vsel %vm458_vm3, %v6235_v35, 0.0 }
 0x630   :  { %2401 = vadd.xlane.f32.xlu2 %v2400_v59  ;;  %v3302_v35 = vsel %vm458_vm3, %v6230_v49, 0.0 }
 0x632   :  { %v3247_v51 = vpop.xlane.xlu2 %3246  ;;  %2422 = vadd.xlane.f32.xlu0 %v2421_v36  ;;  %v4425_v42 = vpop.eup %4424 }
 0x633   :  { %v3263_v46 = vsub.f32 %v6173_v45, %v3247_v51  ;;  %v3290_v45 = vmul.f32 1.442695, %v3261_v26  ;;  %v3356_v34 = vpack.c.bf16 %v4425_v42, %v4425_v42  ;;  %v3332_v26 = vsel %vm458_vm3, %v4425_v42, 0.0 }
 0x635   :  { %4164 = vmatmul.msk.bf16.vlgmr.msra.gmra.mxu3 %vm621_vm4, %v3355_v6  ;;  %v3294_v58 = vmul.f32 1.442695, %v3263_v46  ;;  %v2427_v6 = vsel %vm458_vm3, %v5948_v56, 0.0  ;;  %v3299_v46 = vsel %vm458_vm3, %v6194_v14, 0.0  ;;  %v3308_v56 = vsel %vm458_vm3, %v6215_v44, 0.0 }
 0x636   :  { %4163 = vmatmul.msk.bf16.vlgmr.msra.gmra.mxu2 %vm621_vm4, %v3354_v53  ;;  %v2436_v53 = vsel %vm458_vm3, %v5984_v37, 0.0  ;;  %v3314_v14 = vsel %vm458_vm3, %v6277_v15, 0.0  ;;  %v3317_v37 = vsel %vm458_vm3, %v6275_v61, 0.0  ;;  %v3323_v44 = vsel %vm458_vm3, %v6259_v16, 0.0 }
 0x637   :  { %2425 = vadd.xlane.f32.xlu1 %v2424_v4  ;;  %4426 = vpow2.f32 %v3294_v58  ;;  %v3311_v15 = vsel %vm458_vm3, %v6213_v12, 0.0  ;;  %v3320_v16 = vsel %vm458_vm3, %v6261_v47, 0.0 }
 0x638   :  { %2410 = vadd.xlane.f32.xlu2 %v2409_v18  ;;  %4428 = vpow2.f32 %v3292_v43 }
 0x639   :  { %4430 = vpow2.f32 %v3290_v45  ;;  %v3329_v45 = vsel %vm458_vm3, %v6298_v33, 0.0 }
 0x63a   :  { %v3655_v9 = vpop.permute.xlu2 %3654  ;;  %2431 = vadd.xlane.f32.xlu0 %v2430_v39  ;;  %v3613_v38 = vpop.permute.xlu0 %3612 }
 0x63b   :  { %v3660_v13 = vand.u32 %v3655_v9, %v4892_v52  ;;  %v3618_v28 = vand.u32 %v3613_v38, %v4892_v52 }
 0x63d   :  { %3627 = vmatpush.bf16.msrb.mxu0 %v3618_v28  ;;  %3669 = vmatpush.bf16.msrb.mxu2 %v3660_v13  ;;  %v4427_v60 = vpop.eup %4426 }
 0x63e   :  { %v6327_v40 = vpop.eup %4428  ;;  %v3359_v8 = vpack.c.bf16 %v4427_v60, %v4427_v60  ;;  %v3341_v4 = vsel %vm458_vm3, %v4427_v60, 0.0 }
 0x63f   :  { %2434 = vadd.xlane.f32.xlu1 %v2433_v7  ;;  %v3676_v22 = vpop.permute.xlu1 %3675  ;;  %v4431_v3 = vpop.eup %4430  ;;  %v3358_v32 = vpack.c.bf16 %v6327_v40, %v6327_v40  ;;  %v3338_v13 = vsel %vm458_vm3, %v6327_v40, 0.0 }
 0x640   :  { %v3681_v31 = vand.u32 %v3676_v22, %v4892_v52  ;;  %2419 = vadd.xlane.f32.xlu2 %v2418_v21  ;;  %4165 = vmatmul.msk.bf16.vlgmr.msrb.gmra.mxu0 %vm621_vm4, %v3356_v34  ;;  %v3357_v51 = vpack.c.bf16 %v4431_v3, %v4431_v3  ;;  %v3335_v49 = vsel %vm458_vm3, %v4431_v3, 0.0  ;;  %v6942_v34 = vld [vmem:[#allocation51_spill] sm:$0xff] }
 0x642   :  { %2440 = vadd.xlane.f32.xlu0 %v2439_v57  ;;  %v3634_v59 = vpop.permute.xlu0 %3633  ;;  %3690 = vmatpush.bf16.msrb.mxu3 %v3681_v31  ;;  %v6943_v31 = vld [vmem:[#allocation50_spill] sm:$0xff] }
 0x643   :  { %v3639_v41 = vand.u32 %v3634_v59, %v4892_v52  ;;  %v3296_v52 = vsel %vm458_vm3, %v6177_v50, 0.0  ;;  %v2445_v50 = vsel %vm458_vm3, %v6046_v62, 0.0  ;;  %v3326_v62 = vsel %vm458_vm3, %v6300_v11, 0.0 }
 0x645   :  { %v6334_v36 = vpop.f32.mrf.mxu0  ;;  %3648 = vmatpush.bf16.msrb.mxu1 %v3639_v41  ;;  %4168 = vmatmul.msk.bf16.vlgmr.msrb.gmra.mxu3 %vm621_vm4, %v3359_v8 }
 0x646   :  { %4167 = vmatmul.msk.bf16.vlgmr.msrb.gmra.mxu2 %vm621_vm4, %v3358_v32 }
 0x647   :  { %2443 = vadd.xlane.f32.xlu1 %v2442_v30 }
 0x648   :  { %2428 = vadd.xlane.f32.xlu2 %v2427_v6  ;;  %4166 = vmatmul.msk.bf16.vlgmr.msrb.gmra.mxu1 %vm621_vm4, %v3357_v51  ;;  %v6944_v51 = vld [vmem:[#allocation59_spill] sm:$0xff] }
 0x64a   :  { %3297 = vadd.xlane.f32.xlu0 %v3296_v52 }
 0x64d   :  { %v3379_v20 = vpop.f32.mrf.mxu0 }
 0x64e   :  { %v6945_v20 = vld [vmem:[#allocation56_spill] sm:$0xff] }
 0x64f   :  { %3300 = vadd.xlane.f32.xlu1 %v3299_v46 }
 0x650   :  { %2437 = vadd.xlane.f32.xlu2 %v2436_v53  ;;  %v6946_v53 = vld [vmem:[#allocation54_spill] sm:$0xff] }
 0x652   :  { %3306 = vadd.xlane.f32.xlu0 %v3305_v27 }
 0x657   :  { %3309 = vadd.xlane.f32.xlu1 %v3308_v56 }
 0x658   :  { %2446 = vadd.xlane.f32.xlu2 %v2445_v50 }
 0x65a   :  { %3315 = vadd.xlane.f32.xlu0 %v3314_v14  ;;  %v6947_v14 = vld [vmem:[#allocation58_spill] sm:$0xff] }
 0x65f   :  { %3318 = vadd.xlane.f32.xlu1 %v3317_v37 }
 0x660   :  { %3303 = vadd.xlane.f32.xlu2 %v3302_v35 }
 0x662   :  { %3324 = vadd.xlane.f32.xlu0 %v3323_v44 }
 0x667   :  { %3327 = vadd.xlane.f32.xlu1 %v3326_v62 }
 0x668   :  { %3312 = vadd.xlane.f32.xlu2 %v3311_v15 }
 0x66a   :  { %3333 = vadd.xlane.f32.xlu0 %v3332_v26  ;;  %v1506_v61 = vpop.xlane.xlu1 %1505 }
 0x66d   :  { %v1509_v58 = vpop.xlane.xlu0 %1508 }
 0x66e   :  { %4432 = vrcp.f32 %v1509_v58 }
 0x66f   :  { %3336 = vadd.xlane.f32.xlu1 %v3335_v49  ;;  %4434 = vrcp.f32 %v1506_v61 }
 0x670   :  { %3321 = vadd.xlane.f32.xlu2 %v3320_v16  ;;  %v6948_v16 = vld [vmem:[#allocation26_spill] sm:$0xff] }
 0x672   :  { %v6372_v11 = vpop.f32.mrf.mxu1  ;;  %3342 = vadd.xlane.f32.xlu0 %v3341_v4  ;;  %v1515_v43 = vpop.xlane.xlu1 %1514 }
 0x673   :  { %v6374_v12 = vpop.xlane.xlu2 %601 }
 0x674   :  { %v4433_v42 = vpop.eup %4432 }
 0x675   :  { %v1521_v18 = vpop.xlane.xlu0 %1520  ;;  %v4435_v28 = vpop.eup %4434  ;;  %v1921_v7 = vmul.f32 %v4433_v42, %v6942_v34  ;;  %v6951_v42 = vld [vmem:[#allocation53_spill] sm:$0xff] }
 0x676   :  { %4436 = vrcp.f32 %v1521_v18  ;;  %v1920_v57 = vmul.f32 %v4435_v28, %v6943_v31  ;;  %v6949_v18 = vld [vmem:[#allocation52_spill] sm:$0xff] }
 0x678   :  { %3330 = vadd.xlane.f32.xlu2 %v3329_v45  ;;  %v4184_v3 = vpack.i.bf16 %v1921_v7, %v1920_v57 }
 0x67a   :  { %v3400_v39 = vpop.f32.mrf.mxu1  ;;  %v1524_v9 = vpop.xlane.xlu1 %1523 }
 0x67b   :  { %v1512_v38 = vpop.xlane.xlu2 %1511  ;;  %v6950_v39 = vld [vmem:[#allocation57_spill] sm:$0xff] }
 0x67c   :  { %v4437_v8 = vpop.eup %4436 }
 0x67d   :  { %v1530_v47 = vpop.xlane.xlu0 %1529  ;;  %v1925_v46 = vmul.f32 %v4437_v8, %v6945_v20  ;;  %v6955_v20 = vld [vmem:[#allocation55_spill] sm:$0xff] }
 0x67e   :  { %4438 = vrcp.f32 %v1530_v47 }
 0x680   :  { %3339 = vadd.xlane.f32.xlu2 %v3338_v13 }
 0x682   :  { %v6381_v22 = vpop.f32.mrf.mxu1  ;;  %v1533_v33 = vpop.xlane.xlu1 %1532 }
 0x683   :  { %4440 = vrcp.f32 %v1533_v33  ;;  %v6383_v21 = vpop.f32.mrf.mxu0  ;;  %v1518_v60 = vpop.xlane.xlu2 %1517 }
 0x684   :  { %4442 = vrcp.f32 %v1518_v60  ;;  %v4439_v40 = vpop.eup %4438 }
 0x685   :  { %v1539_v59 = vpop.xlane.xlu0 %1538  ;;  %4444 = vrcp.f32 %v1512_v38  ;;  %v1928_v37 = vmul.f32 %v4439_v40, %v6947_v14  ;;  %v6953_v40 = vld [vmem:[#allocation63_spill] sm:$0xff] }
 0x686   :  { %4446 = vrcp.f32 %v1524_v9 }
 0x687   :  { %4448 = vrcp.f32 %v1515_v43 }
 0x688   :  { %4185 = vrot.lane.b32.xlu1 %v4184_v3, %s4572_s19  ;;  %v6952_v3 = vld [vmem:[#allocation64_spill] sm:$0xff] }
 0x689   :  { %v4441_v41 = vpop.eup %4440 }
 0x68a   :  { %v4443_v32 = vpop.eup %4442  ;;  %v1929_v30 = vmul.f32 %v4441_v41, %v6944_v51  ;;  %v3484_v6 = vpop.f32.mrf.mxu1 }
 0x68b   :  { %v1542_v52 = vpop.xlane.xlu1 %1541  ;;  %v1924_v27 = vmul.f32 %v4443_v32, %v6946_v53  ;;  %v3463_v56 = vpop.f32.mrf.mxu0 }
 0x68c   :  { %v1527_v50 = vpop.xlane.xlu2 %1526  ;;  %v4204_v62 = vpack.i.bf16 %v1929_v30, %v1928_v37  ;;  %v4445_v15 = vpop.eup %4444  ;;  %v6954_v30 = vld [vmem:[#allocation60_spill] sm:$0xff] }
 0x68d   :  { %4450 = vrcp.f32 %v1527_v50  ;;  %v1548_v35 = vpop.xlane.xlu0 %1547  ;;  %v4194_v44 = vpack.i.bf16 %v1925_v46, %v1924_v27  ;;  %v4447_v26 = vpop.eup %4446  ;;  %v1922_v4 = vmul.f32 %v4445_v15, %v6948_v16 }
 0x68e   :  { %v4449_v58 = vpop.eup %4448  ;;  %4452 = vrcp.f32 %v1548_v35  ;;  %v1926_v45 = vmul.f32 %v4447_v26, %v6949_v18  ;;  %v6956_v26 = vld [vmem:[#allocation62_spill] sm:$0xff] }
 0x68f   :  { %4195 = vrot.lane.b32.xlu0 %v4194_v44, %s4572_s19  ;;  %4454 = vrcp.f32 %v1539_v59  ;;  %v1923_v13 = vmul.f32 %v4449_v58, %v6951_v42 }
 0x690   :  { %v6392_v61 = vpop.f32.mrf.mxu2  ;;  %4205 = vrot.lane.b32.xlu1 %v4204_v62, %s4572_s19 }
 0x691   :  { %v4189_v7 = vpack.i.bf16 %v1923_v13, %v1922_v4 }
 0x693   :  { %v4451_v49 = vpop.eup %4450  ;;  %v1551_v43 = vpop.xlane.xlu1 %1550 }
 0x694   :  { %v1927_v9 = vmul.f32 %v4451_v49, %v6950_v39  ;;  %4456 = vrcp.f32 %v1551_v43  ;;  %v6398_v38 = vpop.f32.mrf.mxu3  ;;  %v1536_v47 = vpop.xlane.xlu2 %1535  ;;  %v6957_v49 = vld [vmem:[#allocation61_spill] sm:$0xff] }
 0x695   :  { %4458 = vrcp.f32 %v1536_v47  ;;  %v2405_v28 = vpop.xlane.xlu0 %2404  ;;  %v4453_v33 = vpop.eup %4452 }
 0x696   :  { %v4199_v34 = vpack.i.bf16 %v1927_v9, %v1926_v45  ;;  %v4455_v60 = vpop.eup %4454  ;;  %v1934_v8 = vmul.f32 %v4453_v33, %v6952_v3  ;;  %4460 = vrcp.f32 %v1542_v52 }
 0x697   :  { %v1931_v6 = vmul.f32 %v4455_v60, %v6954_v30 }
 0x698   :  { %4200 = vrot.lane.b32.xlu0 %v4199_v34, %s4572_s19  ;;  %v3421_v31 = vpop.f32.mrf.mxu2  ;;  %4190 = vrot.lane.b32.xlu2 %v4189_v7, %s4572_s19 }
 0x69a   :  { %v4457_v57 = vpop.eup %4456  ;;  %v6405_v32 = vpop.f32.mrf.mxu1 }
 0x69b   :  { %v4459_v59 = vpop.eup %4458  ;;  %v1935_v41 = vmul.f32 %v4457_v57, %v6953_v40  ;;  %v2408_v51 = vpop.xlane.xlu1 %2407 }
 0x69c   :  { %v1930_v46 = vmul.f32 %v4459_v59, %v6955_v20  ;;  %v6409_v53 = vpop.f32.mrf.mxu0  ;;  %v3442_v27 = vpop.f32.mrf.mxu3 }
 0x69d   :  { %v1545_v56 = vpop.xlane.xlu2 %1544  ;;  %v4219_v50 = vpack.i.bf16 %v1935_v41, %v1934_v8  ;;  %v2414_v14 = vpop.xlane.xlu0 %2413 }
 0x69e   :  { %4462 = vrcp.f32 %v1545_v56  ;;  %v4209_v37 = vpack.i.bf16 %v1931_v6, %v1930_v46  ;;  %v4461_v35 = vpop.eup %4460 }
 0x69f   :  { %4220 = vrot.lane.b32.xlu1 %v4219_v50, %s4572_s19  ;;  %4464 = vrcp.f32 %v2414_v14  ;;  %v1932_v58 = vmul.f32 %v4461_v35, %v6956_v26 }
 0x6a0   :  { %4210 = vrot.lane.b32.xlu2 %v4209_v37, %s4572_s19  ;;  %4466 = vrcp.f32 %v2405_v28 }
 0x6a2   :  { %v3568_v44 = vpop.f32.mrf.mxu1 }
 0x6a3   :  { %v2417_v62 = vpop.xlane.xlu1 %2416 }
 0x6a4   :  { %v4463_v52 = vpop.eup %4462  ;;  %4468 = vrcp.f32 %v2417_v62  ;;  %v3547_v15 = vpop.f32.mrf.mxu0 }
 0x6a5   :  { %v1933_v16 = vmul.f32 %v4463_v52, %v6957_v49  ;;  %v2402_v4 = vpop.xlane.xlu2 %2401  ;;  %v2423_v43 = vpop.xlane.xlu0 %2422 }
 0x6a6   :  { %4470 = vrcp.f32 %v2402_v4  ;;  %v4465_v45 = vpop.eup %4464 }
 0x6a7   :  { %v4214_v18 = vpack.i.bf16 %v1933_v16, %v1932_v58  ;;  %v4467_v39 = vpop.eup %4466  ;;  %v2820_v13 = vmul.f32 %v4465_v45, %v6062_v55  ;;  %4472 = vrcp.f32 %v2408_v51 }
 0x6a8   :  { %v6416_v9 = vpop.f32.mrf.mxu3  ;;  %v2817_v33 = vmul.f32 %v4467_v39, %v6025_v17 }
 0x6a9   :  { %4215 = vrot.lane.b32.xlu0 %v4214_v18, %s4572_s19  ;;  %v6418_v42 = vpop.f32.mrf.mxu2 }
 0x6aa   :  { %v4469_v47 = vpop.eup %4468 }
 0x6ab   :  { %v2821_v28 = vmul.f32 %v4469_v47, %v6059_v48  ;;  %v2426_v34 = vpop.xlane.xlu1 %2425 }
 0x6ac   :  { %v4471_v7 = vpop.eup %4470 }
 0x6ad   :  { %v2816_v60 = vmul.f32 %v4471_v7, %v6050_v24  ;;  %v2411_v31 = vpop.xlane.xlu2 %2410  ;;  %v4234_v57 = vpack.i.bf16 %v2821_v28, %v2820_v13  ;;  %v2432_v59 = vpop.xlane.xlu0 %2431 }
 0x6ae   :  { %4474 = vrcp.f32 %v2411_v31  ;;  %v4473_v8 = vpop.eup %4472 }
 0x6af   :  { %4235 = vrot.lane.b32.xlu1 %v4234_v57, %s4573_s20  ;;  %v4224_v3 = vpack.i.bf16 %v2817_v33, %v2816_v60  ;;  %4476 = vrcp.f32 %v2432_v59  ;;  %v2818_v17 = vmul.f32 %v4473_v8, %v6068_v1 }
 0x6b0   :  { %v3526_v55 = vpop.f32.mrf.mxu3  ;;  %4478 = vrcp.f32 %v2423_v43 }
 0x6b1   :  { %4225 = vrot.lane.b32.xlu2 %v4224_v3, %s4573_s20  ;;  %v3505_v48 = vpop.f32.mrf.mxu2 }
 0x6b3   :  { %v2435_v40 = vpop.xlane.xlu1 %2434 }
 0x6b4   :  { %v4475_v41 = vpop.eup %4474  ;;  %4480 = vrcp.f32 %v2435_v40 }
 0x6b5   :  { %v2819_v24 = vmul.f32 %v4475_v41, %v6072_v63  ;;  %v2420_v51 = vpop.xlane.xlu2 %2419  ;;  %v2441_v30 = vpop.xlane.xlu0 %2440 }
 0x6b6   :  { %4482 = vrcp.f32 %v2420_v51  ;;  %v4477_v20 = vpop.eup %4476 }
 0x6b7   :  { %v4229_v6 = vpack.i.bf16 %v2819_v24, %v2818_v17  ;;  %v4479_v46 = vpop.eup %4478  ;;  %v2826_v14 = vmul.f32 %v4477_v20, %v6096_v19  ;;  %4484 = vrcp.f32 %v2426_v34  ;;  %v6958_v24 = vld [vmem:[#allocation65_spill] sm:$0xff] }
 0x6b8   :  { %v6429_v27 = vpop.f32.mrf.mxu3  ;;  %v2823_v63 = vmul.f32 %v4479_v46, %v6084_v5 }
 0x6b9   :  { %4230 = vrot.lane.b32.xlu0 %v4229_v6, %s4573_s20  ;;  %v6431_v50 = vpop.f32.mrf.mxu2 }
 0x6ba   :  { %v4481_v56 = vpop.eup %4480 }
 0x6bb   :  { %v2827_v37 = vmul.f32 %v4481_v56, %v6098_v10  ;;  %v2444_v1 = vpop.xlane.xlu1 %2443 }
 0x6bc   :  { %v4483_v35 = vpop.eup %4482 }
 0x6bd   :  { %v2822_v44 = vmul.f32 %v4483_v35, %v6087_v54  ;;  %v2429_v62 = vpop.xlane.xlu2 %2428  ;;  %v4249_v52 = vpack.i.bf16 %v2827_v37, %v2826_v14  ;;  %v3298_v15 = vpop.xlane.xlu0 %3297 }
 0x6be   :  { %4486 = vrcp.f32 %v2429_v62  ;;  %v6437_v26 = vpop.f32.mrf.mxu0  ;;  %v4485_v10 = vpop.eup %4484 }
 0x6bf   :  { %4250 = vrot.lane.b32.xlu1 %v4249_v52, %s4573_s20  ;;  %v4239_v58 = vpack.i.bf16 %v2823_v63, %v2822_v44  ;;  %4488 = vrcp.f32 %v3298_v15  ;;  %v2824_v54 = vmul.f32 %v4485_v10, %v6075_v25 }
 0x6c0   :  { %v3610_v19 = vpop.f32.mrf.mxu3  ;;  %4490 = vrcp.f32 %v2441_v30 }
 0x6c1   :  { %4240 = vrot.lane.b32.xlu2 %v4239_v58, %s4573_s20  ;;  %v3589_v49 = vpop.f32.mrf.mxu2 }
 0x6c3   :  { %v3301_v16 = vpop.xlane.xlu1 %3300 }
 0x6c4   :  { %v4487_v5 = vpop.eup %4486  ;;  %4492 = vrcp.f32 %v3301_v16 }
 0x6c5   :  { %v2825_v4 = vmul.f32 %v4487_v5, %v6082_v29  ;;  %v2438_v43 = vpop.xlane.xlu2 %2437  ;;  %v6443_v18 = vpop.f32.mrf.mxu1 }
 0x6c6   :  { %4494 = vrcp.f32 %v2438_v43  ;;  %v3307_v45 = vpop.xlane.xlu0 %3306  ;;  %v3631_v39 = vpop.f32.mrf.mxu0 }
 0x6c7   :  { %v4244_v47 = vpack.i.bf16 %v2825_v4, %v2824_v54  ;;  %v4489_v13 = vpop.eup %4488  ;;  %4496 = vrcp.f32 %v2444_v1 }
 0x6c8   :  { %v4491_v28 = vpop.eup %4490  ;;  %v6446_v34 = vpop.f32.mrf.mxu3  ;;  %v3712_v25 = vmul.f32 %v4489_v13, %v6334_v36 }
 0x6c9   :  { %4245 = vrot.lane.b32.xlu0 %v4244_v47, %s4573_s20  ;;  %v6448_v33 = vpop.f32.mrf.mxu2  ;;  %v2829_v57 = vmul.f32 %v4491_v28, %v6091_v23 }
 0x6ca   :  { %v4493_v7 = vpop.eup %4492 }
 0x6cb   :  { %v3713_v29 = vmul.f32 %v4493_v7, %v6372_v11  ;;  %v3310_v60 = vpop.xlane.xlu1 %3309 }
 0x6cc   :  { %v4495_v31 = vpop.eup %4494 }
 0x6cd   :  { %v2828_v59 = vmul.f32 %v4495_v31, %v6093_v2  ;;  %v2447_v3 = vpop.xlane.xlu2 %2446  ;;  %v4264_v55 = vpack.i.bf16 %v3713_v29, %v3712_v25  ;;  %v3652_v8 = vpop.f32.mrf.mxu1 }
 0x6ce   :  { %4498 = vrcp.f32 %v2447_v3  ;;  %v3316_v48 = vpop.xlane.xlu0 %3315  ;;  %v4497_v11 = vpop.eup %4496  ;;  %v6959_v3 = vld [vmem:[#allocation10_spill] sm:$0xff] }
 0x6cf   :  { %4265 = vrot.lane.b32.xlu1 %v4264_v55, %s4574_s21  ;;  %v4254_v40 = vpack.i.bf16 %v2829_v57, %v2828_v59  ;;  %4500 = vrcp.f32 %v3316_v48  ;;  %v2830_v2 = vmul.f32 %v4497_v11, %v6104_v0  ;;  %v6960_v55 = vld [vmem:[#allocation43_spill] sm:$0xff]  ;;  %v6962_v11 = vld [vmem:[#allocation9_spill] sm:$0xff] }
 0x6d0   :  { %v3694_v36 = vpop.f32.mrf.mxu3  ;;  %4502 = vrcp.f32 %v3307_v45 }
 0x6d1   :  { %4255 = vrot.lane.b32.xlu2 %v4254_v40, %s4573_s20  ;;  %v3673_v41 = vpop.f32.mrf.mxu2  ;;  %v6961_v40 = vld [vmem:[#allocation29_spill] sm:$0xff] }
 0x6d3   :  { %v3319_v17 = vpop.xlane.xlu1 %3318 }
 0x6d4   :  { %v4499_v23 = vpop.eup %4498  ;;  %4504 = vrcp.f32 %v3319_v17 }
 0x6d5   :  { %v2831_v51 = vmul.f32 %v4499_v23, %v6958_v24  ;;  %v3304_v30 = vpop.xlane.xlu2 %3303  ;;  %v4501_v46 = vpop.eup %4500 }
 0x6d6   :  { %4506 = vrcp.f32 %v3304_v30  ;;  %v3325_v6 = vpop.xlane.xlu0 %3324  ;;  %v4503_v56 = vpop.eup %4502  ;;  %v3718_v37 = vmul.f32 %v4501_v46, %v6418_v42 }
 0x6d7   :  { %v4259_v20 = vpack.i.bf16 %v2831_v51, %v2830_v2  ;;  %4508 = vrcp.f32 %v3310_v60  ;;  %v3715_v0 = vmul.f32 %v4503_v56, %v6398_v38 }
 0x6d9   :  { %4260 = vrot.lane.b32.xlu0 %v4259_v20, %s4573_s20 }
 0x6da   :  { %v4505_v14 = vpop.eup %4504 }
 0x6db   :  { %v3719_v1 = vmul.f32 %v4505_v14, %v6416_v9  ;;  %v3328_v35 = vpop.xlane.xlu1 %3327  ;;  %v6963_v14 = vld [vmem:[#allocation40_spill] sm:$0xff] }
 0x6dc   :  { %v4507_v63 = vpop.eup %4506 }
 0x6dd   :  { %v3714_v44 = vmul.f32 %v4507_v63, %v6392_v61  ;;  %v3313_v62 = vpop.xlane.xlu2 %3312  ;;  %v4279_v52 = vpack.i.bf16 %v3719_v1, %v3718_v37  ;;  %v4509_v19 = vpop.eup %4508  ;;  %v6964_v37 = vld [vmem:[#allocation30_spill] sm:$0xff] }
 0x6de   :  { %4510 = vrcp.f32 %v3313_v62  ;;  %v3334_v15 = vpop.xlane.xlu0 %3333  ;;  %v3716_v10 = vmul.f32 %v4509_v19, %v6383_v21 }
 0x6df   :  { %4280 = vrot.lane.b32.xlu1 %v4279_v52, %s4574_s21  ;;  %v4269_v58 = vpack.i.bf16 %v3715_v0, %v3714_v44  ;;  %4512 = vrcp.f32 %v3334_v15  ;;  %v6965_v0 = vld [vmem:[#allocation33_spill] sm:$0xff]  ;;  %v6966_v52 = vld [vmem:[#allocation2_spill] sm:$0xff] }
 0x6e0   :  { %4514 = vrcp.f32 %v3325_v6 }
 0x6e1   :  { %4270 = vrot.lane.b32.xlu2 %v4269_v58, %s4574_s21 }
 0x6e3   :  { %v3337_v9 = vpop.xlane.xlu1 %3336 }
 0x6e4   :  { %v4511_v42 = vpop.eup %4510  ;;  %4516 = vrcp.f32 %v3337_v9 }
 0x6e5   :  { %v3717_v38 = vmul.f32 %v4511_v42, %v6381_v22  ;;  %v3322_v61 = vpop.xlane.xlu2 %3321  ;;  %v4513_v16 = vpop.eup %4512 }
 0x6e6   :  { %4518 = vrcp.f32 %v3322_v61  ;;  %v4515_v5 = vpop.eup %4514  ;;  %v3724_v4 = vmul.f32 %v4513_v16, %v6437_v26  ;;  %v3343_v28 = vpop.xlane.xlu0 %3342  ;;  %v6968_v61 = vld [vmem:[#allocation6_spill] sm:$0xff] }
 0x6e7   :  { %v4274_v49 = vpack.i.bf16 %v3717_v38, %v3716_v10  ;;  %4520 = vrcp.f32 %v3328_v35  ;;  %v3721_v39 = vmul.f32 %v4515_v5, %v6405_v32  ;;  %v6967_v10 = vld [vmem:[#allocation23_spill] sm:$0xff] }
 0x6e9   :  { %4275 = vrot.lane.b32.xlu0 %v4274_v49, %s4574_s21 }
 0x6ea   :  { %v4517_v54 = vpop.eup %4516 }
 0x6eb   :  { %v3725_v43 = vmul.f32 %v4517_v54, %v6443_v18 }
 0x6ec   :  { %v4519_v45 = vpop.eup %4518 }
 0x6ed   :  { %v3720_v21 = vmul.f32 %v4519_v45, %v6409_v53  ;;  %v3331_v47 = vpop.xlane.xlu2 %3330  ;;  %v4294_v22 = vpack.i.bf16 %v3725_v43, %v3724_v4  ;;  %v4521_v7 = vpop.eup %4520 }
 0x6ee   :  { %4522 = vrcp.f32 %v3331_v47  ;;  %v3722_v26 = vmul.f32 %v4521_v7, %v6431_v50  ;;  %v3995_v7 = vld [vmem:[%s6735_s1 + $0x8] sm:$0x7] }
 0x6ef   :  { %4295 = vrot.lane.b32.xlu1 %v4294_v22, %s4574_s21  ;;  %v4284_v13 = vpack.i.bf16 %v3721_v39, %v3720_v21  ;;  %4524 = vrcp.f32 %v3343_v28 }
 0x6f1   :  { %4285 = vrot.lane.b32.xlu2 %v4284_v13, %s4574_s21 }
 0x6f4   :  { %v4523_v25 = vpop.eup %4522 }
 0x6f5   :  { %v3723_v18 = vmul.f32 %v4523_v25, %v6429_v27  ;;  %v3340_v29 = vpop.xlane.xlu2 %3339  ;;  %v4525_v53 = vpop.eup %4524  ;;  %v3998_v25 = vld [vmem:[%s6735_s1 + $0xc] sm:$0x7] }
 0x6f6   :  { %4526 = vrcp.f32 %v3340_v29  ;;  %v3727_v31 = vmul.f32 %v4525_v53, %v6446_v34 }
 0x6f7   :  { %v4289_v32 = vpack.i.bf16 %v3723_v18, %v3722_v26  ;;  %4528 = vrcp.f32 %v6959_v3 }
 0x6f8   :  { %4530 = vrcp.f32 %v6960_v55  ;;  %v6973_v55 = vld [vmem:[#allocation7_spill] sm:$0xff] }
 0x6f9   :  { %4290 = vrot.lane.b32.xlu0 %v4289_v32, %s4574_s21  ;;  %4532 = vrcp.f32 %v6963_v14 }
 0x6fa   :  { %v4186_v2 = vpop.permute.xlu1 %4185  ;;  %4534 = vrcp.f32 %v6964_v37 }
 0x6fb   :  { %4536 = vrcp.f32 %v6965_v0  ;;  %v4188_v22 = vunpack.i.h.bf16 %v4186_v2  ;;  %v4187_v13 = vunpack.i.l.bf16 %v4186_v2  ;;  %v3989_v2 = vld [vmem:[%s6735_s1] sm:$0x7] }
 0x6fc   :  { %v4527_v60 = vpop.eup %4526  ;;  %4538 = vrcp.f32 %v6966_v52  ;;  %v6975_v52 = vld [vmem:[#allocation32_spill] sm:$0xff] }
 0x6fd   :  { %v3726_v57 = vmul.f32 %v4527_v60, %v6448_v33  ;;  %v4191_v59 = vpop.permute.xlu2 %4190  ;;  %v4529_v27 = vpop.eup %4528  ;;  %4540 = vrcp.f32 %v6973_v55 }
 0x6fe   :  { %v4531_v50 = vpop.eup %4530  ;;  %v986_v36 = vmul.f32 %v4529_v27, %v6961_v40  ;;  %v4193_v15 = vunpack.i.h.bf16 %v4191_v59  ;;  %v4192_v58 = vunpack.i.l.bf16 %v4191_v59  ;;  %v6972_v59 = vld [vmem:[#allocation35_spill] sm:$0xff] }
 0x6ff   :  { %v4299_v8 = vpack.i.bf16 %v3727_v31, %v3726_v57  ;;  %v987_v41 = vmul.f32 %v4531_v50, %v6962_v11  ;;  %v4533_v63 = vpop.eup %4532  ;;  %v6971_v31 = vld [vmem:[#allocation36_spill] sm:$0xff] }
 0x700   :  { %v4535_v62 = vpop.eup %4534  ;;  %v978_v38 = vmul.f32 %v4533_v63, %v6967_v10 }
 0x701   :  { %4300 = vrot.lane.b32.xlu2 %v4299_v8, %s4574_s21  ;;  %v6490_v24 = vpop.permute.xlu0 %4195  ;;  %v979_v49 = vmul.f32 %v4535_v62, %v6968_v61  ;;  %v4537_v5 = vpop.eup %4536  ;;  %v6977_v61 = vld [vmem:[#allocation24_spill] sm:$0xff] }
 0x702   :  { %v6492_v51 = vpop.permute.xlu1 %4205  ;;  %v3922_v4 = vsel %vm78_vm0, %v978_v38, %v4192_v58  ;;  %v4539_v39 = vpop.eup %4538  ;;  %v977_v57 = vmul.f32 %v4537_v5, %v6971_v31  ;;  %v6978_v5 = vld [vmem:[#allocation42_spill] sm:$0xff] }
 0x703   :  { %v3923_v54 = vsel %vm78_vm0, %v979_v49, %v4193_v15  ;;  %v976_v3 = vmul.f32 %v4539_v39, %v6972_v59  ;;  %v4541_v62 = vpop.eup %4540  ;;  %v4207_v10 = vunpack.i.l.bf16 %v6492_v51 }
 0x705   :  { %v4211_v48 = vpop.permute.xlu2 %4210  ;;  %v3920_v40 = vsel %vm78_vm0, %v976_v3, %v4187_v13 }
 0x706   :  { %v4213_v17 = vunpack.i.h.bf16 %v4211_v48  ;;  %v4212_v23 = vunpack.i.l.bf16 %v4211_v48  ;;  %v3921_v48 = vsel %vm78_vm0, %v977_v57, %v4188_v22 }
 0x708   :  { %v6485_v34 = vsel %vm78_vm0, %v987_v41, %v4213_v17  ;;  %v6488_v33 = vsel %vm78_vm0, %v986_v36, %v4212_v23  ;;  %v6974_v41 = vld [vmem:[#allocation15_spill] sm:$0xff] }
 0x709   :  { %4542 = vrcp.f32 %v6974_v41 }
 0x70a   :  { %v6494_v6 = vpop.permute.xlu0 %4200  ;;  %4544 = vrcp.f32 %v6975_v52  ;;  %v4010_v52 = vld [vmem:[%s6735_s1 + $0x1c] sm:$0x7] }
 0x70d   :  { %v4226_v30 = vpop.permute.xlu2 %4225 }
 0x70e   :  { %v4228_v29 = vunpack.i.h.bf16 %v4226_v30  ;;  %v4227_v32 = vunpack.i.l.bf16 %v4226_v30  ;;  %v3992_v30 = vld [vmem:[%s6735_s1 + $0x4] sm:$0x7] }
 0x70f   :  { %v4543_v38 = vpop.eup %4542 }
 0x710   :  { %v3937_v17 = vsel %vm3936_vm5, %v3920_v40, %v4227_v32  ;;  %v3938_v23 = vsel %vm3936_vm5, %v3921_v48, %v4228_v29  ;;  %v4203_v29 = vunpack.i.h.bf16 %v6494_v6  ;;  %v4202_v32 = vunpack.i.l.bf16 %v6494_v6  ;;  %v6983_v48 = vld [vmem:[#allocation28_spill] sm:$0xff] }
 0x711   :  { %v6496_v20 = vpop.permute.xlu1 %4220 }
 0x71b   :  { %v6498_v46 = vpop.permute.xlu2 %4240  ;;  %v6500_v56 = vpop.permute.xlu0 %4215 }
 0x71c   :  { %v4243_v59 = vunpack.i.h.bf16 %v6498_v46  ;;  %v4242_v3 = vunpack.i.l.bf16 %v6498_v46 }
 0x721   :  { %v6504_v1 = vpop.permute.xlu1 %4235 }
 0x72b   :  { %v6506_v35 = vpop.permute.xlu2 %4255  ;;  %v4231_v44 = vpop.permute.xlu0 %4230 }
 0x72c   :  { %v4233_v19 = vunpack.i.h.bf16 %v4231_v44  ;;  %v4232_v9 = vunpack.i.l.bf16 %v4231_v44 }
 0x72e   :  { %v3940_v21 = vsel %vm3936_vm5, %v3923_v54, %v4233_v19  ;;  %v3939_v47 = vsel %vm3936_vm5, %v3922_v4, %v4232_v9  ;;  %v6976_v19 = vld [vmem:[#allocation5_spill] sm:$0xff]  ;;  %v4208_v9 = vunpack.i.h.bf16 %v6492_v51  ;;  %v6979_v54 = vld [vmem:[#allocation34_spill] sm:$0xff] }
 0x72f   :  { %4546 = vrcp.f32 %v6976_v19  ;;  %v985_v4 = vmul.f32 %v4541_v62, %v6979_v54  ;;  %v6981_v51 = vld [vmem:[#allocation45_spill] sm:$0xff]  ;;  %v6985_v19 = vld [vmem:[#allocation12_spill] sm:$0xff]  ;;  %v4238_v54 = vunpack.i.h.bf16 %v6504_v1 }
 0x730   :  { %4548 = vrcp.f32 %v6977_v61  ;;  %v4007_v62 = vld [vmem:[%s6735_s1 + $0x18] sm:$0x7]  ;;  %v4197_v61 = vunpack.i.l.bf16 %v6490_v24 }
 0x731   :  { %v6510_v42 = vpop.permute.xlu1 %4250  ;;  %4550 = vrcp.f32 %v6978_v5 }
 0x732   :  { %4552 = vrcp.f32 %v6981_v51  ;;  %v6986_v51 = vld [vmem:[#allocation38_spill] sm:$0xff] }
 0x733   :  { %4554 = vrcp.f32 %v6374_v12 }
 0x73b   :  { %v4271_v16 = vpop.permute.xlu2 %4270  ;;  %v4246_v44 = vpop.permute.xlu0 %4245 }
 0x73c   :  { %v4273_v43 = vunpack.i.h.bf16 %v4271_v16  ;;  %v4272_v45 = vunpack.i.l.bf16 %v4271_v16  ;;  %v4248_v49 = vunpack.i.h.bf16 %v4246_v44  ;;  %v4247_v16 = vunpack.i.l.bf16 %v4246_v44 }
 0x73e   :  { %v3956_v26 = vsel %vm3953_vm6, %v3939_v47, %v4272_v45  ;;  %v3957_v18 = vsel %vm3953_vm6, %v3940_v21, %v4273_v43  ;;  %v6980_v43 = vld [vmem:[#allocation31_spill] sm:$0xff]  ;;  %v3929_v21 = vsel %vm78_vm0, %v985_v4, %v4208_v9  ;;  %v4237_v4 = vunpack.i.l.bf16 %v6504_v1 }
 0x73f   :  { %v3972_v53 = vpack.c.bf16 %v3956_v26, %v3956_v26  ;;  %v3973_v60 = vpack.c.bf16 %v3957_v18, %v3957_v18  ;;  %v984_v45 = vmul.f32 %v4543_v38, %v6980_v43  ;;  %v3946_v26 = vsel %vm3936_vm5, %v3929_v21, %v4248_v49  ;;  %v6987_v21 = vld [vmem:[#allocation25_spill] sm:$0xff] }
 0x740   :  { %v4198_v38 = vunpack.i.h.bf16 %v6490_v24  ;;  %v4223_v49 = vunpack.i.h.bf16 %v6496_v20  ;;  %v6988_v24 = vld [vmem:[#allocation4_spill] sm:$0xff] }
 0x741   :  { %v3996_v8 = vsel %vm6518_vm9, %v3972_v53, %v3995_v7  ;;  %v3999_v27 = vsel %vm6518_vm9, %v3973_v60, %v3998_v25  ;;  %v4266_v50 = vpop.permute.xlu1 %4265  ;;  %v3928_v47 = vsel %vm78_vm0, %v984_v45, %v4207_v10  ;;  %v4545_v7 = vpop.eup %4544  ;;  %v4013_v53 = vld [vmem:[%s6735_s1 + $0x20] sm:$0x7]  ;;  %v4016_v60 = vld [vmem:[%s6735_s1 + $0x24] sm:$0x7] }
 0x742   :  { %3997 = vst [vmem:[%s6735_s1 + $0x8] sm:$0x7] %v3996_v8  ;;  %v4268_v36 = vunpack.i.h.bf16 %v4266_v50  ;;  %v4267_v11 = vunpack.i.l.bf16 %v4266_v50  ;;  %v3945_v25 = vsel %vm3936_vm5, %v3928_v47, %v4247_v16  ;;  %v4547_v18 = vpop.eup %4546  ;;  %v982_v40 = vmul.f32 %v4545_v7, %v6983_v48 }
 0x743   :  { %4000 = vst [vmem:[%s6735_s1 + $0xc] sm:$0x7] %v3999_v27  ;;  %v4549_v57 = vpop.eup %4548  ;;  %v6982_v27 = vld [vmem:[#allocation27_spill] sm:$0xff]  ;;  %v4222_v16 = vunpack.i.l.bf16 %v6496_v20  ;;  %v4258_v48 = vunpack.i.h.bf16 %v6506_v35 }
 0x744   :  { %v3955_v14 = vsel %vm3953_vm6, %v3938_v23, %v4268_v36  ;;  %v3954_v37 = vsel %vm3953_vm6, %v3937_v17, %v4267_v11  ;;  %v4551_v6 = vpop.eup %4550  ;;  %v983_v50 = vmul.f32 %v4549_v57, %v6982_v27  ;;  %v6984_v11 = vld [vmem:[#allocation44_spill] sm:$0xff]  ;;  %v3926_v46 = vsel %vm78_vm0, %v982_v40, %v4202_v32  ;;  %v6990_v20 = vld [vmem:[#allocation39_spill] sm:$0xff] }
 0x745   :  { %v3971_v63 = vpack.c.bf16 %v3955_v14, %v3955_v14  ;;  %v3970_v0 = vpack.c.bf16 %v3954_v37, %v3954_v37  ;;  %v4553_v36 = vpop.eup %4552  ;;  %4556 = vrcp.f32 %v6984_v11  ;;  %v981_v47 = vmul.f32 %v4551_v6, %v6987_v21 }
 0x746   :  { %v4555_v37 = vpop.eup %4554  ;;  %4558 = vrcp.f32 %v6985_v19  ;;  %v4257_v40 = vunpack.i.l.bf16 %v6506_v35  ;;  %v4034_v35 = vld [vmem:[%s6735_s1 + $0x3c] sm:$0x7] }
 0x747   :  { %v3993_v15 = vsel %vm6518_vm9, %v3971_v63, %v3992_v30  ;;  %v3990_v58 = vsel %vm6518_vm9, %v3970_v0, %v3989_v2  ;;  %v3927_v2 = vsel %vm78_vm0, %v983_v50, %v4203_v29  ;;  %v3943_v63 = vsel %vm3936_vm5, %v3926_v46, %v4242_v3 }
 0x748   :  { %3994 = vst [vmem:[%s6735_s1 + $0x4] sm:$0x7] %v3993_v15  ;;  %v3944_v0 = vsel %vm3936_vm5, %v3927_v2, %v4243_v59 }
 0x749   :  { %3991 = vst [vmem:[%s6735_s1] sm:$0x7] %v3990_v58 }
 0x74b   :  { %v4286_v39 = vpop.permute.xlu2 %4285  ;;  %v4261_v44 = vpop.permute.xlu0 %4260 }
 0x74c   :  { %v4288_v22 = vunpack.i.h.bf16 %v4286_v39  ;;  %v4287_v13 = vunpack.i.l.bf16 %v4286_v39  ;;  %v4557_v5 = vpop.eup %4556  ;;  %v980_v39 = vmul.f32 %v4547_v18, %v6986_v51  ;;  %v3925_v18 = vsel %vm78_vm0, %v981_v47, %v4198_v38 }
 0x74d   :  { %v989_v1 = vmul.f32 %v4557_v5, %v6990_v20  ;;  %v3942_v57 = vsel %vm3936_vm5, %v3925_v18, %v4238_v54  ;;  %v4025_v54 = vld [vmem:[%s6735_s1 + $0x30] sm:$0x7] }
 0x74e   :  { %v3963_v31 = vsel %vm3953_vm6, %v3946_v26, %v4288_v22  ;;  %v3962_v12 = vsel %vm3953_vm6, %v3945_v25, %v4287_v13  ;;  %v990_v22 = vmul.f32 %v4553_v36, %v6988_v24  ;;  %v6989_v13 = vld [vmem:[#allocation41_spill] sm:$0xff]  ;;  %v4263_v25 = vunpack.i.h.bf16 %v4261_v44 }
 0x74f   :  { %v3979_v55 = vpack.c.bf16 %v3963_v31, %v3963_v31  ;;  %v3978_v8 = vpack.c.bf16 %v3962_v12, %v3962_v12  ;;  %v991_v7 = vmul.f32 %v4555_v37, %v6989_v13  ;;  %v4262_v26 = vunpack.i.l.bf16 %v4261_v44  ;;  %v4031_v37 = vld [vmem:[%s6735_s1 + $0x38] sm:$0x7]  ;;  %v6991_v44 = vld [vmem:[#allocation3_spill] sm:$0xff] }
 0x750   :  { %v3924_v29 = vsel %vm78_vm0, %v980_v39, %v4197_v61  ;;  %v4218_v31 = vunpack.i.h.bf16 %v6500_v56  ;;  %v4217_v12 = vunpack.i.l.bf16 %v6500_v56  ;;  %v4001_v56 = vld [vmem:[%s6735_s1 + $0x10] sm:$0x7]  ;;  %v4253_v24 = vunpack.i.h.bf16 %v6510_v42 }
 0x751   :  { %v4017_v41 = vsel %vm6518_vm9, %v3979_v55, %v4016_v60  ;;  %v4014_v17 = vsel %vm6518_vm9, %v3978_v8, %v4013_v53  ;;  %v4281_v23 = vpop.permute.xlu1 %4280  ;;  %v3935_v32 = vsel %vm78_vm0, %v991_v7, %v4223_v49  ;;  %v3934_v53 = vsel %vm78_vm0, %v990_v22, %v4222_v16  ;;  %v4559_v60 = vpop.eup %4558 }
 0x752   :  { %4018 = vst [vmem:[%s6735_s1 + $0x24] sm:$0x7] %v4017_v41  ;;  %v4283_v30 = vunpack.i.h.bf16 %v4281_v23  ;;  %v4282_v14 = vunpack.i.l.bf16 %v4281_v23  ;;  %v3941_v59 = vsel %vm3936_vm5, %v3924_v29, %v4237_v4  ;;  %v3951_v36 = vsel %vm3936_vm5, %v3934_v53, %v4262_v26  ;;  %v4004_v41 = vld [vmem:[%s6735_s1 + $0x14] sm:$0x7]  ;;  %v4019_v26 = vld [vmem:[%s6735_s1 + $0x28] sm:$0x7] }
 0x753   :  { %4015 = vst [vmem:[%s6735_s1 + $0x20] sm:$0x7] %v4014_v17  ;;  %v3952_v11 = vsel %vm3936_vm5, %v3935_v32, %v4263_v25  ;;  %v4028_v4 = vld [vmem:[%s6735_s1 + $0x34] sm:$0x7]  ;;  %v4252_v22 = vunpack.i.l.bf16 %v6510_v42  ;;  %v4022_v42 = vld [vmem:[%s6735_s1 + $0x2c] sm:$0x7] }
 0x754   :  { %v3961_v15 = vsel %vm3953_vm6, %v3944_v0, %v4283_v30  ;;  %v3960_v58 = vsel %vm3953_vm6, %v3943_v63, %v4282_v14 }
 0x755   :  { %v3977_v9 = vpack.c.bf16 %v3961_v15, %v3961_v15  ;;  %v3976_v10 = vpack.c.bf16 %v3960_v58, %v3960_v58  ;;  %v3947_v25 = vsel %vm3936_vm5, %v6488_v33, %v4252_v22 }
 0x757   :  { %v4011_v43 = vsel %vm6518_vm9, %v3977_v9, %v4010_v52  ;;  %v4008_v45 = vsel %vm6518_vm9, %v3976_v10, %v4007_v62  ;;  %v988_v62 = vmul.f32 %v4559_v60, %v6991_v44  ;;  %v3933_v52 = vsel %vm78_vm0, %v989_v1, %v4218_v31 }
 0x758   :  { %4012 = vst [vmem:[%s6735_s1 + $0x1c] sm:$0x7] %v4011_v43  ;;  %v3950_v5 = vsel %vm3936_vm5, %v3933_v52, %v4258_v48  ;;  %v3948_v1 = vsel %vm3936_vm5, %v6485_v34, %v4253_v24 }
 0x759   :  { %4009 = vst [vmem:[%s6735_s1 + $0x18] sm:$0x7] %v4008_v45  ;;  %v3932_v10 = vsel %vm78_vm0, %v988_v62, %v4217_v12 }
 0x75a   :  { %v3949_v16 = vsel %vm3936_vm5, %v3932_v10, %v4257_v40 }
 0x75b   :  { %v4276_v3 = vpop.permute.xlu0 %4275  ;;  %v4301_v55 = vpop.permute.xlu2 %4300 }
 0x75c   :  { %v4278_v8 = vunpack.i.h.bf16 %v4276_v3  ;;  %v4277_v6 = vunpack.i.l.bf16 %v4276_v3  ;;  %v4303_v27 = vunpack.i.h.bf16 %v4301_v55  ;;  %v4302_v50 = vunpack.i.l.bf16 %v4301_v55 }
 0x75e   :  { %v3959_v17 = vsel %vm3953_vm6, %v3942_v57, %v4278_v8  ;;  %v3958_v23 = vsel %vm3953_vm6, %v3941_v59, %v4277_v6  ;;  %v3969_v2 = vsel %vm3953_vm6, %v3952_v11, %v4303_v27  ;;  %v3968_v46 = vsel %vm3953_vm6, %v3951_v36, %v4302_v50 }
 0x75f   :  { %v3975_v30 = vpack.c.bf16 %v3959_v17, %v3959_v17  ;;  %v3974_v14 = vpack.c.bf16 %v3958_v23, %v3958_v23  ;;  %v3985_v63 = vpack.c.bf16 %v3969_v2, %v3969_v2  ;;  %v3984_v0 = vpack.c.bf16 %v3968_v46, %v3968_v46 }
 0x761   :  { %v4005_v15 = vsel %vm6518_vm9, %v3975_v30, %v4004_v41  ;;  %v4002_v58 = vsel %vm6518_vm9, %v3974_v14, %v4001_v56  ;;  %v4035_v19 = vsel %vm6518_vm9, %v3985_v63, %v4034_v35  ;;  %v4296_v9 = vpop.permute.xlu1 %4295  ;;  %v4032_v38 = vsel %vm6518_vm9, %v3984_v0, %v4031_v37 }
 0x762   :  { %4006 = vst [vmem:[%s6735_s1 + $0x14] sm:$0x7] %v4005_v15  ;;  %v4298_v61 = vunpack.i.h.bf16 %v4296_v9  ;;  %v4297_v49 = vunpack.i.l.bf16 %v4296_v9 }
 0x763   :  { %4003 = vst [vmem:[%s6735_s1 + $0x10] sm:$0x7] %v4002_v58 }
 0x764   :  { %4036 = vst [vmem:[%s6735_s1 + $0x3c] sm:$0x7] %v4035_v19  ;;  %v3967_v43 = vsel %vm3953_vm6, %v3950_v5, %v4298_v61  ;;  %v3966_v45 = vsel %vm3953_vm6, %v3949_v16, %v4297_v49 }
 0x765   :  { %4033 = vst [vmem:[%s6735_s1 + $0x38] sm:$0x7] %v4032_v38  ;;  %v3983_v51 = vpack.c.bf16 %v3967_v43, %v3967_v43  ;;  %v3982_v39 = vpack.c.bf16 %v3966_v45, %v3966_v45 }
 0x767   :  { %v4029_v21 = vsel %vm6518_vm9, %v3983_v51, %v4028_v4  ;;  %v4026_v47 = vsel %vm6518_vm9, %v3982_v39, %v4025_v54 }
 0x768   :  { %4030 = vst [vmem:[%s6735_s1 + $0x34] sm:$0x7] %v4029_v21 }
 0x769   :  { %4027 = vst [vmem:[%s6735_s1 + $0x30] sm:$0x7] %v4026_v47 }
 0x76b   :  { %v4291_v13 = vpop.permute.xlu0 %4290 }
 0x76c   :  { %v4293_v7 = vunpack.i.h.bf16 %v4291_v13  ;;  %v4292_v20 = vunpack.i.l.bf16 %v4291_v13 }
 0x76e   :  { %v3965_v18 = vsel %vm3953_vm6, %v3948_v1, %v4293_v7  ;;  %v3964_v29 = vsel %vm3953_vm6, %v3947_v25, %v4292_v20 }
 0x76f   :  { %v3981_v32 = vpack.c.bf16 %v3965_v18, %v3965_v18  ;;  %v3980_v53 = vpack.c.bf16 %v3964_v29, %v3964_v29 }
 0x771   :  { %v4023_v34 = vsel %vm6518_vm9, %v3981_v32, %v4022_v42  ;;  %v4020_v33 = vsel %vm6518_vm9, %v3980_v53, %v4019_v26 }
 0x772   :  { %4024 = vst [vmem:[%s6735_s1 + $0x2c] sm:$0x7] %v4023_v34 }
 0x773   :  { %4021 = vst [vmem:[%s6735_s1 + $0x28] sm:$0x7] %v4020_v33 }

</bundles_post_ra>
